<compile_context>
chip_gen: v5e
topology: v5e:2x2
jax: 0.10.0
libtpu: 0.0.40
codegen_flags: <defaults>
</compile_context>

<pallas_src>
import numpy as np
import jax
import jax.numpy as jnp
from jax.experimental import pallas as pl
from jax.experimental.pallas import tpu as pltpu


# ------------------------------ fused Pallas kernel ------------------------------

def _make_fused_kernel(H, W, C1, C2, ch, ch4):
    """conv1+bn1+relu -> PSAS(spatial_pool, channel_pool) -> conv2+bn2+residual+relu,
    one image per grid step, everything resident in VMEM."""
    HW = H * W
    Hp, Wp = H + 2, W + 2

    def conv3x3(xpad_ref, w_ref, shift_ref):
        # 9 accumulating MXU dots over shifted taps of the padded image scratch.
        acc = None
        for t in range(9):
            dy, dx = divmod(t, 3)
            tap = xpad_ref[pl.ds(dy, H), pl.ds(dx, W), :]          # (H, W, Cin) f32
            tap = tap.reshape(HW, tap.shape[-1]).astype(jnp.bfloat16)
            d = jnp.dot(tap, w_ref[t], preferred_element_type=jnp.float32)
            acc = d if acc is None else acc + d
        return acc + shift_ref[...]                                 # folded-BN shift (f32)

    def kernel(x_ref, w1_ref, b1_ref, wr_ref, wu1_ref, bu1_ref, lnw_ref, lnb_ref,
               wu2_ref, bu2_ref, wl_ref, w2_ref, b2_ref, o_ref, xpad_ref):
        x = x_ref[0]                                                # (H, W, C1) f32

        # ---- conv1 (+ folded BN1) + ReLU ----
        xpad_ref[...] = jnp.zeros_like(xpad_ref)                    # zero halo + interior
        xpad_ref[pl.ds(1, H), pl.ds(1, W), :] = x
        out1 = jnp.maximum(conv3x3(xpad_ref, w1_ref, b1_ref), 0.0)  # (HW, C2) f32

        # ---- PSAS spatial pool (per-channel gate) ----
        out1b = out1.astype(jnp.bfloat16)
        proj = jnp.dot(out1b, wr_ref[...], preferred_element_type=jnp.float32)  # (HW, ch+1)
        input_x = proj[:, :ch]                                      # (HW, ch)
        mask = proj[:, ch:ch + 1]                                   # (HW, 1)
        mask = mask - jnp.max(mask, keepdims=True)
        e = jnp.exp(mask)
        pm = e / jnp.sum(e, keepdims=True)                          # softmax over HW
        ctx = jnp.sum(input_x * pm, axis=0, keepdims=True)          # (1, ch)

        # conv_up: 1x1 -> LayerNorm([ch//4,1,1]) -> ReLU -> 1x1 -> sigmoid
        up1 = jnp.dot(ctx.astype(jnp.bfloat16), wu1_ref[...],
                      preferred_element_type=jnp.float32) + bu1_ref[...]        # (1, ch4)
        mu = jnp.mean(up1, axis=1, keepdims=True)
        var = jnp.mean((up1 - mu) ** 2, axis=1, keepdims=True)
        ln = (up1 - mu) * jax.lax.rsqrt(var + 1e-5) * lnw_ref[...] + lnb_ref[...]
        ln = jnp.maximum(ln, 0.0)
        gate_c = jax.nn.sigmoid(
            jnp.dot(ln.astype(jnp.bfloat16), wu2_ref[...],
                    preferred_element_type=jnp.float32) + bu2_ref[...])         # (1, C2)
        x1 = out1 * gate_c                                          # (HW, C2)

        # ---- PSAS channel pool (per-pixel gate) ----
        projL = jnp.dot(x1.astype(jnp.bfloat16), wl_ref[...],
                        preferred_element_type=jnp.float32)          # (HW, 2*ch)
        g = projL[:, :ch]
        theta = projL[:, ch:]
        avg = jnp.mean(g, axis=0, keepdims=True)                    # (1, ch)
        theta = theta - jnp.max(theta, axis=0, keepdims=True)
        te = jnp.exp(theta)
        tp = te / jnp.sum(te, axis=0, keepdims=True)                # softmax over HW per channel
        ctx_sp = jnp.sum(tp * avg, axis=1, keepdims=True)           # (HW, 1)
        x2 = x1 * jax.nn.sigmoid(ctx_sp)                            # (HW, C2)

        # ---- conv2 (+ folded BN2) + identity residual + ReLU ----
        # halo of the scratch is still zero; only the interior is overwritten
        xpad_ref[pl.ds(1, H), pl.ds(1, W), :] = x2.reshape(H, W, C2)
        out2 = conv3x3(xpad_ref, w2_ref, b2_ref)                    # (HW, C2)
        out2 = out2 + x.reshape(HW, C1)                             # residual in f32
        o_ref[0] = jnp.maximum(out2, 0.0).astype(o_ref.dtype)

    return kernel


# ------------------------------ JAX glue / wrapper ------------------------------

def basic_block_forward(x_nchw, p):
    B, C1, H, W = x_nchw.shape
    C2 = p['conv1_w'].shape[-1]
    assert C1 == C2, "downsample=None requires c1 == c2"
    ch = C2 // 2
    ch4 = ch // 4
    HW = H * W

    x_nhwc = jnp.transpose(x_nchw, (0, 2, 3, 1)).astype(jnp.float32)

    # Fold eval-mode BN scale into tap-major (9, Cin, Cout) bf16 weights.
    def fold(w_hwio, scale):
        w = w_hwio * scale.reshape(1, 1, 1, -1)
        return w.reshape(9, w_hwio.shape[2], w_hwio.shape[3]).astype(jnp.bfloat16)

    w1 = fold(p['conv1_w'], p['bn1_scale'])
    w2 = fold(p['conv2_w'], p['bn2_scale'])
    b1 = p['bn1_shift'].reshape(1, C2).astype(jnp.float32)
    b2 = p['bn2_shift'].reshape(1, C2).astype(jnp.float32)

    # Fused PSAS projections: [v_right | q_right] and [q_left | v_left].
    wr = jnp.concatenate([p['wvr'], p['wqr']], axis=1).astype(jnp.bfloat16)   # (C2, ch+1)
    wl = jnp.concatenate([p['wql'], p['wvl']], axis=1).astype(jnp.bfloat16)   # (C2, 2*ch)
    wu1 = p['wu1'].astype(jnp.bfloat16)
    wu2 = p['wu2'].astype(jnp.bfloat16)

    weights = [w1, b1, wr, wu1, p['bu1'], p['lnw'], p['lnb'], wu2, p['bu2'], wl, w2, b2]

    def full_spec(a):
        nd = a.ndim
        return pl.BlockSpec(a.shape, lambda b, _nd=nd: (0,) * _nd)

    in_specs = [pl.BlockSpec((1, H, W, C1), lambda b: (b, 0, 0, 0))] \
               + [full_spec(a) for a in weights]
    out_specs = pl.BlockSpec((1, HW, C2), lambda b: (b, 0, 0))

    # VMEM budget from actual per-step footprint (double-buffered in/out blocks,
    # resident weights, padded-image scratch) plus headroom for spilled temporaries.
    wbytes = sum(int(np.prod(a.shape)) * a.dtype.itemsize for a in weights)
    block_bytes = (2 * H * W * C1 * 4            # input block, double buffered
                   + 2 * HW * C2 * 4             # output block, double buffered
                   + (H + 2) * (W + 2) * C1 * 4  # padded-image scratch
                   + wbytes)
    vmem_limit = int(min(64 * 1024 * 1024,
                         max(8 * 1024 * 1024, 6 * block_bytes + 8 * HW * C2 * 4)))

    flops = 2 * B * HW * (9 * C1 * C2 + 9 * C2 * C2 + C2 * (ch + 1) + C2 * 2 * ch) \
            + 2 * B * (ch * ch4 + ch4 * C2)
    transcendentals = B * (HW * (2 + ch) + C2 + ch4)
    bytes_accessed = int(x_nhwc.size * 4 + B * wbytes + B * HW * C2 * 4)

    out_tok = pl.pallas_call(
        _make_fused_kernel(H, W, C1, C2, ch, ch4),
        out_shape=jax.ShapeDtypeStruct((B, HW, C2), jnp.float32),
        grid=(B,),
        in_specs=in_specs,
        out_specs=out_specs,
        scratch_shapes=[pltpu.VMEM((H + 2, W + 2, C1), jnp.float32)],
        compiler_params=pltpu.CompilerParams(
            dimension_semantics=("parallel",),
            vmem_limit_bytes=vmem_limit),
        cost_estimate=pl.CostEstimate(flops=int(flops),
                                      transcendentals=int(transcendentals),
                                      bytes_accessed=bytes_accessed),
    )(x_nhwc, *weights)

    return jnp.transpose(out_tok.reshape(B, H, W, C2), (0, 3, 1, 2))   # back to NCHW


# ------------------------------ deterministic params ------------------------------

def init_params(key, c1, c2):
    ch = c2 // 2
    ch4 = ch // 4
    assert ch4 >= 1, "c2 must be >= 8 so that ch//4 >= 1"
    keys = jax.random.split(key, 24)

    def w(k, shape, fan_in):
        return jax.random.normal(k, shape, jnp.float32) / np.sqrt(float(fan_in))

    def bn(kg, kb, km, kv, c):
        gamma = 1.0 + 0.1 * jax.random.normal(kg, (c,), jnp.float32)
        beta = 0.1 * jax.random.normal(kb, (c,), jnp.float32)
        rmean = 0.1 * jax.random.normal(km, (c,), jnp.float32)
        rvar = jax.random.uniform(kv, (c,), jnp.float32, 0.5, 1.5)
        scale = gamma / jnp.sqrt(rvar + 1e-5)
        shift = beta - rmean * scale
        return scale.reshape(1, c), shift.reshape(1, c)

    p = {}
    p['conv1_w'] = w(keys[0], (3, 3, c1, c2), c1 * 9)     # HWIO
    p['conv2_w'] = w(keys[1], (3, 3, c2, c2), c2 * 9)
    p['bn1_scale'], p['bn1_shift'] = bn(keys[2], keys[3], keys[4], keys[5], c2)
    p['bn2_scale'], p['bn2_shift'] = bn(keys[6], keys[7], keys[8], keys[9], c2)
    # PSAS(c2, c2)
    p['wqr'] = w(keys[10], (c2, 1), c2)        # conv_q_right
    p['wvr'] = w(keys[11], (c2, ch), c2)       # conv_v_right
    p['wql'] = w(keys[12], (c2, ch), c2)       # conv_q_left
    p['wvl'] = w(keys[13], (c2, ch), c2)       # conv_v_left
    p['wu1'] = w(keys[14], (ch, ch4), ch)      # conv_up[0]
    p['bu1'] = 0.1 * jax.random.normal(keys[15], (1, ch4), jnp.float32)
    p['lnw'] = 1.0 + 0.1 * jax.random.normal(keys[16], (1, ch4), jnp.float32)
    p['lnb'] = 0.1 * jax.random.normal(keys[17], (1, ch4), jnp.float32)
    p['wu2'] = w(keys[18], (ch4, c2), ch4)     # conv_up[3]
    p['bu2'] = 0.1 * jax.random.normal(keys[19], (1, c2), jnp.float32)
    return p


# ------------------------------ plain-JAX reference ------------------------------

def ref_forward(x_nchw, p):
    x = jnp.transpose(x_nchw, (0, 2, 3, 1)).astype(jnp.float32)

    def conv3x3(inp, w):
        return jax.lax.conv_general_dilated(inp, w, (1, 1), 'SAME',
                                            dimension_numbers=('NHWC', 'HWIO', 'NHWC'))

    def bn(y, scale, shift):
        return y * scale.reshape(1, 1, 1, -1) + shift.reshape(1, 1, 1, -1)

    out = jax.nn.relu(bn(conv3x3(x, p['conv1_w']), p['bn1_scale'], p['bn1_shift']))
    B, H, W, C = out.shape
    t = out.reshape(B, H * W, C)
    # spatial pool
    input_x = t @ p['wvr']
    pm = jax.nn.softmax(t @ p['wqr'], axis=1)
    ctx = jnp.einsum('bnc,bn->bc', input_x, pm[..., 0])
    up1 = ctx @ p['wu1'] + p['bu1']
    mu = up1.mean(-1, keepdims=True)
    var = ((up1 - mu) ** 2).mean(-1, keepdims=True)
    ln = jax.nn.relu((up1 - mu) / jnp.sqrt(var + 1e-5) * p['lnw'] + p['lnb'])
    gate_c = jax.nn.sigmoid(ln @ p['wu2'] + p['bu2'])
    t1 = t * gate_c[:, None, :]
    # channel pool
    avg = (t1 @ p['wql']).mean(axis=1)
    theta = jax.nn.softmax(t1 @ p['wvl'], axis=1)
    gate_s = jax.nn.sigmoid(jnp.einsum('bnc,bc->bn', theta, avg))[..., None]
    t2 = (t1 * gate_s).reshape(B, H, W, C)
    out2 = bn(conv3x3(t2, p['conv2_w']), p['bn2_scale'], p['bn2_shift']) + x
    return jnp.transpose(jax.nn.relu(out2), (0, 3, 1, 2))


# ------------------------------ main ------------------------------

if __name__ == "__main__":
    key = jax.random.PRNGKey(0)
    kx, kp = jax.random.split(key)
    B, C, H, W = 2, 16, 16, 16              # c1 = c2 = 16 -> ch = 8, ch//4 = 2
    x = jax.random.normal(kx, (B, C, H, W), jnp.float32)
    params = init_params(kp, C, C)

    out = jax.jit(basic_block_forward)(x, params)
    out = jax.block_until_ready(out)

    ref = ref_forward(x, params)
    # tolerance reflects bf16 MXU operands (f32 accumulation) vs f32 reference
    np.testing.assert_allclose(np.asarray(out), np.asarray(ref), rtol=5e-2, atol=5e-2)
    print("KERNEL_OK")
</pallas_src>

<mosaic_0001>
module attributes {stable_mosaic.version = 11 : i64} {
  func.func @kernel(%arg0: i32, %arg1: memref<1x16x16x16xf32, #tpu.memory_space<vmem>>, %arg2: memref<9x16x16xbf16, #tpu.memory_space<vmem>>, %arg3: memref<1x16xf32, #tpu.memory_space<vmem>>, %arg4: memref<16x9xbf16, #tpu.memory_space<vmem>>, %arg5: memref<8x2xbf16, #tpu.memory_space<vmem>>, %arg6: memref<1x2xf32, #tpu.memory_space<vmem>>, %arg7: memref<1x2xf32, #tpu.memory_space<vmem>>, %arg8: memref<1x2xf32, #tpu.memory_space<vmem>>, %arg9: memref<2x16xbf16, #tpu.memory_space<vmem>>, %arg10: memref<1x16xf32, #tpu.memory_space<vmem>>, %arg11: memref<16x16xbf16, #tpu.memory_space<vmem>>, %arg12: memref<9x16x16xbf16, #tpu.memory_space<vmem>>, %arg13: memref<1x16xf32, #tpu.memory_space<vmem>>, %arg14: memref<1x256x16xf32, #tpu.memory_space<vmem>>, %arg15: memref<18x18x16xf32, #tpu.memory_space<vmem>>) attributes {dimension_semantics = [#tpu.dimension_semantics<parallel>], iteration_bounds = array<i64: 2>, scalar_prefetch = 0 : i64, scratch_operands = 1 : i64, tpu.core_type = #tpu.core_type<tc>, window_params = [{transform_indices = @transform_0, window_bounds = array<i64: 1, 16, 16, 16>}, {pipeline_mode = #tpu.pipeline_mode<synchronous>, transform_indices = @transform_1, window_bounds = array<i64: 9, 16, 16>}, {pipeline_mode = #tpu.pipeline_mode<synchronous>, transform_indices = @transform_2, window_bounds = array<i64: 1, 16>}, {pipeline_mode = #tpu.pipeline_mode<synchronous>, transform_indices = @transform_3, window_bounds = array<i64: 16, 9>}, {pipeline_mode = #tpu.pipeline_mode<synchronous>, transform_indices = @transform_4, window_bounds = array<i64: 8, 2>}, {pipeline_mode = #tpu.pipeline_mode<synchronous>, transform_indices = @transform_5, window_bounds = array<i64: 1, 2>}, {pipeline_mode = #tpu.pipeline_mode<synchronous>, transform_indices = @transform_6, window_bounds = array<i64: 1, 2>}, {pipeline_mode = #tpu.pipeline_mode<synchronous>, transform_indices = @transform_7, window_bounds = array<i64: 1, 2>}, {pipeline_mode = #tpu.pipeline_mode<synchronous>, transform_indices = @transform_8, window_bounds = array<i64: 2, 16>}, {pipeline_mode = #tpu.pipeline_mode<synchronous>, transform_indices = @transform_9, window_bounds = array<i64: 1, 16>}, {pipeline_mode = #tpu.pipeline_mode<synchronous>, transform_indices = @transform_10, window_bounds = array<i64: 16, 16>}, {pipeline_mode = #tpu.pipeline_mode<synchronous>, transform_indices = @transform_11, window_bounds = array<i64: 9, 16, 16>}, {pipeline_mode = #tpu.pipeline_mode<synchronous>, transform_indices = @transform_12, window_bounds = array<i64: 1, 16>}, {transform_indices = @transform_13, window_bounds = array<i64: 1, 256, 16>}]} {
    %c0 = arith.constant 0 : index
    %c0_0 = arith.constant 0 : index
    %c0_1 = arith.constant 0 : index
    %c0_2 = arith.constant 0 : index
    %0 = vector.load %arg1[%c0, %c0_0, %c0_1, %c0_2] : memref<1x16x16x16xf32, #tpu.memory_space<vmem>>, vector<1x16x16x16xf32>
    %1 = vector.shape_cast %0 : vector<1x16x16x16xf32> to vector<16x16x16xf32>
    %cst = arith.constant 0.000000e+00 : f32
    %2 = vector.broadcast %cst : f32 to vector<18x18x16xf32>
    %c0_3 = arith.constant 0 : index
    %c0_4 = arith.constant 0 : index
    %c0_5 = arith.constant 0 : index
    %3 = vector.load %arg15[%c0_3, %c0_4, %c0_5] : memref<18x18x16xf32, #tpu.memory_space<vmem>>, vector<18x18x16xf32>
    tpu.vector_store %arg15[%c0_3, %c0_4, %c0_5], %2 {strides = array<i32>} : memref<18x18x16xf32, #tpu.memory_space<vmem>>, vector<18x18x16xf32>,
    %c1 = arith.constant 1 : index
    %c1_6 = arith.constant 1 : index
    %c0_7 = arith.constant 0 : index
    %4 = vector.load %arg15[%c1, %c1_6, %c0_7] : memref<18x18x16xf32, #tpu.memory_space<vmem>>, vector<16x16x16xf32>
    tpu.vector_store %arg15[%c1, %c1_6, %c0_7], %1 {strides = array<i32>} : memref<18x18x16xf32, #tpu.memory_space<vmem>>, vector<16x16x16xf32>,
    %c0_8 = arith.constant 0 : index
    %c0_9 = arith.constant 0 : index
    %c0_10 = arith.constant 0 : index
    %5 = vector.load %arg15[%c0_8, %c0_9, %c0_10] : memref<18x18x16xf32, #tpu.memory_space<vmem>>, vector<16x16x16xf32>
    %6 = vector.shape_cast %5 : vector<16x16x16xf32> to vector<256x16xf32>
    %7 = arith.truncf %6 : vector<256x16xf32> to vector<256x16xbf16>
    %c0_11 = arith.constant 0 : index
    %c0_12 = arith.constant 0 : index
    %c0_13 = arith.constant 0 : index
    %8 = vector.load %arg2[%c0_11, %c0_12, %c0_13] : memref<9x16x16xbf16, #tpu.memory_space<vmem>>, vector<1x16x16xbf16>
    %9 = vector.shape_cast %8 : vector<1x16x16xbf16> to vector<16x16xbf16>
    %cst_14 = arith.constant dense<0.000000e+00> : vector<256x16xf32>
    %10 = tpu.matmul %7, %9, %cst_14 {dimension_numbers = #tpu.dot_dimension_numbers<[1], [0], [0], [1], [0, 0, 1, 1], [], []>} : vector<256x16xbf16>, vector<16x16xbf16>, vector<256x16xf32> -> vector<256x16xf32>
    %c0_15 = arith.constant 0 : index
    %c1_16 = arith.constant 1 : index
    %c0_17 = arith.constant 0 : index
    %11 = vector.load %arg15[%c0_15, %c1_16, %c0_17] : memref<18x18x16xf32, #tpu.memory_space<vmem>>, vector<16x16x16xf32>
    %12 = vector.shape_cast %11 : vector<16x16x16xf32> to vector<256x16xf32>
    %13 = arith.truncf %12 : vector<256x16xf32> to vector<256x16xbf16>
    %c1_18 = arith.constant 1 : index
    %c0_19 = arith.constant 0 : index
    %c0_20 = arith.constant 0 : index
    %14 = vector.load %arg2[%c1_18, %c0_19, %c0_20] : memref<9x16x16xbf16, #tpu.memory_space<vmem>>, vector<1x16x16xbf16>
    %15 = vector.shape_cast %14 : vector<1x16x16xbf16> to vector<16x16xbf16>
    %cst_21 = arith.constant dense<0.000000e+00> : vector<256x16xf32>
    %16 = tpu.matmul %13, %15, %cst_21 {dimension_numbers = #tpu.dot_dimension_numbers<[1], [0], [0], [1], [0, 0, 1, 1], [], []>} : vector<256x16xbf16>, vector<16x16xbf16>, vector<256x16xf32> -> vector<256x16xf32>
    %17 = arith.addf %10, %16 : vector<256x16xf32>
    %c0_22 = arith.constant 0 : index
    %c2 = arith.constant 2 : index
    %c0_23 = arith.constant 0 : index
    %18 = vector.load %arg15[%c0_22, %c2, %c0_23] : memref<18x18x16xf32, #tpu.memory_space<vmem>>, vector<16x16x16xf32>
    %19 = vector.shape_cast %18 : vector<16x16x16xf32> to vector<256x16xf32>
    %20 = arith.truncf %19 : vector<256x16xf32> to vector<256x16xbf16>
    %c2_24 = arith.constant 2 : index
    %c0_25 = arith.constant 0 : index
    %c0_26 = arith.constant 0 : index
    %21 = vector.load %arg2[%c2_24, %c0_25, %c0_26] : memref<9x16x16xbf16, #tpu.memory_space<vmem>>, vector<1x16x16xbf16>
    %22 = vector.shape_cast %21 : vector<1x16x16xbf16> to vector<16x16xbf16>
    %cst_27 = arith.constant dense<0.000000e+00> : vector<256x16xf32>
    %23 = tpu.matmul %20, %22, %cst_27 {dimension_numbers = #tpu.dot_dimension_numbers<[1], [0], [0], [1], [0, 0, 1, 1], [], []>} : vector<256x16xbf16>, vector<16x16xbf16>, vector<256x16xf32> -> vector<256x16xf32>
    %24 = arith.addf %17, %23 : vector<256x16xf32>
    %c1_28 = arith.constant 1 : index
    %c0_29 = arith.constant 0 : index
    %c0_30 = arith.constant 0 : index
    %25 = vector.load %arg15[%c1_28, %c0_29, %c0_30] : memref<18x18x16xf32, #tpu.memory_space<vmem>>, vector<16x16x16xf32>
    %26 = vector.shape_cast %25 : vector<16x16x16xf32> to vector<256x16xf32>
    %27 = arith.truncf %26 : vector<256x16xf32> to vector<256x16xbf16>
    %c3 = arith.constant 3 : index
    %c0_31 = arith.constant 0 : index
    %c0_32 = arith.constant 0 : index
    %28 = vector.load %arg2[%c3, %c0_31, %c0_32] : memref<9x16x16xbf16, #tpu.memory_space<vmem>>, vector<1x16x16xbf16>
    %29 = vector.shape_cast %28 : vector<1x16x16xbf16> to vector<16x16xbf16>
    %cst_33 = arith.constant dense<0.000000e+00> : vector<256x16xf32>
    %30 = tpu.matmul %27, %29, %cst_33 {dimension_numbers = #tpu.dot_dimension_numbers<[1], [0], [0], [1], [0, 0, 1, 1], [], []>} : vector<256x16xbf16>, vector<16x16xbf16>, vector<256x16xf32> -> vector<256x16xf32>
    %31 = arith.addf %24, %30 : vector<256x16xf32>
    %c1_34 = arith.constant 1 : index
    %c1_35 = arith.constant 1 : index
    %c0_36 = arith.constant 0 : index
    %32 = vector.load %arg15[%c1_34, %c1_35, %c0_36] : memref<18x18x16xf32, #tpu.memory_space<vmem>>, vector<16x16x16xf32>
    %33 = vector.shape_cast %32 : vector<16x16x16xf32> to vector<256x16xf32>
    %34 = arith.truncf %33 : vector<256x16xf32> to vector<256x16xbf16>
    %c4 = arith.constant 4 : index
    %c0_37 = arith.constant 0 : index
    %c0_38 = arith.constant 0 : index
    %35 = vector.load %arg2[%c4, %c0_37, %c0_38] : memref<9x16x16xbf16, #tpu.memory_space<vmem>>, vector<1x16x16xbf16>
    %36 = vector.shape_cast %35 : vector<1x16x16xbf16> to vector<16x16xbf16>
    %cst_39 = arith.constant dense<0.000000e+00> : vector<256x16xf32>
    %37 = tpu.matmul %34, %36, %cst_39 {dimension_numbers = #tpu.dot_dimension_numbers<[1], [0], [0], [1], [0, 0, 1, 1], [], []>} : vector<256x16xbf16>, vector<16x16xbf16>, vector<256x16xf32> -> vector<256x16xf32>
    %38 = arith.addf %31, %37 : vector<256x16xf32>
    %c1_40 = arith.constant 1 : index
    %c2_41 = arith.constant 2 : index
    %c0_42 = arith.constant 0 : index
    %39 = vector.load %arg15[%c1_40, %c2_41, %c0_42] : memref<18x18x16xf32, #tpu.memory_space<vmem>>, vector<16x16x16xf32>
    %40 = vector.shape_cast %39 : vector<16x16x16xf32> to vector<256x16xf32>
    %41 = arith.truncf %40 : vector<256x16xf32> to vector<256x16xbf16>
    %c5 = arith.constant 5 : index
    %c0_43 = arith.constant 0 : index
    %c0_44 = arith.constant 0 : index
    %42 = vector.load %arg2[%c5, %c0_43, %c0_44] : memref<9x16x16xbf16, #tpu.memory_space<vmem>>, vector<1x16x16xbf16>
    %43 = vector.shape_cast %42 : vector<1x16x16xbf16> to vector<16x16xbf16>
    %cst_45 = arith.constant dense<0.000000e+00> : vector<256x16xf32>
    %44 = tpu.matmul %41, %43, %cst_45 {dimension_numbers = #tpu.dot_dimension_numbers<[1], [0], [0], [1], [0, 0, 1, 1], [], []>} : vector<256x16xbf16>, vector<16x16xbf16>, vector<256x16xf32> -> vector<256x16xf32>
    %45 = arith.addf %38, %44 : vector<256x16xf32>
    %c2_46 = arith.constant 2 : index
    %c0_47 = arith.constant 0 : index
    %c0_48 = arith.constant 0 : index
    %46 = vector.load %arg15[%c2_46, %c0_47, %c0_48] : memref<18x18x16xf32, #tpu.memory_space<vmem>>, vector<16x16x16xf32>
    %47 = vector.shape_cast %46 : vector<16x16x16xf32> to vector<256x16xf32>
    %48 = arith.truncf %47 : vector<256x16xf32> to vector<256x16xbf16>
    %c6 = arith.constant 6 : index
    %c0_49 = arith.constant 0 : index
    %c0_50 = arith.constant 0 : index
    %49 = vector.load %arg2[%c6, %c0_49, %c0_50] : memref<9x16x16xbf16, #tpu.memory_space<vmem>>, vector<1x16x16xbf16>
    %50 = vector.shape_cast %49 : vector<1x16x16xbf16> to vector<16x16xbf16>
    %cst_51 = arith.constant dense<0.000000e+00> : vector<256x16xf32>
    %51 = tpu.matmul %48, %50, %cst_51 {dimension_numbers = #tpu.dot_dimension_numbers<[1], [0], [0], [1], [0, 0, 1, 1], [], []>} : vector<256x16xbf16>, vector<16x16xbf16>, vector<256x16xf32> -> vector<256x16xf32>
    %52 = arith.addf %45, %51 : vector<256x16xf32>
    %c2_52 = arith.constant 2 : index
    %c1_53 = arith.constant 1 : index
    %c0_54 = arith.constant 0 : index
    %53 = vector.load %arg15[%c2_52, %c1_53, %c0_54] : memref<18x18x16xf32, #tpu.memory_space<vmem>>, vector<16x16x16xf32>
    %54 = vector.shape_cast %53 : vector<16x16x16xf32> to vector<256x16xf32>
    %55 = arith.truncf %54 : vector<256x16xf32> to vector<256x16xbf16>
    %c7 = arith.constant 7 : index
    %c0_55 = arith.constant 0 : index
    %c0_56 = arith.constant 0 : index
    %56 = vector.load %arg2[%c7, %c0_55, %c0_56] : memref<9x16x16xbf16, #tpu.memory_space<vmem>>, vector<1x16x16xbf16>
    %57 = vector.shape_cast %56 : vector<1x16x16xbf16> to vector<16x16xbf16>
    %cst_57 = arith.constant dense<0.000000e+00> : vector<256x16xf32>
    %58 = tpu.matmul %55, %57, %cst_57 {dimension_numbers = #tpu.dot_dimension_numbers<[1], [0], [0], [1], [0, 0, 1, 1], [], []>} : vector<256x16xbf16>, vector<16x16xbf16>, vector<256x16xf32> -> vector<256x16xf32>
    %59 = arith.addf %52, %58 : vector<256x16xf32>
    %c2_58 = arith.constant 2 : index
    %c2_59 = arith.constant 2 : index
    %c0_60 = arith.constant 0 : index
    %60 = vector.load %arg15[%c2_58, %c2_59, %c0_60] : memref<18x18x16xf32, #tpu.memory_space<vmem>>, vector<16x16x16xf32>
    %61 = vector.shape_cast %60 : vector<16x16x16xf32> to vector<256x16xf32>
    %62 = arith.truncf %61 : vector<256x16xf32> to vector<256x16xbf16>
    %c8 = arith.constant 8 : index
    %c0_61 = arith.constant 0 : index
    %c0_62 = arith.constant 0 : index
    %63 = vector.load %arg2[%c8, %c0_61, %c0_62] : memref<9x16x16xbf16, #tpu.memory_space<vmem>>, vector<1x16x16xbf16>
    %64 = vector.shape_cast %63 : vector<1x16x16xbf16> to vector<16x16xbf16>
    %cst_63 = arith.constant dense<0.000000e+00> : vector<256x16xf32>
    %65 = tpu.matmul %62, %64, %cst_63 {dimension_numbers = #tpu.dot_dimension_numbers<[1], [0], [0], [1], [0, 0, 1, 1], [], []>} : vector<256x16xbf16>, vector<16x16xbf16>, vector<256x16xf32> -> vector<256x16xf32>
    %66 = arith.addf %59, %65 : vector<256x16xf32>
    %c0_64 = arith.constant 0 : index
    %c0_65 = arith.constant 0 : index
    %67 = vector.load %arg3[%c0_64, %c0_65] : memref<1x16xf32, #tpu.memory_space<vmem>>, vector<1x16xf32>
    %68 = vector.broadcast %67 : vector<1x16xf32> to vector<256x16xf32>
    %69 = arith.addf %66, %68 : vector<256x16xf32>
    %cst_66 = arith.constant 0.000000e+00 : f32
    %70 = vector.broadcast %cst_66 : f32 to vector<256x16xf32>
    %71 = arith.maximumf %69, %70 : vector<256x16xf32>
    %72 = arith.truncf %71 : vector<256x16xf32> to vector<256x16xbf16>
    %c0_67 = arith.constant 0 : index
    %c0_68 = arith.constant 0 : index
    %73 = vector.load %arg4[%c0_67, %c0_68] : memref<16x9xbf16, #tpu.memory_space<vmem>>, vector<16x9xbf16>
    %cst_69 = arith.constant dense<0.000000e+00> : vector<256x9xf32>
    %74 = tpu.matmul %72, %73, %cst_69 {dimension_numbers = #tpu.dot_dimension_numbers<[1], [0], [0], [1], [0, 0, 1, 1], [], []>} : vector<256x16xbf16>, vector<16x9xbf16>, vector<256x9xf32> -> vector<256x9xf32>
    %75 = vector.extract_strided_slice %74 {offsets = [0, 0], sizes = [256, 8], strides = [1, 1]} : vector<256x9xf32> to vector<256x8xf32>
    %76 = vector.extract_strided_slice %74 {offsets = [0, 8], sizes = [256, 1], strides = [1, 1]} : vector<256x9xf32> to vector<256x1xf32>
    %77 = vector.shape_cast %76 : vector<256x1xf32> to vector<1x256x1xf32>
    %cst_70 = arith.constant dense<0xFF800000> : vector<1xf32>
    %78 = vector.multi_reduction <maximumf>, %77, %cst_70 [1, 2] : vector<1x256x1xf32> to vector<1xf32>
    %79 = vector.shape_cast %78 : vector<1xf32> to vector<1x1x1xf32>
    %80 = vector.extract %79[0, 0, 0] : f32 from vector<1x1x1xf32>
    %81 = vector.broadcast %80 : f32 to vector<1x1xf32>
    %82 = vector.broadcast %81 : vector<1x1xf32> to vector<256x1xf32>
    %83 = arith.subf %76, %82 : vector<256x1xf32>
    %84 = math.exp %83 : vector<256x1xf32>
    %85 = vector.shape_cast %84 : vector<256x1xf32> to vector<1x256x1xf32>
    %cst_71 = arith.constant dense<0.000000e+00> : vector<1xf32>
    %86 = vector.multi_reduction <add>, %85, %cst_71 [1, 2] : vector<1x256x1xf32> to vector<1xf32>
    %87 = vector.shape_cast %86 : vector<1xf32> to vector<1x1x1xf32>
    %88 = vector.extract %87[0, 0, 0] : f32 from vector<1x1x1xf32>
    %89 = vector.broadcast %88 : f32 to vector<1x1xf32>
    %90 = vector.broadcast %89 : vector<1x1xf32> to vector<256x1xf32>
    %91 = arith.divf %84, %90 : vector<256x1xf32>
    %92 = vector.broadcast %91 : vector<256x1xf32> to vector<256x8xf32>
    %93 = arith.mulf %75, %92 : vector<256x8xf32>
    %cst_72 = arith.constant dense<0.000000e+00> : vector<8xf32>
    %94 = vector.multi_reduction <add>, %93, %cst_72 [0] : vector<256x8xf32> to vector<8xf32>
    %95 = vector.shape_cast %94 : vector<8xf32> to vector<1x8xf32>
    %96 = arith.truncf %95 : vector<1x8xf32> to vector<1x8xbf16>
    %c0_73 = arith.constant 0 : index
    %c0_74 = arith.constant 0 : index
    %97 = vector.load %arg5[%c0_73, %c0_74] : memref<8x2xbf16, #tpu.memory_space<vmem>>, vector<8x2xbf16>
    %cst_75 = arith.constant dense<0.000000e+00> : vector<1x2xf32>
    %98 = tpu.matmul %96, %97, %cst_75 {dimension_numbers = #tpu.dot_dimension_numbers<[1], [0], [0], [1], [0, 0, 1, 1], [], []>} : vector<1x8xbf16>, vector<8x2xbf16>, vector<1x2xf32> -> vector<1x2xf32>
    %c0_76 = arith.constant 0 : index
    %c0_77 = arith.constant 0 : index
    %99 = vector.load %arg6[%c0_76, %c0_77] : memref<1x2xf32, #tpu.memory_space<vmem>>, vector<1x2xf32>
    %100 = arith.addf %98, %99 : vector<1x2xf32>
    %cst_78 = arith.constant dense<0.000000e+00> : vector<1xf32>
    %101 = vector.multi_reduction <add>, %100, %cst_78 [1] : vector<1x2xf32> to vector<1xf32>
    %102 = vector.shape_cast %101 : vector<1xf32> to vector<1x1xf32>
    %cst_79 = arith.constant 2.000000e+00 : f32
    %103 = vector.broadcast %cst_79 : f32 to vector<1x1xf32>
    %104 = arith.divf %102, %103 : vector<1x1xf32>
    %105 = vector.broadcast %104 : vector<1x1xf32> to vector<1x2xf32>
    %106 = arith.subf %100, %105 : vector<1x2xf32>
    %107 = arith.mulf %106, %106 : vector<1x2xf32>
    %cst_80 = arith.constant dense<0.000000e+00> : vector<1xf32>
    %108 = vector.multi_reduction <add>, %107, %cst_80 [1] : vector<1x2xf32> to vector<1xf32>
    %109 = vector.shape_cast %108 : vector<1xf32> to vector<1x1xf32>
    %cst_81 = arith.constant 2.000000e+00 : f32
    %110 = vector.broadcast %cst_81 : f32 to vector<1x1xf32>
    %111 = arith.divf %109, %110 : vector<1x1xf32>
    %112 = vector.broadcast %104 : vector<1x1xf32> to vector<1x2xf32>
    %113 = arith.subf %100, %112 : vector<1x2xf32>
    %cst_82 = arith.constant 9.99999974E-6 : f32
    %114 = vector.broadcast %cst_82 : f32 to vector<1x1xf32>
    %115 = arith.addf %111, %114 : vector<1x1xf32>
    %116 = math.rsqrt %115 : vector<1x1xf32>
    %117 = vector.broadcast %116 : vector<1x1xf32> to vector<1x2xf32>
    %118 = arith.mulf %113, %117 : vector<1x2xf32>
    %c0_83 = arith.constant 0 : index
    %c0_84 = arith.constant 0 : index
    %119 = vector.load %arg7[%c0_83, %c0_84] : memref<1x2xf32, #tpu.memory_space<vmem>>, vector<1x2xf32>
    %120 = arith.mulf %118, %119 : vector<1x2xf32>
    %c0_85 = arith.constant 0 : index
    %c0_86 = arith.constant 0 : index
    %121 = vector.load %arg8[%c0_85, %c0_86] : memref<1x2xf32, #tpu.memory_space<vmem>>, vector<1x2xf32>
    %122 = arith.addf %120, %121 : vector<1x2xf32>
    %cst_87 = arith.constant 0.000000e+00 : f32
    %123 = vector.broadcast %cst_87 : f32 to vector<1x2xf32>
    %124 = arith.maximumf %122, %123 : vector<1x2xf32>
    %125 = arith.truncf %124 : vector<1x2xf32> to vector<1x2xbf16>
    %c0_88 = arith.constant 0 : index
    %c0_89 = arith.constant 0 : index
    %126 = vector.load %arg9[%c0_88, %c0_89] : memref<2x16xbf16, #tpu.memory_space<vmem>>, vector<2x16xbf16>
    %cst_90 = arith.constant dense<0.000000e+00> : vector<1x16xf32>
    %127 = tpu.matmul %125, %126, %cst_90 {dimension_numbers = #tpu.dot_dimension_numbers<[1], [0], [0], [1], [0, 0, 1, 1], [], []>} : vector<1x2xbf16>, vector<2x16xbf16>, vector<1x16xf32> -> vector<1x16xf32>
    %c0_91 = arith.constant 0 : index
    %c0_92 = arith.constant 0 : index
    %128 = vector.load %arg10[%c0_91, %c0_92] : memref<1x16xf32, #tpu.memory_space<vmem>>, vector<1x16xf32>
    %129 = arith.addf %127, %128 : vector<1x16xf32>
    %130 = arith.negf %129 : vector<1x16xf32>
    %131 = math.exp %130 : vector<1x16xf32>
    %cst_93 = arith.constant 1.000000e+00 : f32
    %132 = vector.broadcast %cst_93 : f32 to vector<1x16xf32>
    %133 = arith.addf %132, %131 : vector<1x16xf32>
    %134 = arith.divf %132, %133 : vector<1x16xf32>
    %135 = vector.broadcast %134 : vector<1x16xf32> to vector<256x16xf32>
    %136 = arith.mulf %71, %135 : vector<256x16xf32>
    %137 = arith.truncf %136 : vector<256x16xf32> to vector<256x16xbf16>
    %c0_94 = arith.constant 0 : index
    %c0_95 = arith.constant 0 : index
    %138 = vector.load %arg11[%c0_94, %c0_95] : memref<16x16xbf16, #tpu.memory_space<vmem>>, vector<16x16xbf16>
    %cst_96 = arith.constant dense<0.000000e+00> : vector<256x16xf32>
    %139 = tpu.matmul %137, %138, %cst_96 {dimension_numbers = #tpu.dot_dimension_numbers<[1], [0], [0], [1], [0, 0, 1, 1], [], []>} : vector<256x16xbf16>, vector<16x16xbf16>, vector<256x16xf32> -> vector<256x16xf32>
    %140 = vector.extract_strided_slice %139 {offsets = [0, 0], sizes = [256, 8], strides = [1, 1]} : vector<256x16xf32> to vector<256x8xf32>
    %141 = vector.extract_strided_slice %139 {offsets = [0, 8], sizes = [256, 8], strides = [1, 1]} : vector<256x16xf32> to vector<256x8xf32>
    %cst_97 = arith.constant dense<0.000000e+00> : vector<8xf32>
    %142 = vector.multi_reduction <add>, %140, %cst_97 [0] : vector<256x8xf32> to vector<8xf32>
    %143 = vector.shape_cast %142 : vector<8xf32> to vector<1x8xf32>
    %cst_98 = arith.constant 2.560000e+02 : f32
    %144 = vector.broadcast %cst_98 : f32 to vector<1x8xf32>
    %145 = arith.divf %143, %144 : vector<1x8xf32>
    %cst_99 = arith.constant dense<0xFF800000> : vector<8xf32>
    %146 = vector.multi_reduction <maximumf>, %141, %cst_99 [0] : vector<256x8xf32> to vector<8xf32>
    %147 = vector.shape_cast %146 : vector<8xf32> to vector<1x8xf32>
    %148 = vector.broadcast %147 : vector<1x8xf32> to vector<256x8xf32>
    %149 = arith.subf %141, %148 : vector<256x8xf32>
    %150 = math.exp %149 : vector<256x8xf32>
    %cst_100 = arith.constant dense<0.000000e+00> : vector<8xf32>
    %151 = vector.multi_reduction <add>, %150, %cst_100 [0] : vector<256x8xf32> to vector<8xf32>
    %152 = vector.shape_cast %151 : vector<8xf32> to vector<1x8xf32>
    %153 = vector.broadcast %152 : vector<1x8xf32> to vector<256x8xf32>
    %154 = arith.divf %150, %153 : vector<256x8xf32>
    %155 = vector.broadcast %145 : vector<1x8xf32> to vector<256x8xf32>
    %156 = arith.mulf %154, %155 : vector<256x8xf32>
    %cst_101 = arith.constant dense<0.000000e+00> : vector<256xf32>
    %157 = vector.multi_reduction <add>, %156, %cst_101 [1] : vector<256x8xf32> to vector<256xf32>
    %158 = vector.shape_cast %157 : vector<256xf32> to vector<256x1xf32>
    %159 = arith.negf %158 : vector<256x1xf32>
    %160 = math.exp %159 : vector<256x1xf32>
    %cst_102 = arith.constant 1.000000e+00 : f32
    %161 = vector.broadcast %cst_102 : f32 to vector<256x1xf32>
    %162 = arith.addf %161, %160 : vector<256x1xf32>
    %163 = arith.divf %161, %162 : vector<256x1xf32>
    %164 = vector.broadcast %163 : vector<256x1xf32> to vector<256x16xf32>
    %165 = arith.mulf %136, %164 : vector<256x16xf32>
    %166 = vector.shape_cast %165 : vector<256x16xf32> to vector<16x16x16xf32>
    %c1_103 = arith.constant 1 : index
    %c1_104 = arith.constant 1 : index
    %c0_105 = arith.constant 0 : index
    %167 = vector.load %arg15[%c1_103, %c1_104, %c0_105] : memref<18x18x16xf32, #tpu.memory_space<vmem>>, vector<16x16x16xf32>
    tpu.vector_store %arg15[%c1_103, %c1_104, %c0_105], %166 {strides = array<i32>} : memref<18x18x16xf32, #tpu.memory_space<vmem>>, vector<16x16x16xf32>,
    %c0_106 = arith.constant 0 : index
    %c0_107 = arith.constant 0 : index
    %c0_108 = arith.constant 0 : index
    %168 = vector.load %arg15[%c0_106, %c0_107, %c0_108] : memref<18x18x16xf32, #tpu.memory_space<vmem>>, vector<16x16x16xf32>
    %169 = vector.shape_cast %168 : vector<16x16x16xf32> to vector<256x16xf32>
    %170 = arith.truncf %169 : vector<256x16xf32> to vector<256x16xbf16>
    %c0_109 = arith.constant 0 : index
    %c0_110 = arith.constant 0 : index
    %c0_111 = arith.constant 0 : index
    %171 = vector.load %arg12[%c0_109, %c0_110, %c0_111] : memref<9x16x16xbf16, #tpu.memory_space<vmem>>, vector<1x16x16xbf16>
    %172 = vector.shape_cast %171 : vector<1x16x16xbf16> to vector<16x16xbf16>
    %cst_112 = arith.constant dense<0.000000e+00> : vector<256x16xf32>
    %173 = tpu.matmul %170, %172, %cst_112 {dimension_numbers = #tpu.dot_dimension_numbers<[1], [0], [0], [1], [0, 0, 1, 1], [], []>} : vector<256x16xbf16>, vector<16x16xbf16>, vector<256x16xf32> -> vector<256x16xf32>
    %c0_113 = arith.constant 0 : index
    %c1_114 = arith.constant 1 : index
    %c0_115 = arith.constant 0 : index
    %174 = vector.load %arg15[%c0_113, %c1_114, %c0_115] : memref<18x18x16xf32, #tpu.memory_space<vmem>>, vector<16x16x16xf32>
    %175 = vector.shape_cast %174 : vector<16x16x16xf32> to vector<256x16xf32>
    %176 = arith.truncf %175 : vector<256x16xf32> to vector<256x16xbf16>
    %c1_116 = arith.constant 1 : index
    %c0_117 = arith.constant 0 : index
    %c0_118 = arith.constant 0 : index
    %177 = vector.load %arg12[%c1_116, %c0_117, %c0_118] : memref<9x16x16xbf16, #tpu.memory_space<vmem>>, vector<1x16x16xbf16>
    %178 = vector.shape_cast %177 : vector<1x16x16xbf16> to vector<16x16xbf16>
    %cst_119 = arith.constant dense<0.000000e+00> : vector<256x16xf32>
    %179 = tpu.matmul %176, %178, %cst_119 {dimension_numbers = #tpu.dot_dimension_numbers<[1], [0], [0], [1], [0, 0, 1, 1], [], []>} : vector<256x16xbf16>, vector<16x16xbf16>, vector<256x16xf32> -> vector<256x16xf32>
    %180 = arith.addf %173, %179 : vector<256x16xf32>
    %c0_120 = arith.constant 0 : index
    %c2_121 = arith.constant 2 : index
    %c0_122 = arith.constant 0 : index
    %181 = vector.load %arg15[%c0_120, %c2_121, %c0_122] : memref<18x18x16xf32, #tpu.memory_space<vmem>>, vector<16x16x16xf32>
    %182 = vector.shape_cast %181 : vector<16x16x16xf32> to vector<256x16xf32>
    %183 = arith.truncf %182 : vector<256x16xf32> to vector<256x16xbf16>
    %c2_123 = arith.constant 2 : index
    %c0_124 = arith.constant 0 : index
    %c0_125 = arith.constant 0 : index
    %184 = vector.load %arg12[%c2_123, %c0_124, %c0_125] : memref<9x16x16xbf16, #tpu.memory_space<vmem>>, vector<1x16x16xbf16>
    %185 = vector.shape_cast %184 : vector<1x16x16xbf16> to vector<16x16xbf16>
    %cst_126 = arith.constant dense<0.000000e+00> : vector<256x16xf32>
    %186 = tpu.matmul %183, %185, %cst_126 {dimension_numbers = #tpu.dot_dimension_numbers<[1], [0], [0], [1], [0, 0, 1, 1], [], []>} : vector<256x16xbf16>, vector<16x16xbf16>, vector<256x16xf32> -> vector<256x16xf32>
    %187 = arith.addf %180, %186 : vector<256x16xf32>
    %c1_127 = arith.constant 1 : index
    %c0_128 = arith.constant 0 : index
    %c0_129 = arith.constant 0 : index
    %188 = vector.load %arg15[%c1_127, %c0_128, %c0_129] : memref<18x18x16xf32, #tpu.memory_space<vmem>>, vector<16x16x16xf32>
    %189 = vector.shape_cast %188 : vector<16x16x16xf32> to vector<256x16xf32>
    %190 = arith.truncf %189 : vector<256x16xf32> to vector<256x16xbf16>
    %c3_130 = arith.constant 3 : index
    %c0_131 = arith.constant 0 : index
    %c0_132 = arith.constant 0 : index
    %191 = vector.load %arg12[%c3_130, %c0_131, %c0_132] : memref<9x16x16xbf16, #tpu.memory_space<vmem>>, vector<1x16x16xbf16>
    %192 = vector.shape_cast %191 : vector<1x16x16xbf16> to vector<16x16xbf16>
    %cst_133 = arith.constant dense<0.000000e+00> : vector<256x16xf32>
    %193 = tpu.matmul %190, %192, %cst_133 {dimension_numbers = #tpu.dot_dimension_numbers<[1], [0], [0], [1], [0, 0, 1, 1], [], []>} : vector<256x16xbf16>, vector<16x16xbf16>, vector<256x16xf32> -> vector<256x16xf32>
    %194 = arith.addf %187, %193 : vector<256x16xf32>
    %c1_134 = arith.constant 1 : index
    %c1_135 = arith.constant 1 : index
    %c0_136 = arith.constant 0 : index
    %195 = vector.load %arg15[%c1_134, %c1_135, %c0_136] : memref<18x18x16xf32, #tpu.memory_space<vmem>>, vector<16x16x16xf32>
    %196 = vector.shape_cast %195 : vector<16x16x16xf32> to vector<256x16xf32>
    %197 = arith.truncf %196 : vector<256x16xf32> to vector<256x16xbf16>
    %c4_137 = arith.constant 4 : index
    %c0_138 = arith.constant 0 : index
    %c0_139 = arith.constant 0 : index
    %198 = vector.load %arg12[%c4_137, %c0_138, %c0_139] : memref<9x16x16xbf16, #tpu.memory_space<vmem>>, vector<1x16x16xbf16>
    %199 = vector.shape_cast %198 : vector<1x16x16xbf16> to vector<16x16xbf16>
    %cst_140 = arith.constant dense<0.000000e+00> : vector<256x16xf32>
    %200 = tpu.matmul %197, %199, %cst_140 {dimension_numbers = #tpu.dot_dimension_numbers<[1], [0], [0], [1], [0, 0, 1, 1], [], []>} : vector<256x16xbf16>, vector<16x16xbf16>, vector<256x16xf32> -> vector<256x16xf32>
    %201 = arith.addf %194, %200 : vector<256x16xf32>
    %c1_141 = arith.constant 1 : index
    %c2_142 = arith.constant 2 : index
    %c0_143 = arith.constant 0 : index
    %202 = vector.load %arg15[%c1_141, %c2_142, %c0_143] : memref<18x18x16xf32, #tpu.memory_space<vmem>>, vector<16x16x16xf32>
    %203 = vector.shape_cast %202 : vector<16x16x16xf32> to vector<256x16xf32>
    %204 = arith.truncf %203 : vector<256x16xf32> to vector<256x16xbf16>
    %c5_144 = arith.constant 5 : index
    %c0_145 = arith.constant 0 : index
    %c0_146 = arith.constant 0 : index
    %205 = vector.load %arg12[%c5_144, %c0_145, %c0_146] : memref<9x16x16xbf16, #tpu.memory_space<vmem>>, vector<1x16x16xbf16>
    %206 = vector.shape_cast %205 : vector<1x16x16xbf16> to vector<16x16xbf16>
    %cst_147 = arith.constant dense<0.000000e+00> : vector<256x16xf32>
    %207 = tpu.matmul %204, %206, %cst_147 {dimension_numbers = #tpu.dot_dimension_numbers<[1], [0], [0], [1], [0, 0, 1, 1], [], []>} : vector<256x16xbf16>, vector<16x16xbf16>, vector<256x16xf32> -> vector<256x16xf32>
    %208 = arith.addf %201, %207 : vector<256x16xf32>
    %c2_148 = arith.constant 2 : index
    %c0_149 = arith.constant 0 : index
    %c0_150 = arith.constant 0 : index
    %209 = vector.load %arg15[%c2_148, %c0_149, %c0_150] : memref<18x18x16xf32, #tpu.memory_space<vmem>>, vector<16x16x16xf32>
    %210 = vector.shape_cast %209 : vector<16x16x16xf32> to vector<256x16xf32>
    %211 = arith.truncf %210 : vector<256x16xf32> to vector<256x16xbf16>
    %c6_151 = arith.constant 6 : index
    %c0_152 = arith.constant 0 : index
    %c0_153 = arith.constant 0 : index
    %212 = vector.load %arg12[%c6_151, %c0_152, %c0_153] : memref<9x16x16xbf16, #tpu.memory_space<vmem>>, vector<1x16x16xbf16>
    %213 = vector.shape_cast %212 : vector<1x16x16xbf16> to vector<16x16xbf16>
    %cst_154 = arith.constant dense<0.000000e+00> : vector<256x16xf32>
    %214 = tpu.matmul %211, %213, %cst_154 {dimension_numbers = #tpu.dot_dimension_numbers<[1], [0], [0], [1], [0, 0, 1, 1], [], []>} : vector<256x16xbf16>, vector<16x16xbf16>, vector<256x16xf32> -> vector<256x16xf32>
    %215 = arith.addf %208, %214 : vector<256x16xf32>
    %c2_155 = arith.constant 2 : index
    %c1_156 = arith.constant 1 : index
    %c0_157 = arith.constant 0 : index
    %216 = vector.load %arg15[%c2_155, %c1_156, %c0_157] : memref<18x18x16xf32, #tpu.memory_space<vmem>>, vector<16x16x16xf32>
    %217 = vector.shape_cast %216 : vector<16x16x16xf32> to vector<256x16xf32>
    %218 = arith.truncf %217 : vector<256x16xf32> to vector<256x16xbf16>
    %c7_158 = arith.constant 7 : index
    %c0_159 = arith.constant 0 : index
    %c0_160 = arith.constant 0 : index
    %219 = vector.load %arg12[%c7_158, %c0_159, %c0_160] : memref<9x16x16xbf16, #tpu.memory_space<vmem>>, vector<1x16x16xbf16>
    %220 = vector.shape_cast %219 : vector<1x16x16xbf16> to vector<16x16xbf16>
    %cst_161 = arith.constant dense<0.000000e+00> : vector<256x16xf32>
    %221 = tpu.matmul %218, %220, %cst_161 {dimension_numbers = #tpu.dot_dimension_numbers<[1], [0], [0], [1], [0, 0, 1, 1], [], []>} : vector<256x16xbf16>, vector<16x16xbf16>, vector<256x16xf32> -> vector<256x16xf32>
    %222 = arith.addf %215, %221 : vector<256x16xf32>
    %c2_162 = arith.constant 2 : index
    %c2_163 = arith.constant 2 : index
    %c0_164 = arith.constant 0 : index
    %223 = vector.load %arg15[%c2_162, %c2_163, %c0_164] : memref<18x18x16xf32, #tpu.memory_space<vmem>>, vector<16x16x16xf32>
    %224 = vector.shape_cast %223 : vector<16x16x16xf32> to vector<256x16xf32>
    %225 = arith.truncf %224 : vector<256x16xf32> to vector<256x16xbf16>
    %c8_165 = arith.constant 8 : index
    %c0_166 = arith.constant 0 : index
    %c0_167 = arith.constant 0 : index
    %226 = vector.load %arg12[%c8_165, %c0_166, %c0_167] : memref<9x16x16xbf16, #tpu.memory_space<vmem>>, vector<1x16x16xbf16>
    %227 = vector.shape_cast %226 : vector<1x16x16xbf16> to vector<16x16xbf16>
    %cst_168 = arith.constant dense<0.000000e+00> : vector<256x16xf32>
    %228 = tpu.matmul %225, %227, %cst_168 {dimension_numbers = #tpu.dot_dimension_numbers<[1], [0], [0], [1], [0, 0, 1, 1], [], []>} : vector<256x16xbf16>, vector<16x16xbf16>, vector<256x16xf32> -> vector<256x16xf32>
    %229 = arith.addf %222, %228 : vector<256x16xf32>
    %c0_169 = arith.constant 0 : index
    %c0_170 = arith.constant 0 : index
    %230 = vector.load %arg13[%c0_169, %c0_170] : memref<1x16xf32, #tpu.memory_space<vmem>>, vector<1x16xf32>
    %231 = vector.broadcast %230 : vector<1x16xf32> to vector<256x16xf32>
    %232 = arith.addf %229, %231 : vector<256x16xf32>
    %233 = vector.shape_cast %1 : vector<16x16x16xf32> to vector<256x16xf32>
    %234 = arith.addf %232, %233 : vector<256x16xf32>
    %cst_171 = arith.constant 0.000000e+00 : f32
    %235 = vector.broadcast %cst_171 : f32 to vector<256x16xf32>
    %236 = arith.maximumf %234, %235 : vector<256x16xf32>
    %c0_172 = arith.constant 0 : index
    %c0_173 = arith.constant 0 : index
    %c0_174 = arith.constant 0 : index
    %237 = vector.load %arg14[%c0_172, %c0_173, %c0_174] : memref<1x256x16xf32, #tpu.memory_space<vmem>>, vector<1x256x16xf32>
    %238 = vector.shape_cast %237 : vector<1x256x16xf32> to vector<256x16xf32>
    %239 = vector.shape_cast %236 : vector<256x16xf32> to vector<1x256x16xf32>
    tpu.vector_store %arg14[%c0_172, %c0_173, %c0_174], %239 {strides = array<i32>} : memref<1x256x16xf32, #tpu.memory_space<vmem>>, vector<1x256x16xf32>,
    return
  }
  func.func @transform_0(%arg0: i32) -> (i32, i32, i32, i32) {
    %c0_i32 = arith.constant 0 : i32
    %c0_i32_0 = arith.constant 0 : i32
    %c0_i32_1 = arith.constant 0 : i32
    %c0_i32_2 = arith.constant 0 : i32
    return %arg0, %c0_i32, %c0_i32_0, %c0_i32_1 : i32, i32, i32, i32
  }
  func.func @transform_1(%arg0: i32) -> (i32, i32, i32) {
    %c0_i32 = arith.constant 0 : i32
    %c0_i32_0 = arith.constant 0 : i32
    %c0_i32_1 = arith.constant 0 : i32
    %c0_i32_2 = arith.constant 0 : i32
    return %c0_i32, %c0_i32_0, %c0_i32_1 : i32, i32, i32
  }
  func.func @transform_2(%arg0: i32) -> (i32, i32) {
    %c0_i32 = arith.constant 0 : i32
    %c0_i32_0 = arith.constant 0 : i32
    %c0_i32_1 = arith.constant 0 : i32
    return %c0_i32, %c0_i32_0 : i32, i32
  }
  func.func @transform_3(%arg0: i32) -> (i32, i32) {
    %c0_i32 = arith.constant 0 : i32
    %c0_i32_0 = arith.constant 0 : i32
    %c0_i32_1 = arith.constant 0 : i32
    return %c0_i32, %c0_i32_0 : i32, i32
  }
  func.func @transform_4(%arg0: i32) -> (i32, i32) {
    %c0_i32 = arith.constant 0 : i32
    %c0_i32_0 = arith.constant 0 : i32
    %c0_i32_1 = arith.constant 0 : i32
    return %c0_i32, %c0_i32_0 : i32, i32
  }
  func.func @transform_5(%arg0: i32) -> (i32, i32) {
    %c0_i32 = arith.constant 0 : i32
    %c0_i32_0 = arith.constant 0 : i32
    %c0_i32_1 = arith.constant 0 : i32
    return %c0_i32, %c0_i32_0 : i32, i32
  }
  func.func @transform_6(%arg0: i32) -> (i32, i32) {
    %c0_i32 = arith.constant 0 : i32
    %c0_i32_0 = arith.constant 0 : i32
    %c0_i32_1 = arith.constant 0 : i32
    return %c0_i32, %c0_i32_0 : i32, i32
  }
  func.func @transform_7(%arg0: i32) -> (i32, i32) {
    %c0_i32 = arith.constant 0 : i32
    %c0_i32_0 = arith.constant 0 : i32
    %c0_i32_1 = arith.constant 0 : i32
    return %c0_i32, %c0_i32_0 : i32, i32
  }
  func.func @transform_8(%arg0: i32) -> (i32, i32) {
    %c0_i32 = arith.constant 0 : i32
    %c0_i32_0 = arith.constant 0 : i32
    %c0_i32_1 = arith.constant 0 : i32
    return %c0_i32, %c0_i32_0 : i32, i32
  }
  func.func @transform_9(%arg0: i32) -> (i32, i32) {
    %c0_i32 = arith.constant 0 : i32
    %c0_i32_0 = arith.constant 0 : i32
    %c0_i32_1 = arith.constant 0 : i32
    return %c0_i32, %c0_i32_0 : i32, i32
  }
  func.func @transform_10(%arg0: i32) -> (i32, i32) {
    %c0_i32 = arith.constant 0 : i32
    %c0_i32_0 = arith.constant 0 : i32
    %c0_i32_1 = arith.constant 0 : i32
    return %c0_i32, %c0_i32_0 : i32, i32
  }
  func.func @transform_11(%arg0: i32) -> (i32, i32, i32) {
    %c0_i32 = arith.constant 0 : i32
    %c0_i32_0 = arith.constant 0 : i32
    %c0_i32_1 = arith.constant 0 : i32
    %c0_i32_2 = arith.constant 0 : i32
    return %c0_i32, %c0_i32_0, %c0_i32_1 : i32, i32, i32
  }
  func.func @transform_12(%arg0: i32) -> (i32, i32) {
    %c0_i32 = arith.constant 0 : i32
    %c0_i32_0 = arith.constant 0 : i32
    %c0_i32_1 = arith.constant 0 : i32
    return %c0_i32, %c0_i32_0 : i32, i32
  }
  func.func @transform_13(%arg0: i32) -> (i32, i32, i32) {
    %c0_i32 = arith.constant 0 : i32
    %c0_i32_0 = arith.constant 0 : i32
    %c0_i32_1 = arith.constant 0 : i32
    return %arg0, %c0_i32, %c0_i32_0 : i32, i32, i32
  }
}

</mosaic_0001>

<bundles_post_ra>
// kernel: basic_block_forward.1
= control target key start
LH: loop header
LB: loop body
LE: loop exit
PB: predicated region body
PF: predicated region fallthrough
CT: control target
= control target key end

     0   :  { %s8060_s25 = smov 0   ;;  %s11493_s0 = inlined_call_operand.vmem [shape: f32[2,16,16,16], index: 0, kind: input, shape index: {}]   ;;  %s11494_s1 = inlined_call_operand.vmem [shape: bf16[9,16,16], index: 1, kind: input, shape index: {}]   ;;  %s11495_s2 = inlined_call_operand.vmem [shape: f32[1,16], index: 2, kind: input, shape index: {}]   ;;  %s11496_s3 = inlined_call_operand.vmem [shape: bf16[16,9], index: 3, kind: input, shape index: {}]   ;;  %s11497_s4 = inlined_call_operand.vmem [shape: bf16[8,2], index: 4, kind: input, shape index: {}]   ;;  %s11498_s5 = inlined_call_operand.vmem [shape: f32[1,2], index: 5, kind: input, shape index: {}]   ;;  %s11499_s6 = inlined_call_operand.vmem [shape: f32[1,2], index: 6, kind: input, shape index: {}]   ;;  %s11500_s7 = inlined_call_operand.vmem [shape: f32[1,2], index: 7, kind: input, shape index: {}]   ;;  %s11501_s8 = inlined_call_operand.vmem [shape: bf16[2,16], index: 8, kind: input, shape index: {}]   ;;  %s11502_s9 = inlined_call_operand.vmem [shape: f32[1,16], index: 9, kind: input, shape index: {}]   ;;  %s11503_s10 = inlined_call_operand.vmem [shape: bf16[16,16], index: 10, kind: input, shape index: {}]   ;;  %s11504_s11 = inlined_call_operand.vmem [shape: bf16[9,16,16], index: 11, kind: input, shape index: {}]   ;;  %s11505_s12 = inlined_call_operand.vmem [shape: f32[1,16], index: 12, kind: input, shape index: {}]   ;;  %s11506_s13 = inlined_call_operand.vmem [shape: f32[2,256,16], index: 13, kind: output, shape index: {}]  }
   0x1 LB: > { %s7183_s26 = sadd.s32 4294967295, %s7982_s25   ;;  %p7187_p0 = scmp.ge.s32.totalorder %s7982_s25, 1  ;;  %s7982_s25 = sphi %s8060_s25, %s23_s25  }
   0x2   : > { %p387_p1 = scmp.lt.s32.totalorder %s7982_s25, 3 }
   0x4   : > { %p388_p2 = pnand %p7187_p0, %p387_p1 }
   0x6   : > { %391 = sbr.rel (%p388_p2) target bundleno = 4259 (0x10a3), region = 72 }
   0xb   : > { %v7664_v0 = vld [vmem:[%s11494_s1 + $0x8] sm:$0xff]  ;;  %v7663_v1 = vld [vmem:[%s11494_s1] sm:$0xff]  ;;  %v7665_v2 = vld [vmem:[%s11494_s1 + $0x10] sm:$0xff]  ;;  %vm474_vm0 = vcmask 130048   ;;  %vm477_vm1 = vcmask 123904   ;;  %v7984_v3 = vmov 0.0  }
   0xc   : > { %475 = vst.msk [vmem:[#allocation2] sm:$0xff] %vm474_vm0, %v7984_v3  ;;  %v7666_v4 = vld [vmem:[%s11494_s1 + $0x18] sm:$0xff]  ;;  %725 = vmatpush.bf16.msra.mxu0 %v7664_v0  ;;  %868 = vmatpush.bf16.msra.mxu1 %v7663_v1  ;;  %v7667_v14 = vld [vmem:[%s11494_s1 + $0x20] sm:$0xff]  ;;  %p431_p3 = scmp.lt.s32.totalorder %s7183_s26, 1  ;;  %vm2762_vm2 = vcmask 72768   ;;  %vm3060_vm3 = vcmask 7168  }
   0xd   : > { %476 = vst.msk [vmem:[#allocation2 + $0x8] sm:$0xff] %vm474_vm0, %v7984_v3  ;;  %1062 = vmatpush.bf16.msra.mxu2 %v7665_v2  ;;  %1288 = vmatpush.bf16.msra.mxu3 %v7666_v4  ;;  %vm3448_vm4 = vcmask 1043456   ;;  %vm3372_vm9 = vcmask 64512   ;;  %vm3507_vm10 = vcmask 1040384   ;;  %vm3465_vm11 = vcmask 8192  }
   0xe   : > { %478 = vst.msk [vmem:[#allocation2 + $0x10] sm:$0x3] %vm477_vm1, %v7984_v3  ;;  %s12079_s26 = smov (!%p431_p3, %s7183_s26), 1 }
   0xf   : > { %479 = vst.msk [vmem:[#allocation2 + $0x18] sm:$0xff] %vm474_vm0, %v7984_v3  ;;  %s7661_s20 = sshll.u32 %s12079_s26, 8 }
  0x10   : > { %480 = vst.msk [vmem:[#allocation2 + $0x20] sm:$0xff] %vm474_vm0, %v7984_v3  ;;  %1514 = vmatpush.bf16.msrb.mxu0 %v7667_v14  ;;  %s8196_s23 = scalar_lea.vmem %s11493_s0, %s7661_s20  ;;  %s11218_s21 = scalar_lea.vmem %s11506_s13, %s7661_s20 }
  0x11   : > { %481 = vst.msk [vmem:[#allocation2 + $0x28] sm:$0x3] %vm477_vm1, %v7984_v3  ;;  %v8205_v15 = vld [vmem:[%s8196_s23] sm:$0xff]  ;;  %v8210_v16 = vld [vmem:[%s8196_s23 + $0x8] sm:$0xff]  ;;  %v8215_v17 = vld [vmem:[%s8196_s23 + $0x10] sm:$0xff] }
  0x12   : > { %482 = vst.msk [vmem:[#allocation2 + $0x30] sm:$0xff] %vm474_vm0, %v7984_v3  ;;  %v8220_v18 = vld [vmem:[%s8196_s23 + $0x18] sm:$0xff]  ;;  %v8225_v19 = vld [vmem:[%s8196_s23 + $0x20] sm:$0xff]  ;;  %v8230_v20 = vld [vmem:[%s8196_s23 + $0x28] sm:$0xff] }
  0x13   : > { %483 = vst.msk [vmem:[#allocation2 + $0x38] sm:$0xff] %vm474_vm0, %v7984_v3  ;;  %v563_v5 = vld [vmem:[#allocation2] sm:$0xff]  ;;  %v8249_v30 = vld [vmem:[%s8196_s23 + $0x30] sm:$0xff]  ;;  %v8252_v31 = vld [vmem:[%s8196_s23 + $0x38] sm:$0xff] }
  0x14   : > { %v613_v6 = vld [vmem:[#allocation2 + $0x1] sm:$0xff]  ;;  %484 = vst.msk [vmem:[#allocation2 + $0x40] sm:$0x3] %vm477_vm1, %v7984_v3  ;;  %v8297_v52 = vld [vmem:[%s8196_s23 + $0x50] sm:$0xff]  ;;  %v8300_v53 = vld [vmem:[%s8196_s23 + $0x58] sm:$0xff] }
  0x15   : > { %v564_v7 = vld [vmem:[#allocation2 + $0x8] sm:$0xff]  ;;  %485 = vst.msk [vmem:[#allocation2 + $0x48] sm:$0xff] %vm474_vm0, %v7984_v3  ;;  %v8273_v41 = vld [vmem:[%s8196_s23 + $0x40] sm:$0xff] }
  0x16   : > { %v950_v8 = vld [vmem:[#allocation2 + $0x2] sm:$0xff]  ;;  %v595_v10 = vpack.c.bf16 %v564_v7, %v563_v5  ;;  %v951_v11 = vld [vmem:[#allocation2 + $0xa] sm:$0xff]  ;;  %486 = vst.msk [vmem:[#allocation2 + $0x50] sm:$0xff] %vm474_vm0, %v7984_v3 }
  0x17   : > { %v614_v9 = vld [vmem:[#allocation2 + $0x9] sm:$0xff]  ;;  %v982_v13 = vpack.c.bf16 %v951_v11, %v950_v8  ;;  %487 = vst.msk [vmem:[#allocation2 + $0x58] sm:$0x3] %vm477_vm1, %v7984_v3  ;;  %v8321_v63 = vld [vmem:[%s8196_s23 + $0x60] sm:$0xff]  ;;  %v8348_v11 = vld [vmem:[%s8196_s23 + $0x78] sm:$0xff] }
  0x18   : > { %v645_v12 = vpack.c.bf16 %v614_v9, %v613_v6  ;;  %7218 = vmatmul.msk.bf16.vlgmr.msra.gmra.mxu1 %vm474_vm0, %v595_v10  ;;  %488 = vst.msk [vmem:[#allocation2 + $0x60] sm:$0xff] %vm474_vm0, %v7984_v3  ;;  %v8276_v42 = vld [vmem:[%s8196_s23 + $0x48] sm:$0xff]  ;;  %v8345_v10 = vld [vmem:[%s8196_s23 + $0x70] sm:$0xff] }
  0x19   : > { %7240 = vmatmul.msk.bf16.vlgmr.msra.gmra.mxu2 %vm474_vm0, %v982_v13  ;;  %489 = vst.msk [vmem:[#allocation2 + $0x68] sm:$0xff] %vm474_vm0, %v7984_v3  ;;  %v8324_v0 = vld [vmem:[%s8196_s23 + $0x68] sm:$0xff] }
  0x1a   : > { %7198 = vmatmul.msk.bf16.vlgmr.msra.gmra.mxu0 %vm474_vm0, %v645_v12  ;;  %490 = vst.msk [vmem:[#allocation2 + $0x70] sm:$0x3] %vm477_vm1, %v7984_v3 }
  0x1b   : > { %491 = vst.msk [vmem:[#allocation2 + $0x78] sm:$0xff] %vm474_vm0, %v7984_v3 }
  0x1c   : > { %492 = vst.msk [vmem:[#allocation2 + $0x80] sm:$0xff] %vm474_vm0, %v7984_v3 }
  0x1d   : > { %493 = vst.msk [vmem:[#allocation2 + $0x88] sm:$0x3] %vm477_vm1, %v7984_v3 }
  0x1e   : > { %494 = vst.msk [vmem:[#allocation2 + $0x90] sm:$0xff] %vm474_vm0, %v7984_v3 }
  0x1f   : > { %495 = vst.msk [vmem:[#allocation2 + $0x98] sm:$0xff] %vm474_vm0, %v7984_v3 }
  0x20   : > { %496 = vst.msk [vmem:[#allocation2 + $0xa0] sm:$0x3] %vm477_vm1, %v7984_v3 }
  0x21   : > { %497 = vst.msk [vmem:[#allocation2 + $0xa8] sm:$0xff] %vm474_vm0, %v7984_v3 }
  0x22   : > { %498 = vst.msk [vmem:[#allocation2 + $0xb0] sm:$0xff] %vm474_vm0, %v7984_v3 }
  0x23   : > { %499 = vst.msk [vmem:[#allocation2 + $0xb8] sm:$0x3] %vm477_vm1, %v7984_v3 }
  0x24   : > { %500 = vst.msk [vmem:[#allocation2 + $0xc0] sm:$0xff] %vm474_vm0, %v7984_v3 }
  0x25   : > { %501 = vst.msk [vmem:[#allocation2 + $0xc8] sm:$0xff] %vm474_vm0, %v7984_v3 }
  0x26   : > { %502 = vst.msk [vmem:[#allocation2 + $0xd0] sm:$0x3] %vm477_vm1, %v7984_v3 }
  0x27   : > { %503 = vst.msk [vmem:[#allocation2 + $0xd8] sm:$0xff] %vm474_vm0, %v7984_v3 }
  0x28   : > { %504 = vst.msk [vmem:[#allocation2 + $0xe0] sm:$0xff] %vm474_vm0, %v7984_v3 }
  0x29   : > { %505 = vst.msk [vmem:[#allocation2 + $0xe8] sm:$0x3] %vm477_vm1, %v7984_v3 }
  0x2a   : > { %506 = vst.msk [vmem:[#allocation2 + $0xf0] sm:$0xff] %vm474_vm0, %v7984_v3 }
  0x2b   : > { %507 = vst.msk [vmem:[#allocation2 + $0xf8] sm:$0xff] %vm474_vm0, %v7984_v3 }
  0x2c   : > { %508 = vst.msk [vmem:[#allocation2 + $0x100] sm:$0x3] %vm477_vm1, %v7984_v3 }
  0x2d   : > { %509 = vst.msk [vmem:[#allocation2 + $0x108] sm:$0xff] %vm474_vm0, %v7984_v3 }
  0x2e   : > { %510 = vst.msk [vmem:[#allocation2 + $0x110] sm:$0xff] %vm474_vm0, %v7984_v3 }
  0x2f   : > { %511 = vst.msk [vmem:[#allocation2 + $0x118] sm:$0x3] %vm477_vm1, %v7984_v3 }
  0x30   : > { %512 = vst.msk [vmem:[#allocation2 + $0x120] sm:$0xff] %vm474_vm0, %v7984_v3 }
  0x31   : > { %513 = vst.msk [vmem:[#allocation2 + $0x128] sm:$0xff] %vm474_vm0, %v7984_v3 }
  0x32   : > { %514 = vst.msk [vmem:[#allocation2 + $0x130] sm:$0x3] %vm477_vm1, %v7984_v3 }
  0x33   : > { %515 = vst.msk [vmem:[#allocation2 + $0x138] sm:$0xff] %vm474_vm0, %v7984_v3 }
  0x34   : > { %516 = vst.msk [vmem:[#allocation2 + $0x140] sm:$0xff] %vm474_vm0, %v7984_v3 }
  0x35   : > { %517 = vst.msk [vmem:[#allocation2 + $0x148] sm:$0x3] %vm477_vm1, %v7984_v3 }
  0x36   : > { %518 = vst.msk [vmem:[#allocation2 + $0x150] sm:$0xff] %vm474_vm0, %v7984_v3 }
  0x37   : > { %519 = vst.msk [vmem:[#allocation2 + $0x158] sm:$0xff] %vm474_vm0, %v7984_v3 }
  0x38   : > { %520 = vst.msk [vmem:[#allocation2 + $0x160] sm:$0x3] %vm477_vm1, %v7984_v3 }
  0x39   : > { %521 = vst.msk [vmem:[#allocation2 + $0x168] sm:$0xff] %vm474_vm0, %v7984_v3 }
  0x3a   : > { %522 = vst.msk [vmem:[#allocation2 + $0x170] sm:$0xff] %vm474_vm0, %v7984_v3 }
  0x3b   : > { %523 = vst.msk [vmem:[#allocation2 + $0x178] sm:$0x3] %vm477_vm1, %v7984_v3 }
  0x3c   : > { %524 = vst.msk [vmem:[#allocation2 + $0x180] sm:$0xff] %vm474_vm0, %v7984_v3 }
  0x3d   : > { %525 = vst.msk [vmem:[#allocation2 + $0x188] sm:$0xff] %vm474_vm0, %v7984_v3 }
  0x3e   : > { %526 = vst.msk [vmem:[#allocation2 + $0x190] sm:$0x3] %vm477_vm1, %v7984_v3 }
  0x3f   : > { %527 = vst.msk [vmem:[#allocation2 + $0x198] sm:$0xff] %vm474_vm0, %v7984_v3 }
  0x40   : > { %11672 = vst [vmem:[#allocation3_spill] sm:$0xff] %v8205_v15 }
  0x41   : > { %528 = vst.msk [vmem:[#allocation2 + $0x1a0] sm:$0xff] %vm474_vm0, %v7984_v3 }
  0x42   : > { %11673 = vst [vmem:[#allocation4_spill] sm:$0xff] %v8210_v16 }
  0x43   : > { %529 = vst.msk [vmem:[#allocation2 + $0x1a8] sm:$0x3] %vm477_vm1, %v7984_v3  ;;  %vm3503_vm1 = vcmask 15360  }
  0x44   : > { %11674 = vst [vmem:[#allocation5_spill] sm:$0xff] %v8215_v17 }
  0x45   : > { %531 = vst.msk [vmem:[#allocation2 + $0x19] sm:$0xff] %vm474_vm0, %v8205_v15 }
  0x46   : > { %11675 = vst [vmem:[#allocation6_spill] sm:$0xff] %v8220_v18 }
  0x47   : > { %532 = vst.msk [vmem:[#allocation2 + $0x21] sm:$0xff] %vm474_vm0, %v8210_v16 }
  0x48   : > { %11676 = vst [vmem:[#allocation7_spill] sm:$0xff] %v8225_v19 }
  0x49   : > { %533 = vst.msk [vmem:[#allocation2 + $0x31] sm:$0xff] %vm474_vm0, %v8215_v17 }
  0x4a   : > { %11677 = vst [vmem:[#allocation8_spill] sm:$0xff] %v8230_v20 }
  0x4b   : > { %534 = vst.msk [vmem:[#allocation2 + $0x39] sm:$0xff] %vm474_vm0, %v8220_v18 }
  0x4c   : > { %535 = vst.msk [vmem:[#allocation2 + $0x49] sm:$0xff] %vm474_vm0, %v8225_v19  ;;  %v1176_v21 = vld [vmem:[#allocation2 + $0x18] sm:$0xff] }
  0x4d   : > { %536 = vst.msk [vmem:[#allocation2 + $0x51] sm:$0xff] %vm474_vm0, %v8230_v20  ;;  %v615_v22 = vld [vmem:[#allocation2 + $0x19] sm:$0xff] }
  0x4e   : > { %v1177_v23 = vld [vmem:[#allocation2 + $0x20] sm:$0xff]  ;;  %11678 = vst [vmem:[#allocation9_spill] sm:$0xff] %v8249_v30 }
  0x4f   : > { %v616_v24 = vld [vmem:[#allocation2 + $0x21] sm:$0xff]  ;;  %v1208_v26 = vpack.c.bf16 %v1177_v23, %v1176_v21  ;;  %11679 = vst [vmem:[#allocation10_spill] sm:$0xff] %v8252_v31 }
  0x50   : > { %v952_v25 = vld [vmem:[#allocation2 + $0x1a] sm:$0xff]  ;;  %v8238_v27 = vpack.c.bf16 %v616_v24, %v615_v22  ;;  %v953_v28 = vld [vmem:[#allocation2 + $0x22] sm:$0xff]  ;;  %537 = vst.msk [vmem:[#allocation2 + $0x61] sm:$0xff] %vm474_vm0, %v8249_v30  ;;  %v1178_v32 = vld [vmem:[#allocation2 + $0x30] sm:$0xff] }
  0x51   : > { %v8240_v29 = vpack.c.bf16 %v953_v28, %v952_v25  ;;  %7262 = vmatmul.msk.bf16.vlgmr.msra.gmra.mxu3 %vm474_vm0, %v1208_v26  ;;  %7219 = vmatmul.msk.bf16.gmra.mxu1 %vm474_vm0, %v1208_v26  ;;  %538 = vst.msk [vmem:[#allocation2 + $0x69] sm:$0xff] %vm474_vm0, %v8252_v31  ;;  %v617_v34 = vld [vmem:[#allocation2 + $0x31] sm:$0xff] }
  0x52   : > { %7199 = vmatmul.msk.bf16.gmra.mxu0 %vm474_vm0, %v8238_v27  ;;  %v1179_v33 = vld [vmem:[#allocation2 + $0x38] sm:$0xff]  ;;  %11680 = vst [vmem:[#allocation11_spill] sm:$0xff] %v8273_v41 }
  0x53   : > { %7241 = vmatmul.msk.bf16.gmra.mxu2 %vm474_vm0, %v8240_v29  ;;  %v618_v35 = vld [vmem:[#allocation2 + $0x39] sm:$0xff]  ;;  %v8258_v38 = vpack.c.bf16 %v1179_v33, %v1178_v32  ;;  %11681 = vst [vmem:[#allocation12_spill] sm:$0xff] %v8276_v42  ;;  %v1180_v43 = vld [vmem:[#allocation2 + $0x48] sm:$0xff] }
  0x54   : > { %v954_v36 = vld [vmem:[#allocation2 + $0x32] sm:$0xff]  ;;  %v955_v37 = vld [vmem:[#allocation2 + $0x3a] sm:$0xff]  ;;  %v8260_v39 = vpack.c.bf16 %v618_v35, %v617_v34  ;;  %539 = vst.msk [vmem:[#allocation2 + $0x79] sm:$0xff] %vm474_vm0, %v8273_v41  ;;  %v619_v45 = vld [vmem:[#allocation2 + $0x49] sm:$0xff] }
  0x55   : > { %v8262_v40 = vpack.c.bf16 %v955_v37, %v954_v36  ;;  %540 = vst.msk [vmem:[#allocation2 + $0x81] sm:$0xff] %vm474_vm0, %v8276_v42  ;;  %v1181_v44 = vld [vmem:[#allocation2 + $0x50] sm:$0xff]  ;;  %v8369_v35 = vld [vmem:[%s8196_s23 + $0x80] sm:$0xff]  ;;  %v8372_v36 = vld [vmem:[%s8196_s23 + $0x88] sm:$0xff] }
  0x56   : > { %v620_v46 = vld [vmem:[#allocation2 + $0x51] sm:$0xff]  ;;  %v8282_v49 = vpack.c.bf16 %v1181_v44, %v1180_v43  ;;  %11682 = vst [vmem:[#allocation13_spill] sm:$0xff] %v8297_v52 }
  0x57   : > { %v956_v47 = vld [vmem:[#allocation2 + $0x4a] sm:$0xff]  ;;  %v957_v48 = vld [vmem:[#allocation2 + $0x52] sm:$0xff]  ;;  %v8284_v50 = vpack.c.bf16 %v620_v46, %v619_v45  ;;  %11683 = vst [vmem:[#allocation14_spill] sm:$0xff] %v8300_v53  ;;  %v1182_v54 = vld [vmem:[#allocation2 + $0x60] sm:$0xff] }
  0x58   : > { %v8286_v51 = vpack.c.bf16 %v957_v48, %v956_v47  ;;  %541 = vst.msk [vmem:[#allocation2 + $0x91] sm:$0xff] %vm474_vm0, %v8297_v52  ;;  %v1183_v55 = vld [vmem:[#allocation2 + $0x68] sm:$0xff] }
  0x59   : > { %542 = vst.msk [vmem:[#allocation2 + $0x99] sm:$0xff] %vm474_vm0, %v8300_v53  ;;  %v621_v56 = vld [vmem:[#allocation2 + $0x61] sm:$0xff]  ;;  %v622_v57 = vld [vmem:[#allocation2 + $0x69] sm:$0xff]  ;;  %v8306_v60 = vpack.c.bf16 %v1183_v55, %v1182_v54 }
  0x5a   : > { %v958_v58 = vld [vmem:[#allocation2 + $0x62] sm:$0xff]  ;;  %v959_v59 = vld [vmem:[#allocation2 + $0x6a] sm:$0xff]  ;;  %v8308_v61 = vpack.c.bf16 %v622_v57, %v621_v56  ;;  %11684 = vst [vmem:[#allocation15_spill] sm:$0xff] %v8321_v63 }
  0x5b   : > { %v8310_v62 = vpack.c.bf16 %v959_v59, %v958_v58  ;;  %11685 = vst [vmem:[#allocation16_spill] sm:$0xff] %v8324_v0  ;;  %v1184_v1 = vld [vmem:[#allocation2 + $0x78] sm:$0xff]  ;;  %v7668_v57 = vld [vmem:[%s11494_s1 + $0x28] sm:$0xff]  ;;  %v8396_v58 = vld [vmem:[%s8196_s23 + $0x90] sm:$0xff] }
  0x5c   : > { %543 = vst.msk [vmem:[#allocation2 + $0xa9] sm:$0xff] %vm474_vm0, %v8321_v63  ;;  %v1185_v2 = vld [vmem:[#allocation2 + $0x80] sm:$0xff]  ;;  %1740 = vmatpush.bf16.msrb.mxu1 %v7668_v57  ;;  %v8399_v59 = vld [vmem:[%s8196_s23 + $0x98] sm:$0xff] }
  0x5d   : > { %544 = vst.msk [vmem:[#allocation2 + $0xb1] sm:$0xff] %vm474_vm0, %v8324_v0  ;;  %v623_v3 = vld [vmem:[#allocation2 + $0x79] sm:$0xff]  ;;  %v624_v4 = vld [vmem:[#allocation2 + $0x81] sm:$0xff]  ;;  %v8330_v7 = vpack.c.bf16 %v1185_v2, %v1184_v1 }
  0x5e   : > { %v960_v5 = vld [vmem:[#allocation2 + $0x7a] sm:$0xff]  ;;  %v961_v6 = vld [vmem:[#allocation2 + $0x82] sm:$0xff]  ;;  %v8332_v8 = vpack.c.bf16 %v624_v4, %v623_v3  ;;  %11686 = vst [vmem:[#allocation17_spill] sm:$0xff] %v8345_v10 }
  0x5f   : > { %v8334_v9 = vpack.c.bf16 %v961_v6, %v960_v5  ;;  %11687 = vst [vmem:[#allocation18_spill] sm:$0xff] %v8348_v11  ;;  %v1186_v12 = vld [vmem:[#allocation2 + $0x90] sm:$0xff] }
  0x60   : > { %545 = vst.msk [vmem:[#allocation2 + $0xc1] sm:$0xff] %vm474_vm0, %v8345_v10  ;;  %v1187_v13 = vld [vmem:[#allocation2 + $0x98] sm:$0xff] }
  0x61   : > { %7263 = vmatmul.msk.bf16.gmra.mxu3 %vm474_vm0, %v8258_v38  ;;  %7220 = vmatmul.msk.bf16.gmra.mxu1 %vm474_vm0, %v8258_v38  ;;  %546 = vst.msk [vmem:[#allocation2 + $0xc9] sm:$0xff] %vm474_vm0, %v8348_v11  ;;  %v625_v14 = vld [vmem:[#allocation2 + $0x91] sm:$0xff]  ;;  %v626_v21 = vld [vmem:[#allocation2 + $0x99] sm:$0xff]  ;;  %v8354_v24 = vpack.c.bf16 %v1187_v13, %v1186_v12 }
  0x62   : > { %7200 = vmatmul.msk.bf16.gmra.mxu0 %vm474_vm0, %v8260_v39  ;;  %v962_v22 = vld [vmem:[#allocation2 + $0x92] sm:$0xff]  ;;  %v963_v23 = vld [vmem:[#allocation2 + $0x9a] sm:$0xff]  ;;  %v8356_v25 = vpack.c.bf16 %v626_v21, %v625_v14  ;;  %11688 = vst [vmem:[#allocation19_spill] sm:$0xff] %v8369_v35 }
  0x63   : > { %7242 = vmatmul.msk.bf16.gmra.mxu2 %vm474_vm0, %v8262_v40  ;;  %v8358_v26 = vpack.c.bf16 %v963_v23, %v962_v22  ;;  %11689 = vst [vmem:[#allocation20_spill] sm:$0xff] %v8372_v36  ;;  %v1188_v43 = vld [vmem:[#allocation2 + $0xa8] sm:$0xff]  ;;  %v8424_v23 = vld [vmem:[%s8196_s23 + $0xa0] sm:$0xff] }
  0x64   : > { %547 = vst.msk [vmem:[#allocation2 + $0xd9] sm:$0xff] %vm474_vm0, %v8369_v35  ;;  %v1189_v44 = vld [vmem:[#allocation2 + $0xb0] sm:$0xff] }
  0x65   : > { %548 = vst.msk [vmem:[#allocation2 + $0xe1] sm:$0xff] %vm474_vm0, %v8372_v36  ;;  %v627_v45 = vld [vmem:[#allocation2 + $0xa9] sm:$0xff]  ;;  %v628_v46 = vld [vmem:[#allocation2 + $0xb1] sm:$0xff]  ;;  %v8378_v54 = vpack.c.bf16 %v1189_v44, %v1188_v43 }
  0x66   : > { %v964_v47 = vld [vmem:[#allocation2 + $0xaa] sm:$0xff]  ;;  %v965_v48 = vld [vmem:[#allocation2 + $0xb2] sm:$0xff]  ;;  %v8380_v55 = vpack.c.bf16 %v628_v46, %v627_v45  ;;  %11690 = vst [vmem:[#allocation21_spill] sm:$0xff] %v8396_v58 }
  0x67   : > { %v8382_v56 = vpack.c.bf16 %v965_v48, %v964_v47  ;;  %11691 = vst [vmem:[#allocation22_spill] sm:$0xff] %v8399_v59  ;;  %v1190_v1 = vld [vmem:[#allocation2 + $0xc0] sm:$0xff] }
  0x68   : > { %549 = vst.msk [vmem:[#allocation2 + $0xf1] sm:$0xff] %vm474_vm0, %v8396_v58  ;;  %v1191_v2 = vld [vmem:[#allocation2 + $0xc8] sm:$0xff] }
  0x69   : > { %550 = vst.msk [vmem:[#allocation2 + $0xf9] sm:$0xff] %vm474_vm0, %v8399_v59  ;;  %v629_v3 = vld [vmem:[#allocation2 + $0xc1] sm:$0xff]  ;;  %v630_v4 = vld [vmem:[#allocation2 + $0xc9] sm:$0xff]  ;;  %v8405_v12 = vpack.c.bf16 %v1191_v2, %v1190_v1 }
  0x6a   : > { %v966_v5 = vld [vmem:[#allocation2 + $0xc2] sm:$0xff]  ;;  %v967_v6 = vld [vmem:[#allocation2 + $0xca] sm:$0xff]  ;;  %v8407_v13 = vpack.c.bf16 %v630_v4, %v629_v3  ;;  %11692 = vst [vmem:[#allocation23_spill] sm:$0xff] %v8424_v23 }
  0x6b   : > { %v8409_v14 = vpack.c.bf16 %v967_v6, %v966_v5  ;;  %551 = vst.msk [vmem:[#allocation2 + $0x109] sm:$0xff] %vm474_vm0, %v8424_v23 }
  0x6c   : > { %v632_v43 = vld [vmem:[#allocation2 + $0xe1] sm:$0xff] }
  0x6d   : > { %v968_v45 = vld [vmem:[#allocation2 + $0xda] sm:$0xff]  ;;  %v969_v46 = vld [vmem:[#allocation2 + $0xe2] sm:$0xff] }
  0x6e   : > { %v8439_v1 = vpack.c.bf16 %v969_v46, %v968_v45 }
  0x70   : > { %v971_v23 = vld [vmem:[#allocation2 + $0xfa] sm:$0xff] }
  0x71   : > { %7264 = vmatmul.msk.bf16.gmra.mxu3 %vm474_vm0, %v8282_v49  ;;  %7221 = vmatmul.msk.bf16.gmra.mxu1 %vm474_vm0, %v8282_v49 }
  0x72   : > { %7201 = vmatmul.msk.bf16.gmra.mxu0 %vm474_vm0, %v8284_v50  ;;  %v635_v11 = vld [vmem:[#allocation2 + $0x109] sm:$0xff] }
  0x73   : > { %7243 = vmatmul.msk.bf16.gmra.mxu2 %vm474_vm0, %v8286_v51 }
  0x81   : > { %7265 = vmatmul.msk.bf16.gmra.mxu3 %vm474_vm0, %v8306_v60  ;;  %7222 = vmatmul.msk.bf16.gmra.mxu1 %vm474_vm0, %v8306_v60 }
  0x82   : > { %7202 = vmatmul.msk.bf16.gmra.mxu0 %vm474_vm0, %v8308_v61 }
  0x83   : > { %7244 = vmatmul.msk.bf16.gmra.mxu2 %vm474_vm0, %v8310_v62 }
  0x91   : > { %7266 = vmatmul.msk.bf16.gmra.mxu3 %vm474_vm0, %v8330_v7  ;;  %7223 = vmatmul.msk.bf16.gmra.mxu1 %vm474_vm0, %v8330_v7 }
  0x92   : > { %7203 = vmatmul.msk.bf16.gmra.mxu0 %vm474_vm0, %v8332_v8 }
  0x93   : > { %7245 = vmatmul.msk.bf16.gmra.mxu2 %vm474_vm0, %v8334_v9 }
  0x95   : > { %v870_v32 = vpop.f32.mrf.mxu1 }
  0x97   : > { %v727_v28 = vpop.f32.mrf.mxu0 }
  0x98   : > { %v871_v33 = vadd.f32 %v870_v32, %v727_v28  ;;  %v8427_v28 = vld [vmem:[%s8196_s23 + $0xa8] sm:$0xff]  ;;  %v1192_v32 = vld [vmem:[#allocation2 + $0xd8] sm:$0xff] }
  0x99   : > { %11693 = vst [vmem:[#allocation24_spill] sm:$0xff] %v8427_v28 }
  0x9a   : > { %552 = vst.msk [vmem:[#allocation2 + $0x111] sm:$0xff] %vm474_vm0, %v8427_v28  ;;  %v633_v28 = vld [vmem:[#allocation2 + $0xf1] sm:$0xff] }
  0x9c   : > { %v1064_v34 = vpop.f32.mrf.mxu2 }
  0x9d   : > { %v1144_v37 = vadd.f32 %v1064_v34, %v871_v33  ;;  %v8421_v22 = vpop.f32.mrf.mxu1  ;;  %v1193_v33 = vld [vmem:[#allocation2 + $0xe0] sm:$0xff] }
  0x9e   : > { %v631_v34 = vld [vmem:[#allocation2 + $0xd9] sm:$0xff]  ;;  %v8435_v47 = vpack.c.bf16 %v1193_v33, %v1192_v32 }
  0x9f   : > { %v8419_v21 = vpop.f32.mrf.mxu0  ;;  %v8437_v48 = vpack.c.bf16 %v632_v43, %v631_v34  ;;  %v8452_v34 = vld [vmem:[%s8196_s23 + $0xb0] sm:$0xff]  ;;  %v8455_v43 = vld [vmem:[%s8196_s23 + $0xb8] sm:$0xff] }
  0xa0   : > { %11694 = vst [vmem:[#allocation25_spill] sm:$0xff] %v8452_v34 }
  0xa1   : > { %7267 = vmatmul.msk.bf16.gmra.mxu3 %vm474_vm0, %v8354_v24  ;;  %7224 = vmatmul.msk.bf16.gmra.mxu1 %vm474_vm0, %v8354_v24  ;;  %11695 = vst [vmem:[#allocation26_spill] sm:$0xff] %v8455_v43  ;;  %v1197_v35 = vld [vmem:[#allocation2 + $0x110] sm:$0xff] }
  0xa2   : > { %7204 = vmatmul.msk.bf16.gmra.mxu0 %vm474_vm0, %v8356_v25  ;;  %553 = vst.msk [vmem:[#allocation2 + $0x121] sm:$0xff] %vm474_vm0, %v8452_v34  ;;  %v973_v10 = vld [vmem:[#allocation2 + $0x112] sm:$0xff] }
  0xa3   : > { %7246 = vmatmul.msk.bf16.gmra.mxu2 %vm474_vm0, %v8358_v26  ;;  %554 = vst.msk [vmem:[#allocation2 + $0x129] sm:$0xff] %vm474_vm0, %v8455_v43 }
  0xa4   : > { %v8433_v44 = vpop.f32.mrf.mxu2 }
  0xaa   : > { %v975_v42 = vld [vmem:[#allocation2 + $0x12a] sm:$0xff] }
  0xb1   : > { %7268 = vmatmul.msk.bf16.gmra.mxu3 %vm474_vm0, %v8378_v54  ;;  %7225 = vmatmul.msk.bf16.gmra.mxu1 %vm474_vm0, %v8378_v54 }
  0xb2   : > { %7205 = vmatmul.msk.bf16.gmra.mxu0 %vm474_vm0, %v8380_v55 }
  0xb3   : > { %7247 = vmatmul.msk.bf16.gmra.mxu2 %vm474_vm0, %v8382_v56 }
  0xc1   : > { %7269 = vmatmul.msk.bf16.gmra.mxu3 %vm474_vm0, %v8405_v12  ;;  %7226 = vmatmul.msk.bf16.gmra.mxu1 %vm474_vm0, %v8405_v12 }
  0xc2   : > { %7206 = vmatmul.msk.bf16.gmra.mxu0 %vm474_vm0, %v8407_v13 }
  0xc3   : > { %7248 = vmatmul.msk.bf16.gmra.mxu2 %vm474_vm0, %v8409_v14 }
  0xce   : > { %v875_v2 = vpop.f32.mrf.mxu1 }
  0xcf   : > { %v732_v57 = vpop.f32.mrf.mxu0 }
  0xd0   : > { %v876_v3 = vadd.f32 %v875_v2, %v732_v57  ;;  %v1194_v57 = vld [vmem:[#allocation2 + $0xf0] sm:$0xff]  ;;  %v1195_v2 = vld [vmem:[#allocation2 + $0xf8] sm:$0xff] }
  0xd1   : > { %7270 = vmatmul.msk.bf16.gmra.mxu3 %vm474_vm0, %v8435_v47  ;;  %7227 = vmatmul.msk.bf16.gmra.mxu1 %vm474_vm0, %v8435_v47 }
  0xd2   : > { %7207 = vmatmul.msk.bf16.gmra.mxu0 %vm474_vm0, %v8437_v48 }
  0xd3   : > { %7249 = vmatmul.msk.bf16.gmra.mxu2 %vm474_vm0, %v8439_v1 }
  0xd4   : > { %v1290_v4 = vpop.f32.mrf.mxu3 }
  0xd5   : > { %v8449_v5 = vadd.f32 %v1290_v4, %v1144_v37  ;;  %v634_v37 = vld [vmem:[#allocation2 + $0xf9] sm:$0xff] }
  0xd6   : > { %v1069_v6 = vpop.f32.mrf.mxu2  ;;  %v877_v45 = vpop.f32.mrf.mxu1  ;;  %v970_v4 = vld [vmem:[#allocation2 + $0xf2] sm:$0xff]  ;;  %v8465_v58 = vpack.c.bf16 %v634_v37, %v633_v28 }
  0xd7   : > { %v1146_v32 = vadd.f32 %v1069_v6, %v876_v3  ;;  %v734_v33 = vpop.f32.mrf.mxu0  ;;  %v8463_v6 = vpack.c.bf16 %v1195_v2, %v1194_v57  ;;  %v8480_v2 = vld [vmem:[%s8196_s23 + $0xc0] sm:$0xff] }
  0xd8   : > { %v878_v46 = vadd.f32 %v877_v45, %v734_v33  ;;  %v8467_v45 = vpack.c.bf16 %v971_v23, %v970_v4  ;;  %11696 = vst [vmem:[#allocation27_spill] sm:$0xff] %v8480_v2 }
  0xd9   : > { %555 = vst.msk [vmem:[#allocation2 + $0x139] sm:$0xff] %vm474_vm0, %v8480_v2 }
  0xdc   : > { %v8461_v3 = vpop.f32.mrf.mxu3 }
  0xde   : > { %v1071_v59 = vpop.f32.mrf.mxu2  ;;  %v880_v43 = vpop.f32.mrf.mxu1 }
  0xdf   : > { %v1147_v34 = vadd.f32 %v1071_v59, %v878_v46  ;;  %v737_v33 = vpop.f32.mrf.mxu0 }
  0xe0   : > { %v881_v36 = vadd.f32 %v880_v43, %v737_v33  ;;  %v8483_v43 = vld [vmem:[%s8196_s23 + $0xc8] sm:$0xff] }
  0xe1   : > { %7271 = vmatmul.msk.bf16.gmra.mxu3 %vm474_vm0, %v8463_v6  ;;  %7228 = vmatmul.msk.bf16.gmra.mxu1 %vm474_vm0, %v8463_v6  ;;  %11697 = vst [vmem:[#allocation28_spill] sm:$0xff] %v8483_v43  ;;  %v1196_v33 = vld [vmem:[#allocation2 + $0x108] sm:$0xff] }
  0xe2   : > { %7208 = vmatmul.msk.bf16.gmra.mxu0 %vm474_vm0, %v8465_v58  ;;  %556 = vst.msk [vmem:[#allocation2 + $0x141] sm:$0xff] %vm474_vm0, %v8483_v43  ;;  %v8491_v0 = vpack.c.bf16 %v1197_v35, %v1196_v33 }
  0xe3   : > { %7250 = vmatmul.msk.bf16.gmra.mxu2 %vm474_vm0, %v8467_v45 }
  0xe4   : > { %v1295_v28 = vpop.f32.mrf.mxu3 }
  0xe5   : > { %v8477_v57 = vadd.f32 %v1295_v28, %v1146_v32  ;;  %v636_v32 = vld [vmem:[#allocation2 + $0x111] sm:$0xff] }
  0xe6   : > { %v1074_v59 = vpop.f32.mrf.mxu2  ;;  %v882_v37 = vpop.f32.mrf.mxu1  ;;  %v972_v28 = vld [vmem:[#allocation2 + $0x10a] sm:$0xff]  ;;  %v8493_v53 = vpack.c.bf16 %v636_v32, %v635_v11 }
  0xe7   : > { %v1148_v23 = vadd.f32 %v1074_v59, %v881_v36  ;;  %v739_v46 = vpop.f32.mrf.mxu0  ;;  %v8495_v2 = vpack.c.bf16 %v973_v10, %v972_v28  ;;  %v1198_v28 = vld [vmem:[#allocation2 + $0x120] sm:$0xff] }
  0xe8   : > { %v883_v4 = vadd.f32 %v882_v37, %v739_v46 }
  0xe9   : > { %v977_v19 = vld [vmem:[#allocation2 + $0x142] sm:$0xff] }
  0xec   : > { %v1297_v36 = vpop.f32.mrf.mxu3 }
  0xed   : > { %v8489_v59 = vadd.f32 %v1297_v36, %v1147_v34  ;;  %v1199_v36 = vld [vmem:[#allocation2 + $0x128] sm:$0xff] }
  0xee   : > { %v1076_v63 = vpop.f32.mrf.mxu2  ;;  %v885_v43 = vpop.f32.mrf.mxu1  ;;  %v8519_v41 = vpack.c.bf16 %v1199_v36, %v1198_v28  ;;  %v8536_v36 = vld [vmem:[%s8196_s23 + $0xe0] sm:$0xff] }
  0xef   : > { %v1149_v46 = vadd.f32 %v1076_v63, %v883_v4  ;;  %v742_v37 = vpop.f32.mrf.mxu0  ;;  %v8508_v4 = vld [vmem:[%s8196_s23 + $0xd0] sm:$0xff]  ;;  %11701 = vst [vmem:[#allocation32_spill] sm:$0xff] %v8536_v36 }
  0xf0   : > { %v886_v52 = vadd.f32 %v885_v43, %v742_v37  ;;  %11698 = vst [vmem:[#allocation29_spill] sm:$0xff] %v8508_v4  ;;  %v8511_v43 = vld [vmem:[%s8196_s23 + $0xd8] sm:$0xff]  ;;  %v637_v37 = vld [vmem:[#allocation2 + $0x121] sm:$0xff] }
  0xf1   : > { %7272 = vmatmul.msk.bf16.gmra.mxu3 %vm474_vm0, %v8491_v0  ;;  %7229 = vmatmul.msk.bf16.gmra.mxu1 %vm474_vm0, %v8491_v0  ;;  %11699 = vst [vmem:[#allocation30_spill] sm:$0xff] %v8511_v43 }
  0xf2   : > { %7209 = vmatmul.msk.bf16.gmra.mxu0 %vm474_vm0, %v8493_v53  ;;  %557 = vst.msk [vmem:[#allocation2 + $0x151] sm:$0xff] %vm474_vm0, %v8508_v4 }
  0xf3   : > { %7251 = vmatmul.msk.bf16.gmra.mxu2 %vm474_vm0, %v8495_v2  ;;  %558 = vst.msk [vmem:[#allocation2 + $0x159] sm:$0xff] %vm474_vm0, %v8511_v43 }
  0xf4   : > { %v1300_v11 = vpop.f32.mrf.mxu3  ;;  %559 = vst.msk [vmem:[#allocation2 + $0x169] sm:$0xff] %vm474_vm0, %v8536_v36 }
  0xf5   : > { %v8505_v35 = vadd.f32 %v1300_v11, %v1148_v23  ;;  %v638_v23 = vld [vmem:[#allocation2 + $0x129] sm:$0xff] }
  0xf6   : > { %v1079_v63 = vpop.f32.mrf.mxu2  ;;  %v887_v33 = vpop.f32.mrf.mxu1  ;;  %v974_v11 = vld [vmem:[#allocation2 + $0x122] sm:$0xff]  ;;  %v8521_v30 = vpack.c.bf16 %v638_v23, %v637_v37 }
  0xf7   : > { %v1150_v10 = vadd.f32 %v1079_v63, %v886_v52  ;;  %v744_v34 = vpop.f32.mrf.mxu0  ;;  %v8523_v4 = vpack.c.bf16 %v975_v42, %v974_v11  ;;  %v1200_v11 = vld [vmem:[#allocation2 + $0x138] sm:$0xff] }
  0xf8   : > { %v888_v32 = vadd.f32 %v887_v33, %v744_v34 }
  0xf9   : > { %11700 = vst [vmem:[#allocation31_spill] sm:$0xff] %v8523_v4 }
  0xfc   : > { %v1302_v52 = vpop.f32.mrf.mxu3 }
  0xfd   : > { %v8517_v63 = vadd.f32 %v1302_v52, %v1149_v46  ;;  %v1201_v52 = vld [vmem:[#allocation2 + $0x140] sm:$0xff] }
  0xfe   : > { %v1081_v31 = vpop.f32.mrf.mxu2  ;;  %v890_v43 = vpop.f32.mrf.mxu1  ;;  %v8547_v18 = vpack.c.bf16 %v1201_v52, %v1200_v11  ;;  %v8564_v52 = vld [vmem:[%s8196_s23 + $0xf0] sm:$0xff] }
  0xff   : > { %v1151_v34 = vadd.f32 %v1081_v31, %v888_v32  ;;  %v747_v33 = vpop.f32.mrf.mxu0  ;;  %11708 = vst [vmem:[#allocation39_spill] sm:$0xff] %v8564_v52 }
 0x100   : > { %v891_v20 = vadd.f32 %v890_v43, %v747_v33  ;;  %v8539_v43 = vld [vmem:[%s8196_s23 + $0xe8] sm:$0xff]  ;;  %v639_v33 = vld [vmem:[#allocation2 + $0x139] sm:$0xff]  ;;  %11704 = vst [vmem:[#allocation35_spill] sm:$0xff] %v8547_v18 }
 0x101   : > { %7273 = vmatmul.msk.bf16.gmra.mxu3 %vm474_vm0, %v8519_v41  ;;  %7230 = vmatmul.msk.bf16.gmra.mxu1 %vm474_vm0, %v8519_v41  ;;  %11702 = vst [vmem:[#allocation33_spill] sm:$0xff] %v8539_v43 }
 0x102   : > { %7210 = vmatmul.msk.bf16.gmra.mxu0 %vm474_vm0, %v8521_v30  ;;  %560 = vst.msk [vmem:[#allocation2 + $0x171] sm:$0xff] %vm474_vm0, %v8539_v43 }
 0x103   : > { %7252 = vmatmul.msk.bf16.gmra.mxu2 %vm474_vm0, %v8523_v4  ;;  %561 = vst.msk [vmem:[#allocation2 + $0x181] sm:$0xff] %vm474_vm0, %v8564_v52 }
 0x104   : > { %v1305_v46 = vpop.f32.mrf.mxu3 }
 0x105   : > { %v8533_v28 = vadd.f32 %v1305_v46, %v1150_v10  ;;  %v640_v10 = vld [vmem:[#allocation2 + $0x141] sm:$0xff] }
 0x106   : > { %v1084_v31 = vpop.f32.mrf.mxu2  ;;  %v892_v37 = vpop.f32.mrf.mxu1  ;;  %v976_v46 = vld [vmem:[#allocation2 + $0x13a] sm:$0xff]  ;;  %v8549_v16 = vpack.c.bf16 %v640_v10, %v639_v33 }
 0x107   : > { %v1152_v42 = vadd.f32 %v1084_v31, %v891_v20  ;;  %v749_v32 = vpop.f32.mrf.mxu0  ;;  %v8551_v36 = vpack.c.bf16 %v977_v19, %v976_v46  ;;  %v1202_v46 = vld [vmem:[#allocation2 + $0x150] sm:$0xff] }
 0x108   : > { %v893_v23 = vadd.f32 %v892_v37, %v749_v32  ;;  %11705 = vst [vmem:[#allocation36_spill] sm:$0xff] %v8549_v16 }
 0x109   : > { %11706 = vst [vmem:[#allocation37_spill] sm:$0xff] %v8551_v36 }
 0x10c   : > { %v1307_v20 = vpop.f32.mrf.mxu3 }
 0x10d   : > { %v8545_v31 = vadd.f32 %v1307_v20, %v1151_v34  ;;  %v1203_v20 = vld [vmem:[#allocation2 + $0x158] sm:$0xff] }
 0x10e   : > { %v1086_v17 = vpop.f32.mrf.mxu2  ;;  %v895_v43 = vpop.f32.mrf.mxu1 }
 0x10f   : > { %11703 = vst [vmem:[#allocation34_spill] sm:$0xff] %v8545_v31  ;;  %v1153_v32 = vadd.f32 %v1086_v17, %v893_v23  ;;  %v752_v37 = vpop.f32.mrf.mxu0 }
 0x110   : > { %v896_v15 = vadd.f32 %v895_v43, %v752_v37  ;;  %v8567_v43 = vld [vmem:[%s8196_s23 + $0xf8] sm:$0xff]  ;;  %s7985_s23 = smov 120  }
 0x111   : > { %7274 = vmatmul.msk.bf16.gmra.mxu3 %vm474_vm0, %v8547_v18  ;;  %7231 = vmatmul.msk.bf16.gmra.mxu1 %vm474_vm0, %v8547_v18  ;;  %11709 = vst [vmem:[#allocation40_spill] sm:$0xff] %v8567_v43  ;;  %v641_v37 = vld [vmem:[#allocation2 + $0x151] sm:$0xff] }
 0x112   : > { %7211 = vmatmul.msk.bf16.gmra.mxu0 %vm474_vm0, %v8549_v16  ;;  %562 = vst.msk [vmem:[#allocation2 + $0x189] sm:$0xff] %vm474_vm0, %v8567_v43  ;;  %v8575_v16 = vpack.c.bf16 %v1203_v20, %v1202_v46  ;;  %v7670_v46 = vld [vmem:[%s11494_s1 + $0x38] sm:$0xff] }
 0x113   : > { %7253 = vmatmul.msk.bf16.gmra.mxu2 %vm474_vm0, %v8551_v36  ;;  %v979_v36 = vld [vmem:[#allocation2 + $0x15a] sm:$0xff]  ;;  %2193 = vmatpush.bf16.msrb.mxu3 %v7670_v46 }
 0x114   : > { %v1310_v34 = vpop.f32.mrf.mxu3  ;;  %11711 = vst [vmem:[#allocation42_spill] sm:$0xff] %v8575_v16 }
 0x115   : > { %v8561_v11 = vadd.f32 %v1310_v34, %v1152_v42  ;;  %v642_v42 = vld [vmem:[#allocation2 + $0x159] sm:$0xff] }
 0x116   : > { %v1089_v17 = vpop.f32.mrf.mxu2  ;;  %v897_v33 = vpop.f32.mrf.mxu1  ;;  %v978_v34 = vld [vmem:[#allocation2 + $0x152] sm:$0xff]  ;;  %v8577_v31 = vpack.c.bf16 %v642_v42, %v641_v37 }
 0x117   : > { %11707 = vst [vmem:[#allocation38_spill] sm:$0xff] %v8561_v11  ;;  %v1154_v19 = vadd.f32 %v1089_v17, %v896_v15  ;;  %v754_v23 = vpop.f32.mrf.mxu0 }
 0x118   : > { %v898_v10 = vadd.f32 %v897_v33, %v754_v23  ;;  %11712 = vst [vmem:[#allocation43_spill] sm:$0xff] %v8577_v31  ;;  %v8579_v23 = vpack.c.bf16 %v979_v36, %v978_v34 }
 0x11a   : > { %11713 = vst [vmem:[#allocation44_spill] sm:$0xff] %v8579_v23 }
 0x11c   : > { %v1312_v15 = vpop.f32.mrf.mxu3 }
 0x11d   : > { %v8573_v17 = vadd.f32 %v1312_v15, %v1153_v32  ;;  %v7669_v32 = vld [vmem:[%s11494_s1 + $0x30] sm:$0xff]  ;;  %v1204_v15 = vld [vmem:[#allocation2 + $0x168] sm:$0xff] }
 0x11e   : > { %v1091_v11 = vpop.f32.mrf.mxu2  ;;  %v900_v33 = vpop.f32.mrf.mxu1  ;;  %1967 = vmatpush.bf16.msrb.mxu2 %v7669_v32  ;;  %v981_v32 = vld [vmem:[#allocation2 + $0x172] sm:$0xff] }
 0x11f   : > { %11710 = vst [vmem:[#allocation41_spill] sm:$0xff] %v8573_v17  ;;  %v1155_v4 = vadd.f32 %v1091_v11, %v898_v10  ;;  %v757_v52 = vpop.f32.mrf.mxu0  ;;  %v7671_v10 = vld [vmem:[%s11494_s1 + $0x40] sm:$0xff]  ;;  %v644_v17 = vld [vmem:[#allocation2 + $0x171] sm:$0xff] }
 0x120   : > { %v901_v43 = vadd.f32 %v900_v33, %v757_v52  ;;  %2419 = vmatpush.bf16.msra.mxu0 %v7671_v10  ;;  %v1205_v33 = vld [vmem:[#allocation2 + $0x170] sm:$0xff] }
 0x121   : > { %7275 = vmatmul.msk.bf16.gmra.mxu3 %vm474_vm0, %v8575_v16  ;;  %7232 = vmatmul.msk.bf16.gmra.mxu1 %vm474_vm0, %v8575_v16 }
 0x122   : > { %7212 = vmatmul.msk.bf16.gmra.mxu0 %vm474_vm0, %v8577_v31  ;;  %v643_v31 = vld [vmem:[#allocation2 + $0x169] sm:$0xff] }
 0x123   : > { %7254 = vmatmul.msk.bf16.gmra.mxu2 %vm474_vm0, %v8579_v23  ;;  %v980_v23 = vld [vmem:[#allocation2 + $0x16a] sm:$0xff] }
 0x124   : > { %v1315_v36 = vpop.f32.mrf.mxu3 }
 0x125   : > { %v8595_v11 = vadd.f32 %v1315_v36, %v1154_v19  ;;  %v8602_v19 = vpack.c.bf16 %v1205_v33, %v1204_v15  ;;  %v1206_v33 = vld [vmem:[#allocation2 + $0x180] sm:$0xff] }
 0x126   : > { %v1094_v52 = vpop.f32.mrf.mxu2  ;;  %v902_v42 = vpop.f32.mrf.mxu1 }
 0x127   : > { %11714 = vst [vmem:[#allocation45_spill] sm:$0xff] %v8595_v11  ;;  %v1156_v20 = vadd.f32 %v1094_v52, %v901_v43  ;;  %v759_v37 = vpop.f32.mrf.mxu0  ;;  %v8604_v11 = vpack.c.bf16 %v644_v17, %v643_v31  ;;  %v8606_v52 = vpack.c.bf16 %v981_v32, %v980_v23  ;;  %v1207_v32 = vld [vmem:[#allocation2 + $0x188] sm:$0xff] }
 0x128   : > { %v903_v34 = vadd.f32 %v902_v42, %v759_v37  ;;  %11716 = vst [vmem:[#allocation47_spill] sm:$0xff] %v8602_v19 }
 0x129   : > { %11717 = vst [vmem:[#allocation48_spill] sm:$0xff] %v8604_v11 }
 0x12a   : > { %11718 = vst [vmem:[#allocation49_spill] sm:$0xff] %v8606_v52 }
 0x12c   : > { %v1317_v46 = vpop.f32.mrf.mxu3 }
 0x12d   : > { %v8600_v16 = vadd.f32 %v1317_v46, %v1155_v4 }
 0x12e   : > { %v1096_v36 = vpop.f32.mrf.mxu2  ;;  %v905_v10 = vpop.f32.mrf.mxu1 }
 0x12f   : > { %11715 = vst [vmem:[#allocation46_spill] sm:$0xff] %v8600_v16  ;;  %v1157_v18 = vadd.f32 %v1096_v36, %v903_v34  ;;  %v762_v43 = vpop.f32.mrf.mxu0 }
 0x130   : > { %v906_v37 = vadd.f32 %v905_v10, %v762_v43  ;;  %v8620_v43 = vpack.c.bf16 %v1207_v32, %v1206_v33 }
 0x131   : > { %7276 = vmatmul.msk.bf16.gmra.mxu3 %vm474_vm0, %v8602_v19  ;;  %7233 = vmatmul.msk.bf16.gmra.mxu1 %vm474_vm0, %v8602_v19 }
 0x132   : > { %7213 = vmatmul.msk.bf16.gmra.mxu0 %vm474_vm0, %v8604_v11 }
 0x133   : > { %7255 = vmatmul.msk.bf16.gmra.mxu2 %vm474_vm0, %v8606_v52 }
 0x134   : > { %v1320_v4 = vpop.f32.mrf.mxu3 }
 0x135   : > { %v8616_v31 = vadd.f32 %v1320_v4, %v1156_v20 }
 0x136   : > { %v1099_v17 = vpop.f32.mrf.mxu2  ;;  %v907_v34 = vpop.f32.mrf.mxu1 }
 0x137   : > { %v1158_v23 = vadd.f32 %v1099_v17, %v906_v37  ;;  %v764_v42 = vpop.f32.mrf.mxu0 }
 0x138   : > { %v908_v15 = vadd.f32 %v907_v34, %v764_v42 }
 0x13c   : > { %v1322_v46 = vpop.f32.mrf.mxu3 }
 0x13d   : > { %v8618_v36 = vadd.f32 %v1322_v46, %v1157_v18 }
 0x13e   : > { %v1101_v10 = vpop.f32.mrf.mxu2  ;;  %v910_v19 = vpop.f32.mrf.mxu1 }
 0x13f   : > { %v1159_v11 = vadd.f32 %v1101_v10, %v908_v15  ;;  %v767_v16 = vpop.f32.mrf.mxu0 }
 0x140   : > { %v911_v52 = vadd.f32 %v910_v19, %v767_v16 }
 0x141   : > { %7277 = vmatmul.msk.bf16.gmra.mxu3 %vm474_vm0, %v8620_v43  ;;  %7306 = vmatmul.msk.bf16.vlgmr.msrb.gmra.mxu1 %vm474_vm0, %v8240_v29 }
 0x142   : > { %7284 = vmatmul.msk.bf16.vlgmr.msrb.gmra.mxu0 %vm474_vm0, %v8238_v27 }
 0x143   : > { %7328 = vmatmul.msk.bf16.vlgmr.msrb.gmra.mxu2 %vm474_vm0, %v8258_v38 }
 0x144   : > { %v1325_v18 = vpop.f32.mrf.mxu3 }
 0x145   : > { %v8630_v20 = vadd.f32 %v1325_v18, %v1158_v23 }
 0x146   : > { %v1104_v37 = vpop.f32.mrf.mxu2  ;;  %v912_v42 = vpop.f32.mrf.mxu1 }
 0x147   : > { %v1160_v4 = vadd.f32 %v1104_v37, %v911_v52  ;;  %v769_v17 = vpop.f32.mrf.mxu0 }
 0x148   : > { %v913_v16 = vadd.f32 %v912_v42, %v769_v17 }
 0x14c   : > { %v1327_v19 = vpop.f32.mrf.mxu3 }
 0x14d   : > { %v8632_v34 = vadd.f32 %v1327_v19, %v1159_v11 }
 0x14e   : > { %v1106_v15 = vpop.f32.mrf.mxu2  ;;  %v915_v32 = vpop.f32.mrf.mxu1 }
 0x14f   : > { %v1161_v33 = vadd.f32 %v1106_v15, %v913_v16  ;;  %v772_v27 = vpop.f32.mrf.mxu0 }
 0x150   : > { %v916_v46 = vadd.f32 %v915_v32, %v772_v27 }
 0x151   : > { %7350 = vmatmul.msk.bf16.vlgmr.msrb.gmra.mxu3 %vm474_vm0, %v8260_v39  ;;  %7307 = vmatmul.msk.bf16.gmra.mxu1 %vm474_vm0, %v8262_v40 }
 0x152   : > { %7285 = vmatmul.msk.bf16.gmra.mxu0 %vm474_vm0, %v8260_v39 }
 0x153   : > { %7329 = vmatmul.msk.bf16.gmra.mxu2 %vm474_vm0, %v8282_v49 }
 0x154   : > { %v1330_v29 = vpop.f32.mrf.mxu3 }
 0x155   : > { %v8642_v38 = vadd.f32 %v1330_v29, %v1160_v4 }
 0x156   : > { %v1109_v11 = vpop.f32.mrf.mxu2  ;;  %v917_v10 = vpop.f32.mrf.mxu1 }
 0x157   : > { %v1162_v52 = vadd.f32 %v1109_v11, %v916_v46  ;;  %v774_v23 = vpop.f32.mrf.mxu0 }
 0x158   : > { %v918_v18 = vadd.f32 %v917_v10, %v774_v23 }
 0x15c   : > { %v1332_v37 = vpop.f32.mrf.mxu3 }
 0x15d   : > { %v8644_v17 = vadd.f32 %v1332_v37, %v1161_v33 }
 0x15e   : > { %v1111_v42 = vpop.f32.mrf.mxu2  ;;  %v920_v19 = vpop.f32.mrf.mxu1 }
 0x15f   : > { %v1163_v16 = vadd.f32 %v1111_v42, %v918_v18  ;;  %v777_v39 = vpop.f32.mrf.mxu0 }
 0x160   : > { %v921_v15 = vadd.f32 %v920_v19, %v777_v39 }
 0x161   : > { %7351 = vmatmul.msk.bf16.gmra.mxu3 %vm474_vm0, %v8284_v50  ;;  %7308 = vmatmul.msk.bf16.gmra.mxu1 %vm474_vm0, %v8286_v51 }
 0x162   : > { %7286 = vmatmul.msk.bf16.gmra.mxu0 %vm474_vm0, %v8284_v50 }
 0x163   : > { %7330 = vmatmul.msk.bf16.gmra.mxu2 %vm474_vm0, %v8306_v60 }
 0x164   : > { %v1335_v40 = vpop.f32.mrf.mxu3 }
 0x165   : > { %v8654_v49 = vadd.f32 %v1335_v40, %v1162_v52 }
 0x166   : > { %v1114_v4 = vpop.f32.mrf.mxu2  ;;  %v922_v32 = vpop.f32.mrf.mxu1 }
 0x167   : > { %v1164_v33 = vadd.f32 %v1114_v4, %v921_v15  ;;  %v779_v27 = vpop.f32.mrf.mxu0 }
 0x168   : > { %v923_v46 = vadd.f32 %v922_v32, %v779_v27 }
 0x16c   : > { %v1337_v29 = vpop.f32.mrf.mxu3 }
 0x16d   : > { %v8656_v11 = vadd.f32 %v1337_v29, %v1163_v16 }
 0x16e   : > { %v1116_v23 = vpop.f32.mrf.mxu2  ;;  %v925_v18 = vpop.f32.mrf.mxu1 }
 0x16f   : > { %v1165_v10 = vadd.f32 %v1116_v23, %v923_v46  ;;  %v782_v50 = vpop.f32.mrf.mxu0 }
 0x170   : > { %v926_v37 = vadd.f32 %v925_v18, %v782_v50 }
 0x171   : > { %7352 = vmatmul.msk.bf16.gmra.mxu3 %vm474_vm0, %v8308_v61  ;;  %7309 = vmatmul.msk.bf16.gmra.mxu1 %vm474_vm0, %v8310_v62 }
 0x172   : > { %7287 = vmatmul.msk.bf16.gmra.mxu0 %vm474_vm0, %v8308_v61 }
 0x173   : > { %7331 = vmatmul.msk.bf16.gmra.mxu2 %vm474_vm0, %v8330_v7 }
 0x174   : > { %v1340_v51 = vpop.f32.mrf.mxu3 }
 0x175   : > { %v8666_v60 = vadd.f32 %v1340_v51, %v1164_v33 }
 0x176   : > { %v1119_v52 = vpop.f32.mrf.mxu2  ;;  %v927_v39 = vpop.f32.mrf.mxu1 }
 0x177   : > { %v1166_v42 = vadd.f32 %v1119_v52, %v926_v37  ;;  %v784_v16 = vpop.f32.mrf.mxu0 }
 0x178   : > { %v928_v19 = vadd.f32 %v927_v39, %v784_v16 }
 0x17c   : > { %v1342_v15 = vpop.f32.mrf.mxu3 }
 0x17d   : > { %v8668_v40 = vadd.f32 %v1342_v15, %v1165_v10 }
 0x17e   : > { %v1121_v4 = vpop.f32.mrf.mxu2  ;;  %v930_v32 = vpop.f32.mrf.mxu1 }
 0x17f   : > { %v1167_v27 = vadd.f32 %v1121_v4, %v928_v19  ;;  %v787_v61 = vpop.f32.mrf.mxu0 }
 0x180   : > { %v931_v46 = vadd.f32 %v930_v32, %v787_v61 }
 0x181   : > { %7353 = vmatmul.msk.bf16.gmra.mxu3 %vm474_vm0, %v8332_v8  ;;  %7310 = vmatmul.msk.bf16.gmra.mxu1 %vm474_vm0, %v8334_v9 }
 0x182   : > { %7288 = vmatmul.msk.bf16.gmra.mxu0 %vm474_vm0, %v8332_v8 }
 0x183   : > { %7332 = vmatmul.msk.bf16.gmra.mxu2 %vm474_vm0, %v8354_v24 }
 0x184   : > { %v1345_v62 = vpop.f32.mrf.mxu3 }
 0x185   : > { %v8678_v7 = vadd.f32 %v1345_v62, %v1166_v42 }
 0x186   : > { %v1124_v33 = vpop.f32.mrf.mxu2  ;;  %v932_v10 = vpop.f32.mrf.mxu1 }
 0x187   : > { %v1168_v29 = vadd.f32 %v1124_v33, %v931_v46  ;;  %v789_v23 = vpop.f32.mrf.mxu0 }
 0x188   : > { %v933_v50 = vadd.f32 %v932_v10, %v789_v23 }
 0x18c   : > { %v1347_v18 = vpop.f32.mrf.mxu3 }
 0x18d   : > { %v8680_v37 = vadd.f32 %v1347_v18, %v1167_v27 }
 0x18e   : > { %v1126_v51 = vpop.f32.mrf.mxu2  ;;  %v935_v16 = vpop.f32.mrf.mxu1 }
 0x18f   : > { %v1169_v52 = vadd.f32 %v1126_v51, %v933_v50  ;;  %v792_v8 = vpop.f32.mrf.mxu0 }
 0x190   : > { %v936_v39 = vadd.f32 %v935_v16, %v792_v8 }
 0x191   : > { %7354 = vmatmul.msk.bf16.gmra.mxu3 %vm474_vm0, %v8356_v25  ;;  %7311 = vmatmul.msk.bf16.gmra.mxu1 %vm474_vm0, %v8358_v26 }
 0x192   : > { %7289 = vmatmul.msk.bf16.gmra.mxu0 %vm474_vm0, %v8356_v25 }
 0x193   : > { %7333 = vmatmul.msk.bf16.gmra.mxu2 %vm474_vm0, %v8378_v54 }
 0x194   : > { %v1350_v9 = vpop.f32.mrf.mxu3 }
 0x195   : > { %v8690_v24 = vadd.f32 %v1350_v9, %v1168_v29 }
 0x196   : > { %v1129_v42 = vpop.f32.mrf.mxu2  ;;  %v937_v4 = vpop.f32.mrf.mxu1 }
 0x197   : > { %v1170_v19 = vadd.f32 %v1129_v42, %v936_v39  ;;  %v794_v15 = vpop.f32.mrf.mxu0 }
 0x198   : > { %v938_v27 = vadd.f32 %v937_v4, %v794_v15  ;;  %v7672_v15 = vld [vmem:[%s11496_s3] sm:$0xff] }
 0x199   : > { %2680 = vmatpush.bf16.msra.mxu1 %v7672_v15 }
 0x19c   : > { %v1352_v61 = vpop.f32.mrf.mxu3 }
 0x19d   : > { %v8692_v32 = vadd.f32 %v1352_v61, %v1169_v52 }
 0x19e   : > { %v1131_v46 = vpop.f32.mrf.mxu2  ;;  %v940_v33 = vpop.f32.mrf.mxu1 }
 0x19f   : > { %v1171_v62 = vadd.f32 %v1131_v46, %v938_v27  ;;  %v797_v25 = vpop.f32.mrf.mxu0 }
 0x1a0   : > { %v941_v23 = vadd.f32 %v940_v33, %v797_v25 }
 0x1a1   : > { %7355 = vmatmul.msk.bf16.gmra.mxu3 %vm474_vm0, %v8380_v55  ;;  %7312 = vmatmul.msk.bf16.gmra.mxu1 %vm474_vm0, %v8382_v56 }
 0x1a2   : > { %7290 = vmatmul.msk.bf16.gmra.mxu0 %vm474_vm0, %v8380_v55 }
 0x1a3   : > { %7334 = vmatmul.msk.bf16.gmra.mxu2 %vm474_vm0, %v8405_v12 }
 0x1a4   : > { %v1355_v26 = vpop.f32.mrf.mxu3 }
 0x1a5   : > { %v8702_v54 = vadd.f32 %v1355_v26, %v1170_v19  ;;  %v873_v26 = vadd.f32 %v8421_v22, %v8419_v21 }
 0x1a6   : > { %v1134_v29 = vpop.f32.mrf.mxu2  ;;  %v942_v18 = vpop.f32.mrf.mxu1 }
 0x1a7   : > { %v1172_v10 = vadd.f32 %v1134_v29, %v941_v23  ;;  %v799_v50 = vpop.f32.mrf.mxu0 }
 0x1a8   : > { %v943_v51 = vadd.f32 %v942_v18, %v799_v50 }
 0x1ac   : > { %v1357_v52 = vpop.f32.mrf.mxu3 }
 0x1ad   : > { %v8704_v8 = vadd.f32 %v1357_v52, %v1171_v62 }
 0x1ae   : > { %v1136_v16 = vpop.f32.mrf.mxu2  ;;  %v945_v9 = vpop.f32.mrf.mxu1 }
 0x1af   : > { %v1173_v39 = vadd.f32 %v1136_v16, %v943_v51  ;;  %v802_v55 = vpop.f32.mrf.mxu0 }
 0x1b0   : > { %v946_v42 = vadd.f32 %v945_v9, %v802_v55 }
 0x1b1   : > { %7356 = vmatmul.msk.bf16.gmra.mxu3 %vm474_vm0, %v8407_v13  ;;  %7313 = vmatmul.msk.bf16.gmra.mxu1 %vm474_vm0, %v8409_v14 }
 0x1b2   : > { %7291 = vmatmul.msk.bf16.gmra.mxu0 %vm474_vm0, %v8407_v13 }
 0x1b3   : > { %7335 = vmatmul.msk.bf16.gmra.mxu2 %vm474_vm0, %v8435_v47 }
 0x1b4   : > { %v1360_v56 = vpop.f32.mrf.mxu3 }
 0x1b5   : > { %v8714_v12 = vadd.f32 %v1360_v56, %v1172_v10  ;;  %v1145_v10 = vadd.f32 %v8433_v44, %v873_v26 }
 0x1b6   : > { %v1139_v19 = vpop.f32.mrf.mxu2  ;;  %v947_v61 = vpop.f32.mrf.mxu1 }
 0x1b7   : > { %v1174_v4 = vadd.f32 %v1139_v19, %v946_v42  ;;  %v804_v27 = vpop.f32.mrf.mxu0  ;;  %v1371_v50 = vadd.f32 %v8461_v3, %v1145_v10 }
 0x1b8   : > { %v948_v46 = vadd.f32 %v947_v61, %v804_v27 }
 0x1bc   : > { %v1362_v13 = vpop.f32.mrf.mxu3 }
 0x1bd   : > { %v8719_v62 = vadd.f32 %v1362_v13, %v1173_v39 }
 0x1be   : > { %v1141_v47 = vpop.f32.mrf.mxu2  ;;  %v1742_v23 = vpop.f32.mrf.mxu1 }
 0x1bf   : > { %v1175_v25 = vadd.f32 %v1141_v47, %v948_v46  ;;  %v1516_v33 = vpop.f32.mrf.mxu0 }
 0x1c0   : > { %v1596_v14 = vadd.f32 %v1516_v33, %v8449_v5 }
 0x1c1   : > { %7357 = vmatmul.msk.bf16.gmra.mxu3 %vm474_vm0, %v8437_v48  ;;  %7314 = vmatmul.msk.bf16.gmra.mxu1 %vm474_vm0, %v8439_v1 }
 0x1c2   : > { %v1822_v29 = vadd.f32 %v1742_v23, %v1596_v14  ;;  %7292 = vmatmul.msk.bf16.gmra.mxu0 %vm474_vm0, %v8437_v48 }
 0x1c3   : > { %7336 = vmatmul.msk.bf16.gmra.mxu2 %vm474_vm0, %v8463_v6 }
 0x1c4   : > { %v1365_v5 = vpop.f32.mrf.mxu3 }
 0x1c5   : > { %v8734_v18 = vadd.f32 %v1365_v5, %v1174_v4 }
 0x1c6   : > { %v1969_v21 = vpop.f32.mrf.mxu2  ;;  %v1744_v16 = vpop.f32.mrf.mxu1 }
 0x1c7   : > { %v2049_v22 = vadd.f32 %v1969_v21, %v1822_v29  ;;  %v1518_v51 = vpop.f32.mrf.mxu0 }
 0x1c8   : > { %v1597_v52 = vadd.f32 %v1518_v51, %v1371_v50 }
 0x1ca   : > { %v1823_v39 = vadd.f32 %v1744_v16, %v1597_v52 }
 0x1cc   : > { %v1367_v48 = vpop.f32.mrf.mxu3 }
 0x1cd   : > { %v8736_v55 = vadd.f32 %v1367_v48, %v1175_v25 }
 0x1ce   : > { %v1971_v6 = vpop.f32.mrf.mxu2  ;;  %v1747_v44 = vpop.f32.mrf.mxu1 }
 0x1cf   : > { %v2050_v9 = vadd.f32 %v1971_v6, %v1823_v39  ;;  %v1521_v42 = vpop.f32.mrf.mxu0  ;;  %v11719_v39 = vld [vmem:[#allocation35_spill] sm:$0xff] }
 0x1d0   : > { %v1598_v1 = vadd.f32 %v1521_v42, %v8477_v57 }
 0x1d1   : > { %7358 = vmatmul.msk.bf16.gmra.mxu3 %vm474_vm0, %v8465_v58  ;;  %7315 = vmatmul.msk.bf16.gmra.mxu1 %vm474_vm0, %v8467_v45 }
 0x1d2   : > { %v1824_v3 = vadd.f32 %v1747_v44, %v1598_v1  ;;  %7293 = vmatmul.msk.bf16.gmra.mxu0 %vm474_vm0, %v8465_v58  ;;  %v11721_v1 = vld [vmem:[#allocation34_spill] sm:$0xff] }
 0x1d3   : > { %7337 = vmatmul.msk.bf16.gmra.mxu2 %vm474_vm0, %v8491_v0 }
 0x1d4   : > { %v2195_v56 = vpop.f32.mrf.mxu3 }
 0x1d5   : > { %v8747_v19 = vadd.f32 %v2195_v56, %v2049_v22 }
 0x1d6   : > { %v1974_v15 = vpop.f32.mrf.mxu2  ;;  %v1749_v61 = vpop.f32.mrf.mxu1 }
 0x1d7   : > { %v2051_v4 = vadd.f32 %v1974_v15, %v1824_v3  ;;  %v1523_v57 = vpop.f32.mrf.mxu0 }
 0x1d8   : > { %v1599_v27 = vadd.f32 %v1523_v57, %v8489_v59 }
 0x1da   : > { %v1825_v46 = vadd.f32 %v1749_v61, %v1599_v27  ;;  %v11722_v61 = vld [vmem:[#allocation38_spill] sm:$0xff] }
 0x1dc   : > { %v2197_v13 = vpop.f32.mrf.mxu3 }
 0x1dd   : > { %v8750_v47 = vadd.f32 %v2197_v13, %v2050_v9 }
 0x1de   : > { %v1976_v58 = vpop.f32.mrf.mxu2  ;;  %v1752_v14 = vpop.f32.mrf.mxu1 }
 0x1df   : > { %v2052_v25 = vadd.f32 %v1976_v58, %v1825_v46  ;;  %v1526_v33 = vpop.f32.mrf.mxu0  ;;  %v11723_v58 = vld [vmem:[#allocation36_spill] sm:$0xff] }
 0x1e0   : > { %v1600_v0 = vadd.f32 %v1526_v33, %v8505_v35  ;;  %v11724_v33 = vld [vmem:[#allocation42_spill] sm:$0xff] }
 0x1e1   : > { %7359 = vmatmul.msk.bf16.gmra.mxu3 %vm474_vm0, %v8493_v53  ;;  %7316 = vmatmul.msk.bf16.gmra.mxu1 %vm474_vm0, %v8495_v2 }
 0x1e2   : > { %v1826_v45 = vadd.f32 %v1752_v14, %v1600_v0  ;;  %7294 = vmatmul.msk.bf16.gmra.mxu0 %vm474_vm0, %v8493_v53  ;;  %v11725_v0 = vld [vmem:[#allocation37_spill] sm:$0xff] }
 0x1e3   : > { %7338 = vmatmul.msk.bf16.gmra.mxu2 %vm474_vm0, %v8519_v41 }
 0x1e4   : > { %v2200_v59 = vpop.f32.mrf.mxu3 }
 0x1e5   : > { %v8761_v23 = vadd.f32 %v2200_v59, %v2051_v4 }
 0x1e6   : > { %v1979_v26 = vpop.f32.mrf.mxu2  ;;  %v1754_v5 = vpop.f32.mrf.mxu1 }
 0x1e7   : > { %v2053_v29 = vadd.f32 %v1979_v26, %v1826_v45  ;;  %v1528_v35 = vpop.f32.mrf.mxu0  ;;  %v11726_v26 = vld [vmem:[#allocation41_spill] sm:$0xff] }
 0x1e8   : > { %v1601_v10 = vadd.f32 %v1528_v35, %v8517_v63  ;;  %v11720_v63 = vld [vmem:[#allocation31_spill] sm:$0xff] }
 0x1ea   : > { %v1827_v50 = vadd.f32 %v1754_v5, %v1601_v10 }
 0x1ec   : > { %v2202_v21 = vpop.f32.mrf.mxu3 }
 0x1ed   : > { %v8764_v22 = vadd.f32 %v2202_v21, %v2052_v25  ;;  %v11727_v21 = vld [vmem:[#allocation45_spill] sm:$0xff] }
 0x1ee   : > { %v1981_v53 = vpop.f32.mrf.mxu2  ;;  %v1757_v16 = vpop.f32.mrf.mxu1 }
 0x1ef   : > { %v2054_v51 = vadd.f32 %v1981_v53, %v1827_v50  ;;  %v1531_v52 = vpop.f32.mrf.mxu0 }
 0x1f0   : > { %v1602_v41 = vadd.f32 %v1531_v52, %v8533_v28  ;;  %v11728_v52 = vld [vmem:[#allocation43_spill] sm:$0xff] }
 0x1f1   : > { %7360 = vmatmul.msk.bf16.gmra.mxu3 %vm474_vm0, %v8521_v30  ;;  %7317 = vmatmul.msk.bf16.gmra.mxu1 %vm474_vm0, %v11720_v63  ;;  %v11731_v63 = vld [vmem:[#allocation46_spill] sm:$0xff] }
 0x1f2   : > { %v1828_v2 = vadd.f32 %v1757_v16, %v1602_v41  ;;  %7295 = vmatmul.msk.bf16.gmra.mxu0 %vm474_vm0, %v8521_v30  ;;  %v11729_v16 = vld [vmem:[#allocation47_spill] sm:$0xff] }
 0x1f3   : > { %7339 = vmatmul.msk.bf16.gmra.mxu2 %vm474_vm0, %v11719_v39 }
 0x1f4   : > { %v2205_v48 = vpop.f32.mrf.mxu3 }
 0x1f5   : > { %v8775_v6 = vadd.f32 %v2205_v48, %v2053_v29 }
 0x1f6   : > { %v1984_v9 = vpop.f32.mrf.mxu2  ;;  %v1759_v3 = vpop.f32.mrf.mxu1 }
 0x1f7   : > { %v2055_v42 = vadd.f32 %v1984_v9, %v1828_v2  ;;  %v1533_v28 = vpop.f32.mrf.mxu0  ;;  %v11730_v2 = vld [vmem:[#allocation44_spill] sm:$0xff] }
 0x1f8   : > { %v1603_v44 = vadd.f32 %v1533_v28, %v11721_v1 }
 0x1fa   : > { %v1829_v56 = vadd.f32 %v1759_v3, %v1603_v44  ;;  %v11732_v44 = vld [vmem:[#allocation48_spill] sm:$0xff] }
 0x1fc   : > { %v2207_v15 = vpop.f32.mrf.mxu3 }
 0x1fd   : > { %v8778_v4 = vadd.f32 %v2207_v15, %v2054_v51 }
 0x1fe   : > { %v1986_v30 = vpop.f32.mrf.mxu2  ;;  %v1762_v13 = vpop.f32.mrf.mxu1 }
 0x1ff   : > { %v2056_v57 = vadd.f32 %v1986_v30, %v1829_v56  ;;  %v1536_v27 = vpop.f32.mrf.mxu0  ;;  %v11733_v56 = vld [vmem:[#allocation49_spill] sm:$0xff] }
 0x200   : > { %v1604_v46 = vadd.f32 %v1536_v27, %v11722_v61  ;;  %v2110_v27 = vld [vmem:[#allocation2 + $0x189] sm:$0xff]  ;;  %v1885_v61 = vld [vmem:[#allocation2 + $0x198] sm:$0xff] }
 0x201   : > { %7361 = vmatmul.msk.bf16.gmra.mxu3 %vm474_vm0, %v11723_v58  ;;  %7318 = vmatmul.msk.bf16.gmra.mxu1 %vm474_vm0, %v11725_v0 }
 0x202   : > { %v8783_v25 = vadd.f32 %v1762_v13, %v1604_v46  ;;  %7296 = vmatmul.msk.bf16.gmra.mxu0 %vm474_vm0, %v11723_v58  ;;  %v1886_v46 = vld [vmem:[#allocation2 + $0x1a0] sm:$0xff]  ;;  %v1659_v58 = vld [vmem:[#allocation2 + $0x18a] sm:$0xff] }
 0x203   : > { %7340 = vmatmul.msk.bf16.gmra.mxu2 %vm474_vm0, %v11724_v33  ;;  %v1658_v13 = vld [vmem:[#allocation2 + $0x182] sm:$0xff] }
 0x204   : > { %v2210_v14 = vpop.f32.mrf.mxu3 }
 0x205   : > { %v8791_v45 = vadd.f32 %v2210_v14, %v2055_v42  ;;  %v1902_v14 = vpack.c.bf16 %v1886_v46, %v1885_v61 }
 0x206   : > { %v8796_v35 = vpop.f32.mrf.mxu1 }
 0x207   : > { %v1538_v59 = vpop.f32.mrf.mxu0 }
 0x208   : > { %v8794_v29 = vadd.f32 %v1538_v59, %v11726_v26  ;;  %v8832_v59 = vpack.c.bf16 %v1659_v58, %v1658_v13 }
 0x20c   : > { %v2212_v10 = vpop.f32.mrf.mxu3 }
 0x20d   : > { %v8798_v5 = vadd.f32 %v2212_v10, %v2056_v57  ;;  %v2109_v57 = vld [vmem:[#allocation2 + $0x181] sm:$0xff] }
 0x20e   : > { %v1767_v51 = vpop.f32.mrf.mxu1  ;;  %v2127_v33 = vpack.c.bf16 %v2110_v27, %v2109_v57 }
 0x20f   : > { %v1541_v50 = vpop.f32.mrf.mxu0 }
 0x210   : > { %v1606_v53 = vadd.f32 %v1541_v50, %v11727_v21 }
 0x211   : > { %7362 = vmatmul.msk.bf16.gmra.mxu3 %vm474_vm0, %v11728_v52  ;;  %7319 = vmatmul.msk.bf16.gmra.mxu1 %vm474_vm0, %v11730_v2 }
 0x212   : > { %v8803_v41 = vadd.f32 %v1767_v51, %v1606_v53  ;;  %7297 = vmatmul.msk.bf16.gmra.mxu0 %vm474_vm0, %v11728_v52  ;;  %v2111_v53 = vld [vmem:[#allocation2 + $0x199] sm:$0xff] }
 0x213   : > { %7341 = vmatmul.msk.bf16.gmra.mxu2 %vm474_vm0, %v11729_v16  ;;  %v2307_v51 = vld [vmem:[#allocation2 + $0x32] sm:$0xff]  ;;  %v2308_v52 = vld [vmem:[#allocation2 + $0x3a] sm:$0xff] }
 0x214   : > { %v2339_v2 = vpack.c.bf16 %v2308_v52, %v2307_v51  ;;  %v2314_v52 = vld [vmem:[#allocation2 + $0x82] sm:$0xff] }
 0x216   : > { %v8814_v9 = vpop.f32.mrf.mxu1 }
 0x217   : > { %v1543_v39 = vpop.f32.mrf.mxu0 }
 0x218   : > { %v8812_v48 = vadd.f32 %v1543_v39, %v11731_v63 }
 0x21e   : > { %v1772_v1 = vpop.f32.mrf.mxu1 }
 0x21f   : > { %v1546_v42 = vpop.f32.mrf.mxu0 }
 0x220   : > { %v1608_v28 = vadd.f32 %v1546_v42, %v8616_v31 }
 0x221   : > { %7363 = vmatmul.msk.bf16.gmra.mxu3 %vm474_vm0, %v11732_v44  ;;  %7320 = vmatmul.msk.bf16.gmra.mxu1 %vm474_vm0, %v11733_v56  ;;  %v2309_v56 = vld [vmem:[#allocation2 + $0x4a] sm:$0xff] }
 0x222   : > { %v8819_v3 = vadd.f32 %v1772_v1, %v1608_v28  ;;  %7298 = vmatmul.msk.bf16.gmra.mxu0 %vm474_vm0, %v11732_v44 }
 0x223   : > { %7342 = vmatmul.msk.bf16.gmra.mxu2 %vm474_vm0, %v8620_v43 }
 0x226   : > { %v8830_v31 = vpop.f32.mrf.mxu1 }
 0x227   : > { %v1548_v15 = vpop.f32.mrf.mxu0 }
 0x228   : > { %v8828_v30 = vadd.f32 %v1548_v15, %v8618_v36  ;;  %v2310_v15 = vld [vmem:[#allocation2 + $0x52] sm:$0xff] }
 0x229   : > { %v2340_v57 = vpack.c.bf16 %v2310_v15, %v2309_v56  ;;  %v2316_v15 = vld [vmem:[#allocation2 + $0x9a] sm:$0xff] }
 0x22e   : > { %v1777_v26 = vpop.f32.mrf.mxu1 }
 0x22f   : > { %v1551_v0 = vpop.f32.mrf.mxu0 }
 0x230   : > { %v1610_v43 = vadd.f32 %v1551_v0, %v8630_v20  ;;  %v2112_v20 = vld [vmem:[#allocation2 + $0x1a1] sm:$0xff]  ;;  %v2312_v0 = vld [vmem:[#allocation2 + $0x6a] sm:$0xff] }
 0x231   : > { %7364 = vmatmul.msk.bf16.gmra.mxu3 %vm474_vm0, %v2127_v33  ;;  %7321 = vmatmul.msk.bf16.gmra.mxu1 %vm474_vm0, %v8832_v59  ;;  %v2128_v16 = vpack.c.bf16 %v2112_v20, %v2111_v53 }
 0x232   : > { %v8836_v36 = vadd.f32 %v1777_v26, %v1610_v43  ;;  %7299 = vmatmul.msk.bf16.gmra.mxu0 %vm474_vm0, %v2127_v33 }
 0x233   : > { %7343 = vmatmul.msk.bf16.gmra.mxu2 %vm474_vm0, %v1902_v14 }
 0x236   : > { %v8845_v21 = vpop.f32.mrf.mxu1 }
 0x237   : > { %v1553_v10 = vpop.f32.mrf.mxu0 }
 0x238   : > { %v8843_v50 = vadd.f32 %v1553_v10, %v8632_v34 }
 0x23e   : > { %v1782_v42 = vpop.f32.mrf.mxu1 }
 0x23f   : > { %v1556_v39 = vpop.f32.mrf.mxu0 }
 0x240   : > { %v1612_v63 = vadd.f32 %v1556_v39, %v8642_v38 }
 0x241   : > { %7365 = vmatmul.msk.bf16.gmra.mxu3 %vm474_vm0, %v2128_v16 }
 0x242   : > { %v8849_v28 = vadd.f32 %v1782_v42, %v1612_v63  ;;  %7372 = vmatmul.msk.bf16.vlgmr.msra.gmra.mxu0 %vm474_vm0, %v2339_v2 }
 0x246   : > { %v8855_v44 = vpop.f32.mrf.mxu1 }
 0x247   : > { %v1558_v34 = vpop.f32.mrf.mxu0 }
 0x248   : > { %v8853_v1 = vadd.f32 %v1558_v34, %v8644_v17  ;;  %v2311_v17 = vld [vmem:[#allocation2 + $0x62] sm:$0xff] }
 0x249   : > { %v2341_v14 = vpack.c.bf16 %v2312_v0, %v2311_v17 }
 0x24e   : > { %v1787_v38 = vpop.f32.mrf.mxu1 }
 0x24f   : > { %v1561_v27 = vpop.f32.mrf.mxu0 }
 0x250   : > { %v1614_v61 = vadd.f32 %v1561_v27, %v8654_v49 }
 0x252   : > { %v8858_v46 = vadd.f32 %v1787_v38, %v1614_v61  ;;  %7373 = vmatmul.msk.bf16.gmra.mxu0 %vm474_vm0, %v2340_v57 }
 0x256   : > { %v8864_v33 = vpop.f32.mrf.mxu1 }
 0x257   : > { %v1563_v13 = vpop.f32.mrf.mxu0 }
 0x258   : > { %v8862_v58 = vadd.f32 %v1563_v13, %v8656_v11  ;;  %v2313_v11 = vld [vmem:[#allocation2 + $0x7a] sm:$0xff] }
 0x259   : > { %v2342_v16 = vpack.c.bf16 %v2314_v52, %v2313_v11 }
 0x25e   : > { %v1792_v10 = vpop.f32.mrf.mxu1 }
 0x25f   : > { %v1566_v43 = vpop.f32.mrf.mxu0 }
 0x260   : > { %v1616_v26 = vadd.f32 %v1566_v43, %v8666_v60 }
 0x262   : > { %v8867_v53 = vadd.f32 %v1792_v10, %v1616_v26  ;;  %7374 = vmatmul.msk.bf16.gmra.mxu0 %vm474_vm0, %v2341_v14  ;;  %v2318_v14 = vld [vmem:[#allocation2 + $0xb2] sm:$0xff] }
 0x266   : > { %v8873_v51 = vpop.f32.mrf.mxu1 }
 0x267   : > { %v1568_v49 = vpop.f32.mrf.mxu0 }
 0x268   : > { %v8871_v20 = vadd.f32 %v1568_v49, %v8668_v40  ;;  %v2315_v40 = vld [vmem:[#allocation2 + $0x92] sm:$0xff] }
 0x269   : > { %v2343_v57 = vpack.c.bf16 %v2316_v15, %v2315_v40 }
 0x26e   : > { %v1797_v63 = vpop.f32.mrf.mxu1 }
 0x26f   : > { %v1571_v2 = vpop.f32.mrf.mxu0 }
 0x270   : > { %v1618_v39 = vadd.f32 %v1571_v2, %v8678_v7  ;;  %v2320_v2 = vld [vmem:[#allocation2 + $0xca] sm:$0xff] }
 0x272   : > { %v8876_v42 = vadd.f32 %v1797_v63, %v1618_v39  ;;  %7375 = vmatmul.msk.bf16.gmra.mxu0 %vm474_vm0, %v2342_v16 }
 0x276   : > { %v8882_v56 = vpop.f32.mrf.mxu1 }
 0x277   : > { %v1573_v60 = vpop.f32.mrf.mxu0 }
 0x278   : > { %v8880_v34 = vadd.f32 %v1573_v60, %v8680_v37  ;;  %v2317_v37 = vld [vmem:[#allocation2 + $0xaa] sm:$0xff] }
 0x279   : > { %v2344_v43 = vpack.c.bf16 %v2318_v14, %v2317_v37 }
 0x27e   : > { %v1802_v38 = vpop.f32.mrf.mxu1 }
 0x27f   : > { %v1576_v27 = vpop.f32.mrf.mxu0 }
 0x280   : > { %v1620_v61 = vadd.f32 %v1576_v27, %v8690_v24 }
 0x282   : > { %v8885_v13 = vadd.f32 %v1802_v38, %v1620_v61  ;;  %7376 = vmatmul.msk.bf16.gmra.mxu0 %vm474_vm0, %v2343_v57  ;;  %v2322_v61 = vld [vmem:[#allocation2 + $0xe2] sm:$0xff] }
 0x286   : > { %v8891_v0 = vpop.f32.mrf.mxu1 }
 0x287   : > { %v1578_v7 = vpop.f32.mrf.mxu0 }
 0x288   : > { %v8889_v17 = vadd.f32 %v1578_v7, %v8692_v32  ;;  %v2319_v32 = vld [vmem:[#allocation2 + $0xc2] sm:$0xff] }
 0x289   : > { %v2345_v39 = vpack.c.bf16 %v2320_v2, %v2319_v32 }
 0x28e   : > { %v1807_v49 = vpop.f32.mrf.mxu1 }
 0x28f   : > { %v1581_v26 = vpop.f32.mrf.mxu0 }
 0x290   : > { %v1622_v10 = vadd.f32 %v1581_v26, %v8702_v54 }
 0x292   : > { %v8894_v11 = vadd.f32 %v1807_v49, %v1622_v10  ;;  %7377 = vmatmul.msk.bf16.gmra.mxu0 %vm474_vm0, %v2344_v43  ;;  %v2323_v10 = vld [vmem:[#allocation2 + $0xf2] sm:$0xff] }
 0x296   : > { %v8900_v16 = vpop.f32.mrf.mxu1 }
 0x297   : > { %v1583_v24 = vpop.f32.mrf.mxu0 }
 0x298   : > { %v8898_v52 = vadd.f32 %v1583_v24, %v8704_v8  ;;  %v2321_v8 = vld [vmem:[#allocation2 + $0xda] sm:$0xff] }
 0x299   : > { %v2346_v38 = vpack.c.bf16 %v2322_v61, %v2321_v8  ;;  %v2215_v61 = vpop.f32.mrf.mxu3 }
 0x29e   : > { %v1812_v40 = vpop.f32.mrf.mxu1 }
 0x29f   : > { %v1586_v63 = vpop.f32.mrf.mxu0 }
 0x2a0   : > { %v1624_v60 = vadd.f32 %v1586_v63, %v8714_v12 }
 0x2a2   : > { %v8903_v15 = vadd.f32 %v1812_v40, %v1624_v60  ;;  %7378 = vmatmul.msk.bf16.gmra.mxu0 %vm474_vm0, %v2345_v39  ;;  %v1989_v60 = vpop.f32.mrf.mxu2  ;;  %v2325_v40 = vld [vmem:[#allocation2 + $0x10a] sm:$0xff] }
 0x2a6   : > { %v8909_v27 = vpop.f32.mrf.mxu1 }
 0x2a7   : > { %v1588_v54 = vpop.f32.mrf.mxu0 }
 0x2a8   : > { %v8907_v57 = vadd.f32 %v1588_v54, %v8719_v62  ;;  %v2324_v62 = vld [vmem:[#allocation2 + $0xfa] sm:$0xff]  ;;  %v2326_v54 = vld [vmem:[#allocation2 + $0x112] sm:$0xff] }
 0x2a9   : > { %v2347_v49 = vpack.c.bf16 %v2324_v62, %v2323_v10 }
 0x2ae   : > { %v1817_v14 = vpop.f32.mrf.mxu1 }
 0x2af   : > { %v1591_v7 = vpop.f32.mrf.mxu0 }
 0x2b0   : > { %v1626_v37 = vadd.f32 %v1591_v7, %v8734_v18  ;;  %v8923_v18 = vld [vmem:[%s11495_s2] ss:$0 sm:$0xff]  ;;  %v2348_v7 = vpack.c.bf16 %v2326_v54, %v2325_v40 }
 0x2b2   : > { %v8912_v43 = vadd.f32 %v1817_v14, %v1626_v37  ;;  %7379 = vmatmul.msk.bf16.gmra.mxu0 %vm474_vm0, %v2346_v38  ;;  %v1991_v14 = vpop.f32.mrf.mxu2 }
 0x2b7   : > { %v1593_v12 = vpop.f32.mrf.mxu0 }
 0x2b8   : > { %v8916_v26 = vadd.f32 %v1593_v12, %v8736_v55  ;;  %v2217_v12 = vpop.f32.mrf.mxu3 }
 0x2ba   : > { %11734 = vst [vmem:[#allocation35_spill] sm:$0xff] %v8916_v26 }
 0x2bf   : > { %v2421_v24 = vpop.f32.mrf.mxu0 }
 0x2c0   : > { %v2501_v32 = vadd.f32 %v2421_v24, %v8747_v19 }
 0x2c2   : > { %7380 = vmatmul.msk.bf16.gmra.mxu0 %vm474_vm0, %v2347_v49  ;;  %v8926_v39 = vadd.f32 %v8923_v18, %v2501_v32  ;;  %v2327_v32 = vld [vmem:[#allocation2 + $0x122] sm:$0xff] }
 0x2c4   : > { %11735 = vst [vmem:[#allocation31_spill] sm:$0xff] %v8926_v39  ;;  %v11553_v8 = vmax.f32 %v8926_v39, 0.0 }
 0x2c7   : > { %v2423_v2 = vpop.f32.mrf.mxu0 }
 0x2c8   : > { %v2502_v55 = vadd.f32 %v2423_v2, %v8750_v47  ;;  %v2328_v2 = vld [vmem:[#allocation2 + $0x12a] sm:$0xff] }
 0x2c9   : > { %v2349_v54 = vpack.c.bf16 %v2328_v2, %v2327_v32  ;;  %v2329_v2 = vld [vmem:[#allocation2 + $0x13a] sm:$0xff] }
 0x2ca   : > { %v8930_v63 = vadd.f32 %v8923_v18, %v2502_v55 }
 0x2cc   : > { %11736 = vst [vmem:[#allocation34_spill] sm:$0xff] %v8930_v63  ;;  %v11552_v19 = vmax.f32 %v8930_v63, 0.0 }
 0x2ce   : > { %v2601_v38 = vpack.c.bf16 %v11552_v19, %v11553_v8 }
 0x2cf   : > { %v2426_v37 = vpop.f32.mrf.mxu0 }
 0x2d0   : > { %7392 = vmatmul.msk.bf16.vlgmr.msra.gmra.mxu1 %vm474_vm0, %v2601_v38  ;;  %v2503_v47 = vadd.f32 %v2426_v37, %v8761_v23  ;;  %v1994_v38 = vpop.f32.mrf.mxu2 }
 0x2d2   : > { %7381 = vmatmul.msk.bf16.gmra.mxu0 %vm474_vm0, %v2348_v7  ;;  %v8942_v62 = vadd.f32 %v8923_v18, %v2503_v47 }
 0x2d4   : > { %11737 = vst [vmem:[#allocation38_spill] sm:$0xff] %v8942_v62  ;;  %v11555_v55 = vmax.f32 %v8942_v62, 0.0 }
 0x2d7   : > { %v2428_v10 = vpop.f32.mrf.mxu0 }
 0x2d8   : > { %v2504_v49 = vadd.f32 %v2428_v10, %v8764_v22  ;;  %v2220_v22 = vpop.f32.mrf.mxu3  ;;  %v1996_v19 = vpop.f32.mrf.mxu2 }
 0x2da   : > { %v8946_v24 = vadd.f32 %v8923_v18, %v2504_v49 }
 0x2dc   : > { %11738 = vst [vmem:[#allocation36_spill] sm:$0xff] %v8946_v24  ;;  %v11554_v40 = vmax.f32 %v8946_v24, 0.0 }
 0x2de   : > { %v2602_v23 = vpack.c.bf16 %v11554_v40, %v11555_v55  ;;  %v2330_v40 = vld [vmem:[#allocation2 + $0x142] sm:$0xff] }
 0x2df   : > { %v2431_v7 = vpop.f32.mrf.mxu0 }
 0x2e0   : > { %7393 = vmatmul.msk.bf16.gmra.mxu1 %vm474_vm0, %v2602_v23  ;;  %v2505_v37 = vadd.f32 %v2431_v7, %v8775_v6  ;;  %v2222_v32 = vpop.f32.mrf.mxu3 }
 0x2e2   : > { %7382 = vmatmul.msk.bf16.gmra.mxu0 %vm474_vm0, %v2349_v54  ;;  %v8958_v10 = vadd.f32 %v8923_v18, %v2505_v37  ;;  %v2350_v54 = vpack.c.bf16 %v2330_v40, %v2329_v2  ;;  %v2332_v40 = vld [vmem:[#allocation2 + $0x15a] sm:$0xff] }
 0x2e4   : > { %11739 = vst [vmem:[#allocation42_spill] sm:$0xff] %v8958_v10  ;;  %v11560_v23 = vmax.f32 %v8958_v10, 0.0 }
 0x2e7   : > { %v2433_v47 = vpop.f32.mrf.mxu0 }
 0x2e8   : > { %v2506_v49 = vadd.f32 %v2433_v47, %v8778_v4  ;;  %v1999_v4 = vpop.f32.mrf.mxu2  ;;  %v2225_v47 = vpop.f32.mrf.mxu3 }
 0x2ea   : > { %v8962_v8 = vadd.f32 %v8923_v18, %v2506_v49 }
 0x2ec   : > { %11740 = vst [vmem:[#allocation37_spill] sm:$0xff] %v8962_v8  ;;  %v11559_v55 = vmax.f32 %v8962_v8, 0.0 }
 0x2ee   : > { %v2603_v6 = vpack.c.bf16 %v11559_v55, %v11560_v23  ;;  %v2331_v55 = vld [vmem:[#allocation2 + $0x152] sm:$0xff] }
 0x2ef   : > { %v2436_v7 = vpop.f32.mrf.mxu0 }
 0x2f0   : > { %7394 = vmatmul.msk.bf16.gmra.mxu1 %vm474_vm0, %v2603_v6  ;;  %v2507_v37 = vadd.f32 %v2436_v7, %v8791_v45  ;;  %v2351_v7 = vpack.c.bf16 %v2332_v40, %v2331_v55 }
 0x2f2   : > { %7383 = vmatmul.msk.bf16.gmra.mxu0 %vm474_vm0, %v2350_v54  ;;  %v8974_v24 = vadd.f32 %v8923_v18, %v2507_v37  ;;  %v2001_v54 = vpop.f32.mrf.mxu2  ;;  %v2227_v37 = vpop.f32.mrf.mxu3 }
 0x2f4   : > { %11741 = vst [vmem:[#allocation41_spill] sm:$0xff] %v8974_v24  ;;  %v11590_v2 = vmax.f32 %v8974_v24, 0.0 }
 0x2f7   : > { %v2438_v49 = vpop.f32.mrf.mxu0 }
 0x2f8   : > { %v2508_v62 = vadd.f32 %v2438_v49, %v8798_v5  ;;  %v2057_v5 = vadd.f32 %v1989_v60, %v8783_v25  ;;  %v2333_v60 = vld [vmem:[#allocation2 + $0x16a] sm:$0xff] }
 0x2fa   : > { %v8978_v10 = vadd.f32 %v8923_v18, %v2508_v62  ;;  %v1831_v62 = vadd.f32 %v8796_v35, %v8794_v29  ;;  %v2283_v49 = vadd.f32 %v2215_v61, %v2057_v5  ;;  %v2004_v24 = vpop.f32.mrf.mxu2  ;;  %v2230_v40 = vpop.f32.mrf.mxu3 }
 0x2fc   : > { %11742 = vst [vmem:[#allocation45_spill] sm:$0xff] %v8978_v10  ;;  %v11565_v6 = vmax.f32 %v8978_v10, 0.0  ;;  %v2058_v8 = vadd.f32 %v1991_v14, %v1831_v62 }
 0x2fe   : > { %v2604_v45 = vpack.c.bf16 %v11565_v6, %v11590_v2  ;;  %v2284_v39 = vadd.f32 %v2217_v12, %v2058_v8 }
 0x2ff   : > { %v2441_v23 = vpop.f32.mrf.mxu0 }
 0x300   : > { %7395 = vmatmul.msk.bf16.gmra.mxu1 %vm474_vm0, %v2604_v45  ;;  %v2509_v63 = vadd.f32 %v2441_v23, %v2283_v49  ;;  %v2334_v45 = vld [vmem:[#allocation2 + $0x172] sm:$0xff] }
 0x301   : > { %v2352_v61 = vpack.c.bf16 %v2334_v45, %v2333_v60 }
 0x302   : > { %7384 = vmatmul.msk.bf16.gmra.mxu0 %vm474_vm0, %v2351_v7  ;;  %v8992_v6 = vadd.f32 %v8923_v18, %v2509_v63  ;;  %v2059_v63 = vadd.f32 %v1994_v38, %v8803_v41  ;;  %v2232_v23 = vpop.f32.mrf.mxu3 }
 0x304   : > { %11743 = vst [vmem:[#allocation43_spill] sm:$0xff] %v8992_v6  ;;  %v11589_v29 = vmax.f32 %v8992_v6, 0.0  ;;  %v2285_v12 = vadd.f32 %v2220_v22, %v2059_v63 }
 0x307   : > { %v2443_v26 = vpop.f32.mrf.mxu0 }
 0x308   : > { %v2510_v55 = vadd.f32 %v2443_v26, %v2284_v39  ;;  %v2006_v26 = vpop.f32.mrf.mxu2  ;;  %v1833_v39 = vadd.f32 %v8814_v9, %v8812_v48 }
 0x30a   : > { %v8995_v25 = vadd.f32 %v8923_v18, %v2510_v55  ;;  %v2060_v7 = vadd.f32 %v1996_v19, %v1833_v39  ;;  %v2235_v9 = vpop.f32.mrf.mxu3 }
 0x30c   : > { %11744 = vst [vmem:[#allocation47_spill] sm:$0xff] %v8995_v25  ;;  %v11588_v35 = vmax.f32 %v8995_v25, 0.0  ;;  %v2286_v62 = vadd.f32 %v2222_v32, %v2060_v7  ;;  %v2061_v32 = vadd.f32 %v1999_v4, %v8819_v3  ;;  %v2337_v4 = vld [vmem:[#allocation2 + $0x19a] sm:$0xff] }
 0x30e   : > { %v2605_v8 = vpack.c.bf16 %v11588_v35, %v11589_v29 }
 0x30f   : > { %v2446_v14 = vpop.f32.mrf.mxu0 }
 0x310   : > { %7396 = vmatmul.msk.bf16.gmra.mxu1 %vm474_vm0, %v2605_v8  ;;  %v2511_v5 = vadd.f32 %v2446_v14, %v2285_v12  ;;  %v2009_v38 = vpop.f32.mrf.mxu2  ;;  %v1835_v8 = vadd.f32 %v8830_v31, %v8828_v30 }
 0x312   : > { %7385 = vmatmul.msk.bf16.gmra.mxu0 %vm474_vm0, %v2352_v61  ;;  %v9009_v55 = vadd.f32 %v8923_v18, %v2511_v5  ;;  %v2287_v61 = vadd.f32 %v2225_v47, %v2061_v32  ;;  %v2062_v14 = vadd.f32 %v2001_v54, %v1835_v8  ;;  %v2237_v7 = vpop.f32.mrf.mxu3  ;;  %v1837_v32 = vadd.f32 %v8845_v21, %v8843_v50 }
 0x314   : > { %11745 = vst [vmem:[#allocation44_spill] sm:$0xff] %v9009_v55  ;;  %v11587_v45 = vmax.f32 %v9009_v55, 0.0  ;;  %v2288_v12 = vadd.f32 %v2227_v37, %v2062_v14 }
 0x317   : > { %v2448_v49 = vpop.f32.mrf.mxu0 }
 0x318   : > { %v2512_v60 = vadd.f32 %v2448_v49, %v2286_v62  ;;  %v2011_v39 = vpop.f32.mrf.mxu2 }
 0x31a   : > { %v9012_v41 = vadd.f32 %v8923_v18, %v2512_v60  ;;  %v2338_v60 = vld [vmem:[#allocation2 + $0x1a2] sm:$0xff] }
 0x31b   : > { %v2354_v47 = vpack.c.bf16 %v2338_v60, %v2337_v4 }
 0x31c   : > { %11746 = vst [vmem:[#allocation46_spill] sm:$0xff] %v9012_v41  ;;  %v11586_v48 = vmax.f32 %v9012_v41, 0.0 }
 0x31e   : > { %v2606_v19 = vpack.c.bf16 %v11586_v48, %v11587_v45 }
 0x31f   : > { %v2451_v22 = vpop.f32.mrf.mxu0 }
 0x320   : > { %7397 = vmatmul.msk.bf16.gmra.mxu1 %vm474_vm0, %v2606_v19  ;;  %v2513_v63 = vadd.f32 %v2451_v22, %v2287_v61  ;;  %v2014_v54 = vpop.f32.mrf.mxu2  ;;  %v2063_v19 = vadd.f32 %v2004_v24, %v8836_v36  ;;  %v2240_v22 = vpop.f32.mrf.mxu3  ;;  %v2064_v61 = vadd.f32 %v2006_v26, %v1837_v32  ;;  %v2065_v26 = vadd.f32 %v2009_v38, %v8849_v28 }
 0x322   : > { %7386 = vmatmul.msk.bf16.gmra.mxu0 %vm474_vm0, %v8832_v59  ;;  %v9027_v62 = vadd.f32 %v8923_v18, %v2513_v63  ;;  %v2289_v8 = vadd.f32 %v2230_v40, %v2063_v19  ;;  %v2290_v63 = vadd.f32 %v2232_v23, %v2064_v61  ;;  %v1839_v23 = vadd.f32 %v8855_v44, %v8853_v1 }
 0x324   : > { %11747 = vst [vmem:[#allocation48_spill] sm:$0xff] %v9027_v62  ;;  %v11585_v30 = vmax.f32 %v9027_v62, 0.0 }
 0x327   : > { %v2453_v5 = vpop.f32.mrf.mxu0 }
 0x328   : > { %v2514_v49 = vadd.f32 %v2453_v5, %v2288_v12  ;;  %v2016_v4 = vpop.f32.mrf.mxu2  ;;  %v2242_v24 = vpop.f32.mrf.mxu3 }
 0x32a   : > { %v9030_v3 = vadd.f32 %v8923_v18, %v2514_v49 }
 0x32c   : > { %11748 = vst [vmem:[#allocation49_spill] sm:$0xff] %v9030_v3  ;;  %v11584_v31 = vmax.f32 %v9030_v3, 0.0 }
 0x32e   : > { %v2607_v59 = vpack.c.bf16 %v11584_v31, %v11585_v30 }
 0x32f   : > { %v2456_v37 = vpop.f32.mrf.mxu0 }
 0x330   : > { %7398 = vmatmul.msk.bf16.gmra.mxu1 %vm474_vm0, %v2607_v59  ;;  %v2515_v14 = vadd.f32 %v2456_v37, %v2289_v8  ;;  %v2291_v59 = vadd.f32 %v2235_v9, %v2065_v26  ;;  %v2066_v37 = vadd.f32 %v2011_v39, %v1839_v23  ;;  %v2245_v32 = vpop.f32.mrf.mxu3  ;;  %v9059_v8 = vpop.f32.mrf.mxu1 }
 0x332   : > { %7387 = vmatmul.msk.bf16.gmra.mxu0 %vm474_vm0, %v2354_v47  ;;  %v9044_v5 = vadd.f32 %v8923_v18, %v2515_v14  ;;  %v2019_v47 = vpop.f32.mrf.mxu2  ;;  %v2292_v61 = vadd.f32 %v2237_v7, %v2066_v37 }
 0x334   : > { %11749 = vst [vmem:[#allocation50_spill] sm:$0xff] %v9044_v5  ;;  %v11579_v60 = vmax.f32 %v9044_v5, 0.0 }
 0x337   : > { %v2458_v12 = vpop.f32.mrf.mxu0 }
 0x338   : > { %v2516_v49 = vadd.f32 %v2458_v12, %v2290_v63  ;;  %v2247_v7 = vpop.f32.mrf.mxu3 }
 0x33a   : > { %v9047_v36 = vadd.f32 %v8923_v18, %v2516_v49  ;;  %v2021_v44 = vpop.f32.mrf.mxu2 }
 0x33c   : > { %11750 = vst [vmem:[#allocation51_spill] sm:$0xff] %v9047_v36  ;;  %v11570_v50 = vmax.f32 %v9047_v36, 0.0 }
 0x33e   : > { %v2608_v21 = vpack.c.bf16 %v11570_v50, %v11579_v60 }
 0x33f   : > { %v2461_v40 = vpop.f32.mrf.mxu0 }
 0x340   : > { %7399 = vmatmul.msk.bf16.gmra.mxu1 %vm474_vm0, %v2608_v21  ;;  %v2517_v19 = vadd.f32 %v2461_v40, %v2291_v59  ;;  %v2067_v21 = vadd.f32 %v2014_v54, %v8858_v46  ;;  %v1841_v40 = vadd.f32 %v8864_v33, %v8862_v58 }
 0x342   : > { %v9062_v63 = vadd.f32 %v8923_v18, %v2517_v19  ;;  %v2293_v26 = vadd.f32 %v2240_v22, %v2067_v21  ;;  %v2068_v23 = vadd.f32 %v2016_v4, %v1841_v40 }
 0x344   : > { %11751 = vst [vmem:[#allocation52_spill] sm:$0xff] %v9062_v63  ;;  %v11567_v38 = vmax.f32 %v9062_v63, 0.0  ;;  %v2294_v19 = vadd.f32 %v2242_v24, %v2068_v23  ;;  %v2069_v24 = vadd.f32 %v2019_v47, %v8867_v53 }
 0x347   : > { %v2463_v14 = vpop.f32.mrf.mxu0 }
 0x348   : > { %v2518_v12 = vadd.f32 %v2463_v14, %v2292_v61  ;;  %v2024_v61 = vpop.f32.mrf.mxu2 }
 0x34a   : > { %v9065_v28 = vadd.f32 %v8923_v18, %v2518_v12 }
 0x34c   : > { %11752 = vst [vmem:[#allocation53_spill] sm:$0xff] %v9065_v28  ;;  %v11566_v1 = vmax.f32 %v9065_v28, 0.0 }
 0x34d   : > { %v9069_v9 = vpop.f32.mrf.mxu1 }
 0x34e   : > { %v2609_v39 = vpack.c.bf16 %v11566_v1, %v11567_v38  ;;  %v2250_v38 = vpop.f32.mrf.mxu3  ;;  %v2763_v35 = vsel %vm2762_vm2, %v9069_v9, -inf }
 0x34f   : > { %v2466_v49 = vpop.f32.mrf.mxu0 }
 0x350   : > { %7400 = vmatmul.msk.bf16.gmra.mxu1 %vm474_vm0, %v2609_v39  ;;  %v2519_v59 = vadd.f32 %v2466_v49, %v2293_v26  ;;  %v2026_v39 = vpop.f32.mrf.mxu2  ;;  %v2295_v49 = vadd.f32 %v2245_v32, %v2069_v24 }
 0x352   : > { %v9082_v12 = vadd.f32 %v8923_v18, %v2519_v59 }
 0x354   : > { %11753 = vst [vmem:[#allocation54_spill] sm:$0xff] %v9082_v12  ;;  %v11569_v54 = vmax.f32 %v9082_v12, 0.0 }
 0x355   : > { %v9079_v37 = vpop.f32.mrf.mxu1 }
 0x356   : > { %v2252_v21 = vpop.f32.mrf.mxu3 }
 0x357   : > { %v2468_v14 = vpop.f32.mrf.mxu0 }
 0x358   : > { %v2520_v1 = vadd.f32 %v2468_v14, %v2294_v19  ;;  %v2029_v47 = vpop.f32.mrf.mxu2 }
 0x35a   : > { %v9085_v46 = vadd.f32 %v8923_v18, %v2520_v1  ;;  %v1843_v1 = vadd.f32 %v8873_v51, %v8871_v20 }
 0x35c   : > { %11754 = vst [vmem:[#allocation55_spill] sm:$0xff] %v9085_v46  ;;  %v11568_v58 = vmax.f32 %v9085_v46, 0.0  ;;  %v2070_v40 = vadd.f32 %v2021_v44, %v1843_v1 }
 0x35d   : > { %v9089_v33 = vpop.f32.mrf.mxu1 }
 0x35e   : > { %v2610_v22 = vpack.c.bf16 %v11568_v58, %v11569_v54  ;;  %v2296_v59 = vadd.f32 %v2247_v7, %v2070_v40  ;;  %v2255_v51 = vpop.f32.mrf.mxu3  ;;  %v2765_v29 = vsel %vm2762_vm2, %v9089_v33, -inf }
 0x35f   : > { %v2471_v4 = vpop.f32.mrf.mxu0 }
 0x360   : > { %7401 = vmatmul.msk.bf16.gmra.mxu1 %vm474_vm0, %v2610_v22  ;;  %v2521_v26 = vadd.f32 %v2471_v4, %v2295_v49  ;;  %v2071_v4 = vadd.f32 %v2024_v61, %v8876_v42  ;;  %v2031_v40 = vpop.f32.mrf.mxu2 }
 0x362   : > { %v9102_v14 = vadd.f32 %v8923_v18, %v2521_v26  ;;  %v2297_v24 = vadd.f32 %v2250_v38, %v2071_v4 }
 0x364   : > { %11755 = vst [vmem:[#allocation56_spill] sm:$0xff] %v9102_v14  ;;  %v11574_v22 = vmax.f32 %v9102_v14, 0.0 }
 0x365   : > { %v9099_v23 = vpop.f32.mrf.mxu1 }
 0x366   : > { %v2766_v2 = vsel %vm2762_vm2, %v9099_v23, -inf }
 0x367   : > { %v2473_v19 = vpop.f32.mrf.mxu0 }
 0x368   : > { %v2522_v58 = vadd.f32 %v2473_v19, %v2296_v59  ;;  %v2257_v19 = vpop.f32.mrf.mxu3 }
 0x36a   : > { %v9105_v53 = vadd.f32 %v8923_v18, %v2522_v58  ;;  %v1845_v58 = vadd.f32 %v8882_v56, %v8880_v34 }
 0x36c   : > { %11756 = vst [vmem:[#allocation57_spill] sm:$0xff] %v9105_v53  ;;  %v11571_v20 = vmax.f32 %v9105_v53, 0.0  ;;  %v2072_v1 = vadd.f32 %v2026_v39, %v1845_v58  ;;  %v2034_v39 = vpop.f32.mrf.mxu2 }
 0x36d   : > { %v9109_v32 = vpop.f32.mrf.mxu1 }
 0x36e   : > { %v2611_v44 = vpack.c.bf16 %v11571_v20, %v11574_v22  ;;  %v2298_v59 = vadd.f32 %v2252_v21, %v2072_v1  ;;  %v2767_v31 = vsel %vm2762_vm2, %v9109_v32, -inf }
 0x36f   : > { %v2476_v7 = vpop.f32.mrf.mxu0 }
 0x370   : > { %7402 = vmatmul.msk.bf16.gmra.mxu1 %vm474_vm0, %v2611_v44  ;;  %v2523_v49 = vadd.f32 %v2476_v7, %v2297_v24  ;;  %v2073_v44 = vadd.f32 %v2029_v47, %v8885_v13 }
 0x372   : > { %v9122_v50 = vadd.f32 %v8923_v18, %v2523_v49  ;;  %v2299_v7 = vadd.f32 %v2255_v51, %v2073_v44 }
 0x374   : > { %11757 = vst [vmem:[#allocation58_spill] sm:$0xff] %v9122_v50  ;;  %v11573_v61 = vmax.f32 %v9122_v50, 0.0 }
 0x375   : > { %v9119_v26 = vpop.f32.mrf.mxu1 }
 0x377   : > { %v2478_v54 = vpop.f32.mrf.mxu0 }
 0x378   : > { %v2524_v20 = vadd.f32 %v2478_v54, %v2298_v59  ;;  %v2260_v54 = vpop.f32.mrf.mxu3 }
 0x37a   : > { %v9125_v42 = vadd.f32 %v8923_v18, %v2524_v20  ;;  %v1847_v20 = vadd.f32 %v8891_v0, %v8889_v17 }
 0x37c   : > { %11758 = vst [vmem:[#allocation59_spill] sm:$0xff] %v9125_v42  ;;  %v11572_v34 = vmax.f32 %v9125_v42, 0.0  ;;  %v2074_v4 = vadd.f32 %v2031_v40, %v1847_v20 }
 0x37d   : > { %v9129_v56 = vpop.f32.mrf.mxu1 }
 0x37e   : > { %v2612_v38 = vpack.c.bf16 %v11572_v34, %v11573_v61  ;;  %v2300_v1 = vadd.f32 %v2257_v19, %v2074_v4  ;;  %v2036_v61 = vpop.f32.mrf.mxu2  ;;  %v2075_v19 = vadd.f32 %v2034_v39, %v8894_v11  ;;  %v2771_v30 = vsel %vm2762_vm2, %v9129_v56, -inf }
 0x37f   : > { %v2481_v21 = vpop.f32.mrf.mxu0 }
 0x380   : > { %7403 = vmatmul.msk.bf16.gmra.mxu1 %vm474_vm0, %v2612_v38  ;;  %v2525_v58 = vadd.f32 %v2481_v21, %v2299_v7  ;;  %v2262_v47 = vpop.f32.mrf.mxu3  ;;  %v2301_v21 = vadd.f32 %v2260_v54, %v2075_v19 }
 0x382   : > { %v9142_v59 = vadd.f32 %v8923_v18, %v2525_v58 }
 0x384   : > { %11759 = vst [vmem:[#allocation60_spill] sm:$0xff] %v9142_v59  ;;  %v11576_v38 = vmax.f32 %v9142_v59, 0.0 }
 0x385   : > { %v9139_v24 = vpop.f32.mrf.mxu1 }
 0x386   : > { %v2039_v44 = vpop.f32.mrf.mxu2  ;;  %v2773_v48 = vsel %vm2762_vm2, %v9139_v24, -inf }
 0x387   : > { %v2483_v49 = vpop.f32.mrf.mxu0  ;;  %v2774_v59 = vmax.f32 %v2766_v2, %v2773_v48 }
 0x388   : > { %v2526_v34 = vadd.f32 %v2483_v49, %v2300_v1  ;;  %v2265_v4 = vpop.f32.mrf.mxu3 }
 0x38a   : > { %v9145_v13 = vadd.f32 %v8923_v18, %v2526_v34  ;;  %v1849_v34 = vadd.f32 %v8900_v16, %v8898_v52 }
 0x38c   : > { %11760 = vst [vmem:[#allocation61_spill] sm:$0xff] %v9145_v13  ;;  %v11575_v17 = vmax.f32 %v9145_v13, 0.0  ;;  %v2076_v20 = vadd.f32 %v2036_v61, %v1849_v34  ;;  %v2772_v13 = vmax.f32 %v2765_v29, %v2771_v30 }
 0x38d   : > { %v9149_v0 = vpop.f32.mrf.mxu1 }
 0x38e   : > { %v2613_v51 = vpack.c.bf16 %v11575_v17, %v11576_v38  ;;  %v2302_v1 = vadd.f32 %v2262_v47, %v2076_v20  ;;  %v2041_v16 = vpop.f32.mrf.mxu2 }
 0x38f   : > { %v2486_v40 = vpop.f32.mrf.mxu0 }
 0x390   : > { %7404 = vmatmul.msk.bf16.gmra.mxu1 %vm474_vm0, %v2613_v51  ;;  %v2527_v7 = vadd.f32 %v2486_v40, %v2301_v21  ;;  %v2267_v47 = vpop.f32.mrf.mxu3  ;;  %v2077_v40 = vadd.f32 %v2039_v44, %v8903_v15 }
 0x392   : > { %v9162_v22 = vadd.f32 %v8923_v18, %v2527_v7  ;;  %v2303_v19 = vadd.f32 %v2265_v4, %v2077_v40 }
 0x394   : > { %11761 = vst [vmem:[#allocation62_spill] sm:$0xff] %v9162_v22  ;;  %v11578_v39 = vmax.f32 %v9162_v22, 0.0  ;;  %v2768_v22 = vmax.f32 %v2763_v35, %v2767_v31 }
 0x395   : > { %v9159_v58 = vpop.f32.mrf.mxu1 }
 0x396   : > { %v2777_v45 = vsel %vm2762_vm2, %v9159_v58, -inf }
 0x397   : > { %v2488_v49 = vpop.f32.mrf.mxu0 }
 0x398   : > { %v2528_v17 = vadd.f32 %v2488_v49, %v2302_v1  ;;  %v2044_v1 = vpop.f32.mrf.mxu2 }
 0x39a   : > { %v9165_v11 = vadd.f32 %v8923_v18, %v2528_v17  ;;  %v1851_v17 = vadd.f32 %v8909_v27, %v8907_v57 }
 0x39c   : > { %11762 = vst [vmem:[#allocation63_spill] sm:$0xff] %v9165_v11  ;;  %v11577_v52 = vmax.f32 %v9165_v11, 0.0  ;;  %v2078_v34 = vadd.f32 %v2041_v16, %v1851_v17 }
 0x39d   : > { %v9169_v54 = vpop.f32.mrf.mxu1 }
 0x39e   : > { %11763 = vst [vmem:[#allocation64_spill] sm:$0xff] %v9169_v54  ;;  %v2614_v61 = vpack.c.bf16 %v11577_v52, %v11578_v39  ;;  %v2304_v7 = vadd.f32 %v2267_v47, %v2078_v34  ;;  %v2270_v39 = vpop.f32.mrf.mxu3 }
 0x39f   : > { %v2491_v51 = vpop.f32.mrf.mxu0 }
 0x3a0   : > { %7405 = vmatmul.msk.bf16.gmra.mxu1 %vm474_vm0, %v2614_v61  ;;  %v2529_v21 = vadd.f32 %v2491_v51, %v2303_v19  ;;  %v2079_v61 = vadd.f32 %v2044_v1, %v8912_v43  ;;  %v2046_v47 = vpop.f32.mrf.mxu2  ;;  %v11768_v51 = vld [vmem:[#allocation35_spill] sm:$0xff] }
 0x3a2   : > { %v9182_v38 = vadd.f32 %v8923_v18, %v2529_v21  ;;  %v2305_v40 = vadd.f32 %v2270_v39, %v2079_v61 }
 0x3a4   : > { %11765 = vst [vmem:[#allocation66_spill] sm:$0xff] %v9182_v38  ;;  %v11583_v44 = vmax.f32 %v9182_v38, 0.0 }
 0x3a5   : > { %v9179_v20 = vpop.f32.mrf.mxu1 }
 0x3a6   : > { %11764 = vst [vmem:[#allocation65_spill] sm:$0xff] %v9179_v20  ;;  %v2272_v17 = vpop.f32.mrf.mxu3  ;;  %v2781_v38 = vsel %vm2762_vm2, %v9179_v20, -inf }
 0x3a7   : > { %v2493_v49 = vpop.f32.mrf.mxu0  ;;  %v2782_v12 = vmax.f32 %v2774_v59, %v2781_v38 }
 0x3a8   : > { %v2530_v52 = vadd.f32 %v2493_v49, %v2304_v7 }
 0x3aa   : > { %v9185_v15 = vadd.f32 %v8923_v18, %v2530_v52  ;;  %v1853_v52 = vadd.f32 %v9059_v8, %v11768_v51 }
 0x3ac   : > { %11766 = vst [vmem:[#allocation67_spill] sm:$0xff] %v9185_v15  ;;  %v11580_v57 = vmax.f32 %v9185_v15, 0.0  ;;  %v2080_v19 = vadd.f32 %v2046_v47, %v1853_v52  ;;  %v2779_v15 = vsel %vm2762_vm2, %v9169_v54, -inf }
 0x3ad   : > { %v9189_v27 = vpop.f32.mrf.mxu1  ;;  %v2780_v46 = vmax.f32 %v2772_v13, %v2779_v15 }
 0x3ae   : > { %11767 = vst [vmem:[#allocation68_spill] sm:$0xff] %v9189_v27  ;;  %v2615_v4 = vpack.c.bf16 %v11580_v57, %v11583_v44  ;;  %v2306_v7 = vadd.f32 %v2272_v17, %v2080_v19  ;;  %v2764_v44 = vsel %vm2762_vm2, %v9079_v37, -inf  ;;  %v2783_v50 = vsel %vm2762_vm2, %v9189_v27, -inf }
 0x3af   : > { %v2496_v16 = vpop.f32.mrf.mxu0 }
 0x3b0   : > { %7406 = vmatmul.msk.bf16.gmra.mxu1 %vm474_vm0, %v2615_v4  ;;  %v2531_v34 = vadd.f32 %v2496_v16, %v2305_v40 }
 0x3b2   : > { %v9202_v60 = vadd.f32 %v8923_v18, %v2531_v34 }
 0x3b4   : > { %11770 = vst [vmem:[#allocation69_spill] sm:$0xff] %v9202_v60  ;;  %v11582_v1 = vmax.f32 %v9202_v60, 0.0  ;;  %v2775_v60 = vsel %vm2762_vm2, %v9149_v0, -inf }
 0x3b5   : > { %v9199_v21 = vpop.f32.mrf.mxu1  ;;  %v2776_v14 = vmax.f32 %v2768_v22, %v2775_v60 }
 0x3b6   : > { %11769 = vst [vmem:[#allocation35_spill] sm:$0xff] %v9199_v21  ;;  %v2785_v11 = vsel %vm2762_vm2, %v9199_v21, -inf }
 0x3b7   : > { %v2498_v49 = vpop.f32.mrf.mxu0  ;;  %v2784_v30 = vmax.f32 %v2776_v14, %v2783_v50 }
 0x3b8   : > { %v2532_v57 = vadd.f32 %v2498_v49, %v2306_v7 }
 0x3ba   : > { %v9205_v43 = vadd.f32 %v8923_v18, %v2532_v57 }
 0x3bc   : > { %11771 = vst [vmem:[#allocation70_spill] sm:$0xff] %v9205_v43  ;;  %v11581_v4 = vmax.f32 %v9205_v43, 0.0 }
 0x3bd   : > { %v9209_v8 = vpop.f32.mrf.mxu1 }
 0x3be   : > { %11772 = vst [vmem:[#allocation71_spill] sm:$0xff] %v9209_v8  ;;  %v2616_v39 = vpack.c.bf16 %v11581_v4, %v11582_v1  ;;  %v2769_v1 = vsel %vm2762_vm2, %v9119_v26, -inf }
 0x3bf   : > { %v2770_v43 = vmax.f32 %v2764_v44, %v2769_v1  ;;  %v2787_v44 = vsel %vm2762_vm2, %v9209_v8, -inf }
 0x3c0   : > { %7407 = vmatmul.msk.bf16.gmra.mxu1 %vm474_vm0, %v2616_v39  ;;  %v2788_v31 = vmax.f32 %v2780_v46, %v2787_v44 }
 0x3c1   : > { %v2778_v42 = vmax.f32 %v2770_v43, %v2777_v45 }
 0x3c3   : > { %v2786_v28 = vmax.f32 %v2778_v42, %v2785_v11 }
 0x3c5   : > { %v9216_v16 = vpop.f32.mrf.mxu1 }
 0x3c6   : > { %11773 = vst [vmem:[#allocation72_spill] sm:$0xff] %v9216_v16  ;;  %v2789_v1 = vsel %vm2762_vm2, %v9216_v16, -inf }
 0x3c7   : > { %v2790_v60 = vmax.f32 %v2782_v12, %v2789_v1 }
 0x3cd   : > { %v9218_v61 = vpop.f32.mrf.mxu1 }
 0x3ce   : > { %11774 = vst [vmem:[#allocation73_spill] sm:$0xff] %v9218_v61  ;;  %v2791_v2 = vsel %vm2762_vm2, %v9218_v61, -inf }
 0x3cf   : > { %v2792_v11 = vmax.f32 %v2784_v30, %v2791_v2 }
 0x3d5   : > { %v9220_v47 = vpop.f32.mrf.mxu1 }
 0x3d6   : > { %11775 = vst [vmem:[#allocation74_spill] sm:$0xff] %v9220_v47  ;;  %v2793_v53 = vsel %vm2762_vm2, %v9220_v47, -inf }
 0x3d7   : > { %v2794_v22 = vmax.f32 %v2786_v28, %v2793_v53 }
 0x3dd   : > { %v9222_v18 = vpop.f32.mrf.mxu1 }
 0x3de   : > { %11776 = vst [vmem:[#allocation75_spill] sm:$0xff] %v9222_v18  ;;  %v2795_v29 = vsel %vm2762_vm2, %v9222_v18, -inf }
 0x3df   : > { %v2796_v15 = vmax.f32 %v2788_v31, %v2795_v29 }
 0x3e5   : > { %v9224_v57 = vpop.f32.mrf.mxu1 }
 0x3e6   : > { %11777 = vst [vmem:[#allocation76_spill] sm:$0xff] %v9224_v57  ;;  %v2797_v45 = vsel %vm2762_vm2, %v9224_v57, -inf }
 0x3e7   : > { %v2798_v43 = vmax.f32 %v2790_v60, %v2797_v45 }
 0x3ed   : > { %v9226_v51 = vpop.f32.mrf.mxu1 }
 0x3ee   : > { %11778 = vst [vmem:[#allocation77_spill] sm:$0xff] %v9226_v51  ;;  %v2799_v42 = vsel %vm2762_vm2, %v9226_v51, -inf }
 0x3ef   : > { %v2800_v14 = vmax.f32 %v2792_v11, %v2799_v42 }
 0x3f5   : > { %v9228_v52 = vpop.f32.mrf.mxu1 }
 0x3f6   : > { %11779 = vst [vmem:[#allocation78_spill] sm:$0xff] %v9228_v52  ;;  %v2801_v48 = vsel %vm2762_vm2, %v9228_v52, -inf }
 0x3f7   : > { %v2802_v63 = vmax.f32 %v2794_v22, %v2801_v48 }
 0x3fd   : > { %v9230_v40 = vpop.f32.mrf.mxu1 }
 0x3fe   : > { %11780 = vst [vmem:[#allocation79_spill] sm:$0xff] %v9230_v40  ;;  %v2803_v59 = vsel %vm2762_vm2, %v9230_v40, -inf }
 0x3ff   : > { %v2804_v53 = vmax.f32 %v2796_v15, %v2803_v59 }
 0x405   : > { %v9232_v17 = vpop.f32.mrf.mxu1 }
 0x406   : > { %11781 = vst [vmem:[#allocation80_spill] sm:$0xff] %v9232_v17  ;;  %v2805_v13 = vsel %vm2762_vm2, %v9232_v17, -inf }
 0x407   : > { %v2806_v44 = vmax.f32 %v2798_v43, %v2805_v13 }
 0x40d   : > { %v9234_v19 = vpop.f32.mrf.mxu1 }
 0x40e   : > { %11782 = vst [vmem:[#allocation81_spill] sm:$0xff] %v9234_v19  ;;  %v2807_v50 = vsel %vm2762_vm2, %v9234_v19, -inf }
 0x40f   : > { %v2808_v45 = vmax.f32 %v2800_v14, %v2807_v50 }
 0x415   : > { %v9236_v34 = vpop.f32.mrf.mxu1 }
 0x416   : > { %11783 = vst [vmem:[#allocation82_spill] sm:$0xff] %v9236_v34  ;;  %v2809_v38 = vsel %vm2762_vm2, %v9236_v34, -inf }
 0x417   : > { %v2810_v1 = vmax.f32 %v2802_v63, %v2809_v38 }
 0x41d   : > { %v9238_v7 = vpop.f32.mrf.mxu1 }
 0x41e   : > { %11784 = vst [vmem:[#allocation83_spill] sm:$0xff] %v9238_v7  ;;  %v2811_v28 = vsel %vm2762_vm2, %v9238_v7, -inf }
 0x41f   : > { %v2812_v48 = vmax.f32 %v2804_v53, %v2811_v28 }
 0x425   : > { %v9240_v49 = vpop.f32.mrf.mxu1 }
 0x426   : > { %11785 = vst [vmem:[#allocation84_spill] sm:$0xff] %v9240_v49  ;;  %v2813_v12 = vsel %vm2762_vm2, %v9240_v49, -inf }
 0x427   : > { %v2814_v31 = vmax.f32 %v2806_v44, %v2813_v12 }
 0x42d   : > { %v9242_v39 = vpop.f32.mrf.mxu1 }
 0x42e   : > { %11786 = vst [vmem:[#allocation85_spill] sm:$0xff] %v9242_v39  ;;  %v2815_v2 = vsel %vm2762_vm2, %v9242_v39, -inf }
 0x42f   : > { %v2816_v36 = vmax.f32 %v2808_v45, %v2815_v2 }
 0x435   : > { %v9244_v4 = vpop.f32.mrf.mxu1 }
 0x436   : > { %11787 = vst [vmem:[#allocation86_spill] sm:$0xff] %v9244_v4  ;;  %v2817_v46 = vsel %vm2762_vm2, %v9244_v4, -inf }
 0x437   : > { %v2818_v60 = vmax.f32 %v2810_v1, %v2817_v46 }
 0x439   : > { %v2823_v13 = vmax.f32 %v2816_v36, %v2818_v60 }
 0x43d   : > { %v9280_v35 = vpop.f32.mrf.mxu1 }
 0x43e   : > { %11788 = vst [vmem:[#allocation87_spill] sm:$0xff] %v9280_v35  ;;  %v2819_v29 = vsel %vm2762_vm2, %v9280_v35, -inf }
 0x43f   : > { %v2820_v42 = vmax.f32 %v2812_v48, %v2819_v29 }
 0x445   : > { %v9310_v30 = vpop.f32.mrf.mxu1 }
 0x446   : > { %11789 = vst [vmem:[#allocation88_spill] sm:$0xff] %v9310_v30  ;;  %v2821_v22 = vsel %vm2762_vm2, %v9310_v30, -inf }
 0x447   : > { %v2822_v59 = vmax.f32 %v2814_v31, %v2821_v22 }
 0x449   : > { %v2824_v63 = vmax.f32 %v2820_v42, %v2822_v59 }
 0x44b   : > { %v2825_v38 = vmax.f32 %v2823_v13, %v2824_v63 }
 0x44d   : > { %2826 = vmax.xlane.f32.xlu0 %v2825_v38 }
 0x4c0   : > { %v2827_v11 = vpop.xlane.xlu0 %2826 }
 0x4c1   : > { %v2828_v15 = vrot.slane %v2827_v11, 4 }
 0x4c3   : > { %v2829_v43 = vmax.f32 %v2827_v11, %v2828_v15 }
 0x4c5   : > { %v2830_v5 = vrot.slane %v2829_v43, 2 }
 0x4c7   : > { %v2831_v50 = vmax.f32 %v2829_v43, %v2830_v5 }
 0x4c9   : > { %v2832_v28 = vrot.slane %v2831_v50, 1 }
 0x4cb   : > { %v2833_v14 = vmax.f32 %v2831_v50, %v2832_v28 }
 0x4cd   : > { %7683 = vpush %v2833_v14 }
 0x4fe   : > { %s7684_s22 = spop %7683 }
 0x4ff   : > { %v9314_v12 = vstv %s7684_s22 }
 0x500   : > { %v2836_v46 = vsub.f32 %v9069_v9, %v9314_v12  ;;  %v2837_v36 = vsub.f32 %v9079_v37, %v9314_v12  ;;  %v2839_v53 = vsub.f32 %v9099_v23, %v9314_v12  ;;  %v2840_v5 = vsub.f32 %v9109_v32, %v9314_v12 }
 0x501   : > { %v2838_v29 = vsub.f32 %v9089_v33, %v9314_v12  ;;  %v2845_v45 = vsub.f32 %v9159_v58, %v9314_v12  ;;  %v2842_v13 = vsub.f32 %v9129_v56, %v9314_v12  ;;  %v2841_v63 = vsub.f32 %v9119_v26, %v9314_v12 }
 0x502   : > { %v2874_v44 = vmul.f32 1.442695, %v2839_v53  ;;  %v2868_v1 = vmul.f32 1.442695, %v2836_v46  ;;  %v2870_v2 = vmul.f32 1.442695, %v2837_v36  ;;  %v2848_v38 = vsub.f32 %v9189_v27, %v9314_v12 }
 0x503   : > { %v2876_v48 = vmul.f32 1.442695, %v2840_v5  ;;  %v2872_v31 = vmul.f32 1.442695, %v2838_v29  ;;  %v2886_v22 = vmul.f32 1.442695, %v2845_v45  ;;  %v2844_v46 = vsub.f32 %v9149_v0, %v9314_v12 }
 0x504   : > { %7706 = vpow2.f32 %v2874_v44  ;;  %v2880_v11 = vmul.f32 1.442695, %v2842_v13  ;;  %v2878_v15 = vmul.f32 1.442695, %v2841_v63  ;;  %v2892_v50 = vmul.f32 1.442695, %v2848_v38 }
 0x505   : > { %7708 = vpow2.f32 %v2870_v2  ;;  %v2843_v36 = vsub.f32 %v9139_v24, %v9314_v12  ;;  %v2851_v53 = vsub.f32 %v9216_v16, %v9314_v12  ;;  %v2884_v44 = vmul.f32 1.442695, %v2844_v46 }
 0x506   : > { %7710 = vpow2.f32 %v2868_v1  ;;  %v2850_v46 = vsub.f32 %v9209_v8, %v9314_v12 }
 0x507   : > { %7712 = vpow2.f32 %v2876_v48  ;;  %v2882_v1 = vmul.f32 1.442695, %v2843_v36  ;;  %v2898_v5 = vmul.f32 1.442695, %v2851_v53  ;;  %v2847_v48 = vsub.f32 %v9179_v20, %v9314_v12 }
 0x508   : > { %7714 = vpow2.f32 %v2872_v31  ;;  %v2846_v31 = vsub.f32 %v9169_v54, %v9314_v12  ;;  %v2849_v36 = vsub.f32 %v9199_v21, %v9314_v12  ;;  %v2857_v53 = vsub.f32 %v9228_v52, %v9314_v12 }
 0x509   : > { %7716 = vpow2.f32 %v2886_v22  ;;  %v2854_v22 = vsub.f32 %v9222_v18, %v9314_v12  ;;  %v2890_v13 = vmul.f32 1.442695, %v2847_v48 }
 0x50a   : > { %v9328_v60 = vpop.eup %7706  ;;  %7718 = vpow2.f32 %v2880_v11  ;;  %v2888_v63 = vmul.f32 1.442695, %v2846_v31  ;;  %v2910_v48 = vmul.f32 1.442695, %v2857_v53 }
 0x50b   : > { %v9330_v42 = vpop.eup %7708  ;;  %2970 = vrot.lane.b32.xlu2 %v9328_v60, %s7985_s23  ;;  %7720 = vpow2.f32 %v2878_v15  ;;  %v2904_v11 = vmul.f32 1.442695, %v2854_v22 }
 0x50c   : > { %v9334_v59 = vpop.eup %7710  ;;  %2966 = vrot.lane.b32.xlu1 %v9330_v42, %s7985_s23  ;;  %7722 = vpow2.f32 %v2892_v50 }
 0x50d   : > { %2964 = vrot.lane.b32.xlu0 %v9334_v59, %s7985_s23  ;;  %v9346_v43 = vpop.eup %7712  ;;  %7724 = vpow2.f32 %v2884_v44  ;;  %v2896_v44 = vmul.f32 1.442695, %v2850_v46 }
 0x50e   : > { %v9348_v28 = vpop.eup %7714  ;;  %7726 = vpow2.f32 %v2882_v1  ;;  %v2894_v1 = vmul.f32 1.442695, %v2849_v36 }
 0x50f   : > { %v9352_v14 = vpop.eup %7716  ;;  %7728 = vpow2.f32 %v2898_v5 }
 0x510   : > { %v9364_v2 = vpop.eup %7718  ;;  %7730 = vpow2.f32 %v2890_v13  ;;  %v2853_v13 = vsub.f32 %v9220_v47, %v9314_v12 }
 0x511   : > { %v9366_v29 = vpop.eup %7720  ;;  %7732 = vpow2.f32 %v2888_v63  ;;  %v2852_v63 = vsub.f32 %v9218_v61, %v9314_v12 }
 0x512   : > { %v9370_v45 = vpop.eup %7722  ;;  %7734 = vpow2.f32 %v2904_v11  ;;  %v2860_v11 = vsub.f32 %v9234_v19, %v9314_v12  ;;  %v2902_v46 = vmul.f32 1.442695, %v2853_v13  ;;  %v2863_v13 = vsub.f32 %v9240_v49, %v9314_v12 }
 0x513   : > { %2972 = vrot.lane.b32.xlu2 %v9346_v43, %s7985_s23  ;;  %v9382_v38 = vpop.eup %7724  ;;  %7736 = vpow2.f32 %v2896_v44  ;;  %v2900_v36 = vmul.f32 1.442695, %v2852_v63 }
 0x514   : > { %2968 = vrot.lane.b32.xlu1 %v9348_v28, %s7985_s23  ;;  %v9384_v15 = vpop.eup %7726  ;;  %7738 = vpow2.f32 %v2894_v1  ;;  %v2916_v3 = vmul.f32 1.442695, %v2860_v11  ;;  %v2856_v1 = vsub.f32 %v9226_v51, %v9314_v12  ;;  %v2922_v55 = vmul.f32 1.442695, %v2863_v13 }
 0x515   : > { %2982 = vrot.lane.b32.xlu0 %v9352_v14, %s7985_s23  ;;  %v9388_v50 = vpop.eup %7728  ;;  %7740 = vpow2.f32 %v2910_v48  ;;  %v2855_v48 = vsub.f32 %v9224_v57, %v9314_v12 }
 0x516   : > { %v9400_v5 = vpop.eup %7730  ;;  %7742 = vpow2.f32 %v2902_v46  ;;  %v2908_v63 = vmul.f32 1.442695, %v2856_v1  ;;  %v2866_v1 = vsub.f32 %v9280_v35, %v9314_v12 }
 0x517   : > { %v9402_v31 = vpop.eup %7732  ;;  %7744 = vpow2.f32 %v2900_v36  ;;  %v2906_v11 = vmul.f32 1.442695, %v2855_v48  ;;  %v2859_v36 = vsub.f32 %v9232_v17, %v9314_v12 }
 0x518   : > { %v9406_v22 = vpop.eup %7734  ;;  %7746 = vpow2.f32 %v2916_v3  ;;  %v2858_v3 = vsub.f32 %v9230_v40, %v9314_v12  ;;  %v2928_v10 = vmul.f32 1.442695, %v2866_v1 }
 0x519   : > { %v9418_v53 = vpop.eup %7736  ;;  %7748 = vpow2.f32 %v2908_v63  ;;  %v2914_v48 = vmul.f32 1.442695, %v2859_v36 }
 0x51a   : > { %v9420_v44 = vpop.eup %7738  ;;  %7750 = vpow2.f32 %v2906_v11  ;;  %v2912_v13 = vmul.f32 1.442695, %v2858_v3  ;;  %v2862_v11 = vsub.f32 %v9238_v7, %v9314_v12  ;;  %v2865_v7 = vsub.f32 %v9244_v4, %v9314_v12 }
 0x51b   : > { %2976 = vrot.lane.b32.xlu2 %v9364_v2, %s7985_s23  ;;  %v9424_v62 = vpop.eup %7740  ;;  %7752 = vpow2.f32 %v2922_v55  ;;  %v2861_v55 = vsub.f32 %v9236_v34, %v9314_v12 }
 0x51c   : > { %2974 = vrot.lane.b32.xlu1 %v9366_v29, %s7985_s23  ;;  %v9436_v41 = vpop.eup %7742  ;;  %7754 = vpow2.f32 %v2914_v48  ;;  %v2920_v36 = vmul.f32 1.442695, %v2862_v11 }
 0x51d   : > { %2988 = vrot.lane.b32.xlu0 %v9370_v45, %s7985_s23  ;;  %v9438_v46 = vpop.eup %7744  ;;  %7756 = vpow2.f32 %v2912_v13  ;;  %v2918_v3 = vmul.f32 1.442695, %v2861_v55  ;;  %v2926_v13 = vmul.f32 1.442695, %v2865_v7 }
 0x51e   : > { %v9442_v25 = vpop.eup %7746  ;;  %7758 = vpow2.f32 %v2928_v10  ;;  %v2864_v10 = vsub.f32 %v9242_v39, %v9314_v12 }
 0x51f   : > { %v9454_v6 = vpop.eup %7748  ;;  %7760 = vpow2.f32 %v2920_v36  ;;  %v2867_v36 = vsub.f32 %v9310_v30, %v9314_v12 }
 0x520   : > { %v9456_v63 = vpop.eup %7750  ;;  %7762 = vpow2.f32 %v2918_v3  ;;  %v2924_v11 = vmul.f32 1.442695, %v2864_v10 }
 0x521   : > { %v9460_v49 = vpop.eup %7752  ;;  %7764 = vpow2.f32 %v2926_v13  ;;  %v2930_v3 = vmul.f32 1.442695, %v2867_v36 }
 0x522   : > { %v9470_v1 = vpop.eup %7754  ;;  %7766 = vpow2.f32 %v2924_v11 }
 0x523   : > { %2980 = vrot.lane.b32.xlu2 %v9382_v38, %s7985_s23  ;;  %v9472_v35 = vpop.eup %7756  ;;  %7768 = vpow2.f32 %v2930_v3 }
 0x524   : > { %2978 = vrot.lane.b32.xlu1 %v9384_v15, %s7985_s23  ;;  %v9476_v48 = vpop.eup %7758 }
 0x525   : > { %2994 = vrot.lane.b32.xlu0 %v9388_v50, %s7985_s23  ;;  %v9486_v55 = vpop.eup %7760 }
 0x526   : > { %v9488_v19 = vpop.eup %7762 }
 0x527   : > { %v9496_v4 = vpop.eup %7764 }
 0x528   : > { %v9498_v7 = vpop.eup %7766 }
 0x529   : > { %v9504_v10 = vpop.eup %7768 }
 0x52b   : > { %2986 = vrot.lane.b32.xlu2 %v9400_v5, %s7985_s23 }
 0x52c   : > { %2984 = vrot.lane.b32.xlu1 %v9402_v31, %s7985_s23 }
 0x52d   : > { %3000 = vrot.lane.b32.xlu0 %v9406_v22, %s7985_s23 }
 0x533   : > { %2992 = vrot.lane.b32.xlu2 %v9418_v53, %s7985_s23 }
 0x534   : > { %2990 = vrot.lane.b32.xlu1 %v9420_v44, %s7985_s23 }
 0x535   : > { %3006 = vrot.lane.b32.xlu0 %v9424_v62, %s7985_s23 }
 0x53b   : > { %2998 = vrot.lane.b32.xlu2 %v9436_v41, %s7985_s23 }
 0x53c   : > { %2996 = vrot.lane.b32.xlu1 %v9438_v46, %s7985_s23 }
 0x53d   : > { %3012 = vrot.lane.b32.xlu0 %v9442_v25, %s7985_s23 }
 0x543   : > { %3004 = vrot.lane.b32.xlu2 %v9454_v6, %s7985_s23 }
 0x544   : > { %3002 = vrot.lane.b32.xlu1 %v9456_v63, %s7985_s23 }
 0x545   : > { %3018 = vrot.lane.b32.xlu0 %v9460_v49, %s7985_s23 }
 0x54b   : > { %3010 = vrot.lane.b32.xlu2 %v9470_v1, %s7985_s23 }
 0x54c   : > { %3008 = vrot.lane.b32.xlu1 %v9472_v35, %s7985_s23 }
 0x54d   : > { %3024 = vrot.lane.b32.xlu0 %v9476_v48, %s7985_s23 }
 0x553   : > { %3016 = vrot.lane.b32.xlu2 %v9486_v55, %s7985_s23 }
 0x554   : > { %3014 = vrot.lane.b32.xlu1 %v9488_v19, %s7985_s23 }
 0x55b   : > { %3022 = vrot.lane.b32.xlu2 %v9496_v4, %s7985_s23 }
 0x55c   : > { %3020 = vrot.lane.b32.xlu1 %v9498_v7, %s7985_s23 }
 0x564   : > { %3026 = vrot.lane.b32.xlu1 %v9504_v10, %s7985_s23 }
 0x565   : > { %v2971_v13 = vpop.permute.xlu2 %2970 }
 0x566   : > { %v3066_v18 = vsel %vm3060_vm3, %v2971_v13, 0.0 }
 0x56d   : > { %v2973_v12 = vpop.permute.xlu2 %2972 }
 0x56e   : > { %v3068_v61 = vsel %vm3060_vm3, %v2973_v12, 0.0 }
 0x575   : > { %v2977_v11 = vpop.permute.xlu2 %2976 }
 0x57d   : > { %v2981_v3 = vpop.permute.xlu2 %2980 }
 0x57e   : > { %v2967_v36 = vpop.permute.xlu1 %2966 }
 0x57f   : > { %v2965_v30 = vpop.permute.xlu0 %2964  ;;  %v3062_v39 = vsel %vm3060_vm3, %v2967_v36, 0.0 }
 0x580   : > { %v3061_v34 = vsel %vm3060_vm3, %v2965_v30, 0.0  ;;  %v3072_v30 = vsel %vm3060_vm3, %v2977_v11, 0.0 }
 0x581   : > { %v3063_v17 = vadd.f32 %v3062_v39, %v3061_v34 }
 0x585   : > { %v2987_v27 = vpop.permute.xlu2 %2986 }
 0x586   : > { %v2969_v52 = vpop.permute.xlu1 %2968 }
 0x587   : > { %v3064_v40 = vsel %vm3060_vm3, %v2969_v52, 0.0  ;;  %v2983_v47 = vpop.permute.xlu0 %2982 }
 0x588   : > { %v3065_v51 = vadd.f32 %v3064_v40, %v3063_v17  ;;  %v3076_v17 = vsel %vm3060_vm3, %v2981_v3, 0.0  ;;  %v3078_v13 = vsel %vm3060_vm3, %v2983_v47, 0.0 }
 0x58a   : > { %v3067_v57 = vadd.f32 %v3066_v18, %v3065_v51 }
 0x58c   : > { %v3069_v21 = vadd.f32 %v3068_v61, %v3067_v57 }
 0x58d   : > { %v2993_v51 = vpop.permute.xlu2 %2992 }
 0x58e   : > { %v2975_v16 = vpop.permute.xlu1 %2974 }
 0x58f   : > { %v3070_v8 = vsel %vm3060_vm3, %v2975_v16, 0.0  ;;  %v2989_v34 = vpop.permute.xlu0 %2988 }
 0x590   : > { %v3071_v36 = vadd.f32 %v3070_v8, %v3069_v21  ;;  %v3082_v8 = vsel %vm3060_vm3, %v2987_v27, 0.0  ;;  %v3084_v11 = vsel %vm3060_vm3, %v2989_v34, 0.0 }
 0x592   : > { %v3073_v20 = vadd.f32 %v3072_v30, %v3071_v36 }
 0x595   : > { %v2999_v36 = vpop.permute.xlu2 %2998 }
 0x596   : > { %v2979_v39 = vpop.permute.xlu1 %2978  ;;  %v3094_v34 = vsel %vm3060_vm3, %v2999_v36, 0.0 }
 0x597   : > { %v3074_v52 = vsel %vm3060_vm3, %v2979_v39, 0.0  ;;  %v2995_v61 = vpop.permute.xlu0 %2994 }
 0x598   : > { %v3075_v40 = vadd.f32 %v3074_v52, %v3073_v20  ;;  %v3088_v52 = vsel %vm3060_vm3, %v2993_v51, 0.0 }
 0x59a   : > { %v3077_v18 = vadd.f32 %v3076_v17, %v3075_v40  ;;  %v3090_v17 = vsel %vm3060_vm3, %v2995_v61, 0.0 }
 0x59c   : > { %v3079_v54 = vadd.f32 %v3078_v13, %v3077_v18 }
 0x59d   : > { %v3005_v27 = vpop.permute.xlu2 %3004 }
 0x59e   : > { %v2985_v12 = vpop.permute.xlu1 %2984 }
 0x59f   : > { %v3080_v16 = vsel %vm3060_vm3, %v2985_v12, 0.0  ;;  %v3001_v47 = vpop.permute.xlu0 %3000 }
 0x5a0   : > { %v3081_v21 = vadd.f32 %v3080_v16, %v3079_v54 }
 0x5a2   : > { %v3083_v57 = vadd.f32 %v3082_v8, %v3081_v21  ;;  %v3096_v8 = vsel %vm3060_vm3, %v3001_v47, 0.0 }
 0x5a4   : > { %v3085_v20 = vadd.f32 %v3084_v11, %v3083_v57 }
 0x5a5   : > { %v3011_v61 = vpop.permute.xlu2 %3010 }
 0x5a6   : > { %v2991_v30 = vpop.permute.xlu1 %2990 }
 0x5a7   : > { %v3086_v3 = vsel %vm3060_vm3, %v2991_v30, 0.0  ;;  %v3007_v21 = vpop.permute.xlu0 %3006 }
 0x5a8   : > { %v3087_v39 = vadd.f32 %v3086_v3, %v3085_v20  ;;  %v3100_v20 = vsel %vm3060_vm3, %v3005_v27, 0.0 }
 0x5aa   : > { %v3089_v40 = vadd.f32 %v3088_v52, %v3087_v39  ;;  %v3102_v39 = vsel %vm3060_vm3, %v3007_v21, 0.0 }
 0x5ac   : > { %v3091_v13 = vadd.f32 %v3090_v17, %v3089_v40 }
 0x5ae   : > { %v2997_v18 = vpop.permute.xlu1 %2996 }
 0x5af   : > { %v3092_v54 = vsel %vm3060_vm3, %v2997_v18, 0.0  ;;  %v3013_v52 = vpop.permute.xlu0 %3012 }
 0x5b0   : > { %v3093_v12 = vadd.f32 %v3092_v54, %v3091_v13  ;;  %v3106_v13 = vsel %vm3060_vm3, %v3011_v61, 0.0  ;;  %v3017_v54 = vpop.permute.xlu2 %3016 }
 0x5b1   : > { %v3112_v21 = vsel %vm3060_vm3, %v3017_v54, 0.0 }
 0x5b2   : > { %v3095_v16 = vadd.f32 %v3094_v34, %v3093_v12  ;;  %v3108_v12 = vsel %vm3060_vm3, %v3013_v52, 0.0 }
 0x5b4   : > { %v3097_v11 = vadd.f32 %v3096_v8, %v3095_v16 }
 0x5b6   : > { %v3003_v57 = vpop.permute.xlu1 %3002 }
 0x5b7   : > { %v3098_v51 = vsel %vm3060_vm3, %v3003_v57, 0.0  ;;  %v3019_v8 = vpop.permute.xlu0 %3018 }
 0x5b8   : > { %v3099_v30 = vadd.f32 %v3098_v51, %v3097_v11  ;;  %v3114_v51 = vsel %vm3060_vm3, %v3019_v8, 0.0 }
 0x5ba   : > { %v3101_v3 = vadd.f32 %v3100_v20, %v3099_v30  ;;  %v3023_v30 = vpop.permute.xlu2 %3022 }
 0x5bc   : > { %v3103_v17 = vadd.f32 %v3102_v39, %v3101_v3 }
 0x5be   : > { %v3009_v40 = vpop.permute.xlu1 %3008 }
 0x5bf   : > { %v3104_v36 = vsel %vm3060_vm3, %v3009_v40, 0.0  ;;  %v3118_v40 = vsel %vm3060_vm3, %v3023_v30, 0.0  ;;  %v3025_v52 = vpop.permute.xlu0 %3024  ;;  %v7986_v30 = vmov 8  }
 0x5c0   : > { %v3105_v18 = vadd.f32 %v3104_v36, %v3103_v17  ;;  %v3120_v36 = vsel %vm3060_vm3, %v3025_v52, 0.0  ;;  %7703 = vset.pattern.permute.xlu2 %v7986_v30  ;;  %7702 = vset.pattern.permute.xlu1 %v7986_v30 }
 0x5c1   : > { %7701 = vset.pattern.permute.xlu0 %v7986_v30 }
 0x5c2   : > { %v3107_v47 = vadd.f32 %v3106_v13, %v3105_v18 }
 0x5c4   : > { %v3109_v16 = vadd.f32 %v3108_v12, %v3107_v47  ;;  %v3443_v12 = vld [vmem:[%s11497_s4] sm:$0xf] }
 0x5c6   : > { %v3015_v34 = vpop.permute.xlu1 %3014 }
 0x5c7   : > { %v3110_v27 = vsel %vm3060_vm3, %v3015_v34, 0.0  ;;  %v3450_v34 = vsel %vm3448_vm4, %v3443_v12, 0 }
 0x5c8   : > { %v3111_v57 = vadd.f32 %v3110_v27, %v3109_v16  ;;  %3459 = vmatpush.bf16.msra.mxu2 %v3450_v34 }
 0x5ca   : > { %v3113_v11 = vadd.f32 %v3112_v21, %v3111_v57 }
 0x5cc   : > { %v3115_v3 = vadd.f32 %v3114_v51, %v3113_v11 }
 0x5ce   : > { %v3021_v20 = vpop.permute.xlu1 %3020 }
 0x5cf   : > { %v3116_v61 = vsel %vm3060_vm3, %v3021_v20, 0.0 }
 0x5d0   : > { %v3117_v39 = vadd.f32 %v3116_v61, %v3115_v3 }
 0x5d2   : > { %v3119_v17 = vadd.f32 %v3118_v40, %v3117_v39 }
 0x5d4   : > { %v3121_v13 = vadd.f32 %v3120_v36, %v3119_v17 }
 0x5d6   : > { %v3027_v18 = vpop.permute.xlu1 %3026 }
 0x5d7   : > { %v3122_v47 = vsel %vm3060_vm3, %v3027_v18, 0.0 }
 0x5d8   : > { %v3123_v54 = vadd.f32 %v3122_v47, %v3121_v13 }
 0x5da   : > { %3124 = vadd.xlane.f32.xlu2 %v3123_v54 }
 0x64d   : > { %v3125_v16 = vpop.xlane.xlu2 %3124 }
 0x64e   : > { %v3126_v27 = vrot.slane %v3125_v16, 4 }
 0x650   : > { %v3127_v8 = vadd.f32 %v3126_v27, %v3125_v16 }
 0x652   : > { %v3128_v57 = vrot.slane %v3127_v8, 2 }
 0x654   : > { %v3129_v21 = vadd.f32 %v3128_v57, %v3127_v8 }
 0x656   : > { %v3130_v11 = vrot.slane %v3129_v21, 1 }
 0x658   : > { %v3131_v51 = vadd.f32 %v3130_v11, %v3129_v21 }
 0x65a   : > { %7685 = vpush %v3131_v51 }
 0x68b   : > { %s7686_s28 = spop %7685 }
 0x68c   : > { %v3133_v20 = vstv %s7686_s28  ;;  %s7989_s28 = smov 8  }
 0x68d   : > { %7770 = vrcp.f32 %v3133_v20  ;;  %v3145_v40 = vand.u32 2147483648, %v3133_v20  ;;  %v3143_v17 = vand.u32 2147483647, %v3133_v20  ;;  %vm3139_vm6 = vweird.f32 %v3133_v20 }
 0x68f   : > { %v3146_v18 = vor.u32 1.1754944e-38, %v3145_v40  ;;  %vm3144_vm8 = vcmp.eq.f32.partialorder %v3143_v17, 8.507059e+37 }
 0x693   : > { %v7771_v3 = vpop.eup %7770 }
 0x694   : > { %v3135_v61 = vmul.f32 %v7771_v3, %v3133_v20  ;;  %vm3140_vm5 = vweird.f32 %v7771_v3 }
 0x695   : > { %vm3141_vm7 = vmor %vm3139_vm6, %vm3140_vm5  ;;  %vm3814_vm6 = vcmask 130112  }
 0x696   : > { %v3136_v39 = vsub.f32 1.0, %v3135_v61 }
 0x698   : > { %v3137_v52 = vmul.f32 %v7771_v3, %v3136_v39 }
 0x69a   : > { %v3138_v36 = vadd.f32 %v7771_v3, %v3137_v52 }
 0x69c   : > { %v3142_v13 = vsel %vm3141_vm7, %v7771_v3, %v3138_v36 }
 0x69d   : > { %v9543_v47 = vsel %vm3144_vm8, %v3146_v18, %v3142_v13 }
 0x69e   : > { %v3157_v54 = vmul.f32 %v9352_v14, %v9543_v47  ;;  %v3149_v12 = vmul.f32 %v9330_v42, %v9543_v47  ;;  %v3148_v34 = vmul.f32 %v9334_v59, %v9543_v47  ;;  %v3164_v16 = vmul.f32 %v9438_v46, %v9543_v47 }
 0x69f   : > { %v3150_v27 = vmul.f32 %v9348_v28, %v9543_v47  ;;  %v3151_v8 = vmul.f32 %v9328_v60, %v9543_v47  ;;  %v3167_v42 = vmul.f32 %v9456_v63, %v9543_v47  ;;  %v3152_v59 = vmul.f32 %v9346_v43, %v9543_v47 }
 0x6a0   : > { %3227 = vperm.xlu2 %7703, %v3157_v54   ;;  %3187 = vperm.xlu1 %7702, %v3149_v12   ;;  %v3153_v14 = vmul.f32 %v9366_v29, %v9543_v47  ;;  %v3170_v28 = vmul.f32 %v9472_v35, %v9543_v47  ;;  %v3154_v60 = vmul.f32 %v9364_v2, %v9543_v47 }
 0x6a1   : > { %3182 = vperm.xlu0 %7701, %v3148_v34   ;;  %v3155_v46 = vmul.f32 %v9384_v15, %v9543_v47  ;;  %v3173_v43 = vmul.f32 %v9488_v19, %v9543_v47  ;;  %v3156_v29 = vmul.f32 %v9382_v38, %v9543_v47  ;;  %v3158_v63 = vmul.f32 %v9402_v31, %v9543_v47 }
 0x6a2   : > { %v3176_v35 = vmul.f32 %v9498_v7, %v9543_v47  ;;  %v3159_v2 = vmul.f32 %v9400_v5, %v9543_v47  ;;  %v3160_v15 = vmul.f32 %v9370_v45, %v9543_v47  ;;  %v3179_v19 = vmul.f32 %v9504_v10, %v9543_v47 }
 0x6a3   : > { %v3161_v38 = vmul.f32 %v9420_v44, %v9543_v47  ;;  %v3162_v31 = vmul.f32 %v9418_v53, %v9543_v47  ;;  %v3163_v5 = vmul.f32 %v9388_v50, %v9543_v47  ;;  %v3165_v45 = vmul.f32 %v9436_v41, %v9543_v47 }
 0x6a4   : > { %v3166_v7 = vmul.f32 %v9406_v22, %v9543_v47  ;;  %v3168_v44 = vmul.f32 %v9454_v6, %v9543_v47  ;;  %v3169_v53 = vmul.f32 %v9424_v62, %v9543_v47  ;;  %v3171_v10 = vmul.f32 %v9470_v1, %v9543_v47 }
 0x6a5   : > { %v3172_v41 = vmul.f32 %v9442_v25, %v9543_v47  ;;  %v3174_v50 = vmul.f32 %v9486_v55, %v9543_v47  ;;  %v3175_v6 = vmul.f32 %v9460_v49, %v9543_v47  ;;  %v3177_v22 = vmul.f32 %v9496_v4, %v9543_v47 }
 0x6a6   : > { %v3178_v62 = vmul.f32 %v9476_v48, %v9543_v47 }
 0x6a8   : > { %3262 = vperm.xlu2 %7703, %v3164_v16   ;;  %3192 = vperm.xlu1 %7702, %v3150_v27  }
 0x6a9   : > { %3197 = vperm.xlu0 %7701, %v3151_v8  }
 0x6b0   : > { %3277 = vperm.xlu2 %7703, %v3167_v42   ;;  %3202 = vperm.xlu1 %7702, %v3152_v59  }
 0x6b1   : > { %3207 = vperm.xlu0 %7701, %v3153_v14  }
 0x6b8   : > { %3292 = vperm.xlu2 %7703, %v3170_v28   ;;  %3212 = vperm.xlu1 %7702, %v3154_v60  }
 0x6b9   : > { %3217 = vperm.xlu0 %7701, %v3155_v46   ;;  %v11790_v46 = vld [vmem:[#allocation64_spill] sm:$0xff] }
 0x6c0   : > { %3307 = vperm.xlu2 %7703, %v3173_v43   ;;  %3222 = vperm.xlu1 %7702, %v3156_v29  }
 0x6c1   : > { %3232 = vperm.xlu0 %7701, %v3158_v63  }
 0x6c8   : > { %3322 = vperm.xlu2 %7703, %v3176_v35   ;;  %3237 = vperm.xlu1 %7702, %v3159_v2  }
 0x6c9   : > { %3242 = vperm.xlu0 %7701, %v3160_v15  }
 0x6d0   : > { %3337 = vperm.xlu2 %7703, %v3179_v19   ;;  %3247 = vperm.xlu1 %7702, %v3161_v38   ;;  %v11792_v38 = vld [vmem:[#allocation68_spill] sm:$0xff] }
 0x6d1   : > { %3252 = vperm.xlu0 %7701, %v3162_v31  }
 0x6d8   : > { %3257 = vperm.xlu1 %7702, %v3163_v5  }
 0x6d9   : > { %3267 = vperm.xlu0 %7701, %v3165_v45   ;;  %v11793_v45 = vld [vmem:[#allocation35_spill] sm:$0xff] }
 0x6e0   : > { %3272 = vperm.xlu1 %7702, %v3166_v7  }
 0x6e1   : > { %3282 = vperm.xlu0 %7701, %v3168_v44  }
 0x6e8   : > { %3287 = vperm.xlu1 %7702, %v3169_v53  }
 0x6e9   : > { %3297 = vperm.xlu0 %7701, %v3171_v10  }
 0x6f0   : > { %3302 = vperm.xlu1 %7702, %v3172_v41  }
 0x6f1   : > { %3312 = vperm.xlu0 %7701, %v3174_v50   ;;  %v11794_v50 = vld [vmem:[#allocation71_spill] sm:$0xff] }
 0x6f8   : > { %3317 = vperm.xlu1 %7702, %v3175_v6  }
 0x6f9   : > { %3327 = vperm.xlu0 %7701, %v3177_v22  }
 0x6fa   : > { %v3228_v8 = vpop.permute.xlu2 %3227 }
 0x6fb   : > { %v3349_v59 = vmul.f32 %v3228_v8, %v9159_v58 }
 0x6fd   : > { %v3390_v60 = vsel %vm3372_vm9, %v3349_v59, 0.0 }
 0x700   : > { %3332 = vperm.xlu1 %7702, %v3178_v62  }
 0x712   : > { %v3188_v1 = vpop.permute.xlu1 %3187 }
 0x713   : > { %v3183_v57 = vpop.permute.xlu0 %3182  ;;  %v3341_v55 = vmul.f32 %v3188_v1, %v9079_v37 }
 0x714   : > { %v3340_v11 = vmul.f32 %v3183_v57, %v9069_v9  ;;  %v11795_v57 = vld [vmem:[#allocation73_spill] sm:$0xff] }
 0x715   : > { %v3374_v49 = vsel %vm3372_vm9, %v3341_v55, 0.0  ;;  %v11796_v55 = vld [vmem:[#allocation72_spill] sm:$0xff] }
 0x716   : > { %v3373_v4 = vsel %vm3372_vm9, %v3340_v11, 0.0 }
 0x717   : > { %v3375_v3 = vadd.f32 %v3374_v49, %v3373_v4 }
 0x71a   : > { %v3193_v25 = vpop.permute.xlu1 %3192 }
 0x71b   : > { %v3198_v21 = vpop.permute.xlu0 %3197  ;;  %v3342_v51 = vmul.f32 %v3193_v25, %v9089_v33 }
 0x71c   : > { %v3343_v61 = vmul.f32 %v3198_v21, %v9099_v23 }
 0x71d   : > { %v3376_v20 = vsel %vm3372_vm9, %v3342_v51, 0.0 }
 0x71e   : > { %v3377_v40 = vadd.f32 %v3376_v20, %v3375_v3  ;;  %v3378_v37 = vsel %vm3372_vm9, %v3343_v61, 0.0 }
 0x720   : > { %v3379_v33 = vadd.f32 %v3378_v37, %v3377_v40  ;;  %v11798_v37 = vld [vmem:[#allocation76_spill] sm:$0xff] }
 0x722   : > { %v3203_v30 = vpop.permute.xlu1 %3202 }
 0x723   : > { %v3208_v48 = vpop.permute.xlu0 %3207  ;;  %v3344_v39 = vmul.f32 %v3203_v30, %v9109_v32 }
 0x724   : > { %v3345_v17 = vmul.f32 %v3208_v48, %v9119_v26  ;;  %v11797_v48 = vld [vmem:[#allocation74_spill] sm:$0xff] }
 0x725   : > { %v3380_v9 = vsel %vm3372_vm9, %v3344_v39, 0.0 }
 0x726   : > { %v3381_v13 = vadd.f32 %v3380_v9, %v3379_v33  ;;  %v3382_v47 = vsel %vm3372_vm9, %v3345_v17, 0.0 }
 0x728   : > { %v3383_v23 = vadd.f32 %v3382_v47, %v3381_v13 }
 0x72a   : > { %v3213_v52 = vpop.permute.xlu1 %3212 }
 0x72b   : > { %v3346_v36 = vmul.f32 %v3213_v52, %v9129_v56  ;;  %v3218_v18 = vpop.permute.xlu0 %3217  ;;  %v11799_v52 = vld [vmem:[#allocation75_spill] sm:$0xff] }
 0x72c   : > { %v3347_v32 = vmul.f32 %v3218_v18, %v9139_v24  ;;  %v11791_v24 = vld [vmem:[#allocation65_spill] sm:$0xff] }
 0x72d   : > { %v3384_v54 = vsel %vm3372_vm9, %v3346_v36, 0.0 }
 0x72e   : > { %v3385_v12 = vadd.f32 %v3384_v54, %v3383_v23  ;;  %v3386_v42 = vsel %vm3372_vm9, %v3347_v32, 0.0  ;;  %v11800_v23 = vld [vmem:[#allocation77_spill] sm:$0xff] }
 0x730   : > { %v3387_v56 = vadd.f32 %v3386_v42, %v3385_v12  ;;  %v11802_v42 = vld [vmem:[#allocation78_spill] sm:$0xff] }
 0x732   : > { %v3223_v34 = vpop.permute.xlu1 %3222 }
 0x733   : > { %v3348_v16 = vmul.f32 %v3223_v34, %v9149_v0  ;;  %v3233_v27 = vpop.permute.xlu0 %3232  ;;  %v3263_v0 = vpop.permute.xlu2 %3262 }
 0x734   : > { %v3350_v43 = vmul.f32 %v3233_v27, %v11790_v46  ;;  %v3356_v25 = vmul.f32 %v3263_v0, %v11795_v57 }
 0x735   : > { %v3388_v26 = vsel %vm3372_vm9, %v3348_v16, 0.0  ;;  %v11801_v16 = vld [vmem:[#allocation79_spill] sm:$0xff] }
 0x736   : > { %v3389_v14 = vadd.f32 %v3388_v26, %v3387_v56  ;;  %v3392_v2 = vsel %vm3372_vm9, %v3350_v43, 0.0  ;;  %v3404_v20 = vsel %vm3372_vm9, %v3356_v25, 0.0  ;;  %v11803_v43 = vld [vmem:[#allocation80_spill] sm:$0xff] }
 0x738   : > { %v3391_v35 = vadd.f32 %v3390_v60, %v3389_v14 }
 0x73a   : > { %v3238_v28 = vpop.permute.xlu1 %3237  ;;  %v3393_v19 = vadd.f32 %v3392_v2, %v3391_v35  ;;  %v11804_v35 = vld [vmem:[#allocation82_spill] sm:$0xff] }
 0x73b   : > { %v3351_v29 = vmul.f32 %v3238_v28, %v11791_v24  ;;  %v3243_v63 = vpop.permute.xlu0 %3242  ;;  %v3278_v22 = vpop.permute.xlu2 %3277 }
 0x73c   : > { %v3352_v31 = vmul.f32 %v3243_v63, %v11792_v38  ;;  %v3359_v9 = vmul.f32 %v3278_v22, %v11798_v37 }
 0x73d   : > { %v3394_v15 = vsel %vm3372_vm9, %v3351_v29, 0.0 }
 0x73e   : > { %v3395_v5 = vadd.f32 %v3394_v15, %v3393_v19  ;;  %v3396_v53 = vsel %vm3372_vm9, %v3352_v31, 0.0  ;;  %v3410_v54 = vsel %vm3372_vm9, %v3359_v9, 0.0  ;;  %v11805_v15 = vld [vmem:[#allocation81_spill] sm:$0xff] }
 0x740   : > { %v3397_v41 = vadd.f32 %v3396_v53, %v3395_v5 }
 0x742   : > { %v3248_v58 = vpop.permute.xlu1 %3247 }
 0x743   : > { %v3353_v7 = vmul.f32 %v3248_v58, %v11793_v45  ;;  %v3253_v44 = vpop.permute.xlu0 %3252  ;;  %v3293_v39 = vpop.permute.xlu2 %3292 }
 0x744   : > { %v3354_v6 = vmul.f32 %v3253_v44, %v11794_v50  ;;  %v3362_v27 = vmul.f32 %v3293_v39, %v11801_v16  ;;  %v11806_v44 = vld [vmem:[#allocation83_spill] sm:$0xff]  ;;  %v11807_v50 = vld [vmem:[#allocation85_spill] sm:$0xff] }
 0x745   : > { %v3398_v10 = vsel %vm3372_vm9, %v3353_v7, 0.0  ;;  %v11811_v39 = vld [vmem:[#allocation87_spill] sm:$0xff]  ;;  %v3444_v16 = vld [vmem:[%s11498_s5] sm:$0x1] }
 0x746   : > { %v3399_v62 = vadd.f32 %v3398_v10, %v3397_v41  ;;  %v3400_v21 = vsel %vm3372_vm9, %v3354_v6, 0.0  ;;  %v3416_v46 = vsel %vm3372_vm9, %v3362_v27, 0.0 }
 0x748   : > { %v3401_v49 = vadd.f32 %v3400_v21, %v3399_v62  ;;  %v11808_v62 = vld [vmem:[#allocation84_spill] sm:$0xff] }
 0x74a   : > { %v3258_v1 = vpop.permute.xlu1 %3257 }
 0x74b   : > { %v3355_v11 = vmul.f32 %v3258_v1, %v11796_v55  ;;  %v3268_v51 = vpop.permute.xlu0 %3267  ;;  %v3308_v59 = vpop.permute.xlu2 %3307 }
 0x74c   : > { %v3357_v3 = vmul.f32 %v3268_v51, %v11797_v48  ;;  %v3365_v0 = vmul.f32 %v3308_v59, %v11804_v35  ;;  %v11809_v51 = vld [vmem:[#allocation86_spill] sm:$0xff]  ;;  %v11810_v48 = vld [vmem:[#allocation88_spill] sm:$0xff] }
 0x74d   : > { %v3402_v4 = vsel %vm3372_vm9, %v3355_v11, 0.0 }
 0x74e   : > { %v3403_v30 = vadd.f32 %v3402_v4, %v3401_v49  ;;  %v3406_v33 = vsel %vm3372_vm9, %v3357_v3, 0.0  ;;  %v3422_v7 = vsel %vm3372_vm9, %v3365_v0, 0.0 }
 0x750   : > { %v3405_v61 = vadd.f32 %v3404_v20, %v3403_v30 }
 0x752   : > { %v3273_v40 = vpop.permute.xlu1 %3272  ;;  %v3407_v18 = vadd.f32 %v3406_v33, %v3405_v61 }
 0x753   : > { %v3358_v17 = vmul.f32 %v3273_v40, %v11799_v52  ;;  %v3283_v36 = vpop.permute.xlu0 %3282  ;;  %v3323_v58 = vpop.permute.xlu2 %3322 }
 0x754   : > { %v3360_v32 = vmul.f32 %v3283_v36, %v11800_v23  ;;  %v3368_v6 = vmul.f32 %v3323_v58, %v11807_v50 }
 0x755   : > { %v3408_v13 = vsel %vm3372_vm9, %v3358_v17, 0.0 }
 0x756   : > { %v3409_v47 = vadd.f32 %v3408_v13, %v3407_v18  ;;  %v3412_v8 = vsel %vm3372_vm9, %v3360_v32, 0.0  ;;  %v3428_v11 = vsel %vm3372_vm9, %v3368_v6, 0.0 }
 0x758   : > { %v3411_v12 = vadd.f32 %v3410_v54, %v3409_v47 }
 0x75a   : > { %v3288_v34 = vpop.permute.xlu1 %3287  ;;  %v3413_v14 = vadd.f32 %v3412_v8, %v3411_v12  ;;  %v3501_v12 = vld [vmem:[%s11501_s8] sm:$0x1] }
 0x75b   : > { %v3361_v26 = vmul.f32 %v3288_v34, %v11802_v42  ;;  %v3298_v56 = vpop.permute.xlu0 %3297  ;;  %v3338_v4 = vpop.permute.xlu2 %3337  ;;  %v3509_v34 = vsel %vm3507_vm10, %v3501_v12, 0 }
 0x75c   : > { %v3363_v24 = vmul.f32 %v3298_v56, %v11803_v43  ;;  %v3371_v3 = vmul.f32 %v3338_v4, %v11810_v48  ;;  %3518 = vmatpush.bf16.msra.mxu3 %v3509_v34  ;;  %v7987_v56 = vmov 2.0   ;;  %v11818_v34 = vld [vmem:[#allocation36_spill] sm:$0xff] }
 0x75d   : > { %v3414_v28 = vsel %vm3372_vm9, %v3361_v26, 0.0  ;;  %7772 = vrcp.f32 %v7987_v56 }
 0x75e   : > { %v3415_v60 = vadd.f32 %v3414_v28, %v3413_v14  ;;  %v3418_v2 = vsel %vm3372_vm9, %v3363_v24, 0.0  ;;  %v3434_v52 = vsel %vm3372_vm9, %v3371_v3, 0.0 }
 0x760   : > { %v3417_v29 = vadd.f32 %v3416_v46, %v3415_v60 }
 0x762   : > { %v3303_v63 = vpop.permute.xlu1 %3302  ;;  %v3419_v31 = vadd.f32 %v3418_v2, %v3417_v29 }
 0x763   : > { %v3364_v19 = vmul.f32 %v3303_v63, %v11805_v15  ;;  %v3313_v38 = vpop.permute.xlu0 %3312  ;;  %v7773_v59 = vpop.eup %7772 }
 0x764   : > { %v3366_v53 = vmul.f32 %v3313_v38, %v11806_v44  ;;  %v3470_v14 = vmul.f32 2.0, %v7773_v59  ;;  %vm3474_vm12 = vweird.f32 %v7773_v59  ;;  %v3495_v44 = vld [vmem:[%s11499_s6] sm:$0x1] }
 0x765   : > { %v3420_v5 = vsel %vm3372_vm9, %v3364_v19, 0.0 }
 0x766   : > { %v3421_v45 = vadd.f32 %v3420_v5, %v3419_v31  ;;  %v3424_v22 = vsel %vm3372_vm9, %v3366_v53, 0.0  ;;  %v3471_v28 = vsub.f32 1.0, %v3470_v14 }
 0x768   : > { %v3423_v10 = vadd.f32 %v3422_v7, %v3421_v45  ;;  %v3472_v60 = vmul.f32 %v7773_v59, %v3471_v28 }
 0x76a   : > { %v3318_v41 = vpop.permute.xlu1 %3317  ;;  %v3425_v57 = vadd.f32 %v3424_v22, %v3423_v10  ;;  %v3473_v46 = vadd.f32 %v7773_v59, %v3472_v60 }
 0x76b   : > { %v3367_v1 = vmul.f32 %v3318_v41, %v11808_v62  ;;  %v3328_v25 = vpop.permute.xlu0 %3327  ;;  %v3497_v41 = vld [vmem:[%s11500_s7] sm:$0x1] }
 0x76c   : > { %v3369_v49 = vmul.f32 %v3328_v25, %v11809_v51  ;;  %v3475_v43 = vsel %vm3474_vm12, %v7773_v59, %v3473_v46  ;;  %v11823_v59 = vld [vmem:[#allocation37_spill] sm:$0xff] }
 0x76d   : > { %v3426_v21 = vsel %vm3372_vm9, %v3367_v1, 0.0  ;;  %v3502_v1 = vld [vmem:[%s11502_s9] sm:$0x1]  ;;  %v11824_v14 = vmax.f32 %v11823_v59, 0.0 }
 0x76e   : > { %v3427_v55 = vadd.f32 %v3426_v21, %v3425_v57  ;;  %v3430_v61 = vsel %vm3372_vm9, %v3369_v49, 0.0  ;;  %v11826_v46 = vld [vmem:[#allocation41_spill] sm:$0xff] }
 0x770   : > { %v3429_v30 = vadd.f32 %v3428_v11, %v3427_v55  ;;  %v7673_v11 = vld [vmem:[%s11503_s10] sm:$0xff] }
 0x771   : > { %3655 = vmatpush.bf16.msrb.mxu2 %v7673_v11 }
 0x772   : > { %v3333_v20 = vpop.permute.xlu1 %3332  ;;  %v3431_v37 = vadd.f32 %v3430_v61, %v3429_v30 }
 0x773   : > { %v3370_v40 = vmul.f32 %v3333_v20, %v11811_v39 }
 0x775   : > { %v3432_v9 = vsel %vm3372_vm9, %v3370_v40, 0.0 }
 0x776   : > { %v3433_v33 = vadd.f32 %v3432_v9, %v3431_v37 }
 0x778   : > { %v3435_v17 = vadd.f32 %v3434_v52, %v3433_v33  ;;  %v11812_v52 = vld [vmem:[#allocation31_spill] sm:$0xff] }
 0x77a   : > { %v3436_v36 = vrot.slane %v3435_v17, 4 }
 0x77c   : > { %v3437_v18 = vadd.f32 %v3436_v36, %v3435_v17  ;;  %v11813_v17 = vmax.f32 %v11812_v52, 0.0 }
 0x77e   : > { %v3438_v13 = vrot.slane %v3437_v18, 2 }
 0x780   : > { %v3439_v47 = vadd.f32 %v3438_v13, %v3437_v18  ;;  %v11814_v18 = vld [vmem:[#allocation34_spill] sm:$0xff] }
 0x781   : > { %v11815_v13 = vmax.f32 %v11814_v18, 0.0 }
 0x782   : > { %v3440_v54 = vrot.slane %v3439_v47, 1 }
 0x784   : > { %v3441_v23 = vadd.f32 %v3440_v54, %v3439_v47 }
 0x786   : > { %v3442_v32 = vpack.c.bf16 %v3441_v23, %v3441_v23  ;;  %v11816_v23 = vld [vmem:[#allocation38_spill] sm:$0xff] }
 0x788   : > { %7408 = vmatmul.msk.bf16.vlgmr.msra.gmra.mxu2 %vm3372_vm9, %v3442_v32  ;;  %v11817_v32 = vmax.f32 %v11816_v23, 0.0 }
 0x80b   : > { %v3461_v27 = vpop.f32.mrf.mxu2 }
 0x80c   : > { %v3462_v8 = vadd.f32 %v3461_v27, %v3444_v16  ;;  %v11819_v16 = vmax.f32 %v11818_v34, 0.0 }
 0x80e   : > { %v3466_v42 = vsel %vm3465_vm11, %v3462_v8, 0.0 }
 0x80f   : > { %3467 = vadd.xlane.f32.xlu0 %v3466_v42  ;;  %v11821_v42 = vld [vmem:[#allocation42_spill] sm:$0xff] }
 0x813   : > { %v3463_v26 = vpop.f32.mrf.mxu2 }
 0x814   : > { %v11822_v26 = vmax.f32 %v11821_v42, 0.0  ;;  %v11868_v42 = vld [vmem:[#allocation56_spill] sm:$0xff] }
 0x882   : > { %v3468_v24 = vpop.xlane.xlu0 %3467 }
 0x883   : > { %v3476_v29 = vmul.f32 %v3475_v43, %v3468_v24 }
 0x885   : > { %v3477_v63 = vsub.f32 %v3462_v8, %v3476_v29  ;;  %v11829_v29 = vld [vmem:[#allocation45_spill] sm:$0xff] }
 0x887   : > { %v3478_v35 = vmul.f32 %v3477_v63, %v3477_v63 }
 0x889   : > { %v3479_v0 = vsel %vm3465_vm11, %v3478_v35, 0.0 }
 0x88a   : > { %3480 = vadd.xlane.f32.xlu1 %v3479_v0 }
 0x8fd   : > { %v3481_v2 = vpop.xlane.xlu1 %3480 }
 0x8fe   : > { %v3482_v15 = vmul.f32 %v3481_v2, %v3475_v43  ;;  %v11827_v43 = vmax.f32 %v11826_v46, 0.0  ;;  %v11832_v2 = vld [vmem:[#allocation43_spill] sm:$0xff] }
 0x900   : > { %v3483_v19 = vadd.f32 1e-05, %v3482_v15  ;;  %v11833_v15 = vmax.f32 %v11832_v2, 0.0 }
 0x902   : > { %7774 = vrsqrt.f32 %v3483_v19  ;;  %vm3490_vm14 = vweird.f32 %v3483_v19 }
 0x908   : > { %v7775_v38 = vpop.eup %7774 }
 0x909   : > { %v3485_v31 = vmul.f32 %v7775_v38, %v3483_v19  ;;  %vm3491_vm13 = vweird.f32 %v7775_v38 }
 0x90a   : > { %vm3492_vm15 = vmor %vm3490_vm14, %vm3491_vm13 }
 0x90b   : > { %v3486_v5 = vmul.f32 %v7775_v38, %v3485_v31 }
 0x90d   : > { %v3487_v58 = vmul.f32 0.5, %v3486_v5 }
 0x90f   : > { %v3488_v45 = vsub.f32 1.5, %v3487_v58 }
 0x911   : > { %v3489_v7 = vmul.f32 %v7775_v38, %v3488_v45  ;;  %v11838_v45 = vld [vmem:[#allocation44_spill] sm:$0xff] }
 0x913   : > { %v3493_v53 = vsel %vm3492_vm15, %v7775_v38, %v3489_v7  ;;  %v11835_v38 = vld [vmem:[#allocation47_spill] sm:$0xff]  ;;  %v11839_v7 = vmax.f32 %v11838_v45, 0.0 }
 0x914   : > { %v3494_v10 = vmul.f32 %v3493_v53, %v3477_v63  ;;  %v11830_v63 = vmax.f32 %v11829_v29, 0.0  ;;  %v11836_v31 = vmax.f32 %v11835_v38, 0.0  ;;  %v11841_v53 = vld [vmem:[#allocation46_spill] sm:$0xff]  ;;  %v11877_v38 = vld [vmem:[#allocation59_spill] sm:$0xff] }
 0x916   : > { %v3496_v50 = vmul.f32 %v3495_v44, %v3494_v10  ;;  %v11842_v10 = vmax.f32 %v11841_v53, 0.0 }
 0x918   : > { %v3498_v6 = vadd.f32 %v3497_v41, %v3496_v50 }
 0x91a   : > { %v3499_v22 = vmax.f32 %v3498_v6, 0.0  ;;  %v11844_v6 = vld [vmem:[#allocation48_spill] sm:$0xff] }
 0x91c   : > { %v3500_v62 = vpack.c.bf16 %v3499_v22, %v3499_v22  ;;  %v11845_v22 = vmax.f32 %v11844_v6, 0.0 }
 0x91e   : > { %7409 = vmatmul.msk.bf16.vlgmr.msra.gmra.mxu3 %vm3503_vm1, %v3500_v62 }
 0x9a1   : > { %v3520_v57 = vpop.f32.mrf.mxu3 }
 0x9a2   : > { %v3521_v25 = vadd.f32 %v3520_v57, %v3502_v1  ;;  %v11847_v1 = vld [vmem:[#allocation49_spill] sm:$0xff] }
 0x9a3   : > { %v11848_v57 = vmax.f32 %v11847_v1, 0.0 }
 0x9a4   : > { %v7410_v21 = vmul.f32 -1.442695, %v3521_v25 }
 0x9a6   : > { %7776 = vpow2.f32 %v7410_v21 }
 0x9a9   : > { %v3522_v55 = vpop.f32.mrf.mxu3 }
 0x9aa   : > { %v11850_v55 = vld [vmem:[#allocation50_spill] sm:$0xff] }
 0x9ab   : > { %v11851_v11 = vmax.f32 %v11850_v55, 0.0 }
 0x9ac   : > { %v7777_v51 = vpop.eup %7776 }
 0x9ad   : > { %v3527_v49 = vadd.f32 1.0, %v7777_v51 }
 0x9af   : > { %7778 = vrcp.f32 %v3527_v49  ;;  %v3539_v48 = vand.u32 2147483648, %v3527_v49  ;;  %v3537_v61 = vand.u32 2147483647, %v3527_v49  ;;  %vm3533_vm3 = vweird.f32 %v3527_v49 }
 0x9b1   : > { %v3540_v40 = vor.u32 1.1754944e-38, %v3539_v48  ;;  %vm3538_vm5 = vcmp.eq.f32.partialorder %v3537_v61, 8.507059e+37  ;;  %v11856_v48 = vld [vmem:[#allocation52_spill] sm:$0xff] }
 0x9b5   : > { %v7779_v4 = vpop.eup %7778 }
 0x9b6   : > { %v3529_v30 = vmul.f32 %v7779_v4, %v3527_v49  ;;  %vm3534_vm2 = vweird.f32 %v7779_v4  ;;  %v11853_v49 = vld [vmem:[#allocation51_spill] sm:$0xff] }
 0x9b7   : > { %vm3535_vm4 = vmor %vm3533_vm3, %vm3534_vm2 }
 0x9b8   : > { %v3530_v20 = vsub.f32 1.0, %v3529_v30 }
 0x9ba   : > { %v3531_v3 = vmul.f32 %v7779_v4, %v3530_v20 }
 0x9bc   : > { %v3532_v39 = vadd.f32 %v7779_v4, %v3531_v3  ;;  %v11857_v3 = vmax.f32 %v11856_v48, 0.0  ;;  %v11889_v48 = vld [vmem:[#allocation63_spill] sm:$0xff] }
 0x9be   : > { %v3536_v37 = vsel %vm3535_vm4, %v7779_v4, %v3532_v39  ;;  %v11854_v4 = vmax.f32 %v11853_v49, 0.0  ;;  %v11859_v39 = vld [vmem:[#allocation53_spill] sm:$0xff]  ;;  %v11886_v49 = vld [vmem:[#allocation62_spill] sm:$0xff] }
 0x9bf   : > { %v3541_v9 = vsel %vm3538_vm5, %v3540_v40, %v3536_v37  ;;  %v11860_v40 = vmax.f32 %v11859_v39, 0.0 }
 0x9c0   : > { %v9694_v33 = vperm.slane %v3541_v9, 0 }
 0x9c2   : > { %v9699_v36 = vmul.f32 %v9694_v33, %v11813_v17  ;;  %v9704_v47 = vmul.f32 %v9694_v33, %v11815_v13  ;;  %v9712_v12 = vmul.f32 %v9694_v33, %v11817_v32  ;;  %v9717_v27 = vmul.f32 %v9694_v33, %v11819_v16  ;;  %v11862_v17 = vld [vmem:[#allocation54_spill] sm:$0xff] }
 0x9c3   : > { %v9725_v56 = vmul.f32 %v9694_v33, %v11822_v26  ;;  %v9730_v28 = vmul.f32 %v9694_v33, %v11824_v14  ;;  %v9738_v24 = vmul.f32 %v9694_v33, %v11827_v43  ;;  %v9743_v35 = vmul.f32 %v9694_v33, %v11830_v63  ;;  %v11871_v14 = vld [vmem:[#allocation57_spill] sm:$0xff] }
 0x9c4   : > { %v3576_v54 = vpack.c.bf16 %v9704_v47, %v9699_v36  ;;  %11820 = vst [vmem:[#allocation64_spill] sm:$0xff] %v9717_v27  ;;  %v3577_v8 = vpack.c.bf16 %v9717_v27, %v9712_v12  ;;  %v9751_v19 = vmul.f32 %v9694_v33, %v11833_v15  ;;  %v9756_v5 = vmul.f32 %v9694_v33, %v11836_v31 }
 0x9c5   : > { %11825 = vst [vmem:[#allocation65_spill] sm:$0xff] %v9730_v28  ;;  %v3578_v60 = vpack.c.bf16 %v9730_v28, %v9725_v56  ;;  %v3579_v0 = vpack.c.bf16 %v9743_v35, %v9738_v24  ;;  %v9764_v44 = vmul.f32 %v9694_v33, %v11839_v7  ;;  %v9769_v41 = vmul.f32 %v9694_v33, %v11842_v10  ;;  %v11880_v10 = vld [vmem:[#allocation60_spill] sm:$0xff] }
 0x9c6   : > { %7415 = vmatmul.msk.bf16.vlgmr.msrb.gmra.mxu2 %vm474_vm0, %v3576_v54  ;;  %11828 = vst [vmem:[#allocation68_spill] sm:$0xff] %v9738_v24  ;;  %v3580_v58 = vpack.c.bf16 %v9756_v5, %v9751_v19  ;;  %v9777_v62 = vmul.f32 %v9694_v33, %v11845_v22  ;;  %v9782_v25 = vmul.f32 %v9694_v33, %v11848_v57  ;;  %v11863_v18 = vmax.f32 %v11862_v17, 0.0  ;;  %v11865_v54 = vld [vmem:[#allocation55_spill] sm:$0xff]  ;;  %v11883_v22 = vld [vmem:[#allocation61_spill] sm:$0xff] }
 0x9c7   : > { %11831 = vst [vmem:[#allocation35_spill] sm:$0xff] %v9743_v35  ;;  %v3581_v50 = vpack.c.bf16 %v9769_v41, %v9764_v44  ;;  %v9790_v51 = vmul.f32 %v9694_v33, %v11851_v11  ;;  %v9795_v30 = vmul.f32 %v9694_v33, %v11854_v4  ;;  %v9803_v61 = vmul.f32 %v9694_v33, %v11857_v3 }
 0x9c8   : > { %11834 = vst [vmem:[#allocation71_spill] sm:$0xff] %v9751_v19  ;;  %v3582_v21 = vpack.c.bf16 %v9782_v25, %v9777_v62  ;;  %v9808_v37 = vmul.f32 %v9694_v33, %v11860_v40  ;;  %v9818_v13 = vmul.f32 %v9694_v33, %v11863_v18  ;;  %v11866_v23 = vmax.f32 %v11865_v54, 0.0  ;;  %v11892_v18 = vld [vmem:[#allocation66_spill] sm:$0xff] }
 0x9c9   : > { %11837 = vst [vmem:[#allocation73_spill] sm:$0xff] %v9756_v5  ;;  %v3583_v20 = vpack.c.bf16 %v9795_v30, %v9790_v51  ;;  %v11869_v26 = vmax.f32 %v11868_v42, 0.0  ;;  %v11878_v31 = vmax.f32 %v11877_v38, 0.0  ;;  %v11884_v1 = vmax.f32 %v11883_v22, 0.0 }
 0x9ca   : > { %11840 = vst [vmem:[#allocation72_spill] sm:$0xff] %v9764_v44  ;;  %v3584_v9 = vpack.c.bf16 %v9808_v37, %v9803_v61  ;;  %v9823_v32 = vmul.f32 %v9694_v33, %v11866_v23  ;;  %v11887_v4 = vmax.f32 %v11886_v49, 0.0  ;;  %v11890_v3 = vmax.f32 %v11889_v48, 0.0 }
 0x9cb   : > { %11843 = vst [vmem:[#allocation74_spill] sm:$0xff] %v9769_v41  ;;  %v9835_v59 = vmul.f32 %v9694_v33, %v11869_v26  ;;  %v9874_v57 = vmul.f32 %v9694_v33, %v11884_v1  ;;  %v11893_v54 = vmax.f32 %v11892_v18, 0.0 }
 0x9cc   : > { %11846 = vst [vmem:[#allocation76_spill] sm:$0xff] %v9777_v62  ;;  %v3585_v16 = vpack.c.bf16 %v9823_v32, %v9818_v13  ;;  %v9891_v39 = vmul.f32 %v9694_v33, %v11890_v3 }
 0x9cd   : > { %11849 = vst [vmem:[#allocation75_spill] sm:$0xff] %v9782_v25  ;;  %v9903_v23 = vmul.f32 %v9694_v33, %v11893_v54 }
 0x9ce   : > { %11852 = vst [vmem:[#allocation77_spill] sm:$0xff] %v9790_v51 }
 0x9cf   : > { %11855 = vst [vmem:[#allocation79_spill] sm:$0xff] %v9795_v30 }
 0x9d0   : > { %11858 = vst [vmem:[#allocation78_spill] sm:$0xff] %v9803_v61 }
 0x9d1   : > { %11861 = vst [vmem:[#allocation80_spill] sm:$0xff] %v9808_v37 }
 0x9d2   : > { %11864 = vst [vmem:[#allocation82_spill] sm:$0xff] %v9818_v13 }
 0x9d3   : > { %11867 = vst [vmem:[#allocation81_spill] sm:$0xff] %v9823_v32 }
 0x9d4   : > { %11870 = vst [vmem:[#allocation83_spill] sm:$0xff] %v9835_v59 }
 0x9d5   : > { %11885 = vst [vmem:[#allocation87_spill] sm:$0xff] %v9874_v57 }
 0x9d6   : > { %7416 = vmatmul.msk.bf16.gmra.mxu2 %vm474_vm0, %v3577_v8  ;;  %11891 = vst [vmem:[#allocation34_spill] sm:$0xff] %v9891_v39 }
 0x9d7   : > { %11894 = vst [vmem:[#allocation38_spill] sm:$0xff] %v9903_v23 }
 0x9e6   : > { %7417 = vmatmul.msk.bf16.gmra.mxu2 %vm474_vm0, %v3578_v60  ;;  %v11872_v60 = vmax.f32 %v11871_v14, 0.0 }
 0x9e8   : > { %v9840_v46 = vmul.f32 %v9694_v33, %v11872_v60 }
 0x9ea   : > { %11873 = vst [vmem:[#allocation85_spill] sm:$0xff] %v9840_v46  ;;  %v3586_v29 = vpack.c.bf16 %v9840_v46, %v9835_v59 }
 0x9f6   : > { %7418 = vmatmul.msk.bf16.gmra.mxu2 %vm474_vm0, %v3579_v0  ;;  %v11874_v0 = vld [vmem:[#allocation58_spill] sm:$0xff] }
 0x9f7   : > { %v11875_v2 = vmax.f32 %v11874_v0, 0.0  ;;  %v11898_v0 = vld [vmem:[#allocation69_spill] sm:$0xff] }
 0x9f9   : > { %v9852_v15 = vmul.f32 %v9694_v33, %v11875_v2  ;;  %v11899_v2 = vmax.f32 %v11898_v0, 0.0 }
 0x9fb   : > { %11876 = vst [vmem:[#allocation84_spill] sm:$0xff] %v9852_v15  ;;  %v9920_v38 = vmul.f32 %v9694_v33, %v11899_v2 }
 0x9fd   : > { %11900 = vst [vmem:[#allocation42_spill] sm:$0xff] %v9920_v38 }
 0xa06   : > { %7419 = vmatmul.msk.bf16.gmra.mxu2 %vm474_vm0, %v3580_v58  ;;  %v9857_v58 = vmul.f32 %v9694_v33, %v11878_v31  ;;  %v11901_v31 = vld [vmem:[#allocation70_spill] sm:$0xff] }
 0xa08   : > { %11879 = vst [vmem:[#allocation86_spill] sm:$0xff] %v9857_v58  ;;  %v3587_v7 = vpack.c.bf16 %v9857_v58, %v9852_v15 }
 0xa16   : > { %7420 = vmatmul.msk.bf16.gmra.mxu2 %vm474_vm0, %v3581_v50  ;;  %v11881_v50 = vmax.f32 %v11880_v10, 0.0 }
 0xa18   : > { %v9869_v6 = vmul.f32 %v9694_v33, %v11881_v50 }
 0xa1a   : > { %11882 = vst [vmem:[#allocation88_spill] sm:$0xff] %v9869_v6  ;;  %v3588_v55 = vpack.c.bf16 %v9874_v57, %v9869_v6 }
 0xa26   : > { %7421 = vmatmul.msk.bf16.gmra.mxu2 %vm474_vm0, %v3582_v21 }
 0xa36   : > { %7422 = vmatmul.msk.bf16.gmra.mxu2 %vm474_vm0, %v3583_v20  ;;  %v9886_v20 = vmul.f32 %v9694_v33, %v11887_v4 }
 0xa38   : > { %11888 = vst [vmem:[#allocation31_spill] sm:$0xff] %v9886_v20 }
 0xa46   : > { %7423 = vmatmul.msk.bf16.gmra.mxu2 %vm474_vm0, %v3584_v9  ;;  %v3589_v9 = vpack.c.bf16 %v9891_v39, %v9886_v20 }
 0xa49   : > { %v9813_v52 = vpop.f32.mrf.mxu2 }
 0xa51   : > { %v9825_v34 = vpop.f32.mrf.mxu2 }
 0xa56   : > { %7424 = vmatmul.msk.bf16.gmra.mxu2 %vm474_vm0, %v3585_v16  ;;  %v11895_v16 = vld [vmem:[#allocation67_spill] sm:$0xff] }
 0xa57   : > { %v11896_v42 = vmax.f32 %v11895_v16, 0.0  ;;  %v3738_v16 = vsel %vm3372_vm9, %v9825_v34, 0.0 }
 0xa59   : > { %v9830_v8 = vpop.f32.mrf.mxu2  ;;  %v9908_v26 = vmul.f32 %v9694_v33, %v11896_v42  ;;  %v3737_v42 = vsel %vm3372_vm9, %v9813_v52, 0.0 }
 0xa5a   : > { %v3739_v0 = vadd.f32 %v3738_v16, %v3737_v42 }
 0xa5b   : > { %11897 = vst [vmem:[#allocation36_spill] sm:$0xff] %v9908_v26  ;;  %v3590_v60 = vpack.c.bf16 %v9908_v26, %v9903_v23 }
 0xa61   : > { %v9842_v43 = vpop.f32.mrf.mxu2 }
 0xa62   : > { %v3742_v2 = vsel %vm3372_vm9, %v9842_v43, 0.0 }
 0xa66   : > { %7425 = vmatmul.msk.bf16.gmra.mxu2 %vm474_vm0, %v3586_v29 }
 0xa69   : > { %v9847_v63 = vpop.f32.mrf.mxu2 }
 0xa71   : > { %v9859_v45 = vpop.f32.mrf.mxu2 }
 0xa76   : > { %7426 = vmatmul.msk.bf16.gmra.mxu2 %vm474_vm0, %v3587_v7  ;;  %v11902_v7 = vmax.f32 %v11901_v31, 0.0 }
 0xa78   : > { %v9925_v10 = vmul.f32 %v9694_v33, %v11902_v7 }
 0xa79   : > { %v9864_v53 = vpop.f32.mrf.mxu2 }
 0xa7a   : > { %11903 = vst [vmem:[#allocation37_spill] sm:$0xff] %v9925_v10  ;;  %v3591_v22 = vpack.c.bf16 %v9925_v10, %v9920_v38  ;;  %v3746_v38 = vsel %vm3372_vm9, %v9859_v45, 0.0  ;;  %v3748_v23 = vsel %vm3372_vm9, %v9864_v53, 0.0 }
 0xa81   : > { %v9876_v21 = vpop.f32.mrf.mxu2 }
 0xa82   : > { %v3750_v16 = vsel %vm3372_vm9, %v9876_v21, 0.0 }
 0xa86   : > { %7427 = vmatmul.msk.bf16.gmra.mxu2 %vm474_vm0, %v3588_v55 }
 0xa89   : > { %v9881_v11 = vpop.f32.mrf.mxu2 }
 0xa8a   : > { %v3827_v58 = vsel %vm3814_vm6, %v9881_v11, -inf }
 0xa91   : > { %v9893_v40 = vpop.f32.mrf.mxu2 }
 0xa92   : > { %v3829_v13 = vsel %vm3814_vm6, %v9893_v40, -inf }
 0xa96   : > { %7428 = vmatmul.msk.bf16.gmra.mxu2 %vm474_vm0, %v3589_v9 }
 0xa99   : > { %v9898_v17 = vpop.f32.mrf.mxu2 }
 0xa9a   : > { %v3831_v46 = vsel %vm3814_vm6, %v9898_v17, -inf }
 0xaa1   : > { %v9910_v14 = vpop.f32.mrf.mxu2 }
 0xaa6   : > { %7429 = vmatmul.msk.bf16.gmra.mxu2 %vm474_vm0, %v3590_v60  ;;  %v3740_v60 = vsel %vm3372_vm9, %v9830_v8, 0.0 }
 0xaa7   : > { %v3741_v31 = vadd.f32 %v3740_v60, %v3739_v0  ;;  %v3752_v60 = vsel %vm3372_vm9, %v9881_v11, 0.0 }
 0xaa9   : > { %v9915_v29 = vpop.f32.mrf.mxu2  ;;  %v3743_v10 = vadd.f32 %v3742_v2, %v3741_v31  ;;  %v3754_v2 = vsel %vm3372_vm9, %v9893_v40, 0.0 }
 0xab1   : > { %v9927_v50 = vpop.f32.mrf.mxu2 }
 0xab6   : > { %7430 = vmatmul.msk.bf16.gmra.mxu2 %vm474_vm0, %v3591_v22  ;;  %v3744_v22 = vsel %vm3372_vm9, %v9847_v63, 0.0 }
 0xab7   : > { %v3745_v26 = vadd.f32 %v3744_v22, %v3743_v10  ;;  %v3756_v10 = vsel %vm3372_vm9, %v9898_v17, 0.0 }
 0xab9   : > { %v9932_v1 = vpop.f32.mrf.mxu2  ;;  %v3747_v39 = vadd.f32 %v3746_v38, %v3745_v26  ;;  %v3758_v26 = vsel %vm3372_vm9, %v9910_v14, 0.0 }
 0xabb   : > { %v3749_v42 = vadd.f32 %v3748_v23, %v3747_v39  ;;  %v3760_v39 = vsel %vm3372_vm9, %v9915_v29, 0.0 }
 0xabd   : > { %v3751_v0 = vadd.f32 %v3750_v16, %v3749_v42  ;;  %v3762_v16 = vsel %vm3372_vm9, %v9927_v50, 0.0 }
 0xabf   : > { %v3753_v31 = vadd.f32 %v3752_v60, %v3751_v0  ;;  %v3764_v60 = vsel %vm3372_vm9, %v9932_v1, 0.0 }
 0xac1   : > { %v9934_v55 = vpop.f32.mrf.mxu2  ;;  %v3755_v22 = vadd.f32 %v3754_v2, %v3753_v31 }
 0xac2   : > { %v3766_v2 = vsel %vm3372_vm9, %v9934_v55, 0.0 }
 0xac3   : > { %v3757_v38 = vadd.f32 %v3756_v10, %v3755_v22 }
 0xac5   : > { %v3759_v23 = vadd.f32 %v3758_v26, %v3757_v38 }
 0xac7   : > { %v3761_v42 = vadd.f32 %v3760_v39, %v3759_v23 }
 0xac9   : > { %v9936_v49 = vpop.f32.mrf.mxu2  ;;  %v3763_v0 = vadd.f32 %v3762_v16, %v3761_v42 }
 0xaca   : > { %v3768_v10 = vsel %vm3372_vm9, %v9936_v49, 0.0 }
 0xacb   : > { %v3765_v31 = vadd.f32 %v3764_v60, %v3763_v0 }
 0xacd   : > { %v3767_v22 = vadd.f32 %v3766_v2, %v3765_v31 }
 0xacf   : > { %v3769_v38 = vadd.f32 %v3768_v10, %v3767_v22  ;;  %v3815_v22 = vsel %vm3814_vm6, %v9813_v52, -inf }
 0xad1   : > { %v9938_v4 = vpop.f32.mrf.mxu2 }
 0xad2   : > { %v3770_v26 = vsel %vm3372_vm9, %v9938_v4, 0.0 }
 0xad3   : > { %v3771_v23 = vadd.f32 %v3770_v26, %v3769_v38  ;;  %v3816_v26 = vsel %vm3814_vm6, %v9825_v34, -inf }
 0xad9   : > { %v9940_v48 = vpop.f32.mrf.mxu2 }
 0xada   : > { %v3772_v39 = vsel %vm3372_vm9, %v9940_v48, 0.0 }
 0xadb   : > { %v3773_v42 = vadd.f32 %v3772_v39, %v3771_v23  ;;  %v3819_v39 = vsel %vm3814_vm6, %v9847_v63, -inf  ;;  %v3821_v23 = vsel %vm3814_vm6, %v9859_v45, -inf }
 0xadc   : > { %v3820_v32 = vmax.f32 %v3815_v22, %v3819_v39  ;;  %v3822_v62 = vmax.f32 %v3816_v26, %v3821_v23  ;;  %v3837_v22 = vsel %vm3814_vm6, %v9927_v50, -inf  ;;  %v3839_v26 = vsel %vm3814_vm6, %v9932_v1, -inf }
 0xadd   : > { %v3841_v39 = vsel %vm3814_vm6, %v9934_v55, -inf }
 0xade   : > { %v3828_v25 = vmax.f32 %v3820_v32, %v3827_v58  ;;  %v3830_v5 = vmax.f32 %v3822_v62, %v3829_v13  ;;  %v3843_v32 = vsel %vm3814_vm6, %v9936_v49, -inf }
 0xae1   : > { %v9942_v3 = vpop.f32.mrf.mxu2 }
 0xae2   : > { %v3774_v16 = vsel %vm3372_vm9, %v9942_v3, 0.0 }
 0xae3   : > { %v3775_v0 = vadd.f32 %v3774_v16, %v3773_v42  ;;  %v3823_v16 = vsel %vm3814_vm6, %v9864_v53, -inf }
 0xae9   : > { %v9944_v33 = vpop.f32.mrf.mxu2 }
 0xaea   : > { %v3776_v60 = vsel %vm3372_vm9, %v9944_v33, 0.0 }
 0xaeb   : > { %v3777_v31 = vadd.f32 %v3776_v60, %v3775_v0  ;;  %v3817_v60 = vsel %vm3814_vm6, %v9830_v8, -inf  ;;  %v3818_v0 = vsel %vm3814_vm6, %v9842_v43, -inf }
 0xaec   : > { %v3824_v61 = vmax.f32 %v3817_v60, %v3823_v16 }
 0xaee   : > { %v3832_v44 = vmax.f32 %v3824_v61, %v3831_v46  ;;  %v3847_v61 = vsel %vm3814_vm6, %v9940_v48, -inf  ;;  %v3838_v46 = vmax.f32 %v3830_v5, %v3837_v22 }
 0xaf0   : > { %v3840_v58 = vmax.f32 %v3832_v44, %v3839_v26 }
 0xaf1   : > { %v9946_v9 = vpop.f32.mrf.mxu2 }
 0xaf2   : > { %v3778_v2 = vsel %vm3372_vm9, %v9946_v9, 0.0 }
 0xaf3   : > { %v3779_v38 = vadd.f32 %v3778_v2, %v3777_v31  ;;  %v3825_v2 = vsel %vm3814_vm6, %v9876_v21, -inf }
 0xaf4   : > { %v3826_v51 = vmax.f32 %v3818_v0, %v3825_v2 }
 0xaf9   : > { %v9948_v18 = vpop.f32.mrf.mxu2 }
 0xafa   : > { %v3780_v10 = vsel %vm3372_vm9, %v9948_v18, 0.0  ;;  %v3855_v5 = vsel %vm3814_vm6, %v9948_v18, -inf }
 0xafb   : > { %v3781_v31 = vadd.f32 %v3780_v10, %v3779_v38  ;;  %v3833_v10 = vsel %vm3814_vm6, %v9910_v14, -inf  ;;  %v3835_v38 = vsel %vm3814_vm6, %v9915_v29, -inf }
 0xafc   : > { %v3834_v16 = vmax.f32 %v3826_v51, %v3833_v10  ;;  %v3848_v10 = vmax.f32 %v3840_v58, %v3847_v61 }
 0xafe   : > { %v3842_v51 = vmax.f32 %v3834_v16, %v3841_v39 }
 0xb01   : > { %v9950_v54 = vpop.f32.mrf.mxu2 }
 0xb02   : > { %v3782_v42 = vsel %vm3372_vm9, %v9950_v54, 0.0  ;;  %v3857_v44 = vsel %vm3814_vm6, %v9950_v54, -inf }
 0xb03   : > { %v3783_v37 = vadd.f32 %v3782_v42, %v3781_v31  ;;  %v3836_v42 = vmax.f32 %v3828_v25, %v3835_v38 }
 0xb05   : > { %v3844_v0 = vmax.f32 %v3836_v42, %v3843_v32 }
 0xb09   : > { %v9960_v7 = vpop.f32.mrf.mxu2 }
 0xb0a   : > { %v3784_v30 = vsel %vm3372_vm9, %v9960_v7, 0.0  ;;  %v3859_v16 = vsel %vm3814_vm6, %v9960_v7, -inf }
 0xb0b   : > { %v3785_v35 = vadd.f32 %v3784_v30, %v3783_v37  ;;  %v3845_v30 = vsel %vm3814_vm6, %v9938_v4, -inf  ;;  %v3849_v37 = vsel %vm3814_vm6, %v9942_v3, -inf }
 0xb0c   : > { %v3846_v31 = vmax.f32 %v3838_v46, %v3845_v30  ;;  %v3850_v38 = vmax.f32 %v3842_v51, %v3849_v37  ;;  %v3856_v37 = vmax.f32 %v3848_v10, %v3855_v5 }
 0xb11   : > { %v9970_v20 = vpop.f32.mrf.mxu2 }
 0xb12   : > { %v3786_v41 = vsel %vm3372_vm9, %v9970_v20, 0.0  ;;  %v3861_v22 = vsel %vm3814_vm6, %v9970_v20, -inf }
 0xb13   : > { %v3787_v62 = vadd.f32 %v3786_v41, %v3785_v35  ;;  %v3851_v35 = vsel %vm3814_vm6, %v9944_v33, -inf  ;;  %v3853_v41 = vsel %vm3814_vm6, %v9946_v9, -inf }
 0xb14   : > { %v3852_v39 = vmax.f32 %v3844_v0, %v3851_v35 }
 0xb16   : > { %v3860_v51 = vmax.f32 %v3852_v39, %v3859_v16  ;;  %v7988_v16 = vmov 256.0  }
 0xb17   : > { %7780 = vrcp.f32 %v7988_v16 }
 0xb19   : > { %v9980_v6 = vpop.f32.mrf.mxu2 }
 0xb1a   : > { %v3788_v23 = vsel %vm3372_vm9, %v9980_v6, 0.0  ;;  %v3863_v32 = vsel %vm3814_vm6, %v9980_v6, -inf }
 0xb1b   : > { %v3789_v25 = vadd.f32 %v3788_v23, %v3787_v62  ;;  %v3854_v23 = vmax.f32 %v3846_v31, %v3853_v41  ;;  %v3864_v0 = vmax.f32 %v3856_v37, %v3863_v32 }
 0xb1d   : > { %v3862_v46 = vmax.f32 %v3854_v23, %v3861_v22 }
 0xb21   : > { %v9990_v57 = vpop.f32.mrf.mxu2 }
 0xb22   : > { %v3790_v13 = vsel %vm3372_vm9, %v9990_v57, 0.0  ;;  %v3865_v62 = vsel %vm3814_vm6, %v9990_v57, -inf }
 0xb23   : > { %v3791_v24 = vadd.f32 %v3790_v13, %v3789_v25  ;;  %v3858_v13 = vmax.f32 %v3850_v38, %v3857_v44 }
 0xb25   : > { %v3866_v35 = vmax.f32 %v3858_v13, %v3865_v62 }
 0xb29   : > { %v10000_v15 = vpop.f32.mrf.mxu2 }
 0xb2a   : > { %v3792_v2 = vsel %vm3372_vm9, %v10000_v15, 0.0 }
 0xb2b   : > { %v3793_v42 = vadd.f32 %v3792_v2, %v3791_v24  ;;  %v3867_v24 = vsel %vm3814_vm6, %v10000_v15, -inf }
 0xb2c   : > { %v3868_v38 = vmax.f32 %v3860_v51, %v3867_v24 }
 0xb31   : > { %v10026_v59 = vpop.f32.mrf.mxu2 }
 0xb32   : > { %v3794_v26 = vsel %vm3372_vm9, %v10026_v59, 0.0  ;;  %v3869_v30 = vsel %vm3814_vm6, %v10026_v59, -inf }
 0xb33   : > { %v3795_v58 = vadd.f32 %v3794_v26, %v3793_v42  ;;  %v3870_v41 = vmax.f32 %v3862_v46, %v3869_v30 }
 0xb35   : > { %v3875_v26 = vmax.f32 %v3868_v38, %v3870_v41 }
 0xb39   : > { %v10060_v60 = vpop.f32.mrf.mxu2 }
 0xb3a   : > { %v3796_v61 = vsel %vm3372_vm9, %v10060_v60, 0.0  ;;  %v3871_v25 = vsel %vm3814_vm6, %v10060_v60, -inf }
 0xb3b   : > { %v3797_v2 = vadd.f32 %v3796_v61, %v3795_v58  ;;  %v3872_v5 = vmax.f32 %v3864_v0, %v3871_v25  ;;  %v7781_v61 = vpop.eup %7780 }
 0xb3c   : > { %v3807_v13 = vmul.f32 256.0, %v7781_v61  ;;  %vm3811_vm7 = vweird.f32 %v7781_v61 }
 0xb3e   : > { %v3808_v19 = vsub.f32 1.0, %v3807_v13 }
 0xb41   : > { %v10090_v31 = vpop.f32.mrf.mxu2 }
 0xb42   : > { %v3798_v28 = vsel %vm3372_vm9, %v10090_v31, 0.0  ;;  %v3873_v10 = vsel %vm3814_vm6, %v10090_v31, -inf }
 0xb43   : > { %v3799_v44 = vadd.f32 %v3798_v28, %v3797_v2  ;;  %v3874_v22 = vmax.f32 %v3866_v35, %v3873_v10  ;;  %v3809_v28 = vmul.f32 %v7781_v61, %v3808_v19 }
 0xb45   : > { %v3876_v39 = vmax.f32 %v3872_v5, %v3874_v22  ;;  %v3800_v23 = vrot.slane %v3799_v44, 4  ;;  %v3810_v2 = vadd.f32 %v7781_v61, %v3809_v28 }
 0xb47   : > { %v3877_v42 = vmax.f32 %v3875_v26, %v3876_v39  ;;  %v3801_v62 = vadd.f32 %v3800_v23, %v3799_v44  ;;  %v3812_v22 = vsel %vm3811_vm7, %v7781_v61, %v3810_v2 }
 0xb49   : > { %v3878_v32 = vrot.slane %v3877_v42, 4  ;;  %v3802_v46 = vrot.slane %v3801_v62, 2 }
 0xb4b   : > { %v3879_v30 = vmax.f32 %v3877_v42, %v3878_v32  ;;  %v3803_v51 = vadd.f32 %v3802_v46, %v3801_v62 }
 0xb4d   : > { %v3880_v37 = vrot.slane %v3879_v30, 2  ;;  %v3804_v25 = vrot.slane %v3803_v51, 1 }
 0xb4f   : > { %v3881_v58 = vmax.f32 %v3879_v30, %v3880_v37  ;;  %v3805_v10 = vadd.f32 %v3804_v25, %v3803_v51 }
 0xb51   : > { %v3882_v27 = vrot.slane %v3881_v58, 1 }
 0xb53   : > { %v10096_v24 = vmax.f32 %v3881_v58, %v3882_v27 }
 0xb55   : > { %v3884_v0 = vsub.f32 %v9813_v52, %v10096_v24  ;;  %v3885_v35 = vsub.f32 %v9825_v34, %v10096_v24  ;;  %v3886_v41 = vsub.f32 %v9830_v8, %v10096_v24  ;;  %v3887_v38 = vsub.f32 %v9842_v43, %v10096_v24 }
 0xb56   : > { %v3888_v27 = vsub.f32 %v9847_v63, %v10096_v24  ;;  %v3813_v52 = vmul.f32 %v3812_v22, %v3805_v10  ;;  %v3889_v34 = vsub.f32 %v9859_v45, %v10096_v24  ;;  %v3890_v8 = vsub.f32 %v9864_v53, %v10096_v24 }
 0xb57   : > { %v3916_v19 = vmul.f32 1.442695, %v3884_v0  ;;  %v3918_v5 = vmul.f32 1.442695, %v3885_v35  ;;  %v3920_v44 = vmul.f32 1.442695, %v3886_v41  ;;  %v3891_v63 = vsub.f32 %v9876_v21, %v10096_v24 }
 0xb58   : > { %v3922_v26 = vmul.f32 1.442695, %v3887_v38  ;;  %4096 = vrot.lane.b32.xlu2 %v3813_v52, %s7989_s28  ;;  %v3924_v43 = vmul.f32 1.442695, %v3888_v27  ;;  %v3926_v39 = vmul.f32 1.442695, %v3889_v34  ;;  %v3892_v45 = vsub.f32 %v9881_v11, %v10096_v24 }
 0xb59   : > { %7782 = vpow2.f32 %v3916_v19  ;;  %v3928_v16 = vmul.f32 1.442695, %v3890_v8  ;;  %v3893_v53 = vsub.f32 %v9893_v40, %v10096_v24  ;;  %v3930_v62 = vmul.f32 1.442695, %v3891_v63 }
 0xb5a   : > { %7784 = vpow2.f32 %v3918_v5  ;;  %v3894_v11 = vsub.f32 %v9898_v17, %v10096_v24  ;;  %v3932_v37 = vmul.f32 1.442695, %v3892_v45  ;;  %v3895_v58 = vsub.f32 %v9910_v14, %v10096_v24 }
 0xb5b   : > { %7786 = vpow2.f32 %v3920_v44  ;;  %v3934_v51 = vmul.f32 1.442695, %v3893_v53  ;;  %v3896_v17 = vsub.f32 %v9915_v29, %v10096_v24  ;;  %v3897_v14 = vsub.f32 %v9927_v50, %v10096_v24 }
 0xb5c   : > { %7788 = vpow2.f32 %v3922_v26  ;;  %v3936_v35 = vmul.f32 1.442695, %v3894_v11  ;;  %v3938_v38 = vmul.f32 1.442695, %v3895_v58  ;;  %v3898_v29 = vsub.f32 %v9932_v1, %v10096_v24 }
 0xb5d   : > { %7790 = vpow2.f32 %v3924_v43  ;;  %v3940_v44 = vmul.f32 1.442695, %v3896_v17  ;;  %v3899_v50 = vsub.f32 %v9934_v55, %v10096_v24  ;;  %v3942_v26 = vmul.f32 1.442695, %v3897_v14 }
 0xb5e   : > { %7792 = vpow2.f32 %v3926_v39  ;;  %v3900_v1 = vsub.f32 %v9936_v49, %v10096_v24  ;;  %v3944_v39 = vmul.f32 1.442695, %v3898_v29  ;;  %v3901_v55 = vsub.f32 %v9938_v4, %v10096_v24 }
 0xb5f   : > { %v10114_v23 = vpop.eup %7782  ;;  %7794 = vpow2.f32 %v3928_v16  ;;  %v3902_v49 = vsub.f32 %v9940_v48, %v10096_v24  ;;  %v3903_v4 = vsub.f32 %v9942_v3, %v10096_v24  ;;  %v3904_v48 = vsub.f32 %v9944_v33, %v10096_v24 }
 0xb60   : > { %v10118_v42 = vpop.eup %7784  ;;  %v3980_v21 = vsel %vm3814_vm6, %v10114_v23, 0.0  ;;  %7796 = vpow2.f32 %v3930_v62  ;;  %v3946_v62 = vmul.f32 1.442695, %v3899_v50  ;;  %v3905_v3 = vsub.f32 %v9946_v9, %v10096_v24 }
 0xb61   : > { %v10120_v32 = vpop.eup %7786  ;;  %v3981_v30 = vsel %vm3814_vm6, %v10118_v42, 0.0  ;;  %7798 = vpow2.f32 %v3932_v37  ;;  %v3948_v37 = vmul.f32 1.442695, %v3900_v1  ;;  %v3906_v33 = vsub.f32 %v9948_v18, %v10096_v24 }
 0xb62   : > { %v10128_v61 = vpop.eup %7788  ;;  %v3982_v13 = vadd.f32 %v3981_v30, %v3980_v21  ;;  %v3983_v46 = vsel %vm3814_vm6, %v10120_v32, 0.0  ;;  %7800 = vpow2.f32 %v3934_v51  ;;  %v3950_v51 = vmul.f32 1.442695, %v3901_v55 }
 0xb63   : > { %v10134_v40 = vpop.eup %7790  ;;  %v3985_v25 = vsel %vm3814_vm6, %v10128_v61, 0.0  ;;  %7802 = vpow2.f32 %v3936_v35  ;;  %v3952_v35 = vmul.f32 1.442695, %v3902_v49  ;;  %v3907_v9 = vsub.f32 %v9950_v54, %v10096_v24 }
 0xb64   : > { %v3984_v28 = vadd.f32 %v3983_v46, %v3982_v13  ;;  %v10140_v0 = vpop.eup %7792  ;;  %v3987_v2 = vsel %vm3814_vm6, %v10134_v40, 0.0  ;;  %7804 = vpow2.f32 %v3938_v38  ;;  %v3954_v38 = vmul.f32 1.442695, %v3903_v4 }
 0xb65   : > { %v10146_v10 = vpop.eup %7794  ;;  %v3989_v19 = vsel %vm3814_vm6, %v10140_v0, 0.0  ;;  %7806 = vpow2.f32 %v3940_v44  ;;  %v3956_v44 = vmul.f32 1.442695, %v3904_v48  ;;  %v3908_v18 = vsub.f32 %v9960_v7, %v10096_v24 }
 0xb66   : > { %v3986_v41 = vadd.f32 %v3985_v25, %v3984_v28  ;;  %v10152_v5 = vpop.eup %7796  ;;  %v3991_v52 = vsel %vm3814_vm6, %v10146_v10, 0.0  ;;  %7808 = vpow2.f32 %v3942_v26  ;;  %v3958_v26 = vmul.f32 1.442695, %v3905_v3 }
 0xb67   : > { %v10158_v34 = vpop.eup %7798  ;;  %v3993_v43 = vsel %vm3814_vm6, %v10152_v5, 0.0  ;;  %7810 = vpow2.f32 %v3944_v39  ;;  %v3960_v39 = vmul.f32 1.442695, %v3906_v33  ;;  %v3909_v54 = vsub.f32 %v9970_v20, %v10096_v24 }
 0xb68   : > { %v3988_v27 = vadd.f32 %v3987_v2, %v3986_v41  ;;  %v10164_v63 = vpop.eup %7800  ;;  %v3995_v16 = vsel %vm3814_vm6, %v10158_v34, 0.0  ;;  %7812 = vpow2.f32 %v3946_v62  ;;  %v3962_v62 = vmul.f32 1.442695, %v3907_v9 }
 0xb69   : > { %v10170_v53 = vpop.eup %7802  ;;  %v3997_v30 = vsel %vm3814_vm6, %v10164_v63, 0.0  ;;  %7814 = vpow2.f32 %v3948_v37  ;;  %v3910_v7 = vsub.f32 %v9980_v6, %v10096_v24  ;;  %v3964_v37 = vmul.f32 1.442695, %v3908_v18 }
 0xb6a   : > { %v3990_v22 = vadd.f32 %v3989_v19, %v3988_v27  ;;  %v10176_v11 = vpop.eup %7804  ;;  %v3999_v46 = vsel %vm3814_vm6, %v10170_v53, 0.0  ;;  %7816 = vpow2.f32 %v3950_v51  ;;  %v3911_v20 = vsub.f32 %v9990_v57, %v10096_v24 }
 0xb6b   : > { %v10182_v58 = vpop.eup %7806  ;;  %v4001_v25 = vsel %vm3814_vm6, %v10176_v11, 0.0  ;;  %7818 = vpow2.f32 %v3952_v35  ;;  %v3966_v51 = vmul.f32 1.442695, %v3909_v54  ;;  %v3912_v6 = vsub.f32 %v10000_v15, %v10096_v24 }
 0xb6c   : > { %v3992_v8 = vadd.f32 %v3991_v52, %v3990_v22  ;;  %v10188_v17 = vpop.eup %7808  ;;  %v4003_v2 = vsel %vm3814_vm6, %v10182_v58, 0.0  ;;  %7820 = vpow2.f32 %v3954_v38  ;;  %v3968_v35 = vmul.f32 1.442695, %v3910_v7 }
 0xb6d   : > { %v10194_v14 = vpop.eup %7810  ;;  %v4005_v19 = vsel %vm3814_vm6, %v10188_v17, 0.0  ;;  %7822 = vpow2.f32 %v3956_v44  ;;  %v3913_v57 = vsub.f32 %v10026_v59, %v10096_v24  ;;  %v3970_v38 = vmul.f32 1.442695, %v3911_v20 }
 0xb6e   : > { %v3994_v45 = vadd.f32 %v3993_v43, %v3992_v8  ;;  %v10200_v29 = vpop.eup %7812  ;;  %v4007_v52 = vsel %vm3814_vm6, %v10194_v14, 0.0  ;;  %7824 = vpow2.f32 %v3958_v26  ;;  %v3914_v15 = vsub.f32 %v10060_v60, %v10096_v24 }
 0xb6f   : > { %v10206_v50 = vpop.eup %7814  ;;  %v4009_v43 = vsel %vm3814_vm6, %v10200_v29, 0.0  ;;  %7826 = vpow2.f32 %v3960_v39  ;;  %v3972_v44 = vmul.f32 1.442695, %v3912_v6  ;;  %v3915_v59 = vsub.f32 %v10090_v31, %v10096_v24 }
 0xb70   : > { %v3996_v21 = vadd.f32 %v3995_v16, %v3994_v45  ;;  %v10212_v1 = vpop.eup %7816  ;;  %v4011_v16 = vsel %vm3814_vm6, %v10206_v50, 0.0  ;;  %7828 = vpow2.f32 %v3962_v62  ;;  %v3974_v26 = vmul.f32 1.442695, %v3913_v57 }
 0xb71   : > { %v10218_v55 = vpop.eup %7818  ;;  %7830 = vpow2.f32 %v3964_v37  ;;  %v3976_v60 = vmul.f32 1.442695, %v3914_v15  ;;  %v3978_v54 = vmul.f32 1.442695, %v3915_v59 }
 0xb72   : > { %v3998_v13 = vadd.f32 %v3997_v30, %v3996_v21  ;;  %v4013_v30 = vsel %vm3814_vm6, %v10212_v1, 0.0  ;;  %v10224_v49 = vpop.eup %7820  ;;  %7832 = vpow2.f32 %v3966_v51 }
 0xb73   : > { %v10230_v4 = vpop.eup %7822  ;;  %7834 = vpow2.f32 %v3968_v35 }
 0xb74   : > { %v4000_v28 = vadd.f32 %v3999_v46, %v3998_v13  ;;  %v4015_v46 = vsel %vm3814_vm6, %v10218_v55, 0.0  ;;  %v10236_v48 = vpop.eup %7824  ;;  %7836 = vpow2.f32 %v3970_v38 }
 0xb75   : > { %v10242_v3 = vpop.eup %7826  ;;  %7838 = vpow2.f32 %v3972_v44 }
 0xb76   : > { %v4002_v41 = vadd.f32 %v4001_v25, %v4000_v28  ;;  %v4017_v25 = vsel %vm3814_vm6, %v10224_v49, 0.0  ;;  %v10248_v33 = vpop.eup %7828  ;;  %7840 = vpow2.f32 %v3974_v26 }
 0xb77   : > { %v10254_v9 = vpop.eup %7830  ;;  %7842 = vpow2.f32 %v3976_v60 }
 0xb78   : > { %v4004_v27 = vadd.f32 %v4003_v2, %v4002_v41  ;;  %v4019_v2 = vsel %vm3814_vm6, %v10230_v4, 0.0  ;;  %v10260_v18 = vpop.eup %7832  ;;  %7844 = vpow2.f32 %v3978_v54 }
 0xb79   : > { %v4029_v31 = vsel %vm3814_vm6, %v10260_v18, 0.0 }
 0xb7a   : > { %v4006_v22 = vadd.f32 %v4005_v19, %v4004_v27  ;;  %v4021_v19 = vsel %vm3814_vm6, %v10236_v48, 0.0 }
 0xb7c   : > { %v4008_v8 = vadd.f32 %v4007_v52, %v4006_v22  ;;  %v4023_v52 = vsel %vm3814_vm6, %v10242_v3, 0.0 }
 0xb7e   : > { %v4010_v45 = vadd.f32 %v4009_v43, %v4008_v8  ;;  %v4025_v43 = vsel %vm3814_vm6, %v10248_v33, 0.0 }
 0xb80   : > { %v4012_v21 = vadd.f32 %v4011_v16, %v4010_v45  ;;  %v4027_v45 = vsel %vm3814_vm6, %v10254_v9, 0.0  ;;  %v10264_v16 = vpop.eup %7834 }
 0xb81   : > { %v10268_v24 = vpop.eup %7836 }
 0xb82   : > { %v4014_v13 = vadd.f32 %v4013_v30, %v4012_v21  ;;  %v4031_v30 = vsel %vm3814_vm6, %v10264_v16, 0.0  ;;  %v10272_v7 = vpop.eup %7838 }
 0xb83   : > { %v4035_v51 = vsel %vm3814_vm6, %v10272_v7, 0.0 }
 0xb84   : > { %v4016_v28 = vadd.f32 %v4015_v46, %v4014_v13  ;;  %v4033_v13 = vsel %vm3814_vm6, %v10268_v24, 0.0  ;;  %v10276_v46 = vpop.eup %7840 }
 0xb85   : > { %v4037_v6 = vsel %vm3814_vm6, %v10276_v46, 0.0 }
 0xb86   : > { %v4018_v41 = vadd.f32 %v4017_v25, %v4016_v28  ;;  %v10280_v28 = vpop.eup %7842 }
 0xb87   : > { %v10284_v35 = vpop.eup %7844 }
 0xb88   : > { %v4020_v27 = vadd.f32 %v4019_v2, %v4018_v41  ;;  %v4039_v2 = vsel %vm3814_vm6, %v10280_v28, 0.0  ;;  %v4041_v38 = vsel %vm3814_vm6, %v10284_v35, 0.0 }
 0xb8a   : > { %v4022_v22 = vadd.f32 %v4021_v19, %v4020_v27 }
 0xb8c   : > { %v4024_v8 = vadd.f32 %v4023_v52, %v4022_v22 }
 0xb8e   : > { %v4026_v39 = vadd.f32 %v4025_v43, %v4024_v8 }
 0xb90   : > { %v4028_v62 = vadd.f32 %v4027_v45, %v4026_v39 }
 0xb92   : > { %v4030_v21 = vadd.f32 %v4029_v31, %v4028_v62 }
 0xb94   : > { %v4032_v37 = vadd.f32 %v4031_v30, %v4030_v21 }
 0xb96   : > { %v4034_v20 = vadd.f32 %v4033_v13, %v4032_v37 }
 0xb98   : > { %v4036_v25 = vadd.f32 %v4035_v51, %v4034_v20 }
 0xb9a   : > { %v4038_v41 = vadd.f32 %v4037_v6, %v4036_v25 }
 0xb9c   : > { %v4040_v57 = vadd.f32 %v4039_v2, %v4038_v41 }
 0xb9e   : > { %v4042_v27 = vadd.f32 %v4041_v38, %v4040_v57 }
 0xba0   : > { %v4043_v19 = vrot.slane %v4042_v27, 4 }
 0xba2   : > { %v4044_v15 = vadd.f32 %v4043_v19, %v4042_v27 }
 0xba4   : > { %v4045_v44 = vrot.slane %v4044_v15, 2 }
 0xba6   : > { %v4046_v22 = vadd.f32 %v4045_v44, %v4044_v15 }
 0xba8   : > { %v4047_v52 = vrot.slane %v4046_v22, 1 }
 0xbaa   : > { %v4048_v59 = vadd.f32 %v4047_v52, %v4046_v22 }
 0xbac   : > { %7846 = vrcp.f32 %v4048_v59  ;;  %v4060_v60 = vand.u32 2147483648, %v4048_v59  ;;  %v4058_v45 = vand.u32 2147483647, %v4048_v59  ;;  %vm4054_vm10 = vweird.f32 %v4048_v59 }
 0xbae   : > { %v4061_v62 = vor.u32 1.1754944e-38, %v4060_v60  ;;  %vm4059_vm12 = vcmp.eq.f32.partialorder %v4058_v45, 8.507059e+37 }
 0xbb2   : > { %v7847_v26 = vpop.eup %7846  ;;  %v10298_v20 = vpop.permute.xlu2 %4096 }
 0xbb3   : > { %v4050_v8 = vmul.f32 %v7847_v26, %v4048_v59  ;;  %vm4055_vm8 = vweird.f32 %v7847_v26 }
 0xbb4   : > { %vm4056_vm11 = vmor %vm4054_vm10, %vm4055_vm8 }
 0xbb5   : > { %v4051_v43 = vsub.f32 1.0, %v4050_v8 }
 0xbb7   : > { %v4052_v39 = vmul.f32 %v7847_v26, %v4051_v43 }
 0xbb9   : > { %v4053_v54 = vadd.f32 %v7847_v26, %v4052_v39 }
 0xbbb   : > { %v4057_v31 = vsel %vm4056_vm11, %v7847_v26, %v4053_v54 }
 0xbbc   : > { %v10290_v21 = vsel %vm4059_vm12, %v4061_v62, %v4057_v31 }
 0xbbd   : > { %v4069_v30 = vmul.f32 %v10146_v10, %v10290_v21  ;;  %v4067_v37 = vmul.f32 %v10134_v40, %v10290_v21  ;;  %v4063_v13 = vmul.f32 %v10114_v23, %v10290_v21  ;;  %v4073_v40 = vmul.f32 %v10170_v53, %v10290_v21 }
 0xbbe   : > { %v4070_v23 = vmul.f32 %v10152_v5, %v10290_v21  ;;  %v4064_v10 = vmul.f32 %v10118_v42, %v10290_v21  ;;  %v4078_v53 = vmul.f32 %v10200_v29, %v10290_v21  ;;  %v4072_v5 = vmul.f32 %v10164_v63, %v10290_v21 }
 0xbbf   : > { %v4105_v51 = vmul.f32 %v10298_v20, %v4069_v30  ;;  %v4103_v25 = vmul.f32 %v10298_v20, %v4067_v37  ;;  %v4099_v6 = vmul.f32 %v10298_v20, %v4063_v13  ;;  %v4109_v41 = vmul.f32 %v10298_v20, %v4073_v40 }
 0xbc0   : > { %v4106_v2 = vmul.f32 %v10298_v20, %v4070_v23  ;;  %v4100_v57 = vmul.f32 %v10298_v20, %v4064_v10  ;;  %v4065_v42 = vmul.f32 %v10120_v32, %v10290_v21  ;;  %v4114_v38 = vmul.f32 %v10298_v20, %v4078_v53 }
 0xbc1   : > { %4175 = vrot.lane.b32.xlu1 %v4105_v51, %s7985_s23  ;;  %4171 = vrot.lane.b32.xlu0 %v4103_v25, %s7985_s23  ;;  %v4108_v27 = vmul.f32 %v10298_v20, %v4072_v5  ;;  %v4079_v29 = vmul.f32 %v10206_v50, %v10290_v21  ;;  %v4074_v63 = vmul.f32 %v10176_v11, %v10290_v21 }
 0xbc2   : > { %4163 = vrot.lane.b32.xlu2 %v4099_v6, %s7985_s23  ;;  %v4101_v19 = vmul.f32 %v10298_v20, %v4065_v42  ;;  %v4066_v32 = vmul.f32 %v10128_v61, %v10290_v21  ;;  %v4076_v50 = vmul.f32 %v10188_v17, %v10290_v21  ;;  %v4068_v11 = vmul.f32 %v10140_v0, %v10290_v21 }
 0xbc3   : > { %v4115_v15 = vmul.f32 %v10298_v20, %v4079_v29  ;;  %v4110_v44 = vmul.f32 %v10298_v20, %v4074_v63  ;;  %v4077_v59 = vmul.f32 %v10194_v14, %v10290_v21  ;;  %v4071_v26 = vmul.f32 %v10158_v34, %v10290_v21 }
 0xbc4   : > { %v4102_v22 = vmul.f32 %v10298_v20, %v4066_v32  ;;  %v4112_v61 = vmul.f32 %v10298_v20, %v4076_v50  ;;  %v4104_v52 = vmul.f32 %v10298_v20, %v4068_v11  ;;  %v4082_v0 = vmul.f32 %v10224_v49, %v10290_v21 }
 0xbc5   : > { %v4113_v8 = vmul.f32 %v10298_v20, %v4077_v59  ;;  %v4107_v17 = vmul.f32 %v10298_v20, %v4071_v26  ;;  %v4075_v43 = vmul.f32 %v10182_v58, %v10290_v21  ;;  %v4080_v34 = vmul.f32 %v10212_v1, %v10290_v21 }
 0xbc6   : > { %v4118_v60 = vmul.f32 %v10298_v20, %v4082_v0  ;;  %v4081_v49 = vmul.f32 %v10218_v55, %v10290_v21  ;;  %v4084_v37 = vmul.f32 %v10236_v48, %v10290_v21  ;;  %v4083_v40 = vmul.f32 %v10230_v4, %v10290_v21 }
 0xbc7   : > { %v4111_v14 = vmul.f32 %v10298_v20, %v4075_v43  ;;  %v4116_v39 = vmul.f32 %v10298_v20, %v4080_v34  ;;  %v4087_v4 = vmul.f32 %v10254_v9, %v10290_v21  ;;  %v4085_v59 = vmul.f32 %v10242_v3, %v10290_v21 }
 0xbc8   : > { %v4117_v58 = vmul.f32 %v10298_v20, %v4081_v49  ;;  %v4120_v25 = vmul.f32 %v10298_v20, %v4084_v37  ;;  %v4119_v23 = vmul.f32 %v10298_v20, %v4083_v40 }
 0xbc9   : > { %4183 = vrot.lane.b32.xlu1 %v4109_v41, %s7985_s23  ;;  %4177 = vrot.lane.b32.xlu0 %v4106_v2, %s7985_s23  ;;  %v4086_v41 = vmul.f32 %v10248_v33, %v10290_v21  ;;  %v4123_v42 = vmul.f32 %v10298_v20, %v4087_v4  ;;  %v4121_v0 = vmul.f32 %v10298_v20, %v4085_v59  ;;  %v5028_v4 = vld [vmem:[#allocation2 + $0x8] sm:$0xff] }
 0xbca   : > { %4165 = vrot.lane.b32.xlu2 %v4100_v57, %s7985_s23  ;;  %v4090_v59 = vmul.f32 %v10268_v24, %v10290_v21 }
 0xbcb   : > { %v4122_v57 = vmul.f32 %v10298_v20, %v4086_v41  ;;  %v5078_v41 = vld [vmem:[#allocation2 + $0x9] sm:$0xff] }
 0xbd1   : > { %4193 = vrot.lane.b32.xlu1 %v4114_v38, %s7985_s23  ;;  %4181 = vrot.lane.b32.xlu0 %v4108_v27, %s7985_s23 }
 0xbd2   : > { %4167 = vrot.lane.b32.xlu2 %v4101_v19, %s7985_s23 }
 0xbd9   : > { %4195 = vrot.lane.b32.xlu1 %v4115_v15, %s7985_s23  ;;  %4185 = vrot.lane.b32.xlu0 %v4110_v44, %s7985_s23 }
 0xbda   : > { %4169 = vrot.lane.b32.xlu2 %v4102_v22, %s7985_s23 }
 0xbe1   : > { %4189 = vrot.lane.b32.xlu0 %v4112_v61, %s7985_s23  ;;  %v4088_v61 = vmul.f32 %v10260_v18, %v10290_v21 }
 0xbe2   : > { %4173 = vrot.lane.b32.xlu2 %v4104_v52, %s7985_s23 }
 0xbe9   : > { %4191 = vrot.lane.b32.xlu0 %v4113_v8, %s7985_s23  ;;  %v4124_v8 = vmul.f32 %v10298_v20, %v4088_v61 }
 0xbea   : > { %4179 = vrot.lane.b32.xlu2 %v4107_v17, %s7985_s23 }
 0xbf1   : > { %4201 = vrot.lane.b32.xlu0 %v4118_v60, %s7985_s23 }
 0xbf2   : > { %4187 = vrot.lane.b32.xlu2 %v4111_v14, %s7985_s23 }
 0xbfa   : > { %4197 = vrot.lane.b32.xlu2 %v4116_v39, %s7985_s23 }
 0xc02   : > { %4199 = vrot.lane.b32.xlu2 %v4117_v58, %s7985_s23 }
 0xc1c   : > { %v4164_v45 = vpop.permute.xlu2 %4163 }
 0xc1d   : > { %v4259_v54 = vsel %vm3372_vm9, %v4164_v45, 0.0 }
 0xc1e   : > { %4260 = vadd.xlane.f32.xlu1 %v4259_v54 }
 0xc24   : > { %v4166_v62 = vpop.permute.xlu2 %4165 }
 0xc25   : > { %v4262_v31 = vsel %vm3372_vm9, %v4166_v62, 0.0 }
 0xc2b   : > { %4263 = vadd.xlane.f32.xlu2 %v4262_v31 }
 0xc2c   : > { %v4168_v1 = vpop.permute.xlu2 %4167 }
 0xc2d   : > { %v4265_v30 = vsel %vm3372_vm9, %v4168_v1, 0.0 }
 0xc2e   : > { %4266 = vadd.xlane.f32.xlu0 %v4265_v30 }
 0xc33   : > { %v4172_v55 = vpop.permute.xlu0 %4171  ;;  %v4176_v38 = vpop.permute.xlu1 %4175 }
 0xc34   : > { %v4170_v13 = vpop.permute.xlu2 %4169  ;;  %v4271_v51 = vsel %vm3372_vm9, %v4172_v55, 0.0  ;;  %v4277_v33 = vsel %vm3372_vm9, %v4176_v38, 0.0 }
 0xc35   : > { %4272 = vadd.xlane.f32.xlu2 %v4271_v51  ;;  %v4268_v53 = vsel %vm3372_vm9, %v4170_v13, 0.0  ;;  %v7675_v13 = vld [vmem:[%s11504_s11 + $0x8] sm:$0xff]  ;;  %v7674_v51 = vld [vmem:[%s11504_s11] sm:$0xff] }
 0xc36   : > { %5189 = vmatpush.bf16.msrb.mxu3 %v7675_v13  ;;  %5332 = vmatpush.bf16.msrb.mxu0 %v7674_v51 }
 0xc37   : > { %4205 = vrot.lane.b32.xlu1 %v4120_v25, %s7985_s23  ;;  %v7676_v25 = vld [vmem:[%s11504_s11 + $0x10] sm:$0xff] }
 0xc38   : > { %5526 = vmatpush.bf16.msrb.mxu1 %v7676_v25 }
 0xc3b   : > { %v4178_v2 = vpop.permute.xlu0 %4177  ;;  %v4184_v29 = vpop.permute.xlu1 %4183 }
 0xc3c   : > { %v4174_v6 = vpop.permute.xlu2 %4173  ;;  %v4280_v63 = vsel %vm3372_vm9, %v4178_v2, 0.0  ;;  %v4289_v9 = vsel %vm3372_vm9, %v4184_v29, 0.0  ;;  %v5027_v2 = vld [vmem:[#allocation2] sm:$0xff] }
 0xc3d   : > { %v4274_v27 = vsel %vm3372_vm9, %v4174_v6, 0.0  ;;  %v5059_v29 = vpack.c.bf16 %v5028_v4, %v5027_v2 }
 0xc3f   : > { %7489 = vmatmul.msk.bf16.vlgmr.msrb.gmra.mxu0 %vm474_vm0, %v5059_v29 }
 0xc42   : > { %4203 = vrot.lane.b32.xlu0 %v4119_v23, %s7985_s23 }
 0xc43   : > { %v4182_v5 = vpop.permute.xlu0 %4181  ;;  %v10402_v22 = vpop.permute.xlu1 %4193 }
 0xc44   : > { %v4180_v10 = vpop.permute.xlu2 %4179  ;;  %v4286_v15 = vsel %vm3372_vm9, %v4182_v5, 0.0  ;;  %v5414_v5 = vld [vmem:[#allocation2 + $0x2] sm:$0xff] }
 0xc45   : > { %v4283_v48 = vsel %vm3372_vm9, %v4180_v10, 0.0 }
 0xc46   : > { %4284 = vadd.xlane.f32.xlu2 %v4283_v48  ;;  %v5077_v48 = vld [vmem:[#allocation2 + $0x1] sm:$0xff] }
 0xc4b   : > { %v4186_v19 = vpop.permute.xlu0 %4185  ;;  %v10406_v11 = vpop.permute.xlu1 %4195 }
 0xc4c   : > { %v10404_v50 = vpop.permute.xlu2 %4187  ;;  %v4292_v26 = vsel %vm3372_vm9, %v4186_v19, 0.0 }
 0xc53   : > { %v4190_v32 = vpop.permute.xlu0 %4189 }
 0xc54   : > { %v4298_v44 = vsel %vm3372_vm9, %v4190_v32, 0.0  ;;  %v4198_v52 = vpop.permute.xlu2 %4197 }
 0xc55   : > { %v4310_v58 = vsel %vm3372_vm9, %v4198_v52, 0.0 }
 0xc5b   : > { %v4192_v17 = vpop.permute.xlu0 %4191 }
 0xc5c   : > { %v10417_v18 = vpop.permute.xlu2 %4199  ;;  %v4301_v14 = vsel %vm3372_vm9, %v4192_v17, 0.0 }
 0xc5e   : > { %4209 = vrot.lane.b32.xlu2 %v4122_v57, %s7985_s23 }
 0xc61   : > { %4269 = vadd.xlane.f32.xlu1 %v4268_v53  ;;  %v5109_v53 = vpack.c.bf16 %v5078_v41, %v5077_v48 }
 0xc63   : > { %v10420_v3 = vpop.permute.xlu0 %4201  ;;  %7469 = vmatmul.msk.bf16.vlgmr.msrb.gmra.mxu3 %vm474_vm0, %v5109_v53 }
 0xc66   : > { %4211 = vrot.lane.b32.xlu2 %v4123_v42, %s7985_s23  ;;  %v5415_v42 = vld [vmem:[#allocation2 + $0xa] sm:$0xff] }
 0xc69   : > { %4275 = vadd.xlane.f32.xlu1 %v4274_v27 }
 0xc6c   : > { %4278 = vadd.xlane.f32.xlu0 %v4277_v33 }
 0xc71   : > { %4281 = vadd.xlane.f32.xlu1 %v4280_v63 }
 0xc74   : > { %4290 = vadd.xlane.f32.xlu0 %v4289_v9  ;;  %v5446_v9 = vpack.c.bf16 %v5415_v42, %v5414_v5 }
 0xc76   : > { %7511 = vmatmul.msk.bf16.vlgmr.msrb.gmra.mxu1 %vm474_vm0, %v5446_v9 }
 0xc79   : > { %4287 = vadd.xlane.f32.xlu1 %v4286_v15 }
 0xc7c   : > { %4299 = vadd.xlane.f32.xlu0 %v4298_v44 }
 0xc8f   : > { %4293 = vadd.xlane.f32.xlu2 %v4292_v26 }
 0xc90   : > { %4213 = vrot.lane.b32.xlu0 %v4124_v8, %s7985_s23 }
 0xc91   : > { %v4261_v43 = vpop.xlane.xlu1 %4260 }
 0xc92   : > { %v7431_v60 = vmul.f32 -1.442695, %v4261_v43  ;;  %4207 = vrot.lane.b32.xlu1 %v4121_v0, %s7985_s23 }
 0xc94   : > { %7848 = vpow2.f32 %v7431_v60 }
 0xc97   : > { %4302 = vadd.xlane.f32.xlu2 %v4301_v14 }
 0xc9a   : > { %v7849_v34 = vpop.eup %7848 }
 0xc9b   : > { %v4451_v39 = vadd.f32 1.0, %v7849_v34 }
 0xc9d   : > { %7850 = vrcp.f32 %v4451_v39  ;;  %v4494_v55 = vand.u32 2147483648, %v4451_v39  ;;  %v4492_v40 = vand.u32 2147483647, %v4451_v39  ;;  %vm4488_vm14 = vweird.f32 %v4451_v39 }
 0xc9e   : > { %v4264_v49 = vpop.xlane.xlu2 %4263 }
 0xc9f   : > { %v7432_v45 = vmul.f32 -1.442695, %v4264_v49  ;;  %4311 = vadd.xlane.f32.xlu2 %v4310_v58  ;;  %v4495_v33 = vor.u32 1.1754944e-38, %v4494_v55  ;;  %vm4493_vm1 = vcmp.eq.f32.partialorder %v4492_v40, 8.507059e+37  ;;  %v4295_v40 = vsel %vm3372_vm9, %v10404_v50, 0.0 }
 0xca0   : > { %v4316_v50 = vsel %vm3372_vm9, %v10420_v3, 0.0 }
 0xca1   : > { %7852 = vpow2.f32 %v7432_v45  ;;  %v4267_v54 = vpop.xlane.xlu0 %4266 }
 0xca2   : > { %v7433_v62 = vmul.f32 -1.442695, %v4267_v54  ;;  %v7677_v54 = vld [vmem:[%s11504_s11 + $0x18] sm:$0xff] }
 0xca3   : > { %v7851_v31 = vpop.eup %7850  ;;  %5752 = vmatpush.bf16.msra.mxu2 %v7677_v54 }
 0xca4   : > { %v4484_v1 = vmul.f32 %v7851_v31, %v4451_v39  ;;  %7854 = vpow2.f32 %v7433_v62  ;;  %vm4489_vm13 = vweird.f32 %v7851_v31 }
 0xca5   : > { %vm4490_vm15 = vmor %vm4488_vm14, %vm4489_vm13 }
 0xca6   : > { %v4485_v30 = vsub.f32 1.0, %v4484_v1  ;;  %v4307_v1 = vsel %vm3372_vm9, %v10406_v11, 0.0 }
 0xca7   : > { %v7853_v37 = vpop.eup %7852 }
 0xca8   : > { %v4486_v6 = vmul.f32 %v7851_v31, %v4485_v30  ;;  %v4452_v23 = vadd.f32 1.0, %v7853_v37  ;;  %v4273_v10 = vpop.xlane.xlu2 %4272 }
 0xca9   : > { %v7435_v57 = vmul.f32 -1.442695, %v4273_v10 }
 0xcaa   : > { %v7855_v38 = vpop.eup %7854  ;;  %v4487_v27 = vadd.f32 %v7851_v31, %v4486_v6  ;;  %7856 = vrcp.f32 %v4452_v23  ;;  %v4509_v0 = vand.u32 2147483648, %v4452_v23  ;;  %v4507_v14 = vand.u32 2147483647, %v4452_v23 }
 0xcab   : > { %v4453_v19 = vadd.f32 1.0, %v7855_v38  ;;  %7858 = vpow2.f32 %v7435_v57  ;;  %vm4503_vm3 = vweird.f32 %v4452_v23 }
 0xcac   : > { %v4491_v63 = vsel %vm4490_vm15, %v7851_v31, %v4487_v27  ;;  %v4510_v58 = vor.u32 1.1754944e-38, %v4509_v0  ;;  %vm4508_vm6 = vcmp.eq.f32.partialorder %v4507_v14, 8.507059e+37 }
 0xcad   : > { %v4496_v32 = vsel %vm4493_vm1, %v4495_v33, %v4491_v63  ;;  %7860 = vrcp.f32 %v4453_v19  ;;  %v4524_v49 = vand.u32 2147483648, %v4453_v19  ;;  %v4522_v45 = vand.u32 2147483647, %v4453_v19 }
 0xcae   : > { %v4963_v15 = vmul.f32 %v4496_v32, %v9699_v36  ;;  %v4126_v36 = vmul.f32 %v10298_v20, %v4090_v59  ;;  %vm4518_vm7 = vweird.f32 %v4453_v19  ;;  %v4206_v32 = vpop.permute.xlu1 %4205 }
 0xcaf   : > { %v4525_v25 = vor.u32 1.1754944e-38, %v4524_v49  ;;  %vm4523_vm10 = vcmp.eq.f32.partialorder %v4522_v45, 8.507059e+37 }
 0xcb0   : > { %v7857_v44 = vpop.eup %7856  ;;  %4995 = vst.msk [vmem:[#allocation2 + $0x19] sm:$0xff] %vm474_vm0, %v4963_v15 }
 0xcb1   : > { %v7859_v61 = vpop.eup %7858  ;;  %v4499_v52 = vmul.f32 %v7857_v44, %v4452_v23  ;;  %vm4504_vm2 = vweird.f32 %v7857_v44 }
 0xcb2   : > { %v4455_v26 = vadd.f32 1.0, %v7859_v61  ;;  %vm4505_vm4 = vmor %vm4503_vm3, %vm4504_vm2 }
 0xcb3   : > { %v7861_v8 = vpop.eup %7860  ;;  %v4500_v17 = vsub.f32 1.0, %v4499_v52  ;;  %v4313_v52 = vsel %vm3372_vm9, %v10417_v18, 0.0 }
 0xcb4   : > { %v4514_v43 = vmul.f32 %v7861_v8, %v4453_v19  ;;  %7862 = vrcp.f32 %v4455_v26  ;;  %vm4519_vm5 = vweird.f32 %v7861_v8  ;;  %v4554_v41 = vand.u32 2147483648, %v4455_v26  ;;  %v4204_v45 = vpop.permute.xlu0 %4203 }
 0xcb5   : > { %v4501_v60 = vmul.f32 %v7857_v44, %v4500_v17  ;;  %vm4520_vm8 = vmor %vm4518_vm7, %vm4519_vm5  ;;  %vm4548_vm12 = vweird.f32 %v4455_v26 }
 0xcb6   : > { %v4515_v34 = vsub.f32 1.0, %v4514_v43  ;;  %v4555_v4 = vor.u32 1.1754944e-38, %v4554_v41 }
 0xcb7   : > { %v4502_v39 = vadd.f32 %v7857_v44, %v4501_v60  ;;  %4217 = vrot.lane.b32.xlu2 %v4126_v36, %s7985_s23  ;;  %v5079_v63 = vld [vmem:[#allocation2 + $0x19] sm:$0xff] }
 0xcb8   : > { %v4516_v24 = vmul.f32 %v7861_v8, %v4515_v34  ;;  %v5029_v3 = vld [vmem:[#allocation2 + $0x18] sm:$0xff] }
 0xcb9   : > { %v4506_v62 = vsel %vm4505_vm4, %v7857_v44, %v4502_v39  ;;  %v4285_v31 = vpop.xlane.xlu2 %4284 }
 0xcba   : > { %v7863_v30 = vpop.eup %7862  ;;  %v4511_v37 = vsel %vm4508_vm6, %v4510_v58, %v4506_v62  ;;  %v4517_v55 = vadd.f32 %v7861_v8, %v4516_v24  ;;  %v7439_v13 = vmul.f32 -1.442695, %v4285_v31  ;;  %4308 = vadd.xlane.f32.xlu0 %v4307_v1  ;;  %v11904_v58 = vld [vmem:[#allocation71_spill] sm:$0xff] }
 0xcbb   : > { %v4964_v51 = vmul.f32 %v4511_v37, %v9704_v47  ;;  %v4544_v6 = vmul.f32 %v7863_v30, %v4455_v26  ;;  %vm4549_vm11 = vweird.f32 %v7863_v30  ;;  %v4552_v47 = vand.u32 2147483647, %v4455_v26 }
 0xcbc   : > { %v4521_v23 = vsel %vm4520_vm8, %v7861_v8, %v4517_v55  ;;  %7864 = vpow2.f32 %v7439_v13  ;;  %4296 = vadd.xlane.f32.xlu1 %v4295_v40  ;;  %vm4550_vm13 = vmor %vm4548_vm12, %vm4549_vm11  ;;  %v4319_v37 = vsel %vm3372_vm9, %v4204_v45, 0.0  ;;  %v4089_v55 = vmul.f32 %v10264_v16, %v10290_v21 }
 0xcbd   : > { %4996 = vst.msk [vmem:[#allocation2 + $0x21] sm:$0xff] %vm474_vm0, %v4964_v51  ;;  %v4526_v11 = vsel %vm4523_vm10, %v4525_v25, %v4521_v23  ;;  %v4545_v10 = vsub.f32 1.0, %v4544_v6  ;;  %vm4553_vm14 = vcmp.eq.f32.partialorder %v4552_v47, 8.507059e+37  ;;  %v4091_v13 = vmul.f32 %v10272_v7, %v10290_v21 }
 0xcbe   : > { %v4965_v48 = vmul.f32 %v4526_v11, %v9712_v12  ;;  %v4304_v12 = vsel %vm3372_vm9, %v10402_v22, 0.0  ;;  %v4125_v25 = vmul.f32 %v10298_v20, %v4089_v55 }
 0xcbf   : > { %v4546_v2 = vmul.f32 %v7863_v30, %v4545_v10  ;;  %v4127_v40 = vmul.f32 %v10298_v20, %v4091_v13 }
 0xcc0   : > { %4997 = vst.msk [vmem:[#allocation2 + $0x31] sm:$0xff] %vm474_vm0, %v4965_v48 }
 0xcc1   : > { %v4547_v57 = vadd.f32 %v7863_v30, %v4546_v2  ;;  %v4210_v8 = vpop.permute.xlu2 %4209 }
 0xcc2   : > { %v7865_v53 = vpop.eup %7864  ;;  %4317 = vadd.xlane.f32.xlu0 %v4316_v50  ;;  %v4328_v60 = vsel %vm3372_vm9, %v4210_v8, 0.0 }
 0xcc3   : > { %v4551_v5 = vsel %vm4550_vm13, %v7863_v30, %v4547_v57  ;;  %v4459_v42 = vadd.f32 1.0, %v7865_v53 }
 0xcc4   : > { %v4556_v38 = vsel %vm4553_vm14, %v4555_v4, %v4551_v5  ;;  %4305 = vadd.xlane.f32.xlu1 %v4304_v12  ;;  %v5080_v27 = vld [vmem:[#allocation2 + $0x21] sm:$0xff] }
 0xcc5   : > { %v5030_v33 = vld [vmem:[#allocation2 + $0x20] sm:$0xff]  ;;  %v4967_v29 = vmul.f32 %v4556_v38, %v9725_v56  ;;  %7866 = vrcp.f32 %v4459_v42  ;;  %v5110_v15 = vpack.c.bf16 %v5080_v27, %v5079_v63  ;;  %v4322_v56 = vsel %vm3372_vm9, %v4206_v32, 0.0 }
 0xcc6   : > { %v5416_v19 = vld [vmem:[#allocation2 + $0x1a] sm:$0xff]  ;;  %v5417_v9 = vld [vmem:[#allocation2 + $0x22] sm:$0xff]  ;;  %v5060_v44 = vpack.c.bf16 %v5030_v33, %v5029_v3  ;;  %v4614_v17 = vand.u32 2147483648, %v4459_v42  ;;  %v4612_v43 = vand.u32 2147483647, %v4459_v42  ;;  %vm4608_vm1 = vweird.f32 %v4459_v42 }
 0xcc7   : > { %v5447_v61 = vpack.c.bf16 %v5417_v9, %v5416_v19  ;;  %4999 = vst.msk [vmem:[#allocation2 + $0x49] sm:$0xff] %vm474_vm0, %v4967_v29  ;;  %7470 = vmatmul.msk.bf16.gmra.mxu3 %vm474_vm0, %v5110_v15  ;;  %v4092_v32 = vmul.f32 %v10276_v46, %v10290_v21 }
 0xcc8   : > { %7490 = vmatmul.msk.bf16.gmra.mxu0 %vm474_vm0, %v5060_v44  ;;  %7533 = vmatmul.msk.bf16.vlgmr.msra.gmra.mxu2 %vm474_vm0, %v5060_v44  ;;  %v4615_v36 = vor.u32 1.1754944e-38, %v4614_v17  ;;  %vm4613_vm3 = vcmp.eq.f32.partialorder %v4612_v43, 8.507059e+37  ;;  %v11905_v44 = vld [vmem:[#allocation64_spill] sm:$0xff] }
 0xcc9   : > { %7512 = vmatmul.msk.bf16.gmra.mxu1 %vm474_vm0, %v5447_v61  ;;  %v4128_v46 = vmul.f32 %v10298_v20, %v4092_v32  ;;  %v10504_v13 = vpop.permute.xlu2 %4211 }
 0xcca   : > { %4323 = vadd.xlane.f32.xlu0 %v4322_v56 }
 0xccb   : > { %v7867_v22 = vpop.eup %7866 }
 0xccc   : > { %v4604_v59 = vmul.f32 %v7867_v22, %v4459_v42  ;;  %4314 = vadd.xlane.f32.xlu1 %v4313_v52  ;;  %vm4609_vm15 = vweird.f32 %v7867_v22 }
 0xccd   : > { %vm4610_vm2 = vmor %vm4608_vm1, %vm4609_vm15 }
 0xcce   : > { %v4605_v26 = vsub.f32 1.0, %v4604_v59 }
 0xcd0   : > { %v4606_v0 = vmul.f32 %v7867_v22, %v4605_v26 }
 0xcd2   : > { %v4607_v14 = vadd.f32 %v7867_v22, %v4606_v0  ;;  %4329 = vadd.xlane.f32.xlu0 %v4328_v60 }
 0xcd4   : > { %v4611_v34 = vsel %vm4610_vm2, %v7867_v22, %v4607_v14  ;;  %v4270_v39 = vpop.xlane.xlu1 %4269 }
 0xcd5   : > { %v4616_v49 = vsel %vm4613_vm3, %v4615_v36, %v4611_v34  ;;  %v7434_v18 = vmul.f32 -1.442695, %v4270_v39 }
 0xcd6   : > { %v4971_v24 = vmul.f32 %v4616_v49, %v11904_v58 }
 0xcd7   : > { %7868 = vpow2.f32 %v7434_v18 }
 0xcd8   : > { %5003 = vst.msk [vmem:[#allocation2 + $0x79] sm:$0xff] %vm474_vm0, %v4971_v24 }
 0xcdc   : > { %v4276_v54 = vpop.xlane.xlu1 %4275 }
 0xcdd   : > { %v7869_v62 = vpop.eup %7868  ;;  %v7436_v31 = vmul.f32 -1.442695, %v4276_v54 }
 0xcde   : > { %v4454_v1 = vadd.f32 1.0, %v7869_v62 }
 0xcdf   : > { %7870 = vpow2.f32 %v7436_v31  ;;  %v4279_v30 = vpop.xlane.xlu0 %4278  ;;  %v11906_v31 = vld [vmem:[#allocation65_spill] sm:$0xff] }
 0xce0   : > { %7872 = vrcp.f32 %v4454_v1  ;;  %4320 = vadd.xlane.f32.xlu2 %v4319_v37  ;;  %v7437_v51 = vmul.f32 -1.442695, %v4279_v30  ;;  %v4539_v57 = vand.u32 2147483648, %v4454_v1  ;;  %v4537_v4 = vand.u32 2147483647, %v4454_v1 }
 0xce1   : > { %vm4533_vm5 = vweird.f32 %v4454_v1 }
 0xce2   : > { %7874 = vpow2.f32 %v7437_v51  ;;  %v4540_v33 = vor.u32 1.1754944e-38, %v4539_v57  ;;  %vm4538_vm7 = vcmp.eq.f32.partialorder %v4537_v4, 8.507059e+37  ;;  %v5031_v57 = vld [vmem:[#allocation2 + $0x30] sm:$0xff] }
 0xce4   : > { %v4282_v6 = vpop.xlane.xlu1 %4281 }
 0xce5   : > { %v7871_v23 = vpop.eup %7870  ;;  %v7438_v11 = vmul.f32 -1.442695, %v4282_v6  ;;  %4215 = vrot.lane.b32.xlu1 %v4125_v25, %s7985_s23 }
 0xce6   : > { %v7873_v10 = vpop.eup %7872  ;;  %v4456_v48 = vadd.f32 1.0, %v7871_v23  ;;  %4219 = vrot.lane.b32.xlu0 %v4127_v40, %s7985_s23 }
 0xce7   : > { %v4529_v16 = vmul.f32 %v7873_v10, %v4454_v1  ;;  %7876 = vpow2.f32 %v7438_v11  ;;  %v4291_v41 = vpop.xlane.xlu0 %4290  ;;  %vm4534_vm4 = vweird.f32 %v7873_v10 }
 0xce8   : > { %7878 = vrcp.f32 %v4456_v48  ;;  %v7875_v7 = vpop.eup %7874  ;;  %v7441_v47 = vmul.f32 -1.442695, %v4291_v41  ;;  %vm4535_vm6 = vmor %vm4533_vm5, %vm4534_vm4  ;;  %v4567_v22 = vand.u32 2147483647, %v4456_v48  ;;  %v4569_v26 = vand.u32 2147483648, %v4456_v48 }
 0xce9   : > { %v4530_v2 = vsub.f32 1.0, %v4529_v16  ;;  %v10479_v50 = vadd.f32 1.0, %v7875_v7  ;;  %vm4563_vm10 = vweird.f32 %v4456_v48  ;;  %v5081_v16 = vld [vmem:[#allocation2 + $0x31] sm:$0xff] }
 0xcea   : > { %7880 = vpow2.f32 %v7441_v47  ;;  %vm4568_vm11 = vcmp.eq.f32.partialorder %v4567_v22, 8.507059e+37  ;;  %v4570_v34 = vor.u32 1.1754944e-38, %v4569_v26 }
 0xceb   : > { %v4531_v53 = vmul.f32 %v7873_v10, %v4530_v2  ;;  %7882 = vrcp.f32 %v10479_v50  ;;  %v4582_v39 = vand.u32 2147483647, %v10479_v50  ;;  %v4584_v49 = vand.u32 2147483648, %v10479_v50 }
 0xcec   : > { %v4288_v5 = vpop.xlane.xlu1 %4287  ;;  %vm4578_vm14 = vweird.f32 %v10479_v50 }
 0xced   : > { %v7877_v42 = vpop.eup %7876  ;;  %v4532_v12 = vadd.f32 %v7873_v10, %v4531_v53  ;;  %v7440_v38 = vmul.f32 -1.442695, %v4288_v5  ;;  %vm4583_vm1 = vcmp.eq.f32.partialorder %v4582_v39, 8.507059e+37  ;;  %v4585_v51 = vor.u32 1.1754944e-38, %v4584_v49 }
 0xcee   : > { %v7879_v27 = vpop.eup %7878  ;;  %v10482_v19 = vadd.f32 1.0, %v7877_v42 }
 0xcef   : > { %v4536_v29 = vsel %vm4535_vm6, %v7873_v10, %v4532_v12  ;;  %v4559_v63 = vmul.f32 %v7879_v27, %v4456_v48  ;;  %7884 = vpow2.f32 %v7440_v38  ;;  %v4300_v3 = vpop.xlane.xlu0 %4299  ;;  %vm4564_vm8 = vweird.f32 %v7879_v27 }
 0xcf0   : > { %v4541_v9 = vsel %vm4538_vm7, %v4540_v33, %v4536_v29  ;;  %7886 = vrcp.f32 %v10482_v19  ;;  %v7881_v15 = vpop.eup %7880  ;;  %v7444_v52 = vmul.f32 -1.442695, %v4300_v3  ;;  %vm4565_vm12 = vmor %vm4563_vm10, %vm4564_vm8  ;;  %v4597_v62 = vand.u32 2147483647, %v10482_v19 }
 0xcf1   : > { %v4966_v61 = vmul.f32 %v4541_v9, %v11905_v44  ;;  %v4560_v56 = vsub.f32 1.0, %v4559_v63  ;;  %v7883_v59 = vpop.eup %7882  ;;  %v10488_v8 = vadd.f32 1.0, %v7881_v15  ;;  %vm4593_vm2 = vweird.f32 %v10482_v19  ;;  %v11910_v44 = vld [vmem:[#allocation35_spill] sm:$0xff] }
 0xcf2   : > { %v4574_v0 = vmul.f32 %v7883_v59, %v10479_v50  ;;  %vm4579_vm13 = vweird.f32 %v7883_v59  ;;  %v4599_v25 = vand.u32 2147483648, %v10482_v19  ;;  %vm10510_vm4 = vcmp.eq.f32.partialorder %v4597_v62, 8.507059e+37  ;;  %v11909_v50 = vld [vmem:[#allocation68_spill] sm:$0xff] }
 0xcf3   : > { %4998 = vst.msk [vmem:[#allocation2 + $0x39] sm:$0xff] %vm474_vm0, %v4966_v61  ;;  %v4561_v17 = vmul.f32 %v7879_v27, %v4560_v56  ;;  %7888 = vrcp.f32 %v10488_v8  ;;  %vm4580_vm15 = vmor %vm4578_vm14, %vm4579_vm13  ;;  %v4642_v29 = vand.u32 2147483647, %v10488_v8  ;;  %v4644_v63 = vand.u32 2147483648, %v10488_v8 }
 0xcf4   : > { %v4575_v14 = vsub.f32 1.0, %v4574_v0  ;;  %7890 = vpow2.f32 %v7444_v52  ;;  %v4600_v33 = vor.u32 1.1754944e-38, %v4599_v25  ;;  %vm4638_vm7 = vweird.f32 %v10488_v8 }
 0xcf5   : > { %v7885_v43 = vpop.eup %7884  ;;  %v4562_v60 = vadd.f32 %v7879_v27, %v4561_v17  ;;  %vm4643_vm10 = vcmp.eq.f32.partialorder %v4642_v29, 8.507059e+37  ;;  %v4645_v52 = vor.u32 1.1754944e-38, %v4644_v63 }
 0xcf6   : > { %v7887_v36 = vpop.eup %7886  ;;  %v10496_v18 = vadd.f32 1.0, %v7885_v43  ;;  %v4576_v24 = vmul.f32 %v7883_v59, %v4575_v14 }
 0xcf7   : > { %v4566_v58 = vsel %vm4565_vm12, %v7879_v27, %v4562_v60  ;;  %v4589_v45 = vmul.f32 %v7887_v36, %v10482_v19  ;;  %vm4594_vm3 = vweird.f32 %v7887_v36 }
 0xcf8   : > { %v4571_v54 = vsel %vm4568_vm11, %v4570_v34, %v4566_v58  ;;  %7892 = vrcp.f32 %v10496_v18  ;;  %4221 = vrot.lane.b32.xlu2 %v4128_v46, %s7985_s23  ;;  %v4577_v30 = vadd.f32 %v7883_v59, %v4576_v24  ;;  %vm4595_vm5 = vmor %vm4593_vm2, %vm4594_vm3  ;;  %v4629_v26 = vand.u32 2147483648, %v10496_v18 }
 0xcf9   : > { %v4968_v1 = vmul.f32 %v4571_v54, %v11906_v31  ;;  %v4590_v37 = vsub.f32 1.0, %v4589_v45  ;;  %v7889_v55 = vpop.eup %7888  ;;  %vm4623_vm12 = vweird.f32 %v10496_v18  ;;  %v11912_v31 = vld [vmem:[#allocation73_spill] sm:$0xff] }
 0xcfa   : > { %v5082_v6 = vld [vmem:[#allocation2 + $0x39] sm:$0xff]  ;;  %v7891_v23 = vpop.eup %7890  ;;  %v4581_v11 = vsel %vm4580_vm15, %v7883_v59, %v4577_v30  ;;  %v4634_v48 = vmul.f32 %v7889_v55, %v10488_v8  ;;  %vm4639_vm6 = vweird.f32 %v7889_v55  ;;  %v4627_v59 = vand.u32 2147483647, %v10496_v18 }
 0xcfb   : > { %v5032_v40 = vld [vmem:[#allocation2 + $0x38] sm:$0xff]  ;;  %5000 = vst.msk [vmem:[#allocation2 + $0x51] sm:$0xff] %vm474_vm0, %v4968_v1  ;;  %v4591_v10 = vmul.f32 %v7887_v36, %v4590_v37  ;;  %v4586_v41 = vsel %vm4583_vm1, %v4585_v51, %v4581_v11  ;;  %v10514_v2 = vadd.f32 1.0, %v7891_v23  ;;  %v5111_v47 = vpack.c.bf16 %v5082_v6, %v5081_v16  ;;  %vm4640_vm8 = vmor %vm4638_vm7, %vm4639_vm6  ;;  %v5033_v16 = vld [vmem:[#allocation2 + $0x48] sm:$0xff] }
 0xcfc   : > { %v4969_v53 = vmul.f32 %v4586_v41, %v11909_v50  ;;  %v4635_v5 = vsub.f32 1.0, %v4634_v48  ;;  %v5061_v42 = vpack.c.bf16 %v5032_v40, %v5031_v57  ;;  %v5418_v12 = vld [vmem:[#allocation2 + $0x32] sm:$0xff]  ;;  %v5419_v38 = vld [vmem:[#allocation2 + $0x3a] sm:$0xff]  ;;  %v4630_v49 = vor.u32 1.1754944e-38, %v4629_v26  ;;  %v5083_v40 = vld [vmem:[#allocation2 + $0x49] sm:$0xff] }
 0xcfd   : > { %v4592_v4 = vadd.f32 %v7887_v36, %v4591_v10  ;;  %7894 = vrcp.f32 %v10514_v2  ;;  %7471 = vmatmul.msk.bf16.gmra.mxu3 %vm474_vm0, %v5111_v47  ;;  %v5448_v15 = vpack.c.bf16 %v5419_v38, %v5418_v12  ;;  %v11911_v8 = vld [vmem:[#allocation72_spill] sm:$0xff]  ;;  %vm4628_vm14 = vcmp.eq.f32.partialorder %v4627_v59, 8.507059e+37  ;;  %v7678_v38 = vld [vmem:[%s11504_s11 + $0x20] sm:$0xff] }
 0xcfe   : > { %v7893_v27 = vpop.eup %7892  ;;  %5001 = vst.msk [vmem:[#allocation2 + $0x61] sm:$0xff] %vm474_vm0, %v4969_v53  ;;  %v4636_v9 = vmul.f32 %v7889_v55, %v4635_v5  ;;  %7491 = vmatmul.msk.bf16.gmra.mxu0 %vm474_vm0, %v5061_v42  ;;  %7534 = vmatmul.msk.bf16.gmra.mxu2 %vm474_vm0, %v5061_v42  ;;  %v4687_v54 = vand.u32 2147483647, %v10514_v2  ;;  %v4689_v62 = vand.u32 2147483648, %v10514_v2  ;;  %vm4683_vm1 = vweird.f32 %v10514_v2 }
 0xcff   : > { %v4596_v3 = vsel %vm4595_vm5, %v7887_v36, %v4592_v4  ;;  %v4619_v32 = vmul.f32 %v7893_v27, %v10496_v18  ;;  %7513 = vmatmul.msk.bf16.gmra.mxu1 %vm474_vm0, %v5448_v15  ;;  %vm4624_vm11 = vweird.f32 %v7893_v27  ;;  %v11913_v4 = vld [vmem:[#allocation75_spill] sm:$0xff]  ;;  %5978 = vmatpush.bf16.msra.mxu3 %v7678_v38 }
 0xd00   : > { %v4601_v19 = vsel %vm10510_vm4, %v4600_v33, %v4596_v3  ;;  %v4637_v56 = vadd.f32 %v7889_v55, %v4636_v9  ;;  %vm4625_vm13 = vmor %vm4623_vm12, %vm4624_vm11  ;;  %vm4688_vm3 = vcmp.eq.f32.partialorder %v4687_v54, 8.507059e+37  ;;  %v4690_v11 = vor.u32 1.1754944e-38, %v4689_v62 }
 0xd01   : > { %v4970_v61 = vmul.f32 %v4601_v19, %v11910_v44  ;;  %v4620_v22 = vsub.f32 1.0, %v4619_v32  ;;  %v4331_v62 = vsel %vm3372_vm9, %v10504_v13, 0.0 }
 0xd02   : > { %v4294_v17 = vpop.xlane.xlu2 %4293  ;;  %v4641_v0 = vsel %vm4640_vm8, %v7889_v55, %v4637_v56  ;;  %v5084_v18 = vld [vmem:[#allocation2 + $0x51] sm:$0xff]  ;;  %v4214_v10 = vpop.permute.xlu0 %4213 }
 0xd03   : > { %5002 = vst.msk [vmem:[#allocation2 + $0x69] sm:$0xff] %vm474_vm0, %v4970_v61  ;;  %v4621_v46 = vmul.f32 %v7893_v27, %v4620_v22  ;;  %v7442_v43 = vmul.f32 -1.442695, %v4294_v17  ;;  %v7895_v60 = vpop.eup %7894  ;;  %v4646_v14 = vsel %vm4643_vm10, %v4645_v52, %v4641_v0  ;;  %v5034_v55 = vld [vmem:[#allocation2 + $0x50] sm:$0xff]  ;;  %v5112_v48 = vpack.c.bf16 %v5084_v18, %v5083_v40 }
 0xd04   : > { %v4973_v36 = vmul.f32 %v4646_v14, %v11911_v8  ;;  %v4679_v39 = vmul.f32 %v7895_v60, %v10514_v2  ;;  %vm4684_vm15 = vweird.f32 %v7895_v60  ;;  %v4208_v25 = vpop.permute.xlu1 %4207  ;;  %v5062_v47 = vpack.c.bf16 %v5034_v55, %v5033_v16  ;;  %v5420_v57 = vld [vmem:[#allocation2 + $0x4a] sm:$0xff]  ;;  %v5421_v50 = vld [vmem:[#allocation2 + $0x52] sm:$0xff] }
 0xd05   : > { %v4622_v34 = vadd.f32 %v7893_v27, %v4621_v46  ;;  %7896 = vpow2.f32 %v7442_v43  ;;  %vm4685_vm2 = vmor %vm4683_vm1, %vm4684_vm15  ;;  %v4325_v2 = vsel %vm3372_vm9, %v4208_v25, 0.0  ;;  %v4334_v42 = vsel %vm3372_vm9, %v4214_v10, 0.0  ;;  %v5085_v52 = vld [vmem:[#allocation2 + $0x61] sm:$0xff] }
 0xd06   : > { %5005 = vst.msk [vmem:[#allocation2 + $0x91] sm:$0xff] %vm474_vm0, %v4973_v36  ;;  %v4680_v24 = vsub.f32 1.0, %v4679_v39  ;;  %v5449_v12 = vpack.c.bf16 %v5421_v50, %v5420_v57  ;;  %v5035_v46 = vld [vmem:[#allocation2 + $0x60] sm:$0xff]  ;;  %v5037_v50 = vld [vmem:[#allocation2 + $0x78] sm:$0xff] }
 0xd07   : > { %v4626_v58 = vsel %vm4625_vm13, %v7893_v27, %v4622_v34 }
 0xd08   : > { %v4631_v45 = vsel %vm4628_vm14, %v4630_v49, %v4626_v58  ;;  %v4681_v30 = vmul.f32 %v7895_v60, %v4680_v24  ;;  %v11914_v58 = vld [vmem:[#allocation74_spill] sm:$0xff] }
 0xd09   : > { %v4972_v1 = vmul.f32 %v4631_v45, %v11912_v31 }
 0xd0a   : > { %v4303_v37 = vpop.xlane.xlu2 %4302  ;;  %v4682_v51 = vadd.f32 %v7895_v60, %v4681_v30  ;;  %v5086_v15 = vld [vmem:[#allocation2 + $0x69] sm:$0xff] }
 0xd0b   : > { %5004 = vst.msk [vmem:[#allocation2 + $0x81] sm:$0xff] %vm474_vm0, %v4972_v1  ;;  %v7445_v6 = vmul.f32 -1.442695, %v4303_v37  ;;  %v7897_v23 = vpop.eup %7896  ;;  %v5036_v56 = vld [vmem:[#allocation2 + $0x68] sm:$0xff]  ;;  %v5113_v0 = vpack.c.bf16 %v5086_v15, %v5085_v52  ;;  %v5334_v15 = vpop.f32.mrf.mxu0 }
 0xd0c   : > { %v4686_v41 = vsel %vm4685_vm2, %v7895_v60, %v4682_v51  ;;  %v4462_v7 = vadd.f32 1.0, %v7897_v23  ;;  %v5063_v14 = vpack.c.bf16 %v5036_v56, %v5035_v46  ;;  %v5422_v8 = vld [vmem:[#allocation2 + $0x62] sm:$0xff]  ;;  %v5423_v36 = vld [vmem:[#allocation2 + $0x6a] sm:$0xff] }
 0xd0d   : > { %7898 = vpow2.f32 %v7445_v6  ;;  %v4691_v53 = vsel %vm4688_vm3, %v4690_v11, %v4686_v41  ;;  %7472 = vmatmul.msk.bf16.gmra.mxu3 %vm474_vm0, %v5112_v48  ;;  %v5450_v54 = vpack.c.bf16 %v5423_v36, %v5422_v8  ;;  %v11915_v6 = vld [vmem:[#allocation77_spill] sm:$0xff] }
 0xd0e   : > { %v4976_v5 = vmul.f32 %v4691_v53, %v11913_v4  ;;  %7900 = vrcp.f32 %v4462_v7  ;;  %7492 = vmatmul.msk.bf16.gmra.mxu0 %vm474_vm0, %v5062_v47  ;;  %7535 = vmatmul.msk.bf16.gmra.mxu2 %vm474_vm0, %v5062_v47  ;;  %v4659_v19 = vand.u32 2147483648, %v4462_v7  ;;  %v4657_v61 = vand.u32 2147483647, %v4462_v7 }
 0xd0f   : > { %4326 = vadd.xlane.f32.xlu1 %v4325_v2  ;;  %7514 = vmatmul.msk.bf16.gmra.mxu1 %vm474_vm0, %v5449_v12  ;;  %vm4653_vm5 = vweird.f32 %v4462_v7 }
 0xd10   : > { %4335 = vadd.xlane.f32.xlu0 %v4334_v42  ;;  %5008 = vst.msk [vmem:[#allocation2 + $0xb1] sm:$0xff] %vm474_vm0, %v4976_v5  ;;  %v4660_v43 = vor.u32 1.1754944e-38, %v4659_v19  ;;  %vm4658_vm7 = vcmp.eq.f32.partialorder %v4657_v61, 8.507059e+37  ;;  %v5191_v61 = vpop.f32.mrf.mxu3 }
 0xd12   : > { %v4312_v27 = vpop.xlane.xlu2 %4311  ;;  %v5088_v48 = vld [vmem:[#allocation2 + $0x81] sm:$0xff] }
 0xd13   : > { %v7899_v33 = vpop.eup %7898  ;;  %v7448_v29 = vmul.f32 -1.442695, %v4312_v27  ;;  %v5038_v16 = vld [vmem:[#allocation2 + $0x80] sm:$0xff]  ;;  %v11916_v27 = vld [vmem:[#allocation80_spill] sm:$0xff] }
 0xd14   : > { %v4465_v63 = vadd.f32 1.0, %v7899_v33  ;;  %v7901_v3 = vpop.eup %7900  ;;  %v5064_v4 = vpack.c.bf16 %v5038_v16, %v5037_v50  ;;  %v5424_v5 = vld [vmem:[#allocation2 + $0x7a] sm:$0xff]  ;;  %v5425_v42 = vld [vmem:[#allocation2 + $0x82] sm:$0xff] }
 0xd15   : > { %7902 = vpow2.f32 %v7448_v29  ;;  %v4649_v9 = vmul.f32 %v7901_v3, %v4462_v7  ;;  %vm4654_vm4 = vweird.f32 %v7901_v3  ;;  %v5087_v7 = vld [vmem:[#allocation2 + $0x79] sm:$0xff] }
 0xd16   : > { %7904 = vrcp.f32 %v4465_v63  ;;  %vm4655_vm6 = vmor %vm4653_vm5, %vm4654_vm4  ;;  %v4704_v45 = vand.u32 2147483648, %v4465_v63  ;;  %v4702_v1 = vand.u32 2147483647, %v4465_v63  ;;  %vm4698_vm10 = vweird.f32 %v4465_v63 }
 0xd17   : > { %v4650_v32 = vsub.f32 1.0, %v4649_v9  ;;  %v5114_v57 = vpack.c.bf16 %v5088_v48, %v5087_v7  ;;  %v4093_v9 = vmul.f32 %v10280_v28, %v10290_v21 }
 0xd18   : > { %v4705_v37 = vor.u32 1.1754944e-38, %v4704_v45  ;;  %vm4703_vm12 = vcmp.eq.f32.partialorder %v4702_v1, 8.507059e+37 }
 0xd19   : > { %v4651_v44 = vmul.f32 %v7901_v3, %v4650_v32  ;;  %v4129_v52 = vmul.f32 %v10298_v20, %v4093_v9 }
 0xd1b   : > { %v7903_v22 = vpop.eup %7902  ;;  %v4652_v26 = vadd.f32 %v7901_v3, %v4651_v44 }
 0xd1c   : > { %v7905_v59 = vpop.eup %7904  ;;  %v4468_v17 = vadd.f32 1.0, %v7903_v22 }
 0xd1d   : > { %v4694_v60 = vmul.f32 %v7905_v59, %v4465_v63  ;;  %v4656_v34 = vsel %vm4655_vm6, %v7901_v3, %v4652_v26  ;;  %7473 = vmatmul.msk.bf16.gmra.mxu3 %vm474_vm0, %v5113_v0  ;;  %vm4699_vm8 = vweird.f32 %v7905_v59  ;;  %v5451_v63 = vpack.c.bf16 %v5425_v42, %v5424_v5 }
 0xd1e   : > { %7906 = vrcp.f32 %v4468_v17  ;;  %v4661_v39 = vsel %vm4658_vm7, %v4660_v43, %v4656_v34  ;;  %7493 = vmatmul.msk.bf16.gmra.mxu0 %vm474_vm0, %v5063_v14  ;;  %7536 = vmatmul.msk.bf16.gmra.mxu2 %vm474_vm0, %v5063_v14  ;;  %vm4700_vm11 = vmor %vm4698_vm10, %vm4699_vm8  ;;  %v4749_v23 = vand.u32 2147483648, %v4468_v17  ;;  %v4747_v10 = vand.u32 2147483647, %v4468_v17  ;;  %v5089_v43 = vld [vmem:[#allocation2 + $0x91] sm:$0xff] }
 0xd1f   : > { %v4695_v49 = vsub.f32 1.0, %v4694_v60  ;;  %v4974_v24 = vmul.f32 %v4661_v39, %v11914_v58  ;;  %7515 = vmatmul.msk.bf16.gmra.mxu1 %vm474_vm0, %v5450_v54  ;;  %vm4743_vm14 = vweird.f32 %v4468_v17  ;;  %v5039_v14 = vld [vmem:[#allocation2 + $0x90] sm:$0xff]  ;;  %v5528_v58 = vpop.f32.mrf.mxu1 }
 0xd20   : > { %v4750_v47 = vor.u32 1.1754944e-38, %v4749_v23  ;;  %vm4748_vm1 = vcmp.eq.f32.partialorder %v4747_v10, 8.507059e+37  ;;  %v10591_v23 = vpop.f32.mrf.mxu0 }
 0xd21   : > { %v4696_v31 = vmul.f32 %v7905_v59, %v4695_v49  ;;  %4332 = vadd.xlane.f32.xlu2 %v4331_v62  ;;  %5006 = vst.msk [vmem:[#allocation2 + $0x99] sm:$0xff] %vm474_vm0, %v4974_v24 }
 0xd23   : > { %v4697_v30 = vadd.f32 %v7905_v59, %v4696_v31 }
 0xd24   : > { %v7907_v18 = vpop.eup %7906 }
 0xd25   : > { %v4701_v55 = vsel %vm4700_vm11, %v7905_v59, %v4697_v30  ;;  %v4739_v51 = vmul.f32 %v7907_v18, %v4468_v17  ;;  %vm4744_vm13 = vweird.f32 %v7907_v18  ;;  %v5335_v59 = vadd.f32 %v5334_v15, %v5191_v61 }
 0xd26   : > { %v4706_v25 = vsel %vm4703_vm12, %v4705_v37, %v4701_v55  ;;  %vm4745_vm15 = vmor %vm4743_vm14, %vm4744_vm13 }
 0xd27   : > { %v4977_v40 = vmul.f32 %v4706_v25, %v11915_v6  ;;  %v4740_v13 = vsub.f32 1.0, %v4739_v51  ;;  %v10585_v51 = vpop.f32.mrf.mxu3  ;;  %v5608_v7 = vadd.f32 %v5528_v58, %v5335_v59 }
 0xd28   : > { %v5090_v0 = vld [vmem:[#allocation2 + $0x99] sm:$0xff] }
 0xd29   : > { %5009 = vst.msk [vmem:[#allocation2 + $0xc1] sm:$0xff] %vm474_vm0, %v4977_v40  ;;  %v4741_v11 = vmul.f32 %v7907_v18, %v4740_v13  ;;  %v5040_v28 = vld [vmem:[#allocation2 + $0x98] sm:$0xff]  ;;  %v5115_v60 = vpack.c.bf16 %v5090_v0, %v5089_v43 }
 0xd2a   : > { %v5065_v36 = vpack.c.bf16 %v5040_v28, %v5039_v14  ;;  %v5426_v34 = vld [vmem:[#allocation2 + $0x92] sm:$0xff]  ;;  %v5427_v39 = vld [vmem:[#allocation2 + $0x9a] sm:$0xff] }
 0xd2b   : > { %v4742_v41 = vadd.f32 %v7907_v18, %v4741_v11  ;;  %v5452_v30 = vpack.c.bf16 %v5427_v39, %v5426_v34  ;;  %v11922_v43 = vld [vmem:[#allocation76_spill] sm:$0xff] }
 0xd2d   : > { %v4746_v53 = vsel %vm4745_vm15, %v7907_v18, %v4742_v41  ;;  %v4309_v2 = vpop.xlane.xlu0 %4308  ;;  %7474 = vmatmul.msk.bf16.gmra.mxu3 %vm474_vm0, %v5114_v57 }
 0xd2e   : > { %v4751_v12 = vsel %vm4748_vm1, %v4750_v47, %v4746_v53  ;;  %v7447_v38 = vmul.f32 -1.442695, %v4309_v2  ;;  %7494 = vmatmul.msk.bf16.gmra.mxu0 %vm474_vm0, %v5064_v4  ;;  %7537 = vmatmul.msk.bf16.gmra.mxu2 %vm474_vm0, %v5064_v4 }
 0xd2f   : > { %v4980_v33 = vmul.f32 %v4751_v12, %v11916_v27  ;;  %v4297_v29 = vpop.xlane.xlu1 %4296  ;;  %7516 = vmatmul.msk.bf16.gmra.mxu1 %vm474_vm0, %v5451_v63 }
 0xd30   : > { %7908 = vpow2.f32 %v7447_v38  ;;  %v7443_v3 = vmul.f32 -1.442695, %v4297_v29  ;;  %v10605_v29 = vpop.f32.mrf.mxu1 }
 0xd31   : > { %5012 = vst.msk [vmem:[#allocation2 + $0xe1] sm:$0xff] %vm474_vm0, %v4980_v33 }
 0xd32   : > { %7910 = vpow2.f32 %v7443_v3 }
 0xd35   : > { %v4318_v32 = vpop.xlane.xlu0 %4317 }
 0xd36   : > { %v7909_v19 = vpop.eup %7908  ;;  %v7450_v44 = vmul.f32 -1.442695, %v4318_v32 }
 0xd37   : > { %v4467_v56 = vadd.f32 1.0, %v7909_v19  ;;  %v4306_v22 = vpop.xlane.xlu1 %4305  ;;  %v11919_v19 = vld [vmem:[#allocation78_spill] sm:$0xff] }
 0xd38   : > { %v7911_v26 = vpop.eup %7910  ;;  %7912 = vpow2.f32 %v7450_v44  ;;  %v7446_v17 = vmul.f32 -1.442695, %v4306_v22 }
 0xd39   : > { %7914 = vrcp.f32 %v4467_v56  ;;  %4223 = vrot.lane.b32.xlu2 %v4129_v52, %s7985_s23  ;;  %v10576_v46 = vadd.f32 1.0, %v7911_v26  ;;  %v4732_v37 = vand.u32 2147483647, %v4467_v56  ;;  %v4734_v55 = vand.u32 2147483648, %v4467_v56 }
 0xd3a   : > { %7916 = vpow2.f32 %v7446_v17  ;;  %vm4728_vm2 = vweird.f32 %v4467_v56 }
 0xd3b   : > { %7918 = vrcp.f32 %v10576_v46  ;;  %vm10594_vm4 = vcmp.eq.f32.partialorder %v4732_v37, 8.507059e+37  ;;  %v4735_v48 = vor.u32 1.1754944e-38, %v4734_v55  ;;  %v4672_v50 = vand.u32 2147483647, %v10576_v46 }
 0xd3c   : > { %v4674_v53 = vand.u32 2147483648, %v10576_v46  ;;  %vm4668_vm6 = vweird.f32 %v10576_v46 }
 0xd3d   : > { %v4324_v8 = vpop.xlane.xlu0 %4323  ;;  %7475 = vmatmul.msk.bf16.gmra.mxu3 %vm474_vm0, %v5115_v60  ;;  %vm4673_vm10 = vcmp.eq.f32.partialorder %v4672_v50, 8.507059e+37 }
 0xd3e   : > { %v7913_v49 = vpop.eup %7912  ;;  %v7452_v24 = vmul.f32 -1.442695, %v4324_v8  ;;  %7495 = vmatmul.msk.bf16.gmra.mxu0 %vm474_vm0, %v5065_v36  ;;  %7538 = vmatmul.msk.bf16.gmra.mxu2 %vm474_vm0, %v5065_v36  ;;  %v4675_v44 = vor.u32 1.1754944e-38, %v4674_v53  ;;  %v11924_v53 = vld [vmem:[#allocation79_spill] sm:$0xff] }
 0xd3f   : > { %v7915_v45 = vpop.eup %7914  ;;  %v10580_v54 = vadd.f32 1.0, %v7913_v49  ;;  %v4315_v62 = vpop.xlane.xlu1 %4314  ;;  %7517 = vmatmul.msk.bf16.gmra.mxu1 %vm474_vm0, %v5452_v30 }
 0xd40   : > { %v7917_v31 = vpop.eup %7916  ;;  %v4724_v1 = vmul.f32 %v7915_v45, %v4467_v56  ;;  %7920 = vpow2.f32 %v7452_v24  ;;  %v7449_v18 = vmul.f32 -1.442695, %v4315_v62  ;;  %vm4729_vm3 = vweird.f32 %v7915_v45  ;;  %v10614_v56 = vpop.permute.xlu2 %4217 }
 0xd41   : > { %7922 = vrcp.f32 %v10580_v54  ;;  %v7919_v25 = vpop.eup %7918  ;;  %v10587_v40 = vadd.f32 1.0, %v7917_v31  ;;  %vm4730_vm5 = vmor %vm4728_vm2, %vm4729_vm3  ;;  %v4777_v33 = vand.u32 2147483647, %v10580_v54  ;;  %v4779_v9 = vand.u32 2147483648, %v10580_v54 }
 0xd42   : > { %v4725_v6 = vsub.f32 1.0, %v4724_v1  ;;  %7924 = vpow2.f32 %v7449_v18  ;;  %v4664_v13 = vmul.f32 %v7919_v25, %v10576_v46  ;;  %vm4669_vm7 = vweird.f32 %v7919_v25 }
 0xd43   : > { %7926 = vrcp.f32 %v10587_v40  ;;  %vm4670_vm8 = vmor %vm4668_vm6, %vm4669_vm7  ;;  %vm4773_vm11 = vweird.f32 %v10580_v54  ;;  %vm10621_vm13 = vcmp.eq.f32.partialorder %v4777_v33, 8.507059e+37  ;;  %v4780_v14 = vor.u32 1.1754944e-38, %v4779_v9 }
 0xd44   : > { %v4726_v11 = vmul.f32 %v7915_v45, %v4725_v6  ;;  %v4665_v16 = vsub.f32 1.0, %v4664_v13  ;;  %v4717_v49 = vand.u32 2147483647, %v10587_v40  ;;  %v4719_v58 = vand.u32 2147483648, %v10587_v40  ;;  %v11923_v6 = vld [vmem:[#allocation81_spill] sm:$0xff] }
 0xd45   : > { %v4330_v41 = vpop.xlane.xlu0 %4329  ;;  %v5339_v36 = vpop.f32.mrf.mxu0  ;;  %vm4713_vm1 = vweird.f32 %v10587_v40 }
 0xd46   : > { %v7921_v47 = vpop.eup %7920  ;;  %v4727_v57 = vadd.f32 %v7915_v45, %v4726_v11  ;;  %v7454_v2 = vmul.f32 -1.442695, %v4330_v41  ;;  %v4666_v5 = vmul.f32 %v7919_v25, %v4665_v16  ;;  %v4720_v11 = vor.u32 1.1754944e-38, %v4719_v58 }
 0xd47   : > { %v7923_v4 = vpop.eup %7922  ;;  %v10601_v42 = vadd.f32 1.0, %v7921_v47  ;;  %vm4718_vm3 = vcmp.eq.f32.partialorder %v4717_v49, 8.507059e+37 }
 0xd48   : > { %v7925_v12 = vpop.eup %7924  ;;  %v4731_v38 = vsel %vm4730_vm5, %v7915_v45, %v4727_v57  ;;  %v4769_v27 = vmul.f32 %v7923_v4, %v10580_v54  ;;  %7928 = vpow2.f32 %v7454_v2  ;;  %v4667_v3 = vadd.f32 %v7919_v25, %v4666_v5 }
 0xd49   : > { %v4736_v63 = vsel %vm10594_vm4, %v4735_v48, %v4731_v38  ;;  %7930 = vrcp.f32 %v10601_v42  ;;  %v7927_v32 = vpop.eup %7926  ;;  %v10618_v59 = vadd.f32 1.0, %v7925_v12  ;;  %vm4774_vm12 = vweird.f32 %v7923_v4  ;;  %v5533_v48 = vpop.f32.mrf.mxu1  ;;  %v5092_v12 = vld [vmem:[#allocation2 + $0xb1] sm:$0xff] }
 0xd4a   : > { %v4979_v15 = vmul.f32 %v4736_v63, %v11919_v19  ;;  %v4770_v61 = vsub.f32 1.0, %v4769_v27  ;;  %v4671_v22 = vsel %vm4670_vm8, %v7919_v25, %v4667_v3  ;;  %v4709_v52 = vmul.f32 %v7927_v32, %v10587_v40  ;;  %v5196_v26 = vpop.f32.mrf.mxu3  ;;  %vm4775_vm14 = vmor %vm4773_vm11, %vm4774_vm12 }
 0xd4b   : > { %v4676_v17 = vsel %vm4673_vm10, %v4675_v44, %v4671_v22  ;;  %v5754_v28 = vpop.f32.mrf.mxu2  ;;  %7932 = vrcp.f32 %v10618_v59  ;;  %v5340_v24 = vadd.f32 %v5339_v36, %v5196_v26  ;;  %vm4714_vm15 = vweird.f32 %v7927_v32 }
 0xd4c   : > { %5011 = vst.msk [vmem:[#allocation2 + $0xd9] sm:$0xff] %vm474_vm0, %v4979_v15  ;;  %v4771_v0 = vmul.f32 %v7923_v4, %v4770_v61  ;;  %v4975_v60 = vmul.f32 %v4676_v17, %v11922_v43  ;;  %v4710_v8 = vsub.f32 1.0, %v4709_v52  ;;  %v10635_v1 = vadd.f32 %v5754_v28, %v5608_v7  ;;  %vm4715_vm2 = vmor %vm4713_vm1, %vm4714_vm15 }
 0xd4d   : > { %v4807_v37 = vand.u32 2147483647, %v10601_v42  ;;  %v4809_v54 = vand.u32 2147483648, %v10601_v42  ;;  %v10645_v7 = vadd.f32 %v5533_v48, %v5340_v24  ;;  %vm4803_vm6 = vweird.f32 %v10601_v42  ;;  %v5093_v48 = vld [vmem:[#allocation2 + $0xc1] sm:$0xff] }
 0xd4e   : > { %v7929_v34 = vpop.eup %7928  ;;  %v4772_v39 = vadd.f32 %v7923_v4, %v4771_v0  ;;  %5007 = vst.msk [vmem:[#allocation2 + $0xa9] sm:$0xff] %vm474_vm0, %v4975_v60  ;;  %v4711_v62 = vmul.f32 %v7927_v32, %v4710_v8  ;;  %v4762_v19 = vand.u32 2147483647, %v10618_v59  ;;  %v4764_v15 = vand.u32 2147483648, %v10618_v59  ;;  %v5429_v0 = vld [vmem:[#allocation2 + $0xb2] sm:$0xff]  ;;  %v11927_v60 = vld [vmem:[#allocation85_spill] sm:$0xff] }
 0xd4f   : > { %v7931_v45 = vpop.eup %7930  ;;  %v10633_v31 = vadd.f32 1.0, %v7929_v34  ;;  %vm10650_vm5 = vcmp.eq.f32.partialorder %v4807_v37, 8.507059e+37  ;;  %v4810_v5 = vor.u32 1.1754944e-38, %v4809_v54  ;;  %vm4758_vm10 = vweird.f32 %v10618_v59 }
 0xd50   : > { %v4776_v30 = vsel %vm4775_vm14, %v7923_v4, %v4772_v39  ;;  %v4799_v18 = vmul.f32 %v7931_v45, %v10601_v42  ;;  %v4712_v25 = vadd.f32 %v7927_v32, %v4711_v62  ;;  %vm4804_vm4 = vweird.f32 %v7931_v45 }
 0xd51   : > { %v4781_v55 = vsel %vm10621_vm13, %v4780_v14, %v4776_v30  ;;  %7934 = vrcp.f32 %v10633_v31  ;;  %v7933_v16 = vpop.eup %7932  ;;  %vm4805_vm7 = vmor %vm4803_vm6, %vm4804_vm4  ;;  %vm4763_vm12 = vcmp.eq.f32.partialorder %v4762_v19, 8.507059e+37  ;;  %v4765_v34 = vor.u32 1.1754944e-38, %v4764_v15  ;;  %v11930_v15 = vld [vmem:[#allocation83_spill] sm:$0xff] }
 0xd52   : > { %v4982_v13 = vmul.f32 %v4781_v55, %v11923_v6  ;;  %v4800_v10 = vsub.f32 1.0, %v4799_v18  ;;  %v4716_v40 = vsel %vm4715_vm2, %v7927_v32, %v4712_v25  ;;  %v4754_v50 = vmul.f32 %v7933_v16, %v10618_v59 }
 0xd53   : > { %v4321_v41 = vpop.xlane.xlu2 %4320  ;;  %v4721_v47 = vsel %vm4718_vm3, %v4720_v11, %v4716_v40  ;;  %vm4759_vm8 = vweird.f32 %v7933_v16  ;;  %v4839_v39 = vand.u32 2147483648, %v10633_v31  ;;  %v4837_v24 = vand.u32 2147483647, %v10633_v31  ;;  %v5043_v40 = vld [vmem:[#allocation2 + $0xc0] sm:$0xff] }
 0xd54   : > { %5014 = vst.msk [vmem:[#allocation2 + $0xf9] sm:$0xff] %vm474_vm0, %v4982_v13  ;;  %v4801_v57 = vmul.f32 %v7931_v45, %v4800_v10  ;;  %v4978_v2 = vmul.f32 %v4721_v47, %v11924_v53  ;;  %v4755_v27 = vsub.f32 1.0, %v4754_v50  ;;  %v7451_v33 = vmul.f32 -1.442695, %v4321_v41  ;;  %vm4760_vm11 = vmor %vm4758_vm10, %vm4759_vm8  ;;  %v11929_v13 = vld [vmem:[#allocation86_spill] sm:$0xff] }
 0xd55   : > { %v5091_v63 = vld [vmem:[#allocation2 + $0xa9] sm:$0xff]  ;;  %vm4833_vm14 = vweird.f32 %v10633_v31  ;;  %v4840_v37 = vor.u32 1.1754944e-38, %v4839_v39  ;;  %vm4838_vm1 = vcmp.eq.f32.partialorder %v4837_v24, 8.507059e+37  ;;  %v4340_v6 = vsel %vm3372_vm9, %v10614_v56, 0.0 }
 0xd56   : > { %v4802_v38 = vadd.f32 %v7931_v45, %v4801_v57  ;;  %v5041_v3 = vld [vmem:[#allocation2 + $0xa8] sm:$0xff]  ;;  %v5042_v9 = vld [vmem:[#allocation2 + $0xb0] sm:$0xff]  ;;  %5010 = vst.msk [vmem:[#allocation2 + $0xc9] sm:$0xff] %vm474_vm0, %v4978_v2  ;;  %v5116_v61 = vpack.c.bf16 %v5092_v12, %v5091_v63  ;;  %v4756_v42 = vmul.f32 %v7933_v16, %v4755_v27  ;;  %7936 = vpow2.f32 %v7451_v33 }
 0xd57   : > { %v7935_v32 = vpop.eup %7934  ;;  %v4216_v44 = vpop.permute.xlu1 %4215  ;;  %v5066_v22 = vpack.c.bf16 %v5042_v9, %v5041_v3  ;;  %v5428_v52 = vld [vmem:[#allocation2 + $0xaa] sm:$0xff] }
 0xd58   : > { %v4806_v26 = vsel %vm4805_vm7, %v7931_v45, %v4802_v38  ;;  %v4829_v17 = vmul.f32 %v7935_v32, %v10633_v31  ;;  %7476 = vmatmul.msk.bf16.gmra.mxu3 %vm474_vm0, %v5116_v61  ;;  %v5453_v28 = vpack.c.bf16 %v5429_v0, %v5428_v52  ;;  %v4337_v43 = vsel %vm3372_vm9, %v4216_v44, 0.0  ;;  %v11928_v45 = vld [vmem:[#allocation82_spill] sm:$0xff]  ;;  %v10687_v61 = vpop.f32.mrf.mxu0  ;;  %v5045_v52 = vld [vmem:[#allocation2 + $0xd8] sm:$0xff]  ;;  %v10690_v0 = vpop.f32.mrf.mxu1 }
 0xd59   : > { %v4811_v46 = vsel %vm10650_vm5, %v4810_v5, %v4806_v26  ;;  %7496 = vmatmul.msk.bf16.gmra.mxu0 %vm474_vm0, %v5066_v22  ;;  %v4757_v8 = vadd.f32 %v7933_v16, %v4756_v42  ;;  %7539 = vmatmul.msk.bf16.gmra.mxu2 %vm474_vm0, %v5066_v22  ;;  %vm4834_vm13 = vweird.f32 %v7935_v32  ;;  %v5095_v22 = vld [vmem:[#allocation2 + $0xd9] sm:$0xff]  ;;  %v5096_v42 = vld [vmem:[#allocation2 + $0xe1] sm:$0xff] }
 0xd5a   : > { %v4984_v14 = vmul.f32 %v4811_v46, %v11927_v60  ;;  %v4830_v36 = vsub.f32 1.0, %v4829_v17  ;;  %4338 = vadd.xlane.f32.xlu1 %v4337_v43  ;;  %7518 = vmatmul.msk.bf16.gmra.mxu1 %vm474_vm0, %v5453_v28  ;;  %vm4835_vm15 = vmor %vm4833_vm14, %vm4834_vm13  ;;  %v5046_v26 = vld [vmem:[#allocation2 + $0xe0] sm:$0xff]  ;;  %v5118_v46 = vpack.c.bf16 %v5096_v42, %v5095_v22  ;;  %v10692_v60 = vpop.f32.mrf.mxu3 }
 0xd5b   : > { %v4761_v49 = vsel %vm4760_vm11, %v7933_v16, %v4757_v8  ;;  %v4220_v16 = vpop.permute.xlu0 %4219  ;;  %v4222_v33 = vpop.permute.xlu2 %4221  ;;  %v5432_v17 = vld [vmem:[#allocation2 + $0xda] sm:$0xff]  ;;  %v5068_v28 = vpack.c.bf16 %v5046_v26, %v5045_v52  ;;  %v5433_v43 = vld [vmem:[#allocation2 + $0xe2] sm:$0xff] }
 0xd5c   : > { %5016 = vst.msk [vmem:[#allocation2 + $0x111] sm:$0xff] %vm474_vm0, %v4984_v14  ;;  %v4831_v58 = vmul.f32 %v7935_v32, %v4830_v36  ;;  %v4766_v59 = vsel %vm4763_vm12, %v4765_v34, %v4761_v49  ;;  %v7937_v18 = vpop.eup %7936  ;;  %v4343_v4 = vsel %vm3372_vm9, %v4220_v16, 0.0  ;;  %v5455_v14 = vpack.c.bf16 %v5433_v43, %v5432_v17  ;;  %v10697_v8 = vpop.f32.mrf.mxu2 }
 0xd5d   : > { %v4981_v62 = vmul.f32 %v4766_v59, %v11928_v45  ;;  %v4471_v25 = vadd.f32 1.0, %v7937_v18  ;;  %v5094_v10 = vld [vmem:[#allocation2 + $0xc9] sm:$0xff] }
 0xd5e   : > { %v4832_v30 = vadd.f32 %v7935_v32, %v4831_v58  ;;  %v5044_v31 = vld [vmem:[#allocation2 + $0xc8] sm:$0xff]  ;;  %v5117_v57 = vpack.c.bf16 %v5094_v10, %v5093_v48 }
 0xd5f   : > { %5013 = vst.msk [vmem:[#allocation2 + $0xf1] sm:$0xff] %vm474_vm0, %v4981_v62  ;;  %7938 = vrcp.f32 %v4471_v25  ;;  %v5430_v41 = vld [vmem:[#allocation2 + $0xc2] sm:$0xff]  ;;  %v5431_v47 = vld [vmem:[#allocation2 + $0xca] sm:$0xff]  ;;  %v5067_v50 = vpack.c.bf16 %v5044_v31, %v5043_v40  ;;  %v4794_v12 = vand.u32 2147483648, %v4471_v25  ;;  %v4792_v27 = vand.u32 2147483647, %v4471_v25 }
 0xd60   : > { %v4836_v55 = vsel %vm4835_vm15, %v7935_v32, %v4832_v30  ;;  %v5454_v56 = vpack.c.bf16 %v5431_v47, %v5430_v41  ;;  %vm4788_vm3 = vweird.f32 %v4471_v25  ;;  %v4346_v32 = vsel %vm3372_vm9, %v4222_v33, 0.0 }
 0xd61   : > { %v4841_v54 = vsel %vm4838_vm1, %v4840_v37, %v4836_v55  ;;  %v4795_v3 = vor.u32 1.1754944e-38, %v4794_v12  ;;  %vm4793_vm5 = vcmp.eq.f32.partialorder %v4792_v27, 8.507059e+37 }
 0xd62   : > { %v4986_v11 = vmul.f32 %v4841_v54, %v11929_v13  ;;  %4341 = vadd.xlane.f32.xlu1 %v4340_v6  ;;  %v4094_v6 = vmul.f32 %v10284_v35, %v10290_v21  ;;  %v5098_v13 = vld [vmem:[#allocation2 + $0xf9] sm:$0xff] }
 0xd63   : > { %v5100_v52 = vld [vmem:[#allocation2 + $0x111] sm:$0xff] }
 0xd64   : > { %5018 = vst.msk [vmem:[#allocation2 + $0x129] sm:$0xff] %vm474_vm0, %v4986_v11  ;;  %v4130_v41 = vmul.f32 %v10298_v20, %v4094_v6 }
 0xd65   : > { %v7939_v53 = vpop.eup %7938 }
 0xd66   : > { %v4784_v2 = vmul.f32 %v7939_v53, %v4471_v25  ;;  %vm4789_vm2 = vweird.f32 %v7939_v53  ;;  %v5097_v37 = vld [vmem:[#allocation2 + $0xf1] sm:$0xff] }
 0xd67   : > { %vm4790_vm4 = vmor %vm4788_vm3, %vm4789_vm2  ;;  %v5047_v55 = vld [vmem:[#allocation2 + $0xf0] sm:$0xff]  ;;  %v5048_v25 = vld [vmem:[#allocation2 + $0xf8] sm:$0xff]  ;;  %v5119_v31 = vpack.c.bf16 %v5098_v13, %v5097_v37 }
 0xd68   : > { %7477 = vmatmul.msk.bf16.gmra.mxu3 %vm474_vm0, %v5117_v57  ;;  %v4785_v5 = vsub.f32 1.0, %v4784_v2  ;;  %v5434_v11 = vld [vmem:[#allocation2 + $0xf2] sm:$0xff]  ;;  %v5069_v48 = vpack.c.bf16 %v5048_v25, %v5047_v55 }
 0xd69   : > { %7497 = vmatmul.msk.bf16.gmra.mxu0 %vm474_vm0, %v5067_v50  ;;  %7540 = vmatmul.msk.bf16.gmra.mxu2 %vm474_vm0, %v5067_v50 }
 0xd6a   : > { %4344 = vadd.xlane.f32.xlu1 %v4343_v4  ;;  %7519 = vmatmul.msk.bf16.gmra.mxu1 %vm474_vm0, %v5454_v56  ;;  %v4786_v38 = vmul.f32 %v7939_v53, %v4785_v5 }
 0xd6c   : > { %v4787_v63 = vadd.f32 %v7939_v53, %v4786_v38 }
 0xd6e   : > { %v4791_v9 = vsel %vm4790_vm4, %v7939_v53, %v4787_v63 }
 0xd6f   : > { %v4796_v19 = vsel %vm4793_vm5, %v4795_v3, %v4791_v9 }
 0xd70   : > { %v4983_v44 = vmul.f32 %v4796_v19, %v11930_v15 }
 0xd72   : > { %4347 = vadd.xlane.f32.xlu1 %v4346_v32  ;;  %5015 = vst.msk [vmem:[#allocation2 + $0x109] sm:$0xff] %vm474_vm0, %v4983_v44 }
 0xd78   : > { %7478 = vmatmul.msk.bf16.gmra.mxu3 %vm474_vm0, %v5118_v46 }
 0xd79   : > { %7498 = vmatmul.msk.bf16.gmra.mxu0 %vm474_vm0, %v5068_v28  ;;  %7541 = vmatmul.msk.bf16.gmra.mxu2 %vm474_vm0, %v5068_v28  ;;  %v5099_v33 = vld [vmem:[#allocation2 + $0x109] sm:$0xff]  ;;  %v5437_v28 = vld [vmem:[#allocation2 + $0x112] sm:$0xff] }
 0xd7a   : > { %7520 = vmatmul.msk.bf16.gmra.mxu1 %vm474_vm0, %v5455_v14  ;;  %v5049_v63 = vld [vmem:[#allocation2 + $0x108] sm:$0xff]  ;;  %v5050_v3 = vld [vmem:[#allocation2 + $0x110] sm:$0xff]  ;;  %v5120_v17 = vpack.c.bf16 %v5100_v52, %v5099_v33 }
 0xd7b   : > { %v5344_v36 = vpop.f32.mrf.mxu0  ;;  %v5436_v44 = vld [vmem:[#allocation2 + $0x10a] sm:$0xff]  ;;  %v5070_v46 = vpack.c.bf16 %v5050_v3, %v5049_v63 }
 0xd7c   : > { %v5538_v34 = vpop.f32.mrf.mxu1 }
 0xd80   : > { %v5201_v39 = vpop.f32.mrf.mxu3 }
 0xd81   : > { %v5345_v49 = vadd.f32 %v5344_v36, %v5201_v39  ;;  %v5759_v24 = vpop.f32.mrf.mxu2  ;;  %v5457_v36 = vpack.c.bf16 %v5437_v28, %v5436_v44 }
 0xd82   : > { %v4327_v58 = vpop.xlane.xlu1 %4326  ;;  %v10701_v62 = vadd.f32 %v5759_v24, %v10645_v7  ;;  %v5435_v7 = vld [vmem:[#allocation2 + $0xfa] sm:$0xff] }
 0xd83   : > { %v7453_v59 = vmul.f32 -1.442695, %v4327_v58  ;;  %v4336_v45 = vpop.xlane.xlu0 %4335  ;;  %v10703_v30 = vpop.f32.mrf.mxu0  ;;  %v5612_v54 = vadd.f32 %v5538_v34, %v5345_v49  ;;  %v5456_v40 = vpack.c.bf16 %v5435_v7, %v5434_v11 }
 0xd84   : > { %v7456_v18 = vmul.f32 -1.442695, %v4336_v45  ;;  %v10707_v10 = vpop.f32.mrf.mxu1 }
 0xd85   : > { %7940 = vpow2.f32 %v7453_v59 }
 0xd86   : > { %7942 = vpow2.f32 %v7456_v18 }
 0xd88   : > { %v10709_v16 = vpop.f32.mrf.mxu3  ;;  %7479 = vmatmul.msk.bf16.gmra.mxu3 %vm474_vm0, %v5119_v31 }
 0xd89   : > { %7499 = vmatmul.msk.bf16.gmra.mxu0 %vm474_vm0, %v5069_v48  ;;  %7542 = vmatmul.msk.bf16.gmra.mxu2 %vm474_vm0, %v5069_v48  ;;  %v10716_v21 = vpop.f32.mrf.mxu2 }
 0xd8a   : > { %7521 = vmatmul.msk.bf16.gmra.mxu1 %vm474_vm0, %v5456_v40 }
 0xd8b   : > { %v7941_v35 = vpop.eup %7940  ;;  %4225 = vrot.lane.b32.xlu1 %v4130_v41, %s7985_s23  ;;  %v5349_v50 = vpop.f32.mrf.mxu0  ;;  %v11931_v41 = vld [vmem:[#allocation84_spill] sm:$0xff] }
 0xd8c   : > { %v7943_v47 = vpop.eup %7942  ;;  %v4473_v57 = vadd.f32 1.0, %v7941_v35  ;;  %v5543_v2 = vpop.f32.mrf.mxu1 }
 0xd8d   : > { %v4476_v53 = vadd.f32 1.0, %v7943_v47 }
 0xd8e   : > { %7944 = vrcp.f32 %v4473_v57  ;;  %v4824_v43 = vand.u32 2147483648, %v4473_v57  ;;  %v4822_v39 = vand.u32 2147483647, %v4473_v57  ;;  %vm4818_vm8 = vweird.f32 %v4473_v57 }
 0xd8f   : > { %7946 = vrcp.f32 %v4476_v53  ;;  %v4869_v49 = vand.u32 2147483648, %v4476_v53  ;;  %v4867_v59 = vand.u32 2147483647, %v4476_v53  ;;  %vm4863_vm11 = vweird.f32 %v4476_v53 }
 0xd90   : > { %v5206_v56 = vpop.f32.mrf.mxu3  ;;  %v4825_v37 = vor.u32 1.1754944e-38, %v4824_v43  ;;  %vm4823_vm12 = vcmp.eq.f32.partialorder %v4822_v39, 8.507059e+37 }
 0xd91   : > { %v5350_v4 = vadd.f32 %v5349_v50, %v5206_v56  ;;  %v5764_v5 = vpop.f32.mrf.mxu2  ;;  %v4870_v11 = vor.u32 1.1754944e-38, %v4869_v49  ;;  %vm4868_vm14 = vcmp.eq.f32.partialorder %v4867_v59, 8.507059e+37  ;;  %v11932_v50 = vld [vmem:[#allocation87_spill] sm:$0xff] }
 0xd92   : > { %v10719_v12 = vadd.f32 %v5764_v5, %v5612_v54 }
 0xd93   : > { %v10721_v38 = vpop.f32.mrf.mxu0  ;;  %v5614_v9 = vadd.f32 %v5543_v2, %v5350_v4 }
 0xd94   : > { %v7945_v20 = vpop.eup %7944  ;;  %v4333_v27 = vpop.xlane.xlu2 %4332 }
 0xd95   : > { %v7947_v32 = vpop.eup %7946  ;;  %v4814_v19 = vmul.f32 %v7945_v20, %v4473_v57  ;;  %v7455_v15 = vmul.f32 -1.442695, %v4333_v27  ;;  %v10723_v42 = vpop.f32.mrf.mxu1  ;;  %vm4819_vm6 = vweird.f32 %v7945_v20 }
 0xd96   : > { %v4859_v22 = vmul.f32 %v7947_v32, %v4476_v53  ;;  %vm4864_vm7 = vweird.f32 %v7947_v32  ;;  %vm4820_vm10 = vmor %vm4818_vm8, %vm4819_vm6 }
 0xd97   : > { %v4815_v26 = vsub.f32 1.0, %v4814_v19  ;;  %7948 = vpow2.f32 %v7455_v15  ;;  %vm4865_vm13 = vmor %vm4863_vm11, %vm4864_vm7  ;;  %v5102_v19 = vld [vmem:[#allocation2 + $0x129] sm:$0xff] }
 0xd98   : > { %v4860_v14 = vsub.f32 1.0, %v4859_v22  ;;  %v10725_v58 = vpop.f32.mrf.mxu3  ;;  %7480 = vmatmul.msk.bf16.gmra.mxu3 %vm474_vm0, %v5120_v17 }
 0xd99   : > { %v4816_v34 = vmul.f32 %v7945_v20, %v4815_v26  ;;  %7500 = vmatmul.msk.bf16.gmra.mxu0 %vm474_vm0, %v5070_v46  ;;  %7543 = vmatmul.msk.bf16.gmra.mxu2 %vm474_vm0, %v5070_v46  ;;  %v10731_v18 = vpop.f32.mrf.mxu2  ;;  %v5439_v46 = vld [vmem:[#allocation2 + $0x12a] sm:$0xff] }
 0xd9a   : > { %v4861_v24 = vmul.f32 %v7947_v32, %v4860_v14  ;;  %7522 = vmatmul.msk.bf16.gmra.mxu1 %vm474_vm0, %v5457_v36 }
 0xd9b   : > { %v4817_v45 = vadd.f32 %v7945_v20, %v4816_v34  ;;  %v5354_v25 = vpop.f32.mrf.mxu0 }
 0xd9c   : > { %v4862_v55 = vadd.f32 %v7947_v32, %v4861_v24  ;;  %v4224_v54 = vpop.permute.xlu2 %4223 }
 0xd9d   : > { %v7949_v6 = vpop.eup %7948  ;;  %v4821_v13 = vsel %vm4820_vm10, %v7945_v20, %v4817_v45  ;;  %v4349_v31 = vsel %vm3372_vm9, %v4224_v54, 0.0  ;;  %v5548_v57 = vpop.f32.mrf.mxu1 }
 0xd9e   : > { %v4826_v48 = vsel %vm4823_vm12, %v4825_v37, %v4821_v13  ;;  %v4866_v7 = vsel %vm4865_vm13, %v7947_v32, %v4862_v55  ;;  %v4475_v40 = vadd.f32 1.0, %v7949_v6  ;;  %4350 = vadd.xlane.f32.xlu0 %v4349_v31  ;;  %v11936_v55 = vld [vmem:[#allocation88_spill] sm:$0xff] }
 0xd9f   : > { %v4985_v35 = vmul.f32 %v4826_v48, %v11931_v41  ;;  %v4871_v47 = vsel %vm4868_vm14, %v4870_v11, %v4866_v7 }
 0xda0   : > { %v4988_v53 = vmul.f32 %v4871_v47, %v11932_v50  ;;  %7950 = vrcp.f32 %v4475_v40  ;;  %v5211_v2 = vpop.f32.mrf.mxu3  ;;  %v4854_v28 = vand.u32 2147483648, %v4475_v40  ;;  %v4852_v36 = vand.u32 2147483647, %v4475_v40 }
 0xda1   : > { %5017 = vst.msk [vmem:[#allocation2 + $0x121] sm:$0xff] %vm474_vm0, %v4985_v35  ;;  %v5355_v56 = vadd.f32 %v5354_v25, %v5211_v2  ;;  %v5769_v4 = vpop.f32.mrf.mxu2  ;;  %vm4848_vm1 = vweird.f32 %v4475_v40 }
 0xda2   : > { %5020 = vst.msk [vmem:[#allocation2 + $0x141] sm:$0xff] %vm474_vm0, %v4988_v53  ;;  %v10739_v5 = vadd.f32 %v5769_v4, %v5614_v9  ;;  %v4855_v24 = vor.u32 1.1754944e-38, %v4854_v28  ;;  %vm4853_vm3 = vcmp.eq.f32.partialorder %v4852_v36, 8.507059e+37 }
 0xda3   : > { %v10741_v20 = vpop.f32.mrf.mxu0  ;;  %v5616_v27 = vadd.f32 %v5548_v57, %v5355_v56 }
 0xda4   : > { %11933 = vst [vmem:[#allocation41_spill] sm:$0xff] %v10741_v20  ;;  %v6330_v20 = vld [vmem:[#allocation2 + $0xc0] sm:$0xff] }
 0xda5   : > { %v10743_v3 = vpop.f32.mrf.mxu1 }
 0xda6   : > { %v7951_v33 = vpop.eup %7950  ;;  %11934 = vst [vmem:[#allocation45_spill] sm:$0xff] %v10743_v3 }
 0xda7   : > { %v4844_v63 = vmul.f32 %v7951_v33, %v4475_v40  ;;  %vm4849_vm15 = vweird.f32 %v7951_v33 }
 0xda8   : > { %v5101_v32 = vld [vmem:[#allocation2 + $0x121] sm:$0xff]  ;;  %v10745_v22 = vpop.f32.mrf.mxu3  ;;  %vm4850_vm2 = vmor %vm4848_vm1, %vm4849_vm15 }
 0xda9   : > { %v5051_v15 = vld [vmem:[#allocation2 + $0x120] sm:$0xff]  ;;  %v4845_v44 = vsub.f32 1.0, %v4844_v63  ;;  %11935 = vst [vmem:[#allocation43_spill] sm:$0xff] %v10745_v22  ;;  %v5121_v52 = vpack.c.bf16 %v5102_v19, %v5101_v32  ;;  %v5052_v26 = vld [vmem:[#allocation2 + $0x128] sm:$0xff]  ;;  %v10747_v34 = vpop.f32.mrf.mxu2 }
 0xdaa   : > { %v5438_v17 = vld [vmem:[#allocation2 + $0x122] sm:$0xff]  ;;  %v5071_v9 = vpack.c.bf16 %v5052_v26, %v5051_v15 }
 0xdab   : > { %v5458_v43 = vpack.c.bf16 %v5439_v46, %v5438_v17  ;;  %v4846_v14 = vmul.f32 %v7951_v33, %v4845_v44  ;;  %7481 = vmatmul.msk.bf16.gmra.mxu3 %vm474_vm0, %v5121_v52  ;;  %v5359_v49 = vpop.f32.mrf.mxu0  ;;  %v5104_v41 = vld [vmem:[#allocation2 + $0x141] sm:$0xff]  ;;  %v5881_v22 = vld [vmem:[#allocation2 + $0xc9] sm:$0xff] }
 0xdac   : > { %7501 = vmatmul.msk.bf16.gmra.mxu0 %vm474_vm0, %v5071_v9  ;;  %7544 = vmatmul.msk.bf16.gmra.mxu2 %vm474_vm0, %v5071_v9  ;;  %v5441_v4 = vld [vmem:[#allocation2 + $0x142] sm:$0xff] }
 0xdad   : > { %7523 = vmatmul.msk.bf16.gmra.mxu1 %vm474_vm0, %v5458_v43  ;;  %v4847_v39 = vadd.f32 %v7951_v33, %v4846_v14  ;;  %v5553_v45 = vpop.f32.mrf.mxu1 }
 0xdaf   : > { %v4851_v59 = vsel %vm4850_vm2, %v7951_v33, %v4847_v39 }
 0xdb0   : > { %v4856_v37 = vsel %vm4853_vm3, %v4855_v24, %v4851_v59  ;;  %v5216_v54 = vpop.f32.mrf.mxu3 }
 0xdb1   : > { %v4987_v25 = vmul.f32 %v4856_v37, %v11936_v55  ;;  %v5360_v6 = vadd.f32 %v5359_v49, %v5216_v54  ;;  %v5774_v13 = vpop.f32.mrf.mxu2 }
 0xdb2   : > { %v10755_v11 = vadd.f32 %v5774_v13, %v5616_v27 }
 0xdb3   : > { %5019 = vst.msk [vmem:[#allocation2 + $0x139] sm:$0xff] %vm474_vm0, %v4987_v25  ;;  %v5618_v31 = vadd.f32 %v5553_v45, %v5360_v6  ;;  %v10757_v48 = vpop.f32.mrf.mxu0 }
 0xdb4   : > { %11937 = vst [vmem:[#allocation47_spill] sm:$0xff] %v10757_v48  ;;  %v5879_v48 = vld [vmem:[#allocation2 + $0xb1] sm:$0xff] }
 0xdb5   : > { %v10759_v7 = vpop.f32.mrf.mxu1 }
 0xdb6   : > { %11938 = vst [vmem:[#allocation44_spill] sm:$0xff] %v10759_v7  ;;  %v5876_v7 = vld [vmem:[#allocation2 + $0x91] sm:$0xff] }
 0xdb8   : > { %v10761_v40 = vpop.f32.mrf.mxu3 }
 0xdb9   : > { %11939 = vst [vmem:[#allocation46_spill] sm:$0xff] %v10761_v40  ;;  %v10763_v50 = vpop.f32.mrf.mxu2  ;;  %v6105_v40 = vld [vmem:[#allocation2 + $0xb2] sm:$0xff] }
 0xdba   : > { %v5103_v35 = vld [vmem:[#allocation2 + $0x139] sm:$0xff]  ;;  %11940 = vst [vmem:[#allocation48_spill] sm:$0xff] %v10763_v50 }
 0xdbb   : > { %v5053_v47 = vld [vmem:[#allocation2 + $0x138] sm:$0xff]  ;;  %v5054_v57 = vld [vmem:[#allocation2 + $0x140] sm:$0xff]  ;;  %v5122_v53 = vpack.c.bf16 %v5104_v41, %v5103_v35  ;;  %v5364_v33 = vpop.f32.mrf.mxu0 }
 0xdbc   : > { %v10765_v2 = vpack.c.bf16 %v5054_v57, %v5053_v47  ;;  %v5440_v56 = vld [vmem:[#allocation2 + $0x13a] sm:$0xff] }
 0xdbd   : > { %v5459_v27 = vpack.c.bf16 %v5441_v4, %v5440_v56  ;;  %7482 = vmatmul.msk.bf16.gmra.mxu3 %vm474_vm0, %v5122_v53  ;;  %v5558_v19 = vpop.f32.mrf.mxu1 }
 0xdbe   : > { %7502 = vmatmul.msk.bf16.gmra.mxu0 %vm474_vm0, %v10765_v2  ;;  %7545 = vmatmul.msk.bf16.gmra.mxu2 %vm474_vm0, %v10765_v2 }
 0xdbf   : > { %7524 = vmatmul.msk.bf16.gmra.mxu1 %vm474_vm0, %v5459_v27 }
 0xdc0   : > { %v5221_v63 = vpop.f32.mrf.mxu3 }
 0xdc1   : > { %v5365_v32 = vadd.f32 %v5364_v33, %v5221_v63  ;;  %v5779_v15 = vpop.f32.mrf.mxu2 }
 0xdc2   : > { %v10773_v44 = vadd.f32 %v5779_v15, %v5618_v31 }
 0xdc3   : > { %v5620_v52 = vadd.f32 %v5558_v19, %v5365_v32  ;;  %v10775_v17 = vpop.f32.mrf.mxu0 }
 0xdc4   : > { %11941 = vst [vmem:[#allocation49_spill] sm:$0xff] %v10775_v17  ;;  %v11972_v17 = vld [vmem:[#allocation42_spill] sm:$0xff] }
 0xdc5   : > { %v10777_v28 = vpop.f32.mrf.mxu1 }
 0xdc6   : > { %11942 = vst [vmem:[#allocation50_spill] sm:$0xff] %v10777_v28 }
 0xdc8   : > { %v10779_v9 = vpop.f32.mrf.mxu3 }
 0xdc9   : > { %11943 = vst [vmem:[#allocation51_spill] sm:$0xff] %v10779_v9  ;;  %v10781_v43 = vpop.f32.mrf.mxu2 }
 0xdca   : > { %11944 = vst [vmem:[#allocation52_spill] sm:$0xff] %v10781_v43  ;;  %v6329_v43 = vld [vmem:[#allocation2 + $0xb0] sm:$0xff] }
 0xdcd   : > { %v4339_v26 = vpop.xlane.xlu1 %4338 }
 0xdce   : > { %v7457_v46 = vmul.f32 -1.442695, %v4339_v26 }
 0xdd0   : > { %7952 = vpow2.f32 %v7457_v46 }
 0xdd5   : > { %v4342_v14 = vpop.xlane.xlu1 %4341 }
 0xdd6   : > { %v7953_v36 = vpop.eup %7952  ;;  %v7458_v39 = vmul.f32 -1.442695, %v4342_v14  ;;  %v5369_v49 = vpop.f32.mrf.mxu0 }
 0xdd7   : > { %v4477_v24 = vadd.f32 1.0, %v7953_v36  ;;  %v5563_v59 = vpop.f32.mrf.mxu1 }
 0xdd8   : > { %7954 = vpow2.f32 %v7458_v39 }
 0xdd9   : > { %7956 = vrcp.f32 %v4477_v24  ;;  %v4884_v4 = vand.u32 2147483648, %v4477_v24  ;;  %v4882_v33 = vand.u32 2147483647, %v4477_v24  ;;  %vm4878_vm5 = vweird.f32 %v4477_v24 }
 0xddb   : > { %v5226_v45 = vpop.f32.mrf.mxu3  ;;  %v4885_v36 = vor.u32 1.1754944e-38, %v4884_v4  ;;  %vm4883_vm7 = vcmp.eq.f32.partialorder %v4882_v33, 8.507059e+37 }
 0xddc   : > { %v5370_v37 = vadd.f32 %v5369_v49, %v5226_v45  ;;  %v5784_v55 = vpop.f32.mrf.mxu2 }
 0xddd   : > { %v4345_v25 = vpop.xlane.xlu1 %4344  ;;  %v10783_v6 = vadd.f32 %v5784_v55, %v5620_v52  ;;  %v11949_v55 = vld [vmem:[#allocation31_spill] sm:$0xff] }
 0xdde   : > { %v7955_v54 = vpop.eup %7954  ;;  %v7459_v13 = vmul.f32 -1.442695, %v4345_v25  ;;  %v10785_v31 = vpop.f32.mrf.mxu0  ;;  %v5622_v47 = vadd.f32 %v5563_v59, %v5370_v37 }
 0xddf   : > { %11945 = vst [vmem:[#allocation53_spill] sm:$0xff] %v10785_v31  ;;  %v7957_v41 = vpop.eup %7956  ;;  %v4478_v35 = vadd.f32 1.0, %v7955_v54  ;;  %v10787_v53 = vpop.f32.mrf.mxu1  ;;  %v5866_v31 = vld [vmem:[#allocation2 + $0x19] sm:$0xff] }
 0xde0   : > { %v4874_v57 = vmul.f32 %v7957_v41, %v4477_v24  ;;  %7958 = vpow2.f32 %v7459_v13  ;;  %11946 = vst [vmem:[#allocation54_spill] sm:$0xff] %v10787_v53  ;;  %vm4879_vm4 = vweird.f32 %v7957_v41 }
 0xde1   : > { %7960 = vrcp.f32 %v4478_v35  ;;  %vm4880_vm6 = vmor %vm4878_vm5, %vm4879_vm4  ;;  %v4899_v13 = vand.u32 2147483648, %v4478_v35  ;;  %vm4893_vm10 = vweird.f32 %v4478_v35 }
 0xde2   : > { %v4875_v56 = vsub.f32 1.0, %v4874_v57  ;;  %v4897_v57 = vand.u32 2147483647, %v4478_v35 }
 0xde3   : > { %v10789_v63 = vpop.f32.mrf.mxu3 }
 0xde4   : > { %v4876_v27 = vmul.f32 %v7957_v41, %v4875_v56  ;;  %11947 = vst [vmem:[#allocation55_spill] sm:$0xff] %v10789_v63  ;;  %v10791_v32 = vpop.f32.mrf.mxu2  ;;  %vm4898_vm12 = vcmp.eq.f32.partialorder %v4897_v57, 8.507059e+37 }
 0xde5   : > { %11948 = vst [vmem:[#allocation56_spill] sm:$0xff] %v10791_v32  ;;  %v4348_v19 = vpop.xlane.xlu1 %4347 }
 0xde6   : > { %v7959_v15 = vpop.eup %7958  ;;  %v4877_v52 = vadd.f32 %v7957_v41, %v4876_v27  ;;  %v7460_v26 = vmul.f32 -1.442695, %v4348_v19  ;;  %v5374_v46 = vpop.f32.mrf.mxu0 }
 0xde7   : > { %v7961_v14 = vpop.eup %7960  ;;  %v4479_v39 = vadd.f32 1.0, %v7959_v15  ;;  %v5568_v45 = vpop.f32.mrf.mxu1 }
 0xde8   : > { %v4881_v49 = vsel %vm4880_vm6, %v7957_v41, %v4877_v52  ;;  %v4889_v59 = vmul.f32 %v7961_v14, %v4478_v35  ;;  %7962 = vpow2.f32 %v7460_v26  ;;  %vm4894_vm8 = vweird.f32 %v7961_v14 }
 0xde9   : > { %v4886_v37 = vsel %vm4883_vm7, %v4885_v36, %v4881_v49  ;;  %7964 = vrcp.f32 %v4479_v39  ;;  %vm4895_vm11 = vmor %vm4893_vm10, %vm4894_vm8  ;;  %v4900_v26 = vor.u32 1.1754944e-38, %v4899_v13  ;;  %v4914_v35 = vand.u32 2147483648, %v4479_v39 }
 0xdea   : > { %v4989_v25 = vmul.f32 %v4886_v37, %v11949_v55  ;;  %v4890_v54 = vsub.f32 1.0, %v4889_v59  ;;  %vm4908_vm14 = vweird.f32 %v4479_v39 }
 0xdeb   : > { %v5231_v56 = vpop.f32.mrf.mxu3 }
 0xdec   : > { %5021 = vst.msk [vmem:[#allocation2 + $0x151] sm:$0xff] %vm474_vm0, %v4989_v25  ;;  %v4891_v24 = vmul.f32 %v7961_v14, %v4890_v54  ;;  %v5375_v27 = vadd.f32 %v5374_v46, %v5231_v56  ;;  %v5789_v4 = vpop.f32.mrf.mxu2  ;;  %v11952_v46 = vld [vmem:[#allocation34_spill] sm:$0xff]  ;;  %v4912_v56 = vand.u32 2147483647, %v4479_v39 }
 0xded   : > { %v10795_v33 = vadd.f32 %v5789_v4, %v5622_v47 }
 0xdee   : > { %v7963_v19 = vpop.eup %7962  ;;  %v4892_v41 = vadd.f32 %v7961_v14, %v4891_v24  ;;  %v10797_v15 = vpop.f32.mrf.mxu0  ;;  %v5624_v49 = vadd.f32 %v5568_v45, %v5375_v27  ;;  %v4915_v27 = vor.u32 1.1754944e-38, %v4914_v35  ;;  %vm4913_vm1 = vcmp.eq.f32.partialorder %v4912_v56, 8.507059e+37 }
 0xdef   : > { %11950 = vst [vmem:[#allocation57_spill] sm:$0xff] %v10797_v15  ;;  %v7965_v52 = vpop.eup %7964  ;;  %v4480_v36 = vadd.f32 1.0, %v7963_v19  ;;  %v10799_v55 = vpop.f32.mrf.mxu1 }
 0xdf0   : > { %v4896_v59 = vsel %vm4895_vm11, %v7961_v14, %v4892_v41  ;;  %v4904_v37 = vmul.f32 %v7965_v52, %v4479_v39  ;;  %11951 = vst [vmem:[#allocation58_spill] sm:$0xff] %v10799_v55  ;;  %vm4909_vm13 = vweird.f32 %v7965_v52 }
 0xdf1   : > { %v4901_v25 = vsel %vm4898_vm12, %v4900_v26, %v4896_v59  ;;  %7966 = vrcp.f32 %v4480_v36  ;;  %vm4910_vm15 = vmor %vm4908_vm14, %vm4909_vm13  ;;  %v4927_v55 = vand.u32 2147483647, %v4480_v36  ;;  %v4929_v15 = vand.u32 2147483648, %v4480_v36 }
 0xdf2   : > { %v4990_v54 = vmul.f32 %v4901_v25, %v11952_v46  ;;  %v4905_v24 = vsub.f32 1.0, %v4904_v37  ;;  %v11955_v37 = vld [vmem:[#allocation38_spill] sm:$0xff]  ;;  %vm4923_vm3 = vweird.f32 %v4480_v36 }
 0xdf3   : > { %v10803_v4 = vpop.f32.mrf.mxu3  ;;  %vm4928_vm5 = vcmp.eq.f32.partialorder %v4927_v55, 8.507059e+37 }
 0xdf4   : > { %5022 = vst.msk [vmem:[#allocation2 + $0x159] sm:$0xff] %vm474_vm0, %v4990_v54  ;;  %v4906_v47 = vmul.f32 %v7965_v52, %v4905_v24  ;;  %v10805_v13 = vpop.f32.mrf.mxu2  ;;  %v5105_v54 = vld [vmem:[#allocation2 + $0x151] sm:$0xff] }
 0xdf5   : > { %11953 = vst [vmem:[#allocation59_spill] sm:$0xff] %v10803_v4  ;;  %v5055_v24 = vld [vmem:[#allocation2 + $0x150] sm:$0xff] }
 0xdf6   : > { %11954 = vst [vmem:[#allocation60_spill] sm:$0xff] %v10805_v13  ;;  %v4907_v14 = vadd.f32 %v7965_v52, %v4906_v47  ;;  %v5379_v45 = vpop.f32.mrf.mxu0 }
 0xdf7   : > { %v7967_v57 = vpop.eup %7966  ;;  %v5573_v26 = vpop.f32.mrf.mxu1 }
 0xdf8   : > { %v4911_v19 = vsel %vm4910_vm15, %v7965_v52, %v4907_v14  ;;  %v4919_v41 = vmul.f32 %v7967_v57, %v4480_v36  ;;  %vm4924_vm2 = vweird.f32 %v7967_v57 }
 0xdf9   : > { %v4916_v59 = vsel %vm4913_vm1, %v4915_v27, %v4911_v19  ;;  %vm4925_vm4 = vmor %vm4923_vm3, %vm4924_vm2 }
 0xdfa   : > { %v4991_v25 = vmul.f32 %v4916_v59, %v11955_v37  ;;  %v4920_v46 = vsub.f32 1.0, %v4919_v41 }
 0xdfb   : > { %v5106_v4 = vld [vmem:[#allocation2 + $0x159] sm:$0xff]  ;;  %v5236_v35 = vpop.f32.mrf.mxu3 }
 0xdfc   : > { %v5056_v13 = vld [vmem:[#allocation2 + $0x158] sm:$0xff]  ;;  %5023 = vst.msk [vmem:[#allocation2 + $0x169] sm:$0xff] %vm474_vm0, %v4991_v25  ;;  %v4921_v39 = vmul.f32 %v7967_v57, %v4920_v46  ;;  %v10809_v52 = vpack.c.bf16 %v5106_v4, %v5105_v54  ;;  %v5380_v27 = vadd.f32 %v5379_v45, %v5236_v35  ;;  %v5794_v19 = vpop.f32.mrf.mxu2 }
 0xdfd   : > { %v5442_v47 = vld [vmem:[#allocation2 + $0x152] sm:$0xff]  ;;  %v10811_v56 = vpack.c.bf16 %v5056_v13, %v5055_v24  ;;  %v5443_v14 = vld [vmem:[#allocation2 + $0x15a] sm:$0xff]  ;;  %v4226_v41 = vpop.permute.xlu1 %4225  ;;  %v10815_v53 = vadd.f32 %v5794_v19, %v5624_v49  ;;  %v4930_v13 = vor.u32 1.1754944e-38, %v4929_v15 }
 0xdfe   : > { %v10813_v59 = vpack.c.bf16 %v5443_v14, %v5442_v47  ;;  %v4922_v37 = vadd.f32 %v7967_v57, %v4921_v39  ;;  %7483 = vmatmul.msk.bf16.gmra.mxu3 %vm474_vm0, %v10809_v52  ;;  %v10819_v25 = vpop.f32.mrf.mxu0  ;;  %v4352_v4 = vsel %vm3372_vm9, %v4226_v41, 0.0  ;;  %v5626_v36 = vadd.f32 %v5573_v26, %v5380_v27  ;;  %v11959_v54 = vld [vmem:[#allocation36_spill] sm:$0xff] }
 0xdff   : > { %11956 = vst [vmem:[#allocation61_spill] sm:$0xff] %v10815_v53  ;;  %7503 = vmatmul.msk.bf16.gmra.mxu0 %vm474_vm0, %v10811_v56  ;;  %7546 = vmatmul.msk.bf16.gmra.mxu2 %vm474_vm0, %v10811_v56  ;;  %v10829_v45 = vpop.f32.mrf.mxu1 }
 0xe00   : > { %11957 = vst [vmem:[#allocation62_spill] sm:$0xff] %v10819_v25  ;;  %7525 = vmatmul.msk.bf16.gmra.mxu1 %vm474_vm0, %v10813_v59  ;;  %v4926_v49 = vsel %vm4925_vm4, %v7967_v57, %v4922_v37  ;;  %4353 = vadd.xlane.f32.xlu0 %v4352_v4 }
 0xe01   : > { %11958 = vst [vmem:[#allocation63_spill] sm:$0xff] %v10829_v45  ;;  %v4931_v46 = vsel %vm4928_vm5, %v4930_v13, %v4926_v49  ;;  %v6093_v45 = vld [vmem:[#allocation2 + $0x22] sm:$0xff] }
 0xe02   : > { %v4992_v24 = vmul.f32 %v4931_v46, %v11959_v54 }
 0xe03   : > { %v10833_v47 = vpop.f32.mrf.mxu3  ;;  %v5107_v14 = vld [vmem:[#allocation2 + $0x169] sm:$0xff] }
 0xe04   : > { %5024 = vst.msk [vmem:[#allocation2 + $0x171] sm:$0xff] %vm474_vm0, %v4992_v24  ;;  %v10835_v15 = vpop.f32.mrf.mxu2  ;;  %v5057_v19 = vld [vmem:[#allocation2 + $0x168] sm:$0xff] }
 0xe05   : > { %11960 = vst [vmem:[#allocation66_spill] sm:$0xff] %v10833_v47  ;;  %v6319_v47 = vld [vmem:[#allocation2 + $0x38] sm:$0xff] }
 0xe06   : > { %11961 = vst [vmem:[#allocation67_spill] sm:$0xff] %v10835_v15  ;;  %v5384_v39 = vpop.f32.mrf.mxu0 }
 0xe07   : > { %v5578_v35 = vpop.f32.mrf.mxu1 }
 0xe0b   : > { %v5108_v41 = vld [vmem:[#allocation2 + $0x171] sm:$0xff]  ;;  %v5241_v55 = vpop.f32.mrf.mxu3 }
 0xe0c   : > { %v5058_v26 = vld [vmem:[#allocation2 + $0x170] sm:$0xff]  ;;  %v10837_v27 = vpack.c.bf16 %v5108_v41, %v5107_v14  ;;  %v5385_v13 = vadd.f32 %v5384_v39, %v5241_v55  ;;  %v5799_v49 = vpop.f32.mrf.mxu2  ;;  %v7679_v39 = vld [vmem:[%s11504_s11 + $0x28] sm:$0xff]  ;;  %v7681_v14 = vld [vmem:[%s11504_s11 + $0x38] sm:$0xff] }
 0xe0d   : > { %v5444_v57 = vld [vmem:[#allocation2 + $0x16a] sm:$0xff]  ;;  %v10839_v37 = vpack.c.bf16 %v5058_v26, %v5057_v19  ;;  %v5445_v4 = vld [vmem:[#allocation2 + $0x172] sm:$0xff]  ;;  %v10843_v54 = vadd.f32 %v5799_v49, %v5626_v36  ;;  %v7682_v41 = vld [vmem:[%s11504_s11 + $0x40] sm:$0xff]  ;;  %6204 = vmatpush.bf16.msra.mxu0 %v7679_v39  ;;  %6656 = vmatpush.bf16.msrb.mxu2 %v7681_v14 }
 0xe0e   : > { %v10841_v46 = vpack.c.bf16 %v5445_v4, %v5444_v57  ;;  %7484 = vmatmul.msk.bf16.gmra.mxu3 %vm474_vm0, %v10837_v27  ;;  %v5628_v24 = vadd.f32 %v5578_v35, %v5385_v13  ;;  %v7680_v36 = vld [vmem:[%s11504_s11 + $0x30] sm:$0xff]  ;;  %v10865_v26 = vpop.f32.mrf.mxu0  ;;  %v5867_v13 = vld [vmem:[#allocation2 + $0x21] sm:$0xff] }
 0xe0f   : > { %11962 = vst [vmem:[#allocation69_spill] sm:$0xff] %v10843_v54  ;;  %7504 = vmatmul.msk.bf16.gmra.mxu0 %vm474_vm0, %v10839_v37  ;;  %7547 = vmatmul.msk.bf16.gmra.mxu2 %vm474_vm0, %v10839_v37  ;;  %v10867_v57 = vpop.f32.mrf.mxu1  ;;  %v6092_v49 = vld [vmem:[#allocation2 + $0x1a] sm:$0xff]  ;;  %v5898_v39 = vpack.c.bf16 %v5867_v13, %v5866_v31  ;;  %v6318_v14 = vld [vmem:[#allocation2 + $0x30] sm:$0xff] }
 0xe10   : > { %7526 = vmatmul.msk.bf16.gmra.mxu1 %vm474_vm0, %v10841_v46  ;;  %11963 = vst [vmem:[#allocation70_spill] sm:$0xff] %v10865_v26  ;;  %6882 = vmatpush.bf16.msrb.mxu3 %v7682_v41 }
 0xe11   : > { %v4351_v19 = vpop.xlane.xlu0 %4350  ;;  %6430 = vmatpush.bf16.msra.mxu1 %v7680_v36  ;;  %11964 = vst [vmem:[#allocation71_spill] sm:$0xff] %v10867_v57  ;;  %v6124_v36 = vpack.c.bf16 %v6093_v45, %v6092_v49  ;;  %v6350_v57 = vpack.c.bf16 %v6319_v47, %v6318_v14  ;;  %v5868_v14 = vld [vmem:[#allocation2 + $0x31] sm:$0xff] }
 0xe12   : > { %v7461_v35 = vmul.f32 -1.442695, %v4351_v19 }
 0xe13   : > { %v10869_v55 = vpop.f32.mrf.mxu3 }
 0xe14   : > { %7968 = vpow2.f32 %v7461_v35  ;;  %11965 = vst [vmem:[#allocation64_spill] sm:$0xff] %v10869_v55  ;;  %v10871_v4 = vpop.f32.mrf.mxu2 }
 0xe15   : > { %11966 = vst [vmem:[#allocation65_spill] sm:$0xff] %v10871_v4 }
 0xe16   : > { %v5389_v26 = vpop.f32.mrf.mxu0 }
 0xe17   : > { %v5583_v35 = vpop.f32.mrf.mxu1 }
 0xe1a   : > { %v7969_v25 = vpop.eup %7968 }
 0xe1b   : > { %v4481_v15 = vadd.f32 1.0, %v7969_v25  ;;  %v5246_v19 = vpop.f32.mrf.mxu3 }
 0xe1c   : > { %v5804_v41 = vpop.f32.mrf.mxu2  ;;  %v5390_v63 = vadd.f32 %v5389_v26, %v5246_v19  ;;  %v5869_v19 = vld [vmem:[#allocation2 + $0x39] sm:$0xff] }
 0xe1d   : > { %7970 = vrcp.f32 %v4481_v15  ;;  %v10873_v55 = vadd.f32 %v5804_v41, %v5628_v24  ;;  %v4944_v13 = vand.u32 2147483648, %v4481_v15  ;;  %v4942_v26 = vand.u32 2147483647, %v4481_v15 }
 0xe1e   : > { %7555 = vmatmul.msk.bf16.vlgmr.msra.gmra.mxu3 %vm474_vm0, %v5898_v39  ;;  %v5630_v25 = vadd.f32 %v5583_v35, %v5390_v63  ;;  %v10878_v31 = vpop.f32.mrf.mxu0  ;;  %v6094_v39 = vld [vmem:[#allocation2 + $0x32] sm:$0xff]  ;;  %vm4938_vm6 = vweird.f32 %v4481_v15  ;;  %v10886_v35 = vpack.c.bf16 %v5869_v19, %v5868_v14 }
 0xe1f   : > { %11967 = vst [vmem:[#allocation68_spill] sm:$0xff] %v10873_v55  ;;  %7577 = vmatmul.msk.bf16.vlgmr.msra.gmra.mxu0 %vm474_vm0, %v6124_v36  ;;  %v10882_v24 = vpop.f32.mrf.mxu1  ;;  %v6095_v36 = vld [vmem:[#allocation2 + $0x3a] sm:$0xff]  ;;  %v6321_v63 = vld [vmem:[#allocation2 + $0x50] sm:$0xff]  ;;  %vm4943_vm8 = vcmp.eq.f32.partialorder %v4942_v26, 8.507059e+37 }
 0xe20   : > { %7599 = vmatmul.msk.bf16.vlgmr.msra.gmra.mxu1 %vm474_vm0, %v6350_v57  ;;  %11968 = vst [vmem:[#allocation35_spill] sm:$0xff] %v10878_v31  ;;  %v6320_v31 = vld [vmem:[#allocation2 + $0x48] sm:$0xff] }
 0xe21   : > { %11970 = vst [vmem:[#allocation73_spill] sm:$0xff] %v10882_v24  ;;  %v6351_v24 = vpack.c.bf16 %v6321_v63, %v6320_v31 }
 0xe23   : > { %v7971_v4 = vpop.eup %7970  ;;  %v10880_v45 = vpop.f32.mrf.mxu3 }
 0xe24   : > { %v4934_v32 = vmul.f32 %v7971_v4, %v4481_v15  ;;  %11969 = vst [vmem:[#allocation72_spill] sm:$0xff] %v10880_v45  ;;  %vm4939_vm9 = vweird.f32 %v7971_v4  ;;  %v10884_v49 = vpop.f32.mrf.mxu2 }
 0xe25   : > { %11971 = vst [vmem:[#allocation75_spill] sm:$0xff] %v10884_v49  ;;  %vm4940_vm7 = vmor %vm4938_vm6, %vm4939_vm9 }
 0xe26   : > { %v4935_v28 = vsub.f32 1.0, %v4934_v32  ;;  %v4945_v32 = vor.u32 1.1754944e-38, %v4944_v13 }
 0xe28   : > { %v4936_v47 = vmul.f32 %v7971_v4, %v4935_v28  ;;  %v10888_v28 = vpack.c.bf16 %v6095_v36, %v6094_v39  ;;  %v5871_v39 = vld [vmem:[#allocation2 + $0x51] sm:$0xff] }
 0xe29   : > { %v5394_v9 = vpop.f32.mrf.mxu0  ;;  %v6096_v36 = vld [vmem:[#allocation2 + $0x4a] sm:$0xff] }
 0xe2a   : > { %v4937_v57 = vadd.f32 %v7971_v4, %v4936_v47  ;;  %v5588_v13 = vpop.f32.mrf.mxu1 }
 0xe2c   : > { %v4941_v41 = vsel %vm4940_vm7, %v7971_v4, %v4937_v57  ;;  %v6097_v57 = vld [vmem:[#allocation2 + $0x52] sm:$0xff] }
 0xe2d   : > { %v4946_v45 = vsel %vm4943_vm8, %v4945_v32, %v4941_v41 }
 0xe2e   : > { %v4993_v49 = vmul.f32 %v4946_v45, %v11972_v17  ;;  %7556 = vmatmul.msk.bf16.gmra.mxu3 %vm474_vm0, %v10886_v35  ;;  %v5251_v15 = vpop.f32.mrf.mxu3 }
 0xe2f   : > { %7578 = vmatmul.msk.bf16.gmra.mxu0 %vm474_vm0, %v10888_v28  ;;  %v5395_v4 = vadd.f32 %v5394_v9, %v5251_v15  ;;  %v5809_v47 = vpop.f32.mrf.mxu2  ;;  %v5870_v9 = vld [vmem:[#allocation2 + $0x49] sm:$0xff] }
 0xe30   : > { %7600 = vmatmul.msk.bf16.gmra.mxu1 %vm474_vm0, %v6351_v24  ;;  %5025 = vst.msk [vmem:[#allocation2 + $0x181] sm:$0xff] %vm474_vm0, %v4993_v49  ;;  %v10897_v26 = vadd.f32 %v5809_v47, %v5630_v25  ;;  %v6323_v24 = vld [vmem:[#allocation2 + $0x68] sm:$0xff]  ;;  %v10907_v32 = vpack.c.bf16 %v5871_v39, %v5870_v9  ;;  %v10909_v49 = vpack.c.bf16 %v6097_v57, %v6096_v36  ;;  %v6322_v25 = vld [vmem:[#allocation2 + $0x60] sm:$0xff] }
 0xe31   : > { %v5632_v31 = vadd.f32 %v5588_v13, %v5395_v4  ;;  %v10899_v19 = vpop.f32.mrf.mxu0  ;;  %v6352_v14 = vpack.c.bf16 %v6323_v24, %v6322_v25  ;;  %v5873_v36 = vld [vmem:[#allocation2 + $0x69] sm:$0xff]  ;;  %v6325_v9 = vld [vmem:[#allocation2 + $0x80] sm:$0xff] }
 0xe32   : > { %11973 = vst [vmem:[#allocation74_spill] sm:$0xff] %v10897_v26  ;;  %v10905_v63 = vpop.f32.mrf.mxu1  ;;  %v6098_v57 = vld [vmem:[#allocation2 + $0x62] sm:$0xff]  ;;  %v6099_v24 = vld [vmem:[#allocation2 + $0x6a] sm:$0xff] }
 0xe33   : > { %11974 = vst [vmem:[#allocation77_spill] sm:$0xff] %v10899_v19  ;;  %v5872_v25 = vld [vmem:[#allocation2 + $0x61] sm:$0xff] }
 0xe34   : > { %11977 = vst [vmem:[#allocation76_spill] sm:$0xff] %v10905_v63  ;;  %v10920_v19 = vpack.c.bf16 %v5873_v36, %v5872_v25  ;;  %v6103_v25 = vld [vmem:[#allocation2 + $0x9a] sm:$0xff]  ;;  %v6106_v26 = vld [vmem:[#allocation2 + $0xc2] sm:$0xff] }
 0xe35   : > { %11978 = vst [vmem:[#allocation81_spill] sm:$0xff] %v10909_v49 }
 0xe36   : > { %v10901_v17 = vpop.f32.mrf.mxu3 }
 0xe37   : > { %11975 = vst [vmem:[#allocation80_spill] sm:$0xff] %v10901_v17  ;;  %v10903_v45 = vpop.f32.mrf.mxu2  ;;  %v10922_v17 = vpack.c.bf16 %v6099_v24, %v6098_v57  ;;  %v6326_v57 = vld [vmem:[#allocation2 + $0x90] sm:$0xff] }
 0xe38   : > { %11976 = vst [vmem:[#allocation78_spill] sm:$0xff] %v10903_v45  ;;  %v6324_v45 = vld [vmem:[#allocation2 + $0x78] sm:$0xff] }
 0xe39   : > { %11980 = vst [vmem:[#allocation85_spill] sm:$0xff] %v10922_v17 }
 0xe3b   : > { %v5399_v41 = vpop.f32.mrf.mxu0 }
 0xe3c   : > { %v5593_v47 = vpop.f32.mrf.mxu1 }
 0xe3e   : > { %7557 = vmatmul.msk.bf16.gmra.mxu3 %vm474_vm0, %v10907_v32 }
 0xe3f   : > { %7579 = vmatmul.msk.bf16.gmra.mxu0 %vm474_vm0, %v10909_v49 }
 0xe40   : > { %7601 = vmatmul.msk.bf16.gmra.mxu1 %vm474_vm0, %v6352_v14  ;;  %v5256_v15 = vpop.f32.mrf.mxu3  ;;  %v6353_v14 = vpack.c.bf16 %v6325_v9, %v6324_v45  ;;  %v5877_v45 = vld [vmem:[#allocation2 + $0x99] sm:$0xff] }
 0xe41   : > { %v5400_v4 = vadd.f32 %v5399_v41, %v5256_v15  ;;  %v5814_v13 = vpop.f32.mrf.mxu2  ;;  %v6100_v41 = vld [vmem:[#allocation2 + $0x7a] sm:$0xff]  ;;  %v6101_v15 = vld [vmem:[#allocation2 + $0x82] sm:$0xff]  ;;  %v6102_v9 = vld [vmem:[#allocation2 + $0x92] sm:$0xff] }
 0xe42   : > { %v10916_v63 = vadd.f32 %v5814_v13, %v5632_v31  ;;  %v5875_v31 = vld [vmem:[#allocation2 + $0x81] sm:$0xff]  ;;  %v5874_v13 = vld [vmem:[#allocation2 + $0x79] sm:$0xff]  ;;  %v10931_v36 = vpack.c.bf16 %v6101_v15, %v6100_v41  ;;  %v10940_v41 = vpack.c.bf16 %v6103_v25, %v6102_v9  ;;  %v6104_v9 = vld [vmem:[#allocation2 + $0xaa] sm:$0xff] }
 0xe43   : > { %v10918_v39 = vadd.f32 %v5593_v47, %v5400_v4  ;;  %v6327_v4 = vld [vmem:[#allocation2 + $0x98] sm:$0xff]  ;;  %v10929_v47 = vpack.c.bf16 %v5875_v31, %v5874_v13  ;;  %v10938_v31 = vpack.c.bf16 %v5877_v45, %v5876_v7  ;;  %v5878_v45 = vld [vmem:[#allocation2 + $0xa9] sm:$0xff] }
 0xe44   : > { %11979 = vst [vmem:[#allocation79_spill] sm:$0xff] %v10916_v63  ;;  %v6354_v24 = vpack.c.bf16 %v6327_v4, %v6326_v57  ;;  %v10947_v4 = vpop.f32.mrf.mxu0  ;;  %v10949_v57 = vpop.f32.mrf.mxu1  ;;  %v6331_v25 = vld [vmem:[#allocation2 + $0xc8] sm:$0xff] }
 0xe45   : > { %11981 = vst [vmem:[#allocation82_spill] sm:$0xff] %v10931_v36 }
 0xe46   : > { %11982 = vst [vmem:[#allocation86_spill] sm:$0xff] %v10940_v41 }
 0xe47   : > { %11983 = vst [vmem:[#allocation83_spill] sm:$0xff] %v10947_v4  ;;  %v10957_v4 = vpack.c.bf16 %v6105_v40, %v6104_v9 }
 0xe48   : > { %11984 = vst [vmem:[#allocation84_spill] sm:$0xff] %v10949_v57  ;;  %v10951_v7 = vpop.f32.mrf.mxu3 }
 0xe49   : > { %11985 = vst [vmem:[#allocation87_spill] sm:$0xff] %v10951_v7 }
 0xe4a   : > { %11987 = vst [vmem:[#allocation31_spill] sm:$0xff] %v10957_v4 }
 0xe4e   : > { %7558 = vmatmul.msk.bf16.gmra.mxu3 %vm474_vm0, %v10920_v19 }
 0xe4f   : > { %7580 = vmatmul.msk.bf16.gmra.mxu0 %vm474_vm0, %v10922_v17 }
 0xe50   : > { %7602 = vmatmul.msk.bf16.gmra.mxu1 %vm474_vm0, %v6353_v14  ;;  %v6328_v14 = vld [vmem:[#allocation2 + $0xa8] sm:$0xff] }
 0xe51   : > { %v6355_v15 = vpack.c.bf16 %v6329_v43, %v6328_v14  ;;  %v10953_v43 = vpop.f32.mrf.mxu2 }
 0xe52   : > { %11986 = vst [vmem:[#allocation88_spill] sm:$0xff] %v10953_v43 }
 0xe5e   : > { %7559 = vmatmul.msk.bf16.gmra.mxu3 %vm474_vm0, %v10929_v47 }
 0xe5f   : > { %7581 = vmatmul.msk.bf16.gmra.mxu0 %vm474_vm0, %v10931_v36 }
 0xe60   : > { %7603 = vmatmul.msk.bf16.gmra.mxu1 %vm474_vm0, %v6354_v24 }
 0xe6e   : > { %7560 = vmatmul.msk.bf16.gmra.mxu3 %vm474_vm0, %v10938_v31 }
 0xe6f   : > { %7582 = vmatmul.msk.bf16.gmra.mxu0 %vm474_vm0, %v10940_v41 }
 0xe70   : > { %7604 = vmatmul.msk.bf16.gmra.mxu1 %vm474_vm0, %v6355_v15  ;;  %v10955_v15 = vpack.c.bf16 %v5879_v48, %v5878_v45 }
 0xe73   : > { %v4354_v13 = vpop.xlane.xlu0 %4353 }
 0xe74   : > { %v7462_v24 = vmul.f32 -1.442695, %v4354_v13  ;;  %v6356_v13 = vpack.c.bf16 %v6331_v25, %v6330_v20 }
 0xe76   : > { %7972 = vpow2.f32 %v7462_v24 }
 0xe7c   : > { %v5404_v14 = vpop.f32.mrf.mxu0  ;;  %v7973_v50 = vpop.eup %7972 }
 0xe7d   : > { %v5598_v3 = vpop.f32.mrf.mxu1  ;;  %v4482_v57 = vadd.f32 1.0, %v7973_v50 }
 0xe7e   : > { %7561 = vmatmul.msk.bf16.gmra.mxu3 %vm474_vm0, %v10955_v15 }
 0xe7f   : > { %7583 = vmatmul.msk.bf16.gmra.mxu0 %vm474_vm0, %v10957_v4  ;;  %7974 = vrcp.f32 %v4482_v57  ;;  %v4959_v63 = vand.u32 2147483648, %v4482_v57  ;;  %v6107_v4 = vld [vmem:[#allocation2 + $0xca] sm:$0xff]  ;;  %vm4953_vm11 = vweird.f32 %v4482_v57 }
 0xe80   : > { %7605 = vmatmul.msk.bf16.gmra.mxu1 %vm474_vm0, %v6356_v13  ;;  %v4957_v13 = vand.u32 2147483647, %v4482_v57 }
 0xe81   : > { %v5261_v24 = vpop.f32.mrf.mxu3 }
 0xe82   : > { %v5405_v7 = vadd.f32 %v5404_v14, %v5261_v24  ;;  %v5819_v43 = vpop.f32.mrf.mxu2  ;;  %v5880_v24 = vld [vmem:[#allocation2 + $0xc1] sm:$0xff]  ;;  %vm4958_vm13 = vcmp.eq.f32.partialorder %v4957_v13, 8.507059e+37 }
 0xe83   : > { %v10965_v48 = vadd.f32 %v5819_v43, %v10918_v39  ;;  %v6332_v39 = vld [vmem:[#allocation2 + $0xd8] sm:$0xff]  ;;  %v6333_v43 = vld [vmem:[#allocation2 + $0xe0] sm:$0xff]  ;;  %v10969_v17 = vpack.c.bf16 %v5881_v22, %v5880_v24 }
 0xe84   : > { %v5406_v40 = vpop.f32.mrf.mxu0  ;;  %v5636_v9 = vadd.f32 %v5598_v3, %v5405_v7  ;;  %v6357_v49 = vpack.c.bf16 %v6333_v43, %v6332_v39  ;;  %v5670_v24 = vld [vmem:[#allocation2 + $0x180] sm:$0xff] }
 0xe85   : > { %11988 = vst [vmem:[#allocation34_spill] sm:$0xff] %v10965_v48  ;;  %v5600_v45 = vpop.f32.mrf.mxu1  ;;  %v7975_v50 = vpop.eup %7974 }
 0xe86   : > { %v4949_v20 = vmul.f32 %v7975_v50, %v4482_v57  ;;  %vm4954_vm10 = vweird.f32 %v7975_v50 }
 0xe87   : > { %vm4955_vm12 = vmor %vm4953_vm11, %vm4954_vm10 }
 0xe88   : > { %v4950_v25 = vsub.f32 1.0, %v4949_v20  ;;  %v10971_v20 = vpack.c.bf16 %v6107_v4, %v6106_v26 }
 0xe89   : > { %v5263_v41 = vpop.f32.mrf.mxu3 }
 0xe8a   : > { %v4951_v36 = vmul.f32 %v7975_v50, %v4950_v25  ;;  %v5407_v55 = vadd.f32 %v5406_v40, %v5263_v41  ;;  %v10967_v14 = vpop.f32.mrf.mxu2  ;;  %v4960_v25 = vor.u32 1.1754944e-38, %v4959_v63 }
 0xe8b   : > { %11989 = vst [vmem:[#allocation38_spill] sm:$0xff] %v10967_v14  ;;  %v6337_v14 = vld [vmem:[#allocation2 + $0x110] sm:$0xff] }
 0xe8c   : > { %v5409_v48 = vpop.f32.mrf.mxu0  ;;  %v4952_v3 = vadd.f32 %v7975_v50, %v4951_v36  ;;  %v10973_v54 = vadd.f32 %v5600_v45, %v5407_v55  ;;  %v11991_v36 = vld [vmem:[#allocation37_spill] sm:$0xff] }
 0xe8d   : > { %v5603_v7 = vpop.f32.mrf.mxu1 }
 0xe8e   : > { %11990 = vst [vmem:[#allocation36_spill] sm:$0xff] %v10973_v54  ;;  %v4956_v53 = vsel %vm4955_vm12, %v7975_v50, %v4952_v3  ;;  %7562 = vmatmul.msk.bf16.gmra.mxu3 %vm474_vm0, %v10969_v17  ;;  %v5882_v50 = vld [vmem:[#allocation2 + $0xd9] sm:$0xff]  ;;  %v6334_v3 = vld [vmem:[#allocation2 + $0xf0] sm:$0xff] }
 0xe8f   : > { %7584 = vmatmul.msk.bf16.gmra.mxu0 %vm474_vm0, %v10971_v20  ;;  %v4961_v22 = vsel %vm4958_vm13, %v4960_v25, %v4956_v53  ;;  %v6108_v53 = vld [vmem:[#allocation2 + $0xda] sm:$0xff] }
 0xe90   : > { %7606 = vmatmul.msk.bf16.gmra.mxu1 %vm474_vm0, %v6357_v49  ;;  %v4994_v41 = vmul.f32 %v4961_v22, %v11991_v36  ;;  %v6335_v25 = vld [vmem:[#allocation2 + $0xf8] sm:$0xff]  ;;  %v5883_v36 = vld [vmem:[#allocation2 + $0xe1] sm:$0xff] }
 0xe91   : > { %v5266_v26 = vpop.f32.mrf.mxu3 }
 0xe92   : > { %5026 = vst.msk [vmem:[#allocation2 + $0x189] sm:$0xff] %vm474_vm0, %v4994_v41  ;;  %v5410_v55 = vadd.f32 %v5409_v48, %v5266_v26  ;;  %v5824_v4 = vpop.f32.mrf.mxu2  ;;  %v6109_v48 = vld [vmem:[#allocation2 + $0xe2] sm:$0xff]  ;;  %v10990_v41 = vpack.c.bf16 %v5883_v36, %v5882_v50  ;;  %v6110_v36 = vld [vmem:[#allocation2 + $0xf2] sm:$0xff] }
 0xe93   : > { %v10982_v63 = vadd.f32 %v5824_v4, %v5636_v9  ;;  %v5337_v4 = vadd.f32 %v10591_v23, %v10585_v51  ;;  %v5885_v51 = vld [vmem:[#allocation2 + $0xf9] sm:$0xff] }
 0xe94   : > { %v5411_v57 = vpop.f32.mrf.mxu0  ;;  %v10984_v45 = vadd.f32 %v5603_v7, %v5410_v55  ;;  %v10992_v7 = vpack.c.bf16 %v6109_v48, %v6108_v53  ;;  %v6358_v55 = vpack.c.bf16 %v6335_v25, %v6334_v3  ;;  %v5884_v25 = vld [vmem:[#allocation2 + $0xf1] sm:$0xff]  ;;  %v6111_v23 = vld [vmem:[#allocation2 + $0xfa] sm:$0xff] }
 0xe95   : > { %v5605_v40 = vpop.f32.mrf.mxu1 }
 0xe96   : > { %11992 = vst [vmem:[#allocation42_spill] sm:$0xff] %v10992_v7 }
 0xe99   : > { %v5268_v13 = vpop.f32.mrf.mxu3  ;;  %v5671_v39 = vld [vmem:[#allocation2 + $0x188] sm:$0xff] }
 0xe9a   : > { %v5412_v43 = vadd.f32 %v5411_v57, %v5268_v13  ;;  %v10986_v49 = vpack.c.bf16 %v5671_v39, %v5670_v24  ;;  %v5609_v24 = vadd.f32 %v10605_v29, %v5337_v4  ;;  %v11010_v29 = vpack.c.bf16 %v5885_v51, %v5884_v25  ;;  %v6113_v51 = vld [vmem:[#allocation2 + $0x112] sm:$0xff] }
 0xe9c   : > { %v6206_v22 = vpop.f32.mrf.mxu0  ;;  %7548 = vmatmul.msk.bf16.gmra.mxu2 %vm474_vm0, %v10986_v49  ;;  %v10994_v26 = vadd.f32 %v5605_v40, %v5412_v43  ;;  %v5835_v43 = vadd.f32 %v10697_v8, %v5609_v24 }
 0xe9d   : > { %v6432_v9 = vpop.f32.mrf.mxu1 }
 0xe9e   : > { %7563 = vmatmul.msk.bf16.gmra.mxu3 %vm474_vm0, %v10990_v41 }
 0xe9f   : > { %7585 = vmatmul.msk.bf16.gmra.mxu0 %vm474_vm0, %v10992_v7 }
 0xea0   : > { %7607 = vmatmul.msk.bf16.gmra.mxu1 %vm474_vm0, %v6358_v55  ;;  %v6336_v55 = vld [vmem:[#allocation2 + $0x108] sm:$0xff] }
 0xea1   : > { %v5980_v57 = vpop.f32.mrf.mxu3 }
 0xea2   : > { %v6060_v50 = vadd.f32 %v5980_v57, %v10635_v1  ;;  %v5342_v57 = vadd.f32 %v10687_v61, %v10692_v60 }
 0xea4   : > { %v6208_v13 = vpop.f32.mrf.mxu0  ;;  %v6286_v40 = vadd.f32 %v6206_v22, %v6060_v50  ;;  %v11012_v22 = vpack.c.bf16 %v6111_v23, %v6110_v36  ;;  %v6338_v36 = vld [vmem:[#allocation2 + $0x120] sm:$0xff] }
 0xea5   : > { %v6434_v39 = vpop.f32.mrf.mxu1 }
 0xea6   : > { %v11005_v53 = vadd.f32 %v6432_v9, %v6286_v40  ;;  %v6359_v9 = vpack.c.bf16 %v6337_v14, %v6336_v55  ;;  %v5611_v14 = vadd.f32 %v10690_v0, %v5342_v57  ;;  %v5887_v55 = vld [vmem:[#allocation2 + $0x111] sm:$0xff] }
 0xea9   : > { %v5982_v3 = vpop.f32.mrf.mxu3 }
 0xeaa   : > { %v6061_v48 = vadd.f32 %v5982_v3, %v5835_v43  ;;  %v5837_v43 = vadd.f32 %v10716_v21, %v5611_v14 }
 0xeac   : > { %v6211_v7 = vpop.f32.mrf.mxu0  ;;  %v6287_v54 = vadd.f32 %v6208_v13, %v6061_v48  ;;  %7621 = vmatmul.msk.bf16.vlgmr.msrb.gmra.mxu2 %vm474_vm0, %v10886_v35  ;;  %v6339_v48 = vld [vmem:[#allocation2 + $0x128] sm:$0xff] }
 0xead   : > { %v6437_v1 = vpop.f32.mrf.mxu1 }
 0xeae   : > { %7564 = vmatmul.msk.bf16.gmra.mxu3 %vm474_vm0, %v11010_v29  ;;  %v11018_v8 = vadd.f32 %v6434_v39, %v6287_v54  ;;  %v5886_v54 = vld [vmem:[#allocation2 + $0x109] sm:$0xff] }
 0xeaf   : > { %7586 = vmatmul.msk.bf16.gmra.mxu0 %vm474_vm0, %v11012_v22  ;;  %v6112_v39 = vld [vmem:[#allocation2 + $0x10a] sm:$0xff]  ;;  %v11030_v60 = vpack.c.bf16 %v5887_v55, %v5886_v54 }
 0xeb0   : > { %7608 = vmatmul.msk.bf16.gmra.mxu1 %vm474_vm0, %v6359_v9 }
 0xeb1   : > { %v5985_v4 = vpop.f32.mrf.mxu3 }
 0xeb2   : > { %v6062_v35 = vadd.f32 %v5985_v4, %v10701_v62  ;;  %v11032_v62 = vpack.c.bf16 %v6113_v51, %v6112_v39  ;;  %v5889_v39 = vld [vmem:[#allocation2 + $0x129] sm:$0xff] }
 0xeb4   : > { %v6213_v50 = vpop.f32.mrf.mxu0  ;;  %v6288_v13 = vadd.f32 %v6211_v7, %v6062_v35  ;;  %v6360_v7 = vpack.c.bf16 %v6339_v48, %v6338_v36 }
 0xeb5   : > { %v6439_v24 = vpop.f32.mrf.mxu1 }
 0xeb6   : > { %v11025_v40 = vadd.f32 %v6437_v1, %v6288_v13 }
 0xeb9   : > { %v5987_v3 = vpop.f32.mrf.mxu3 }
 0xeba   : > { %v6063_v25 = vadd.f32 %v5987_v3, %v5837_v43  ;;  %v5888_v43 = vld [vmem:[#allocation2 + $0x121] sm:$0xff] }
 0xebb   : > { %v6114_v3 = vld [vmem:[#allocation2 + $0x122] sm:$0xff] }
 0xebc   : > { %v6289_v61 = vadd.f32 %v6213_v50, %v6063_v25  ;;  %7622 = vmatmul.msk.bf16.gmra.mxu2 %vm474_vm0, %v10907_v32  ;;  %v6216_v0 = vpop.f32.mrf.mxu0  ;;  %v5347_v32 = vadd.f32 %v10703_v30, %v10709_v16  ;;  %v6115_v25 = vld [vmem:[#allocation2 + $0x12a] sm:$0xff]  ;;  %v11050_v30 = vpack.c.bf16 %v5889_v39, %v5888_v43  ;;  %v6122_v43 = vld [vmem:[#allocation2 + $0x182] sm:$0xff]  ;;  %v5826_v39 = vpop.f32.mrf.mxu2 }
 0xebd   : > { %v6442_v23 = vpop.f32.mrf.mxu1  ;;  %v11052_v16 = vpack.c.bf16 %v6115_v25, %v6114_v3  ;;  %v5896_v3 = vld [vmem:[#allocation2 + $0x181] sm:$0xff] }
 0xebe   : > { %7565 = vmatmul.msk.bf16.gmra.mxu3 %vm474_vm0, %v11030_v60  ;;  %v11038_v21 = vadd.f32 %v6439_v24, %v6289_v61  ;;  %v5613_v57 = vadd.f32 %v10707_v10, %v5347_v32  ;;  %v6116_v32 = vld [vmem:[#allocation2 + $0x13a] sm:$0xff] }
 0xebf   : > { %7587 = vmatmul.msk.bf16.gmra.mxu0 %vm474_vm0, %v11032_v62 }
 0xec0   : > { %7609 = vmatmul.msk.bf16.gmra.mxu1 %vm474_vm0, %v6360_v7  ;;  %v5839_v13 = vadd.f32 %v10731_v18, %v5613_v57  ;;  %v6117_v57 = vld [vmem:[#allocation2 + $0x142] sm:$0xff] }
 0xec1   : > { %v5990_v1 = vpop.f32.mrf.mxu3 }
 0xec2   : > { %v6064_v9 = vadd.f32 %v5990_v1, %v10719_v12  ;;  %v5890_v1 = vld [vmem:[#allocation2 + $0x139] sm:$0xff] }
 0xec4   : > { %v6290_v4 = vadd.f32 %v6216_v0, %v6064_v9  ;;  %v6218_v50 = vpop.f32.mrf.mxu0 }
 0xec5   : > { %v6444_v14 = vpop.f32.mrf.mxu1 }
 0xec6   : > { %v11045_v35 = vadd.f32 %v6442_v23, %v6290_v4  ;;  %v5891_v4 = vld [vmem:[#allocation2 + $0x141] sm:$0xff] }
 0xec9   : > { %v5992_v24 = vpop.f32.mrf.mxu3 }
 0xeca   : > { %v6065_v54 = vadd.f32 %v5992_v24, %v5839_v13  ;;  %v5897_v24 = vld [vmem:[#allocation2 + $0x189] sm:$0xff] }
 0xecc   : > { %v6291_v36 = vadd.f32 %v6218_v50, %v6065_v54  ;;  %7623 = vmatmul.msk.bf16.gmra.mxu2 %vm474_vm0, %v10920_v19  ;;  %v6221_v12 = vpop.f32.mrf.mxu0  ;;  %v5352_v19 = vadd.f32 %v10721_v38, %v10725_v58  ;;  %v11071_v38 = vpack.c.bf16 %v5891_v4, %v5890_v1  ;;  %v11073_v58 = vpack.c.bf16 %v6117_v57, %v6116_v32  ;;  %v11998_v32 = vld [vmem:[#allocation82_spill] sm:$0xff] }
 0xecd   : > { %v6447_v55 = vpop.f32.mrf.mxu1 }
 0xece   : > { %7566 = vmatmul.msk.bf16.gmra.mxu3 %vm474_vm0, %v11050_v30  ;;  %v11058_v10 = vadd.f32 %v6444_v14, %v6291_v36  ;;  %v5615_v61 = vadd.f32 %v10723_v42, %v5352_v19 }
 0xecf   : > { %7588 = vmatmul.msk.bf16.gmra.mxu0 %vm474_vm0, %v11052_v16 }
 0xed0   : > { %7610 = vmatmul.msk.bf16.gmra.mxu1 %vm474_vm0, %v10765_v2  ;;  %v5841_v7 = vadd.f32 %v10747_v34, %v5615_v61 }
 0xed1   : > { %v5995_v18 = vpop.f32.mrf.mxu3 }
 0xed2   : > { %v6066_v48 = vadd.f32 %v5995_v18, %v10739_v5  ;;  %v11993_v18 = vld [vmem:[#allocation61_spill] sm:$0xff] }
 0xed4   : > { %v6292_v51 = vadd.f32 %v6221_v12, %v6066_v48  ;;  %v6223_v2 = vpop.f32.mrf.mxu0 }
 0xed5   : > { %v6449_v42 = vpop.f32.mrf.mxu1 }
 0xed6   : > { %v11066_v0 = vadd.f32 %v6447_v55, %v6292_v51  ;;  %v11994_v51 = vld [vmem:[#allocation81_spill] sm:$0xff] }
 0xed9   : > { %v5997_v23 = vpop.f32.mrf.mxu3 }
 0xeda   : > { %v6067_v9 = vadd.f32 %v5997_v23, %v5841_v7  ;;  %v11996_v7 = vld [vmem:[#allocation85_spill] sm:$0xff]  ;;  %v11997_v23 = vld [vmem:[#allocation68_spill] sm:$0xff] }
 0xedc   : > { %v6293_v50 = vadd.f32 %v6223_v2, %v6067_v9  ;;  %7624 = vmatmul.msk.bf16.gmra.mxu2 %vm474_vm0, %v10929_v47  ;;  %v11999_v2 = vld [vmem:[#allocation74_spill] sm:$0xff] }
 0xede   : > { %7567 = vmatmul.msk.bf16.gmra.mxu3 %vm474_vm0, %v11071_v38  ;;  %v11079_v5 = vadd.f32 %v6449_v42, %v6293_v50  ;;  %v12000_v50 = vld [vmem:[#allocation86_spill] sm:$0xff] }
 0xedf   : > { %7589 = vmatmul.msk.bf16.gmra.mxu0 %vm474_vm0, %v11073_v58 }
 0xee0   : > { %7611 = vmatmul.msk.bf16.gmra.mxu1 %vm474_vm0, %v10811_v56 }
 0xee1   : > { %v6000_v34 = vpop.f32.mrf.mxu3 }
 0xee2   : > { %v11084_v13 = vadd.f32 %v6000_v34, %v10755_v11 }
 0xee9   : > { %v11086_v47 = vpop.f32.mrf.mxu3 }
 0xeec   : > { %7625 = vmatmul.msk.bf16.gmra.mxu2 %vm474_vm0, %v10938_v31 }
 0xeee   : > { %7568 = vmatmul.msk.bf16.gmra.mxu3 %vm474_vm0, %v10809_v52 }
 0xeef   : > { %7590 = vmatmul.msk.bf16.gmra.mxu0 %vm474_vm0, %v10813_v59 }
 0xef0   : > { %7612 = vmatmul.msk.bf16.gmra.mxu1 %vm474_vm0, %v10839_v37  ;;  %v6349_v37 = vld [vmem:[#allocation2 + $0x1a0] sm:$0xff] }
 0xef1   : > { %v6005_v14 = vpop.f32.mrf.mxu3 }
 0xef2   : > { %v11097_v56 = vadd.f32 %v6005_v14, %v10773_v44  ;;  %v6348_v44 = vld [vmem:[#allocation2 + $0x198] sm:$0xff]  ;;  %v12001_v14 = vld [vmem:[#allocation79_spill] sm:$0xff] }
 0xef3   : > { %v6365_v54 = vpack.c.bf16 %v6349_v37, %v6348_v44  ;;  %v6568_v37 = vld [vmem:[#allocation2 + $0x151] sm:$0xff] }
 0xef9   : > { %v11099_v11 = vpop.f32.mrf.mxu3 }
 0xefc   : > { %7626 = vmatmul.msk.bf16.gmra.mxu2 %vm474_vm0, %v10955_v15  ;;  %v6123_v15 = vld [vmem:[#allocation2 + $0x18a] sm:$0xff] }
 0xefe   : > { %7569 = vmatmul.msk.bf16.gmra.mxu3 %vm474_vm0, %v10837_v27  ;;  %v5913_v27 = vpack.c.bf16 %v5897_v24, %v5896_v3  ;;  %v12003_v3 = vld [vmem:[#allocation34_spill] sm:$0xff] }
 0xeff   : > { %7591 = vmatmul.msk.bf16.gmra.mxu0 %vm474_vm0, %v10841_v46  ;;  %v11116_v46 = vpack.c.bf16 %v6123_v15, %v6122_v43  ;;  %v12002_v15 = vld [vmem:[#allocation31_spill] sm:$0xff] }
 0xf00   : > { %7613 = vmatmul.msk.bf16.gmra.mxu1 %vm474_vm0, %v10986_v49 }
 0xf01   : > { %v6010_v52 = vpop.f32.mrf.mxu3 }
 0xf02   : > { %v11110_v59 = vadd.f32 %v6010_v52, %v10783_v6  ;;  %v6569_v52 = vld [vmem:[#allocation2 + $0x159] sm:$0xff] }
 0xf03   : > { %v6588_v43 = vpack.c.bf16 %v6569_v52, %v6568_v37 }
 0xf09   : > { %v11112_v31 = vpop.f32.mrf.mxu3 }
 0xf0c   : > { %7627 = vmatmul.msk.bf16.gmra.mxu2 %vm474_vm0, %v10969_v17 }
 0xf0e   : > { %7570 = vmatmul.msk.bf16.gmra.mxu3 %vm474_vm0, %v5913_v27 }
 0xf0f   : > { %7592 = vmatmul.msk.bf16.gmra.mxu0 %vm474_vm0, %v11116_v46 }
 0xf10   : > { %7614 = vmatmul.msk.bf16.gmra.mxu1 %vm474_vm0, %v6365_v54 }
 0xf11   : > { %v6015_v6 = vpop.f32.mrf.mxu3 }
 0xf12   : > { %v11123_v49 = vadd.f32 %v6015_v6, %v10795_v33 }
 0xf19   : > { %v11125_v25 = vpop.f32.mrf.mxu3 }
 0xf1c   : > { %7628 = vmatmul.msk.bf16.gmra.mxu2 %vm474_vm0, %v10990_v41 }
 0xf1e   : > { %7643 = vmatmul.msk.bf16.vlgmr.msrb.gmra.mxu3 %vm474_vm0, %v10888_v28  ;;  %v11995_v28 = vld [vmem:[#allocation69_spill] sm:$0xff] }
 0xf1f   : > { %v5829_v17 = vpop.f32.mrf.mxu2 }
 0xf20   : > { %v5864_v36 = vadd.f32 %v5829_v17, %v10984_v45  ;;  %v6571_v17 = vld [vmem:[#allocation2 + $0x171] sm:$0xff] }
 0xf21   : > { %v6020_v12 = vpop.f32.mrf.mxu3 }
 0xf22   : > { %v11133_v19 = vadd.f32 %v6020_v12, %v11993_v18  ;;  %v6570_v18 = vld [vmem:[#allocation2 + $0x169] sm:$0xff] }
 0xf27   : > { %v5831_v48 = vpop.f32.mrf.mxu2 }
 0xf28   : > { %v5865_v33 = vadd.f32 %v5831_v48, %v10994_v26  ;;  %v6589_v48 = vpack.c.bf16 %v6571_v17, %v6570_v18 }
 0xf29   : > { %v11136_v55 = vpop.f32.mrf.mxu3 }
 0xf2c   : > { %7629 = vmatmul.msk.bf16.gmra.mxu2 %vm474_vm0, %v11010_v29 }
 0xf2e   : > { %7644 = vmatmul.msk.bf16.gmra.mxu3 %vm474_vm0, %v11994_v51 }
 0xf31   : > { %v6025_v41 = vpop.f32.mrf.mxu3 }
 0xf32   : > { %v11143_v61 = vadd.f32 %v6025_v41, %v11995_v28 }
 0xf39   : > { %v11145_v45 = vpop.f32.mrf.mxu3 }
 0xf3c   : > { %7630 = vmatmul.msk.bf16.gmra.mxu2 %vm474_vm0, %v11030_v60  ;;  %v6658_v60 = vpop.f32.mrf.mxu2 }
 0xf3e   : > { %7645 = vmatmul.msk.bf16.gmra.mxu3 %vm474_vm0, %v11996_v7  ;;  %v12004_v7 = vld [vmem:[#allocation36_spill] sm:$0xff] }
 0xf41   : > { %v6030_v26 = vpop.f32.mrf.mxu3 }
 0xf42   : > { %v11152_v1 = vadd.f32 %v6030_v26, %v11997_v23  ;;  %v5863_v26 = vadd.f32 %v5826_v39, %v12004_v7  ;;  %v11224_v7 = vpop.f32.mrf.mxu1 }
 0xf44   : > { %v6660_v42 = vpop.f32.mrf.mxu2 }
 0xf49   : > { %v11154_v29 = vpop.f32.mrf.mxu3 }
 0xf4c   : > { %7631 = vmatmul.msk.bf16.gmra.mxu2 %vm474_vm0, %v11050_v30  ;;  %v6663_v24 = vpop.f32.mrf.mxu2 }
 0xf4e   : > { %7646 = vmatmul.msk.bf16.gmra.mxu3 %vm474_vm0, %v11998_v32 }
 0xf51   : > { %v6035_v9 = vpop.f32.mrf.mxu3 }
 0xf52   : > { %v11161_v4 = vadd.f32 %v6035_v9, %v11999_v2  ;;  %v12005_v2 = vld [vmem:[#allocation42_spill] sm:$0xff] }
 0xf54   : > { %v6665_v6 = vpop.f32.mrf.mxu2 }
 0xf59   : > { %v11163_v57 = vpop.f32.mrf.mxu3 }
 0xf5c   : > { %7632 = vmatmul.msk.bf16.gmra.mxu2 %vm474_vm0, %v11071_v38  ;;  %v6668_v51 = vpop.f32.mrf.mxu2 }
 0xf5e   : > { %7647 = vmatmul.msk.bf16.gmra.mxu3 %vm474_vm0, %v12000_v50 }
 0xf61   : > { %v6040_v34 = vpop.f32.mrf.mxu3 }
 0xf62   : > { %v11170_v30 = vadd.f32 %v6040_v34, %v12001_v14  ;;  %v6574_v14 = vld [vmem:[#allocation2 + $0x199] sm:$0xff] }
 0xf64   : > { %v6670_v23 = vpop.f32.mrf.mxu2 }
 0xf69   : > { %v11172_v44 = vpop.f32.mrf.mxu3 }
 0xf6c   : > { %7633 = vmatmul.msk.bf16.gmra.mxu2 %vm474_vm0, %v6588_v43  ;;  %v11194_v34 = vpop.f32.mrf.mxu2 }
 0xf6e   : > { %7648 = vmatmul.msk.bf16.gmra.mxu3 %vm474_vm0, %v12002_v15 }
 0xf71   : > { %v6045_v38 = vpop.f32.mrf.mxu3 }
 0xf72   : > { %v11178_v54 = vadd.f32 %v6045_v38, %v12003_v3 }
 0xf74   : > { %v11200_v43 = vpop.f32.mrf.mxu2 }
 0xf79   : > { %v11180_v12 = vpop.f32.mrf.mxu3 }
 0xf7c   : > { %7634 = vmatmul.msk.bf16.gmra.mxu2 %vm474_vm0, %v6589_v48  ;;  %v6226_v48 = vpop.f32.mrf.mxu0 }
 0xf7e   : > { %7649 = vmatmul.msk.bf16.gmra.mxu3 %vm474_vm0, %v10971_v20 }
 0xf81   : > { %v6050_v41 = vpop.f32.mrf.mxu3 }
 0xf82   : > { %v11186_v28 = vadd.f32 %v6050_v41, %v10982_v63  ;;  %v6575_v63 = vld [vmem:[#allocation2 + $0x1a1] sm:$0xff] }
 0xf83   : > { %v6591_v52 = vpack.c.bf16 %v6575_v63, %v6574_v14 }
 0xf89   : > { %v6052_v32 = vpop.f32.mrf.mxu3 }
 0xf8a   : > { %v11189_v9 = vadd.f32 %v6052_v32, %v5863_v26  ;;  %v12007_v26 = vld [vmem:[#allocation4_spill] sm:$0xff] }
 0xf8c   : > { %7635 = vmatmul.msk.bf16.gmra.mxu2 %vm474_vm0, %v5913_v27  ;;  %v6738_v27 = vadd.f32 %v6658_v60, %v11005_v53  ;;  %v6739_v53 = vadd.f32 %v6660_v42, %v11018_v8  ;;  %v6740_v8 = vadd.f32 %v6663_v24, %v11025_v40 }
 0xf8e   : > { %7650 = vmatmul.msk.bf16.gmra.mxu3 %vm474_vm0, %v12005_v2  ;;  %v11229_v2 = vpop.f32.mrf.mxu2 }
 0xf91   : > { %v6055_v50 = vpop.f32.mrf.mxu3 }
 0xf92   : > { %v11196_v20 = vadd.f32 %v6055_v50, %v5864_v36  ;;  %v11209_v36 = vld [vmem:[%s11505_s12] ss:$0 sm:$0xff] }
 0xf99   : > { %v6057_v37 = vpop.f32.mrf.mxu3 }
 0xf9a   : > { %v11198_v39 = vadd.f32 %v6057_v37, %v5865_v33  ;;  %v12006_v33 = vld [vmem:[#allocation3_spill] sm:$0xff]  ;;  %v12008_v37 = vld [vmem:[#allocation5_spill] sm:$0xff] }
 0xf9c   : > { %7636 = vmatmul.msk.bf16.gmra.mxu2 %vm474_vm0, %v6591_v52  ;;  %v11235_v52 = vpop.f32.mrf.mxu0 }
 0xf9e   : > { %7651 = vmatmul.msk.bf16.gmra.mxu3 %vm474_vm0, %v11012_v22 }
 0xfa1   : > { %v6884_v15 = vpop.f32.mrf.mxu3 }
 0xfa2   : > { %v6964_v38 = vadd.f32 %v6884_v15, %v6738_v27  ;;  %v11238_v15 = vpop.f32.mrf.mxu1 }
 0xfa4   : > { %v7000_v3 = vadd.f32 %v11209_v36, %v6964_v38 }
 0xfa6   : > { %v7032_v17 = vadd.f32 %v7000_v3, %v12006_v33  ;;  %v11241_v3 = vpop.f32.mrf.mxu2 }
 0xfa8   : > { %v7064_v22 = vmax.f32 %v7032_v17, 0.0  ;;  %v12009_v17 = vld [vmem:[#allocation6_spill] sm:$0xff] }
 0xfa9   : > { %v6886_v60 = vpop.f32.mrf.mxu3 }
 0xfaa   : > { %7096 = vst.msk [vmem:[%s11218_s21] sm:$0xff] %vm474_vm0, %v7064_v22  ;;  %v6965_v18 = vadd.f32 %v6886_v60, %v6739_v53  ;;  %v11249_v22 = vpop.f32.mrf.mxu0  ;;  %v6742_v60 = vadd.f32 %v6668_v51, %v11045_v35 }
 0xfac   : > { %v7001_v41 = vadd.f32 %v11209_v36, %v6965_v18  ;;  %v11252_v18 = vpop.f32.mrf.mxu1 }
 0xfae   : > { %v7033_v32 = vadd.f32 %v7001_v41, %v12007_v26  ;;  %7652 = vmatmul.msk.bf16.gmra.mxu3 %vm474_vm0, %v11032_v62  ;;  %v6741_v62 = vadd.f32 %v6665_v6, %v11038_v21  ;;  %v11256_v26 = vpop.f32.mrf.mxu2 }
 0xfb0   : > { %v7065_v42 = vmax.f32 %v7033_v32, 0.0 }
 0xfb1   : > { %v6889_v50 = vpop.f32.mrf.mxu3 }
 0xfb2   : > { %7097 = vst.msk [vmem:[%s11218_s21 + $0x8] sm:$0xff] %vm474_vm0, %v7065_v42  ;;  %v6966_v14 = vadd.f32 %v6889_v50, %v6740_v8  ;;  %v12010_v8 = vld [vmem:[#allocation7_spill] sm:$0xff] }
 0xfb4   : > { %v7002_v63 = vadd.f32 %v11209_v36, %v6966_v14  ;;  %v11261_v14 = vpop.f32.mrf.mxu0 }
 0xfb6   : > { %v7034_v27 = vadd.f32 %v7002_v63, %v12008_v37  ;;  %v11265_v63 = vpop.f32.mrf.mxu1 }
 0xfb8   : > { %v7066_v38 = vmax.f32 %v7034_v27, 0.0  ;;  %v11268_v27 = vpop.f32.mrf.mxu2 }
 0xfb9   : > { %v6891_v40 = vpop.f32.mrf.mxu3 }
 0xfba   : > { %7098 = vst.msk [vmem:[%s11218_s21 + $0x10] sm:$0xff] %vm474_vm0, %v7066_v38  ;;  %v6967_v24 = vadd.f32 %v6891_v40, %v6741_v62  ;;  %v12011_v62 = vld [vmem:[#allocation8_spill] sm:$0xff] }
 0xfbc   : > { %v7003_v33 = vadd.f32 %v11209_v36, %v6967_v24 }
 0xfbe   : > { %v7035_v53 = vadd.f32 %v7003_v33, %v12009_v17  ;;  %7653 = vmatmul.msk.bf16.gmra.mxu3 %vm474_vm0, %v11052_v16  ;;  %v6743_v16 = vadd.f32 %v6670_v23, %v11058_v10  ;;  %v6744_v10 = vadd.f32 %v11194_v34, %v11066_v0  ;;  %v11277_v33 = vpop.f32.mrf.mxu0  ;;  %v6745_v0 = vadd.f32 %v11200_v43, %v11079_v5 }
 0xfc0   : > { %v7067_v21 = vmax.f32 %v7035_v53, 0.0  ;;  %v12012_v53 = vld [vmem:[#allocation43_spill] sm:$0xff] }
 0xfc1   : > { %v6894_v6 = vpop.f32.mrf.mxu3 }
 0xfc2   : > { %7099 = vst.msk [vmem:[%s11218_s21 + $0x18] sm:$0xff] %vm474_vm0, %v7067_v21  ;;  %v6968_v41 = vadd.f32 %v6894_v6, %v6742_v60  ;;  %v12013_v60 = vld [vmem:[#allocation41_spill] sm:$0xff]  ;;  %v11282_v6 = vpop.f32.mrf.mxu1 }
 0xfc3   : > { %v5357_v21 = vadd.f32 %v12013_v60, %v12012_v53 }
 0xfc4   : > { %v7004_v32 = vadd.f32 %v11209_v36, %v6968_v41  ;;  %v12014_v41 = vld [vmem:[#allocation9_spill] sm:$0xff] }
 0xfc6   : > { %v7036_v42 = vadd.f32 %v7004_v32, %v12010_v8  ;;  %v11285_v32 = vpop.f32.mrf.mxu2 }
 0xfc8   : > { %v7068_v50 = vmax.f32 %v7036_v42, 0.0  ;;  %v6794_v42 = vld [vmem:[#allocation2 + $0x152] sm:$0xff] }
 0xfc9   : > { %v6896_v35 = vpop.f32.mrf.mxu3 }
 0xfca   : > { %7100 = vst.msk [vmem:[%s11218_s21 + $0x20] sm:$0xff] %vm474_vm0, %v7068_v50  ;;  %v6969_v51 = vadd.f32 %v6896_v35, %v6743_v16  ;;  %v6795_v16 = vld [vmem:[#allocation2 + $0x15a] sm:$0xff] }
 0xfcb   : > { %v12015_v50 = vld [vmem:[#allocation45_spill] sm:$0xff] }
 0xfcc   : > { %v7005_v37 = vadd.f32 %v11209_v36, %v6969_v51  ;;  %v5617_v35 = vadd.f32 %v12015_v50, %v5357_v21  ;;  %v6294_v51 = vadd.f32 %v6226_v48, %v11084_v13  ;;  %v11301_v13 = vpop.f32.mrf.mxu1 }
 0xfce   : > { %v7037_v38 = vadd.f32 %v7005_v37, %v12011_v62  ;;  %7654 = vmatmul.msk.bf16.gmra.mxu3 %vm474_vm0, %v11073_v58  ;;  %v12016_v62 = vld [vmem:[#allocation48_spill] sm:$0xff]  ;;  %v6520_v43 = vadd.f32 %v11224_v7, %v6294_v51  ;;  %v11304_v60 = vpop.f32.mrf.mxu2 }
 0xfd0   : > { %v7069_v23 = vmax.f32 %v7037_v38, 0.0  ;;  %v5843_v38 = vadd.f32 %v12016_v62, %v5617_v35  ;;  %v6746_v48 = vadd.f32 %v11229_v2, %v6520_v43  ;;  %v12021_v62 = vld [vmem:[#allocation44_spill] sm:$0xff] }
 0xfd1   : > { %v6899_v40 = vpop.f32.mrf.mxu3  ;;  %v12022_v43 = vld [vmem:[#allocation52_spill] sm:$0xff] }
 0xfd2   : > { %7101 = vst.msk [vmem:[%s11218_s21 + $0x28] sm:$0xff] %vm474_vm0, %v7069_v23  ;;  %v6970_v24 = vadd.f32 %v6899_v40, %v6744_v10  ;;  %v6814_v23 = vpack.c.bf16 %v6795_v16, %v6794_v42  ;;  %v11295_v40 = vpop.f32.mrf.mxu0  ;;  %v6069_v5 = vadd.f32 %v11086_v47, %v5843_v38  ;;  %v12020_v42 = vld [vmem:[#allocation11_spill] sm:$0xff] }
 0xfd4   : > { %v7006_v17 = vadd.f32 %v11209_v36, %v6970_v24  ;;  %v12017_v24 = vld [vmem:[#allocation10_spill] sm:$0xff] }
 0xfd6   : > { %v7038_v58 = vadd.f32 %v7006_v17, %v12014_v41  ;;  %v6295_v41 = vadd.f32 %v11235_v52, %v6069_v5  ;;  %v6796_v52 = vld [vmem:[#allocation2 + $0x16a] sm:$0xff]  ;;  %v11324_v5 = vpop.f32.mrf.mxu2 }
 0xfd8   : > { %v7070_v34 = vmax.f32 %v7038_v58, 0.0  ;;  %v12018_v58 = vld [vmem:[#allocation46_spill] sm:$0xff] }
 0xfd9   : > { %v6901_v8 = vpop.f32.mrf.mxu3 }
 0xfda   : > { %7102 = vst.msk [vmem:[%s11218_s21 + $0x30] sm:$0xff] %vm474_vm0, %v7070_v34  ;;  %v6971_v37 = vadd.f32 %v6901_v8, %v6745_v0  ;;  %v12019_v0 = vld [vmem:[#allocation47_spill] sm:$0xff]  ;;  %v6521_v8 = vadd.f32 %v11238_v15, %v6295_v41  ;;  %v11314_v2 = vpop.f32.mrf.mxu0 }
 0xfdb   : > { %v5362_v34 = vadd.f32 %v12019_v0, %v12018_v58 }
 0xfdc   : > { %v7007_v10 = vadd.f32 %v11209_v36, %v6971_v37  ;;  %v6747_v50 = vadd.f32 %v11241_v3, %v6521_v8  ;;  %v6797_v37 = vld [vmem:[#allocation2 + $0x172] sm:$0xff] }
 0xfdd   : > { %v5619_v38 = vadd.f32 %v12021_v62, %v5362_v34  ;;  %v12027_v62 = vld [vmem:[#allocation50_spill] sm:$0xff] }
 0xfde   : > { %v7039_v17 = vadd.f32 %v7007_v10, %v12017_v24  ;;  %7655 = vmatmul.msk.bf16.gmra.mxu3 %vm474_vm0, %v6814_v23  ;;  %v6296_v10 = vadd.f32 %v11249_v22, %v11097_v56  ;;  %v11320_v23 = vpop.f32.mrf.mxu1  ;;  %v6695_v8 = vpop.f32.mrf.mxu2 }
 0xfdf   : > { %v5845_v24 = vadd.f32 %v12022_v43, %v5619_v38  ;;  %v6298_v38 = vadd.f32 %v11277_v33, %v11110_v59  ;;  %v12028_v43 = vld [vmem:[#allocation56_spill] sm:$0xff] }
 0xfe0   : > { %v7071_v53 = vmax.f32 %v7039_v17, 0.0  ;;  %v6815_v17 = vpack.c.bf16 %v6797_v37, %v6796_v52 }
 0xfe1   : > { %v6904_v21 = vpop.f32.mrf.mxu3 }
 0xfe2   : > { %7103 = vst.msk [vmem:[%s11218_s21 + $0x38] sm:$0xff] %vm474_vm0, %v7071_v53  ;;  %v6972_v47 = vadd.f32 %v6904_v21, %v6746_v48  ;;  %v6071_v48 = vadd.f32 %v11099_v11, %v5845_v24  ;;  %v6522_v53 = vadd.f32 %v11252_v18, %v6296_v10  ;;  %v12023_v21 = vld [vmem:[#allocation12_spill] sm:$0xff]  ;;  %v12024_v18 = vld [vmem:[#allocation51_spill] sm:$0xff] }
 0xfe4   : > { %v7008_v7 = vadd.f32 %v11209_v36, %v6972_v47  ;;  %v6748_v56 = vadd.f32 %v11256_v26, %v6522_v53  ;;  %v6243_v47 = vpop.f32.mrf.mxu0  ;;  %v6297_v58 = vadd.f32 %v11261_v14, %v6071_v48  ;;  %v12029_v48 = vld [vmem:[#allocation14_spill] sm:$0xff] }
 0xfe6   : > { %v7040_v16 = vadd.f32 %v7008_v7, %v12020_v42  ;;  %v6469_v34 = vpop.f32.mrf.mxu1  ;;  %v12025_v42 = vld [vmem:[#allocation49_spill] sm:$0xff]  ;;  %v6698_v59 = vpop.f32.mrf.mxu2 }
 0xfe8   : > { %v7072_v35 = vmax.f32 %v7040_v16, 0.0  ;;  %v5367_v16 = vadd.f32 %v12025_v42, %v12024_v18  ;;  %v6800_v42 = vld [vmem:[#allocation2 + $0x19a] sm:$0xff] }
 0xfe9   : > { %v6906_v51 = vpop.f32.mrf.mxu3 }
 0xfea   : > { %7104 = vst.msk [vmem:[%s11218_s21 + $0x40] sm:$0xff] %vm474_vm0, %v7072_v35  ;;  %v6973_v15 = vadd.f32 %v6906_v51, %v6747_v50  ;;  %v6523_v50 = vadd.f32 %v11265_v63, %v6297_v58  ;;  %v12026_v35 = vld [vmem:[#allocation13_spill] sm:$0xff]  ;;  %v5621_v14 = vadd.f32 %v12027_v62, %v5367_v16 }
 0xfeb   : > { %v12031_v58 = vld [vmem:[#allocation53_spill] sm:$0xff] }
 0xfec   : > { %v7009_v3 = vadd.f32 %v11209_v36, %v6973_v15  ;;  %v6749_v51 = vadd.f32 %v11268_v27, %v6523_v50  ;;  %v6246_v15 = vpop.f32.mrf.mxu0  ;;  %v5847_v24 = vadd.f32 %v12028_v43, %v5621_v14  ;;  %v6524_v27 = vadd.f32 %v11282_v6, %v6298_v38  ;;  %v12030_v6 = vld [vmem:[#allocation55_spill] sm:$0xff]  ;;  %v12034_v14 = vld [vmem:[#allocation60_spill] sm:$0xff] }
 0xfee   : > { %v7041_v41 = vadd.f32 %v7009_v3, %v12023_v21  ;;  %7656 = vmatmul.msk.bf16.gmra.mxu3 %vm474_vm0, %v6815_v17  ;;  %v6073_v3 = vadd.f32 %v11112_v31, %v5847_v24  ;;  %v6472_v17 = vpop.f32.mrf.mxu1  ;;  %v6750_v33 = vadd.f32 %v11285_v32, %v6524_v27  ;;  %v6801_v32 = vld [vmem:[#allocation2 + $0x1a2] sm:$0xff]  ;;  %v12035_v24 = vld [vmem:[#allocation16_spill] sm:$0xff] }
 0xff0   : > { %v7073_v22 = vmax.f32 %v7041_v41, 0.0 }
 0xff1   : > { %v6909_v7 = vpop.f32.mrf.mxu3 }
 0xff2   : > { %7105 = vst.msk [vmem:[%s11218_s21 + $0x48] sm:$0xff] %vm474_vm0, %v7073_v22  ;;  %v6974_v0 = vadd.f32 %v6909_v7, %v6748_v56  ;;  %v6299_v56 = vadd.f32 %v11295_v40, %v6073_v3 }
 0xff4   : > { %v7010_v11 = vadd.f32 %v11209_v36, %v6974_v0  ;;  %v6248_v7 = vpop.f32.mrf.mxu0  ;;  %v5372_v0 = vadd.f32 %v12031_v58, %v12030_v6 }
 0xff6   : > { %v7042_v26 = vadd.f32 %v7010_v11, %v12026_v35  ;;  %v6525_v11 = vadd.f32 %v11301_v13, %v6299_v56  ;;  %v6474_v16 = vpop.f32.mrf.mxu1  ;;  %v6700_v35 = vpop.f32.mrf.mxu2  ;;  %v6817_v13 = vpack.c.bf16 %v6801_v32, %v6800_v42  ;;  %v12040_v32 = vld [vmem:[#allocation67_spill] sm:$0xff] }
 0xff8   : > { %v7074_v52 = vmax.f32 %v7042_v26, 0.0  ;;  %v6751_v50 = vadd.f32 %v11304_v60, %v6525_v11 }
 0xff9   : > { %v6911_v37 = vpop.f32.mrf.mxu3 }
 0xffa   : > { %7106 = vst.msk [vmem:[%s11218_s21 + $0x50] sm:$0xff] %vm474_vm0, %v7074_v52  ;;  %v6975_v10 = vadd.f32 %v6911_v37, %v6749_v51  ;;  %v12033_v51 = vld [vmem:[#allocation54_spill] sm:$0xff]  ;;  %v6300_v37 = vadd.f32 %v11314_v2, %v11123_v49 }
 0xffb   : > { %v5623_v52 = vadd.f32 %v12033_v51, %v5372_v0 }
 0xffc   : > { %v7011_v63 = vadd.f32 %v11209_v36, %v6975_v10  ;;  %v6526_v60 = vadd.f32 %v11320_v23, %v6300_v37  ;;  %v6251_v3 = vpop.f32.mrf.mxu0  ;;  %v12037_v23 = vld [vmem:[#allocation57_spill] sm:$0xff] }
 0xffd   : > { %v5849_v38 = vadd.f32 %v12034_v14, %v5623_v52  ;;  %v12041_v52 = vld [vmem:[#allocation18_spill] sm:$0xff] }
 0xffe   : > { %v7043_v53 = vadd.f32 %v7011_v63, %v12029_v48  ;;  %7657 = vmatmul.msk.bf16.gmra.mxu3 %vm474_vm0, %v11116_v46  ;;  %v12032_v46 = vld [vmem:[#allocation15_spill] sm:$0xff]  ;;  %v6752_v49 = vadd.f32 %v11324_v5, %v6526_v60  ;;  %v12043_v60 = vld [vmem:[#allocation62_spill] sm:$0xff] }
 0xfff   : > { %v6075_v43 = vadd.f32 %v11125_v25, %v5849_v38 }
0x1000   : > { %v7075_v21 = vmax.f32 %v7043_v53, 0.0  ;;  %v6477_v53 = vpop.f32.mrf.mxu1 }
0x1001   : > { %v6914_v41 = vpop.f32.mrf.mxu3  ;;  %v6301_v48 = vadd.f32 %v6243_v47, %v6075_v43  ;;  %v12042_v43 = vld [vmem:[#allocation66_spill] sm:$0xff] }
0x1002   : > { %7107 = vst.msk [vmem:[%s11218_s21 + $0x58] sm:$0xff] %vm474_vm0, %v7075_v21  ;;  %v6976_v22 = vadd.f32 %v6914_v41, %v6750_v33  ;;  %v6703_v21 = vpop.f32.mrf.mxu2  ;;  %v12036_v41 = vld [vmem:[#allocation59_spill] sm:$0xff] }
0x1003   : > { %v5377_v56 = vadd.f32 %v12037_v23, %v12036_v41  ;;  %v12046_v23 = vld [vmem:[#allocation65_spill] sm:$0xff] }
0x1004   : > { %v7012_v31 = vadd.f32 %v11209_v36, %v6976_v22  ;;  %v6527_v22 = vadd.f32 %v6469_v34, %v6301_v48  ;;  %v6253_v5 = vpop.f32.mrf.mxu0 }
0x1006   : > { %v7044_v18 = vadd.f32 %v7012_v31, %v12032_v46  ;;  %v12038_v31 = vld [vmem:[#allocation17_spill] sm:$0xff]  ;;  %v6753_v58 = vadd.f32 %v6695_v8, %v6527_v22  ;;  %v12039_v46 = vld [vmem:[#allocation58_spill] sm:$0xff] }
0x1007   : > { %v5625_v47 = vadd.f32 %v12039_v46, %v5377_v56 }
0x1008   : > { %v7076_v40 = vmax.f32 %v7044_v18, 0.0  ;;  %v6302_v18 = vadd.f32 %v6246_v15, %v11133_v19 }
0x1009   : > { %v6916_v26 = vpop.f32.mrf.mxu3 }
0x100a   : > { %7108 = vst.msk [vmem:[%s11218_s21 + $0x60] sm:$0xff] %vm474_vm0, %v7076_v40  ;;  %v6977_v62 = vadd.f32 %v6916_v26, %v6751_v50  ;;  %v5851_v50 = vadd.f32 %v12040_v32, %v5625_v47  ;;  %v6479_v40 = vpop.f32.mrf.mxu1  ;;  %v6705_v34 = vpop.f32.mrf.mxu2  ;;  %v6528_v8 = vadd.f32 %v6472_v17, %v6302_v18  ;;  %v12048_v32 = vld [vmem:[#allocation64_spill] sm:$0xff] }
0x100c   : > { %v7013_v10 = vadd.f32 %v11209_v36, %v6977_v62  ;;  %v6077_v51 = vadd.f32 %v11136_v55, %v5851_v50  ;;  %v6754_v62 = vadd.f32 %v6698_v59, %v6528_v8  ;;  %v6256_v15 = vpop.f32.mrf.mxu0  ;;  %v12044_v55 = vld [vmem:[#allocation19_spill] sm:$0xff]  ;;  %v12049_v50 = vld [vmem:[#allocation70_spill] sm:$0xff] }
0x100e   : > { %v7045_v63 = vadd.f32 %v7013_v10, %v12035_v24  ;;  %7658 = vmatmul.msk.bf16.gmra.mxu3 %vm474_vm0, %v6817_v13  ;;  %v6303_v38 = vadd.f32 %v6248_v7, %v6077_v51  ;;  %v5382_v24 = vadd.f32 %v12043_v60, %v12042_v43  ;;  %v6304_v7 = vadd.f32 %v6251_v3, %v11143_v61 }
0x1010   : > { %v7077_v2 = vmax.f32 %v7045_v63, 0.0 }
0x1011   : > { %v6919_v27 = vpop.f32.mrf.mxu3 }
0x1012   : > { %7109 = vst.msk [vmem:[%s11218_s21 + $0x68] sm:$0xff] %vm474_vm0, %v7077_v2  ;;  %v6978_v33 = vadd.f32 %v6919_v27, %v6752_v49  ;;  %v6482_v63 = vpop.f32.mrf.mxu1  ;;  %v6529_v49 = vadd.f32 %v6474_v16, %v6303_v38  ;;  %v6708_v2 = vpop.f32.mrf.mxu2 }
0x1014   : > { %v7014_v25 = vadd.f32 %v11209_v36, %v6978_v33  ;;  %v6755_v27 = vadd.f32 %v6700_v35, %v6529_v49  ;;  %v12045_v33 = vld [vmem:[#allocation63_spill] sm:$0xff] }
0x1016   : > { %v7046_v6 = vadd.f32 %v7014_v25, %v12038_v31  ;;  %v5627_v25 = vadd.f32 %v12045_v33, %v5382_v24  ;;  %v6258_v31 = vpop.f32.mrf.mxu0 }
0x1018   : > { %v7078_v0 = vmax.f32 %v7046_v6, 0.0  ;;  %v5853_v56 = vadd.f32 %v12046_v23, %v5627_v25  ;;  %v6530_v6 = vadd.f32 %v6477_v53, %v6304_v7  ;;  %v12054_v7 = vld [vmem:[#allocation72_spill] sm:$0xff] }
0x1019   : > { %v6921_v11 = vpop.f32.mrf.mxu3 }
0x101a   : > { %7110 = vst.msk [vmem:[%s11218_s21 + $0x70] sm:$0xff] %vm474_vm0, %v7078_v0  ;;  %v6979_v42 = vadd.f32 %v6921_v11, %v6753_v58  ;;  %v6079_v16 = vadd.f32 %v11145_v45, %v5853_v56  ;;  %v12047_v58 = vld [vmem:[#allocation20_spill] sm:$0xff]  ;;  %v6484_v0 = vpop.f32.mrf.mxu1  ;;  %v6756_v11 = vadd.f32 %v6703_v21, %v6530_v6  ;;  %v6710_v47 = vpop.f32.mrf.mxu2  ;;  %v12050_v45 = vld [vmem:[#allocation21_spill] sm:$0xff] }
0x101b   : > { %v12057_v6 = vld [vmem:[#allocation73_spill] sm:$0xff] }
0x101c   : > { %v7015_v26 = vadd.f32 %v11209_v36, %v6979_v42  ;;  %v6305_v61 = vadd.f32 %v6253_v5, %v6079_v16  ;;  %v6306_v5 = vadd.f32 %v6256_v15, %v11152_v1 }
0x101e   : > { %v7047_v37 = vadd.f32 %v7015_v26, %v12041_v52  ;;  %v5387_v26 = vadd.f32 %v12049_v50, %v12048_v32  ;;  %v6531_v51 = vadd.f32 %v6479_v40, %v6305_v61  ;;  %v6261_v8 = vpop.f32.mrf.mxu0  ;;  %v6532_v24 = vadd.f32 %v6482_v63, %v6306_v5  ;;  %v12056_v63 = vld [vmem:[#allocation23_spill] sm:$0xff] }
0x1020   : > { %v7079_v13 = vmax.f32 %v7047_v37, 0.0  ;;  %v6757_v52 = vadd.f32 %v6705_v34, %v6531_v51  ;;  %v12053_v34 = vld [vmem:[#allocation22_spill] sm:$0xff] }
0x1021   : > { %v6924_v14 = vpop.f32.mrf.mxu3 }
0x1022   : > { %7111 = vst.msk [vmem:[%s11218_s21 + $0x78] sm:$0xff] %vm474_vm0, %v7079_v13  ;;  %v6980_v19 = vadd.f32 %v6924_v14, %v6754_v62  ;;  %v12051_v62 = vld [vmem:[#allocation71_spill] sm:$0xff]  ;;  %v6487_v14 = vpop.f32.mrf.mxu1 }
0x1023   : > { %v5629_v13 = vadd.f32 %v12051_v62, %v5387_v26 }
0x1024   : > { %v7016_v10 = vadd.f32 %v11209_v36, %v6980_v19  ;;  %v6713_v19 = vpop.f32.mrf.mxu2 }
0x1026   : > { %v7048_v17 = vadd.f32 %v7016_v10, %v12044_v55  ;;  %v12052_v10 = vld [vmem:[#allocation75_spill] sm:$0xff]  ;;  %v6758_v55 = vadd.f32 %v6708_v2, %v6532_v24 }
0x1027   : > { %v5855_v43 = vadd.f32 %v12052_v10, %v5629_v13  ;;  %v12062_v13 = vld [vmem:[#allocation25_spill] sm:$0xff] }
0x1028   : > { %v7080_v59 = vmax.f32 %v7048_v17, 0.0 }
0x1029   : > { %v6926_v48 = vpop.f32.mrf.mxu3  ;;  %v6081_v60 = vadd.f32 %v11154_v29, %v5855_v43 }
0x102a   : > { %7112 = vst.msk [vmem:[%s11218_s21 + $0x80] sm:$0xff] %vm474_vm0, %v7080_v59  ;;  %v6981_v41 = vadd.f32 %v6926_v48, %v6755_v27  ;;  %v6263_v27 = vpop.f32.mrf.mxu0  ;;  %v6489_v48 = vpop.f32.mrf.mxu1 }
0x102b   : > { %v6307_v1 = vadd.f32 %v6258_v31, %v6081_v60  ;;  %v6308_v31 = vadd.f32 %v6261_v8, %v11161_v4 }
0x102c   : > { %v7017_v22 = vadd.f32 %v11209_v36, %v6981_v41  ;;  %v6715_v25 = vpop.f32.mrf.mxu2  ;;  %v12055_v41 = vld [vmem:[#allocation35_spill] sm:$0xff] }
0x102d   : > { %v5392_v23 = vadd.f32 %v12055_v41, %v12054_v7  ;;  %v6533_v29 = vadd.f32 %v6484_v0, %v6307_v1  ;;  %v12065_v1 = vld [vmem:[#allocation26_spill] sm:$0xff] }
0x102e   : > { %v7049_v35 = vadd.f32 %v7017_v22, %v12047_v58 }
0x102f   : > { %v6759_v22 = vadd.f32 %v6710_v47, %v6533_v29  ;;  %v5631_v58 = vadd.f32 %v12057_v6, %v5392_v23  ;;  %v12059_v47 = vld [vmem:[#allocation24_spill] sm:$0xff] }
0x1030   : > { %v7081_v46 = vmax.f32 %v7049_v35, 0.0 }
0x1031   : > { %v6929_v18 = vpop.f32.mrf.mxu3 }
0x1032   : > { %7113 = vst.msk [vmem:[%s11218_s21 + $0x88] sm:$0xff] %vm474_vm0, %v7081_v46  ;;  %v6982_v3 = vadd.f32 %v6929_v18, %v6756_v11  ;;  %v6266_v11 = vpop.f32.mrf.mxu0  ;;  %v12058_v46 = vld [vmem:[#allocation78_spill] sm:$0xff] }
0x1033   : > { %v5857_v18 = vadd.f32 %v12058_v46, %v5631_v58  ;;  %v6310_v24 = vadd.f32 %v6266_v11, %v11170_v30  ;;  %v12069_v46 = vld [vmem:[#allocation84_spill] sm:$0xff] }
0x1034   : > { %v7018_v42 = vadd.f32 %v11209_v36, %v6982_v3  ;;  %v6492_v3 = vpop.f32.mrf.mxu1  ;;  %v6718_v50 = vpop.f32.mrf.mxu2 }
0x1035   : > { %v6083_v0 = vadd.f32 %v11163_v57, %v5857_v18 }
0x1036   : > { %v7050_v53 = vadd.f32 %v7018_v42, %v12050_v45  ;;  %v6534_v42 = vadd.f32 %v6487_v14, %v6308_v31 }
0x1037   : > { %v6309_v4 = vadd.f32 %v6263_v27, %v6083_v0 }
0x1038   : > { %v7082_v37 = vmax.f32 %v7050_v53, 0.0  ;;  %v6760_v26 = vadd.f32 %v6713_v19, %v6534_v42 }
0x1039   : > { %v6931_v21 = vpop.f32.mrf.mxu3  ;;  %v6535_v57 = vadd.f32 %v6489_v48, %v6309_v4 }
0x103a   : > { %7114 = vst.msk [vmem:[%s11218_s21 + $0x90] sm:$0xff] %vm474_vm0, %v7082_v37  ;;  %v6983_v38 = vadd.f32 %v6931_v21, %v6757_v52  ;;  %v6268_v52 = vpop.f32.mrf.mxu0  ;;  %v12060_v37 = vld [vmem:[#allocation80_spill] sm:$0xff]  ;;  %v12061_v21 = vld [vmem:[#allocation77_spill] sm:$0xff] }
0x103b   : > { %v5397_v62 = vadd.f32 %v12061_v21, %v12060_v37 }
0x103c   : > { %v7019_v40 = vadd.f32 %v11209_v36, %v6983_v38  ;;  %v6494_v14 = vpop.f32.mrf.mxu1  ;;  %v6761_v38 = vadd.f32 %v6715_v25, %v6535_v57  ;;  %v6720_v19 = vpop.f32.mrf.mxu2 }
0x103e   : > { %v7051_v49 = vadd.f32 %v7019_v40, %v12053_v34  ;;  %v12063_v40 = vld [vmem:[#allocation76_spill] sm:$0xff] }
0x103f   : > { %v5633_v60 = vadd.f32 %v12063_v40, %v5397_v62 }
0x1040   : > { %v7083_v17 = vmax.f32 %v7051_v49, 0.0  ;;  %v12064_v49 = vld [vmem:[#allocation88_spill] sm:$0xff] }
0x1041   : > { %v6934_v59 = vpop.f32.mrf.mxu3 }
0x1042   : > { %7115 = vst.msk [vmem:[%s11218_s21 + $0x98] sm:$0xff] %vm474_vm0, %v7083_v17  ;;  %v6984_v15 = vadd.f32 %v6934_v59, %v6758_v55  ;;  %v5859_v55 = vadd.f32 %v12064_v49, %v5633_v60  ;;  %v6536_v59 = vadd.f32 %v6492_v3, %v6310_v24  ;;  %v6271_v48 = vpop.f32.mrf.mxu0  ;;  %v12070_v3 = vld [vmem:[#allocation38_spill] sm:$0xff] }
0x1043   : > { %v12073_v49 = vld [vmem:[#allocation30_spill] sm:$0xff] }
0x1044   : > { %v7020_v33 = vadd.f32 %v11209_v36, %v6984_v15  ;;  %v6085_v27 = vadd.f32 %v11172_v44, %v5859_v55  ;;  %v6497_v23 = vpop.f32.mrf.mxu1  ;;  %v6723_v29 = vpop.f32.mrf.mxu2 }
0x1046   : > { %v7052_v56 = vadd.f32 %v7020_v33, %v12056_v63  ;;  %v6762_v33 = vadd.f32 %v6718_v50, %v6536_v59  ;;  %v6311_v41 = vadd.f32 %v6268_v52, %v6085_v27 }
0x1048   : > { %v7084_v2 = vmax.f32 %v7052_v56, 0.0  ;;  %v12066_v56 = vld [vmem:[#allocation87_spill] sm:$0xff]  ;;  %v6537_v44 = vadd.f32 %v6494_v14, %v6311_v41 }
0x1049   : > { %v6936_v16 = vpop.f32.mrf.mxu3 }
0x104a   : > { %7116 = vst.msk [vmem:[%s11218_s21 + $0xa0] sm:$0xff] %vm474_vm0, %v7084_v2  ;;  %v6985_v35 = vadd.f32 %v6936_v16, %v6759_v22  ;;  %v12067_v22 = vld [vmem:[#allocation83_spill] sm:$0xff]  ;;  %v6763_v58 = vadd.f32 %v6720_v19, %v6537_v44 }
0x104b   : > { %v5402_v2 = vadd.f32 %v12067_v22, %v12066_v56  ;;  %v12068_v16 = vld [vmem:[#allocation27_spill] sm:$0xff] }
0x104c   : > { %v7021_v61 = vadd.f32 %v11209_v36, %v6985_v35  ;;  %v6273_v35 = vpop.f32.mrf.mxu0  ;;  %v6725_v50 = vpop.f32.mrf.mxu2 }
0x104d   : > { %v5635_v18 = vadd.f32 %v12069_v46, %v5402_v2 }
0x104e   : > { %v7053_v32 = vadd.f32 %v7021_v61, %v12059_v47  ;;  %v6312_v61 = vadd.f32 %v6271_v48, %v11178_v54  ;;  %v6499_v47 = vpop.f32.mrf.mxu1 }
0x104f   : > { %v5861_v42 = vadd.f32 %v12070_v3, %v5635_v18 }
0x1050   : > { %v7085_v51 = vmax.f32 %v7053_v32, 0.0 }
0x1051   : > { %v6939_v45 = vpop.f32.mrf.mxu3 }
0x1052   : > { %7117 = vst.msk [vmem:[%s11218_s21 + $0xa8] sm:$0xff] %vm474_vm0, %v7085_v51  ;;  %v6986_v53 = vadd.f32 %v6939_v45, %v6760_v26  ;;  %v6087_v26 = vadd.f32 %v11180_v12, %v5861_v42  ;;  %v6538_v51 = vadd.f32 %v6497_v23, %v6312_v61  ;;  %v12071_v45 = vld [vmem:[#allocation28_spill] sm:$0xff] }
0x1054   : > { %v7022_v8 = vadd.f32 %v11209_v36, %v6986_v53  ;;  %v6764_v53 = vadd.f32 %v6723_v29, %v6538_v51  ;;  %v6313_v37 = vadd.f32 %v6273_v35, %v6087_v26  ;;  %v6276_v21 = vpop.f32.mrf.mxu0 }
0x1056   : > { %v7054_v5 = vadd.f32 %v7022_v8, %v12062_v13  ;;  %v6502_v57 = vpop.f32.mrf.mxu1  ;;  %v6539_v13 = vadd.f32 %v6499_v47, %v6313_v37  ;;  %v12076_v47 = vld [vmem:[#allocation39_spill] sm:$0xff] }
0x1058   : > { %v7086_v10 = vmax.f32 %v7054_v5, 0.0  ;;  %v12072_v5 = vld [vmem:[#allocation29_spill] sm:$0xff]  ;;  %v6765_v12 = vadd.f32 %v6725_v50, %v6539_v13 }
0x1059   : > { %v6941_v43 = vpop.f32.mrf.mxu3 }
0x105a   : > { %7118 = vst.msk [vmem:[%s11218_s21 + $0xb0] sm:$0xff] %vm474_vm0, %v7086_v10  ;;  %v6987_v34 = vadd.f32 %v6941_v43, %v6761_v38  ;;  %v6728_v38 = vpop.f32.mrf.mxu2  ;;  %v6314_v43 = vadd.f32 %v6276_v21, %v11186_v28 }
0x105c   : > { %v7023_v17 = vadd.f32 %v11209_v36, %v6987_v34  ;;  %v6278_v24 = vpop.f32.mrf.mxu0  ;;  %v6540_v34 = vadd.f32 %v6502_v57, %v6314_v43 }
0x105d   : > { %v6315_v48 = vadd.f32 %v6278_v24, %v11189_v9 }
0x105e   : > { %v7055_v15 = vadd.f32 %v7023_v17, %v12065_v1  ;;  %v6504_v17 = vpop.f32.mrf.mxu1  ;;  %v6766_v27 = vadd.f32 %v6728_v38, %v6540_v34 }
0x1060   : > { %v7087_v25 = vmax.f32 %v7055_v15, 0.0 }
0x1061   : > { %v6944_v7 = vpop.f32.mrf.mxu3 }
0x1062   : > { %7119 = vst.msk [vmem:[%s11218_s21 + $0xb8] sm:$0xff] %vm474_vm0, %v7087_v25  ;;  %v6988_v30 = vadd.f32 %v6944_v7, %v6762_v33  ;;  %v6730_v1 = vpop.f32.mrf.mxu2  ;;  %v6541_v25 = vadd.f32 %v6504_v17, %v6315_v48  ;;  %v12074_v7 = vld [vmem:[#allocation32_spill] sm:$0xff] }
0x1064   : > { %v7024_v63 = vadd.f32 %v11209_v36, %v6988_v30  ;;  %v6281_v23 = vpop.f32.mrf.mxu0  ;;  %v6767_v30 = vadd.f32 %v6730_v1, %v6541_v25 }
0x1065   : > { %v6316_v22 = vadd.f32 %v6281_v23, %v11196_v20 }
0x1066   : > { %v7056_v6 = vadd.f32 %v7024_v63, %v12068_v16  ;;  %v6507_v63 = vpop.f32.mrf.mxu1 }
0x1067   : > { %v6542_v16 = vadd.f32 %v6507_v63, %v6316_v22 }
0x1068   : > { %v7088_v31 = vmax.f32 %v7056_v6, 0.0  ;;  %v12075_v6 = vld [vmem:[#allocation33_spill] sm:$0xff] }
0x1069   : > { %v6946_v11 = vpop.f32.mrf.mxu3 }
0x106a   : > { %7120 = vst.msk [vmem:[%s11218_s21 + $0xc0] sm:$0xff] %vm474_vm0, %v7088_v31  ;;  %v6989_v0 = vadd.f32 %v6946_v11, %v6763_v58  ;;  %v6733_v9 = vpop.f32.mrf.mxu2 }
0x106b   : > { %v6768_v31 = vadd.f32 %v6733_v9, %v6542_v16 }
0x106c   : > { %v7025_v32 = vadd.f32 %v11209_v36, %v6989_v0  ;;  %v6283_v11 = vpop.f32.mrf.mxu0 }
0x106d   : > { %v6317_v18 = vadd.f32 %v6283_v11, %v11198_v39  ;;  %v12077_v39 = vld [vmem:[#allocation40_spill] sm:$0xff] }
0x106e   : > { %v7057_v4 = vadd.f32 %v7025_v32, %v12071_v45  ;;  %v6509_v61 = vpop.f32.mrf.mxu1 }
0x106f   : > { %v6543_v42 = vadd.f32 %v6509_v61, %v6317_v18 }
0x1070   : > { %v7089_v8 = vmax.f32 %v7057_v4, 0.0 }
0x1071   : > { %v6949_v52 = vpop.f32.mrf.mxu3 }
0x1072   : > { %7121 = vst.msk [vmem:[%s11218_s21 + $0xc8] sm:$0xff] %vm474_vm0, %v7089_v8  ;;  %v6990_v54 = vadd.f32 %v6949_v52, %v6764_v53  ;;  %v6735_v3 = vpop.f32.mrf.mxu2 }
0x1073   : > { %v6769_v50 = vadd.f32 %v6735_v3, %v6543_v42 }
0x1074   : > { %v7026_v62 = vadd.f32 %v11209_v36, %v6990_v54 }
0x1076   : > { %v7058_v14 = vadd.f32 %v7026_v62, %v12072_v5 }
0x1078   : > { %v7090_v10 = vmax.f32 %v7058_v14, 0.0 }
0x1079   : > { %v6951_v19 = vpop.f32.mrf.mxu3 }
0x107a   : > { %7122 = vst.msk [vmem:[%s11218_s21 + $0xd0] sm:$0xff] %vm474_vm0, %v7090_v10  ;;  %v6991_v40 = vadd.f32 %v6951_v19, %v6765_v12 }
0x107c   : > { %v7027_v60 = vadd.f32 %v11209_v36, %v6991_v40 }
0x107e   : > { %v7059_v55 = vadd.f32 %v7027_v60, %v12073_v49 }
0x1080   : > { %v7091_v59 = vmax.f32 %v7059_v55, 0.0 }
0x1081   : > { %v6954_v15 = vpop.f32.mrf.mxu3 }
0x1082   : > { %7123 = vst.msk [vmem:[%s11218_s21 + $0xd8] sm:$0xff] %vm474_vm0, %v7091_v59  ;;  %v6992_v28 = vadd.f32 %v6954_v15, %v6766_v27 }
0x1084   : > { %v7028_v33 = vadd.f32 %v11209_v36, %v6992_v28 }
0x1086   : > { %v7060_v41 = vadd.f32 %v7028_v33, %v12074_v7 }
0x1088   : > { %v7092_v29 = vmax.f32 %v7060_v41, 0.0 }
0x1089   : > { %v6956_v56 = vpop.f32.mrf.mxu3 }
0x108a   : > { %7124 = vst.msk [vmem:[%s11218_s21 + $0xe0] sm:$0xff] %vm474_vm0, %v7092_v29  ;;  %v6993_v2 = vadd.f32 %v6956_v56, %v6767_v30 }
0x108c   : > { %v7029_v44 = vadd.f32 %v11209_v36, %v6993_v2 }
0x108e   : > { %v7061_v58 = vadd.f32 %v7029_v44, %v12075_v6 }
0x1090   : > { %v7093_v35 = vmax.f32 %v7061_v58, 0.0 }
0x1091   : > { %v6959_v46 = vpop.f32.mrf.mxu3 }
0x1092   : > { %7125 = vst.msk [vmem:[%s11218_s21 + $0xe8] sm:$0xff] %vm474_vm0, %v7093_v35  ;;  %v6994_v20 = vadd.f32 %v6959_v46, %v6768_v31 }
0x1094   : > { %v7030_v0 = vadd.f32 %v11209_v36, %v6994_v20 }
0x1096   : > { %v7062_v32 = vadd.f32 %v7030_v0, %v12076_v47 }
0x1098   : > { %v7094_v26 = vmax.f32 %v7062_v32, 0.0 }
0x1099   : > { %v6961_v51 = vpop.f32.mrf.mxu3 }
0x109a   : > { %7126 = vst.msk [vmem:[%s11218_s21 + $0xf0] sm:$0xff] %vm474_vm0, %v7094_v26  ;;  %v6995_v45 = vadd.f32 %v6961_v51, %v6769_v50 }
0x109c   : > { %v7031_v4 = vadd.f32 %v11209_v36, %v6995_v45 }
0x109e   : > { %v7063_v53 = vadd.f32 %v7031_v4, %v12077_v39 }
0x10a0   : > { %v7095_v8 = vmax.f32 %v7063_v53, 0.0 }
0x10a2   : > { %7127 = vst.msk [vmem:[%s11218_s21 + $0xf8] sm:$0xff] %vm474_vm0, %v7095_v8 }
0x10a3 PF: > { %s23_s25 = sadd.s32 1, %s7982_s25  }
0x10a4   : > { %p20_p4 = scmp.ge.s32.totalorder %s23_s25, 4  }
0x10a6   :  { %22 = sbr.rel (!%p20_p4) target bundleno = 1 (0x1), region = 120 }

</bundles_post_ra>
